<compile_context>
chip_gen: v7x
topology: tpu7x:2x2x1
jax: 0.10.0
libtpu: 0.0.40
codegen_flags: <defaults>
</compile_context>

<pallas_src>
import jax
import jax.numpy as jnp
from jax import lax
from jax.experimental import pallas as pl
from jax.experimental.pallas import tpu as pltpu


# ---------------------------------------------------------------------------
# Kernel 1: fused conv1 -> shift+ReLU -> pool -> conv2 -> shift+ReLU -> pool
# One grid step per image; all intermediates stay in VMEM / vregs.
# ---------------------------------------------------------------------------
def _features_kernel(p1_ref, w1_ref, t1_ref, w2_ref, t2_ref, f_ref):
    # ---- layer 1: one im2col matmul (1024, 27) @ (27, 32), f32 accumulation
    a1 = jnp.dot(p1_ref[0], w1_ref[...], preferred_element_type=jnp.float32)
    y1 = jnp.maximum(a1 + t1_ref[...], 0.0)             # folded-BN shift + ReLU (f32)
    # ---- 2x2 max pool, stride 2 (H via leading-dim split, then W)
    y1 = y1.reshape(32, 32, 32)                          # (H, W, C)
    y1 = jnp.max(y1.reshape(16, 2, 32, 32), axis=1)      # pool H -> (16, 32, 32)
    y1 = jnp.max(y1.reshape(16, 16, 2, 32), axis=2)      # pool W -> (16, 16, 32)

    # ---- layer 2: SAME-pad + im2col patch tensor built once in VMEM + one matmul
    y1b = y1.astype(jnp.bfloat16)                        # MXU operand dtype
    zc = jnp.zeros((16, 1, 32), jnp.bfloat16)
    zr = jnp.zeros((1, 18, 32), jnp.bfloat16)
    yp = jnp.concatenate([zc, y1b, zc], axis=1)          # (16, 18, 32)
    yp = jnp.concatenate([zr, yp, zr], axis=0)           # (18, 18, 32) padded
    taps = [yp[dy:dy + 16, dx:dx + 16, :].reshape(256, 32)
            for dy in range(3) for dx in range(3)]
    p2 = jnp.concatenate(taps, axis=-1)                  # (256, 288) im2col patches
    a2 = jnp.dot(p2, w2_ref[...], preferred_element_type=jnp.float32)   # (256, 64)
    y2 = jnp.maximum(a2 + t2_ref[...], 0.0)              # shift + ReLU (f32)
    y2 = y2.reshape(16, 16, 64)
    y2 = jnp.max(y2.reshape(8, 2, 16, 64), axis=1)       # pool H -> (8, 16, 64)
    y2 = jnp.max(y2.reshape(8, 8, 2, 64), axis=2)        # pool W -> (8, 8, 64) NHWC
    f_ref[0] = y2.astype(f_ref.dtype)


def cnn_features(patches1, w1, t1, w2, t2):
    N = patches1.shape[0]
    return pl.pallas_call(
        _features_kernel,
        out_shape=jax.ShapeDtypeStruct((N, 8, 8, 64), jnp.bfloat16),
        grid=(N,),
        in_specs=[
            pl.BlockSpec((1, 1024, 27), lambda n: (n, 0, 0)),
            pl.BlockSpec((27, 32), lambda n: (0, 0)),
            pl.BlockSpec((1, 32), lambda n: (0, 0)),
            pl.BlockSpec((288, 64), lambda n: (0, 0)),
            pl.BlockSpec((1, 64), lambda n: (0, 0)),
        ],
        out_specs=pl.BlockSpec((1, 8, 8, 64), lambda n: (n, 0, 0, 0)),
        compiler_params=pltpu.CompilerParams(dimension_semantics=("parallel",)),
    )(patches1, w1, t1, w2, t2)


# ---------------------------------------------------------------------------
# Kernel 2: classifier.  W = A @ B is precomputed at init, so this is a single
# batched (N, 4096) @ (4096, 10) matmul with bf16 operands and f32 accumulation.
# ---------------------------------------------------------------------------
def _classifier_kernel(x_ref, w_ref, o_ref):
    o_ref[...] = jnp.dot(x_ref[...], w_ref[...], preferred_element_type=jnp.float32)


def low_rank_classifier(x_flat, w_full):
    N, F = x_flat.shape
    O = w_full.shape[-1]
    return pl.pallas_call(
        _classifier_kernel,
        out_shape=jax.ShapeDtypeStruct((N, O), jnp.float32),
        grid=(1,),
        in_specs=[pl.BlockSpec((N, F), lambda i: (0, 0)),
                  pl.BlockSpec((F, O), lambda i: (0, 0))],
        out_specs=pl.BlockSpec((N, O), lambda i: (0, 0)),
        compiler_params=pltpu.CompilerParams(dimension_semantics=("arbitrary",)),
    )(x_flat, w_full)


# ---------------------------------------------------------------------------
# Wrapper-side layer-1 im2col (layout plumbing: absorbs SAME padding and the
# NCHW->NHWC transpose; Cin=3 would waste lanes if done inside the kernel).
# Done entirely in bf16 to halve the wrapper-side HBM traffic.
# ---------------------------------------------------------------------------
def _im2col_3x3_nchw(x_nchw):
    N, C, H, W = x_nchw.shape
    x_nhwc = jnp.transpose(x_nchw, (0, 2, 3, 1)).astype(jnp.bfloat16)   # (N,H,W,C)
    xp = jnp.pad(x_nhwc, ((0, 0), (1, 1), (1, 1), (0, 0)))              # SAME pad
    taps = [xp[:, dy:dy + H, dx:dx + W, :] for dy in range(3) for dx in range(3)]
    pat = jnp.concatenate(taps, axis=-1)                 # (N, H, W, 9*C), cols=(dy,dx,cin)
    return pat.reshape(N, H * W, 9 * C)                  # rows = h*W + w


# ---------------------------------------------------------------------------
# Parameters (deterministic, mimicking torch default / xavier init)
# ---------------------------------------------------------------------------
def init_params(key):
    ks = jax.random.split(key, 6)

    def conv_w(k, cin, cout):                            # kaiming_uniform(a=sqrt(5)) equiv.
        bound = 1.0 / ((9 * cin) ** 0.5)
        return jax.random.uniform(k, (3, 3, cin, cout), jnp.float32, -bound, bound)

    def conv_b(k, cin, cout):
        bound = 1.0 / ((9 * cin) ** 0.5)
        return jax.random.uniform(k, (cout,), jnp.float32, -bound, bound)

    def xavier(k, fin, fout):
        limit = (6.0 / (fin + fout)) ** 0.5
        return jax.random.uniform(k, (fin, fout), jnp.float32, -limit, limit)

    def fresh_bn(c):                                     # torch BatchNorm2d defaults
        return dict(gamma=jnp.ones((c,), jnp.float32), beta=jnp.zeros((c,), jnp.float32),
                    mean=jnp.zeros((c,), jnp.float32), var=jnp.ones((c,), jnp.float32))

    return dict(w1=conv_w(ks[0], 3, 32), b1=conv_b(ks[1], 3, 32), bn1=fresh_bn(32),
                w2=conv_w(ks[2], 32, 64), b2=conv_b(ks[3], 32, 64), bn2=fresh_bn(64),
                A=xavier(ks[4], 4096, 32), B=xavier(ks[5], 32, 10))


def prepare_kernel_params(raw, eps=1e-5):
    """One-time (init-time) weight preprocessing:
    - fold BN scale (and conv bias) into the conv weights / a per-channel shift,
    - reshape conv weights to im2col form (9*Cin, Cout),
    - precompute the classifier weight A @ B and permute its rows from torch's
      NCHW flatten order to the kernel's NHWC flatten order,
    - cast all MXU operands to bf16."""
    def fold(w_hwio, b, bn):
        s = bn["gamma"] / jnp.sqrt(bn["var"] + eps)
        w = (w_hwio * s).reshape(-1, w_hwio.shape[-1]).astype(jnp.bfloat16)   # (9*Cin, Cout)
        t = (s * (b - bn["mean"]) + bn["beta"]).reshape(1, -1)                # f32 shift
        return w, t

    w1, t1 = fold(raw["w1"], raw["b1"], raw["bn1"])
    w2, t2 = fold(raw["w2"], raw["b2"], raw["bn2"])
    wc = raw["A"] @ raw["B"]                                                  # (4096, 10) once
    wc = wc.reshape(64, 8, 8, 10).transpose(1, 2, 0, 3).reshape(4096, 10)     # NCHW -> NHWC rows
    return dict(w1=w1, t1=t1, w2=w2, t2=t2, wc=wc.astype(jnp.bfloat16))


# ---------------------------------------------------------------------------
# Forward
# ---------------------------------------------------------------------------
def simple_cnn_forward(kparams, x_nchw):
    N = x_nchw.shape[0]
    patches1 = _im2col_3x3_nchw(x_nchw)                           # (N, 1024, 27) bf16
    feats = cnn_features(patches1, kparams["w1"], kparams["t1"],
                         kparams["w2"], kparams["t2"])            # (N, 8, 8, 64) bf16
    flat = feats.reshape(N, -1)                                   # NHWC flatten (free)
    return low_rank_classifier(flat, kparams["wc"])               # (N, 10) f32


# Pure-JAX f32 reference matching the PyTorch module semantics
def reference_forward(raw, x_nchw, eps=1e-5):
    def block(x_nhwc, w, b, bn):
        conv = lax.conv_general_dilated(
            x_nhwc, w, window_strides=(1, 1), padding="SAME",
            dimension_numbers=("NHWC", "HWIO", "NHWC")) + b
        y = (conv - bn["mean"]) / jnp.sqrt(bn["var"] + eps) * bn["gamma"] + bn["beta"]
        y = jax.nn.relu(y)
        return lax.reduce_window(y, -jnp.inf, lax.max,
                                 (1, 2, 2, 1), (1, 2, 2, 1), "VALID")

    x = jnp.transpose(x_nchw, (0, 2, 3, 1))
    h1 = block(x, raw["w1"], raw["b1"], raw["bn1"])
    h2 = block(h1, raw["w2"], raw["b2"], raw["bn2"])
    flat = jnp.transpose(h2, (0, 3, 1, 2)).reshape(x.shape[0], -1)   # torch NCHW flatten
    return flat @ (raw["A"] @ raw["B"])


if __name__ == "__main__":
    key = jax.random.PRNGKey(0)
    k_x, k_p = jax.random.split(key)
    # NCHW input like PyTorch; 3x32x32 so that 64*8*8 == 4096 classifier features.
    x = jax.random.normal(k_x, (2, 3, 32, 32), jnp.float32)
    raw = init_params(k_p)
    kparams = prepare_kernel_params(raw)

    out = jax.jit(simple_cnn_forward)(kparams, x)
    out = jax.block_until_ready(out)

    ref = reference_forward(raw, x)
    assert out.shape == (2, 10), out.shape
    max_err = float(jnp.max(jnp.abs(out - ref)))
    # bf16 MXU operands (f32 accumulation) -> slightly looser tolerance than pure f32.
    assert max_err < 5e-2, f"mismatch vs reference: {max_err}"
    print("KERNEL_OK")
</pallas_src>

<mosaic_0001>
module attributes {stable_mosaic.version = 11 : i64} {
  func.func @_features_kernel(%arg0: i32, %arg1: memref<1x1024x27xbf16, #tpu.memory_space<vmem>>, %arg2: memref<27x32xbf16, #tpu.memory_space<vmem>>, %arg3: memref<1x32xf32, #tpu.memory_space<vmem>>, %arg4: memref<288x64xbf16, #tpu.memory_space<vmem>>, %arg5: memref<1x64xf32, #tpu.memory_space<vmem>>, %arg6: memref<1x8x8x64xbf16, #tpu.memory_space<vmem>>) attributes {dimension_semantics = [#tpu.dimension_semantics<parallel>], iteration_bounds = array<i64: 2>, scalar_prefetch = 0 : i64, scratch_operands = 0 : i64, tpu.core_type = #tpu.core_type<tc>, window_params = [{transform_indices = @transform_0, window_bounds = array<i64: 1, 1024, 27>}, {pipeline_mode = #tpu.pipeline_mode<synchronous>, transform_indices = @transform_1, window_bounds = array<i64: 27, 32>}, {pipeline_mode = #tpu.pipeline_mode<synchronous>, transform_indices = @transform_2, window_bounds = array<i64: 1, 32>}, {pipeline_mode = #tpu.pipeline_mode<synchronous>, transform_indices = @transform_3, window_bounds = array<i64: 288, 64>}, {pipeline_mode = #tpu.pipeline_mode<synchronous>, transform_indices = @transform_4, window_bounds = array<i64: 1, 64>}, {transform_indices = @transform_5, window_bounds = array<i64: 1, 8, 8, 64>}]} {
    %c0 = arith.constant 0 : index
    %c0_0 = arith.constant 0 : index
    %c0_1 = arith.constant 0 : index
    %0 = vector.load %arg1[%c0, %c0_0, %c0_1] : memref<1x1024x27xbf16, #tpu.memory_space<vmem>>, vector<1x1024x27xbf16>
    %1 = vector.shape_cast %0 : vector<1x1024x27xbf16> to vector<1024x27xbf16>
    %c0_2 = arith.constant 0 : index
    %c0_3 = arith.constant 0 : index
    %2 = vector.load %arg2[%c0_2, %c0_3] : memref<27x32xbf16, #tpu.memory_space<vmem>>, vector<27x32xbf16>
    %cst = arith.constant dense<0.000000e+00> : vector<1024x32xf32>
    %3 = tpu.matmul %1, %2, %cst {dimension_numbers = #tpu.dot_dimension_numbers<[1], [0], [0], [1], [0, 0, 1, 1], [], []>} : vector<1024x27xbf16>, vector<27x32xbf16>, vector<1024x32xf32> -> vector<1024x32xf32>
    %c0_4 = arith.constant 0 : index
    %c0_5 = arith.constant 0 : index
    %4 = vector.load %arg3[%c0_4, %c0_5] : memref<1x32xf32, #tpu.memory_space<vmem>>, vector<1x32xf32>
    %5 = vector.broadcast %4 : vector<1x32xf32> to vector<1024x32xf32>
    %6 = arith.addf %3, %5 : vector<1024x32xf32>
    %cst_6 = arith.constant 0.000000e+00 : f32
    %7 = vector.broadcast %cst_6 : f32 to vector<1024x32xf32>
    %8 = arith.maximumf %6, %7 : vector<1024x32xf32>
    %9 = vector.shape_cast %8 : vector<1024x32xf32> to vector<32x32x32xf32>
    %10 = vector.shape_cast %9 : vector<32x32x32xf32> to vector<16x2x32x32xf32>
    %cst_7 = arith.constant dense<0xFF800000> : vector<16x32x32xf32>
    %11 = vector.multi_reduction <maximumf>, %10, %cst_7 [1] : vector<16x2x32x32xf32> to vector<16x32x32xf32>
    %12 = vector.shape_cast %11 : vector<16x32x32xf32> to vector<16x16x2x32xf32>
    %cst_8 = arith.constant dense<0xFF800000> : vector<16x16x32xf32>
    %13 = vector.multi_reduction <maximumf>, %12, %cst_8 [2] : vector<16x16x2x32xf32> to vector<16x16x32xf32>
    %14 = arith.truncf %13 : vector<16x16x32xf32> to vector<16x16x32xbf16>
    %cst_9 = arith.constant 0.000000e+00 : bf16
    %15 = vector.broadcast %cst_9 : bf16 to vector<16x1x32xbf16>
    %cst_10 = arith.constant 0.000000e+00 : bf16
    %16 = vector.broadcast %cst_10 : bf16 to vector<1x18x32xbf16>
    %17 = tpu.concatenate %15, %14, %15 in 1 : vector<16x1x32xbf16>, vector<16x16x32xbf16>, vector<16x1x32xbf16> -> vector<16x18x32xbf16>
    %18 = tpu.concatenate %16, %17, %16 in 0 : vector<1x18x32xbf16>, vector<16x18x32xbf16>, vector<1x18x32xbf16> -> vector<18x18x32xbf16>
    %19 = vector.extract_strided_slice %18 {offsets = [0, 0, 0], sizes = [16, 16, 32], strides = [1, 1, 1]} : vector<18x18x32xbf16> to vector<16x16x32xbf16>
    %20 = vector.shape_cast %19 : vector<16x16x32xbf16> to vector<256x32xbf16>
    %21 = vector.extract_strided_slice %18 {offsets = [0, 1, 0], sizes = [16, 16, 32], strides = [1, 1, 1]} : vector<18x18x32xbf16> to vector<16x16x32xbf16>
    %22 = vector.shape_cast %21 : vector<16x16x32xbf16> to vector<256x32xbf16>
    %23 = vector.extract_strided_slice %18 {offsets = [0, 2, 0], sizes = [16, 16, 32], strides = [1, 1, 1]} : vector<18x18x32xbf16> to vector<16x16x32xbf16>
    %24 = vector.shape_cast %23 : vector<16x16x32xbf16> to vector<256x32xbf16>
    %25 = vector.extract_strided_slice %18 {offsets = [1, 0, 0], sizes = [16, 16, 32], strides = [1, 1, 1]} : vector<18x18x32xbf16> to vector<16x16x32xbf16>
    %26 = vector.shape_cast %25 : vector<16x16x32xbf16> to vector<256x32xbf16>
    %27 = vector.extract_strided_slice %18 {offsets = [1, 1, 0], sizes = [16, 16, 32], strides = [1, 1, 1]} : vector<18x18x32xbf16> to vector<16x16x32xbf16>
    %28 = vector.shape_cast %27 : vector<16x16x32xbf16> to vector<256x32xbf16>
    %29 = vector.extract_strided_slice %18 {offsets = [1, 2, 0], sizes = [16, 16, 32], strides = [1, 1, 1]} : vector<18x18x32xbf16> to vector<16x16x32xbf16>
    %30 = vector.shape_cast %29 : vector<16x16x32xbf16> to vector<256x32xbf16>
    %31 = vector.extract_strided_slice %18 {offsets = [2, 0, 0], sizes = [16, 16, 32], strides = [1, 1, 1]} : vector<18x18x32xbf16> to vector<16x16x32xbf16>
    %32 = vector.shape_cast %31 : vector<16x16x32xbf16> to vector<256x32xbf16>
    %33 = vector.extract_strided_slice %18 {offsets = [2, 1, 0], sizes = [16, 16, 32], strides = [1, 1, 1]} : vector<18x18x32xbf16> to vector<16x16x32xbf16>
    %34 = vector.shape_cast %33 : vector<16x16x32xbf16> to vector<256x32xbf16>
    %35 = vector.extract_strided_slice %18 {offsets = [2, 2, 0], sizes = [16, 16, 32], strides = [1, 1, 1]} : vector<18x18x32xbf16> to vector<16x16x32xbf16>
    %36 = vector.shape_cast %35 : vector<16x16x32xbf16> to vector<256x32xbf16>
    %37 = tpu.concatenate %20, %22, %24, %26, %28, %30, %32, %34, %36 in 1 : vector<256x32xbf16>, vector<256x32xbf16>, vector<256x32xbf16>, vector<256x32xbf16>, vector<256x32xbf16>, vector<256x32xbf16>, vector<256x32xbf16>, vector<256x32xbf16>, vector<256x32xbf16> -> vector<256x288xbf16>
    %c0_11 = arith.constant 0 : index
    %c0_12 = arith.constant 0 : index
    %38 = vector.load %arg4[%c0_11, %c0_12] : memref<288x64xbf16, #tpu.memory_space<vmem>>, vector<288x64xbf16>
    %cst_13 = arith.constant dense<0.000000e+00> : vector<256x64xf32>
    %39 = tpu.matmul %37, %38, %cst_13 {dimension_numbers = #tpu.dot_dimension_numbers<[1], [0], [0], [1], [0, 0, 1, 1], [], []>} : vector<256x288xbf16>, vector<288x64xbf16>, vector<256x64xf32> -> vector<256x64xf32>
    %c0_14 = arith.constant 0 : index
    %c0_15 = arith.constant 0 : index
    %40 = vector.load %arg5[%c0_14, %c0_15] : memref<1x64xf32, #tpu.memory_space<vmem>>, vector<1x64xf32>
    %41 = vector.broadcast %40 : vector<1x64xf32> to vector<256x64xf32>
    %42 = arith.addf %39, %41 : vector<256x64xf32>
    %cst_16 = arith.constant 0.000000e+00 : f32
    %43 = vector.broadcast %cst_16 : f32 to vector<256x64xf32>
    %44 = arith.maximumf %42, %43 : vector<256x64xf32>
    %45 = vector.shape_cast %44 : vector<256x64xf32> to vector<16x16x64xf32>
    %46 = vector.shape_cast %45 : vector<16x16x64xf32> to vector<8x2x16x64xf32>
    %cst_17 = arith.constant dense<0xFF800000> : vector<8x16x64xf32>
    %47 = vector.multi_reduction <maximumf>, %46, %cst_17 [1] : vector<8x2x16x64xf32> to vector<8x16x64xf32>
    %48 = vector.shape_cast %47 : vector<8x16x64xf32> to vector<8x8x2x64xf32>
    %cst_18 = arith.constant dense<0xFF800000> : vector<8x8x64xf32>
    %49 = vector.multi_reduction <maximumf>, %48, %cst_18 [2] : vector<8x8x2x64xf32> to vector<8x8x64xf32>
    %50 = arith.truncf %49 : vector<8x8x64xf32> to vector<8x8x64xbf16>
    %c0_19 = arith.constant 0 : index
    %c0_20 = arith.constant 0 : index
    %c0_21 = arith.constant 0 : index
    %c0_22 = arith.constant 0 : index
    %51 = vector.load %arg6[%c0_19, %c0_20, %c0_21, %c0_22] : memref<1x8x8x64xbf16, #tpu.memory_space<vmem>>, vector<1x8x8x64xbf16>
    %52 = vector.shape_cast %51 : vector<1x8x8x64xbf16> to vector<8x8x64xbf16>
    %53 = vector.shape_cast %50 : vector<8x8x64xbf16> to vector<1x8x8x64xbf16>
    tpu.vector_store %arg6[%c0_19, %c0_20, %c0_21, %c0_22], %53 {strides = array<i32>} : memref<1x8x8x64xbf16, #tpu.memory_space<vmem>>, vector<1x8x8x64xbf16>,
    return
  }
  func.func @transform_0(%arg0: i32) -> (i32, i32, i32) {
    %c0_i32 = arith.constant 0 : i32
    %c0_i32_0 = arith.constant 0 : i32
    %c0_i32_1 = arith.constant 0 : i32
    return %arg0, %c0_i32, %c0_i32_0 : i32, i32, i32
  }
  func.func @transform_1(%arg0: i32) -> (i32, i32) {
    %c0_i32 = arith.constant 0 : i32
    %c0_i32_0 = arith.constant 0 : i32
    %c0_i32_1 = arith.constant 0 : i32
    return %c0_i32, %c0_i32_0 : i32, i32
  }
  func.func @transform_2(%arg0: i32) -> (i32, i32) {
    %c0_i32 = arith.constant 0 : i32
    %c0_i32_0 = arith.constant 0 : i32
    %c0_i32_1 = arith.constant 0 : i32
    return %c0_i32, %c0_i32_0 : i32, i32
  }
  func.func @transform_3(%arg0: i32) -> (i32, i32) {
    %c0_i32 = arith.constant 0 : i32
    %c0_i32_0 = arith.constant 0 : i32
    %c0_i32_1 = arith.constant 0 : i32
    return %c0_i32, %c0_i32_0 : i32, i32
  }
  func.func @transform_4(%arg0: i32) -> (i32, i32) {
    %c0_i32 = arith.constant 0 : i32
    %c0_i32_0 = arith.constant 0 : i32
    %c0_i32_1 = arith.constant 0 : i32
    return %c0_i32, %c0_i32_0 : i32, i32
  }
  func.func @transform_5(%arg0: i32) -> (i32, i32, i32, i32) {
    %c0_i32 = arith.constant 0 : i32
    %c0_i32_0 = arith.constant 0 : i32
    %c0_i32_1 = arith.constant 0 : i32
    %c0_i32_2 = arith.constant 0 : i32
    return %arg0, %c0_i32, %c0_i32_0, %c0_i32_1 : i32, i32, i32, i32
  }
}

module attributes {stable_mosaic.version = 11 : i64} {
  func.func @_classifier_kernel(%arg0: i32, %arg1: memref<2x4096xbf16, #tpu.memory_space<vmem>>, %arg2: memref<4096x10xbf16, #tpu.memory_space<vmem>>, %arg3: memref<2x10xf32, #tpu.memory_space<vmem>>) attributes {dimension_semantics = [#tpu.dimension_semantics<arbitrary>], iteration_bounds = array<i64: 1>, scalar_prefetch = 0 : i64, scratch_operands = 0 : i64, tpu.core_type = #tpu.core_type<tc>, window_params = [{pipeline_mode = #tpu.pipeline_mode<synchronous>, transform_indices = @transform_0, window_bounds = array<i64: 2, 4096>}, {pipeline_mode = #tpu.pipeline_mode<synchronous>, transform_indices = @transform_1, window_bounds = array<i64: 4096, 10>}, {pipeline_mode = #tpu.pipeline_mode<synchronous>, transform_indices = @transform_2, window_bounds = array<i64: 2, 10>}]} {
    %c0 = arith.constant 0 : index
    %c0_0 = arith.constant 0 : index
    %0 = vector.load %arg1[%c0, %c0_0] : memref<2x4096xbf16, #tpu.memory_space<vmem>>, vector<2x4096xbf16>
    %c0_1 = arith.constant 0 : index
    %c0_2 = arith.constant 0 : index
    %1 = vector.load %arg2[%c0_1, %c0_2] : memref<4096x10xbf16, #tpu.memory_space<vmem>>, vector<4096x10xbf16>
    %cst = arith.constant dense<0.000000e+00> : vector<2x10xf32>
    %2 = tpu.matmul %0, %1, %cst {dimension_numbers = #tpu.dot_dimension_numbers<[1], [0], [0], [1], [0, 0, 1, 1], [], []>} : vector<2x4096xbf16>, vector<4096x10xbf16>, vector<2x10xf32> -> vector<2x10xf32>
    %c0_3 = arith.constant 0 : index
    %c0_4 = arith.constant 0 : index
    %3 = vector.load %arg3[%c0_3, %c0_4] : memref<2x10xf32, #tpu.memory_space<vmem>>, vector<2x10xf32>
    tpu.vector_store %arg3[%c0_3, %c0_4], %2 {strides = array<i32>} : memref<2x10xf32, #tpu.memory_space<vmem>>, vector<2x10xf32>,
    return
  }
  func.func @transform_0(%arg0: i32) -> (i32, i32) {
    %c0_i32 = arith.constant 0 : i32
    %c0_i32_0 = arith.constant 0 : i32
    %c0_i32_1 = arith.constant 0 : i32
    return %c0_i32, %c0_i32_0 : i32, i32
  }
  func.func @transform_1(%arg0: i32) -> (i32, i32) {
    %c0_i32 = arith.constant 0 : i32
    %c0_i32_0 = arith.constant 0 : i32
    %c0_i32_1 = arith.constant 0 : i32
    return %c0_i32, %c0_i32_0 : i32, i32
  }
  func.func @transform_2(%arg0: i32) -> (i32, i32) {
    %c0_i32 = arith.constant 0 : i32
    %c0_i32_0 = arith.constant 0 : i32
    %c0_i32_1 = arith.constant 0 : i32
    return %c0_i32, %c0_i32_0 : i32, i32
  }
}

</mosaic_0001>

<bundles_post_ra>
// kernel: simple_cnn_forward.3
= control target key start
LH: loop header
LB: loop body
LE: loop exit
PB: predicated region body
PF: predicated region fallthrough
CT: control target
= control target key end

     0   :  { %v537_v28 = vlaneseq  ;;  %v3847_v36 = vmov 1966171168   ;;  %s4702_s0 = inlined_call_operand.vmem [shape: bf16[2,4096], index: 0, kind: input, shape index: {}]   ;;  %s4703_s1 = inlined_call_operand.vmem [shape: bf16[4096,10], index: 1, kind: input, shape index: {}]   ;;  %s4704_s2 = inlined_call_operand.hbm [shape: f32[2,10], index: 2, kind: output, shape index: {}]  }
   0x1   :  { %v3563_v0 = vld [vmem:[%s4703_s1 + $0x40] sm:$0xff]   ;;  %v3567_v4 = vld [vmem:[%s4703_s1 + $0x48] sm:$0xff]   ;;  %v3571_v8 = vld [vmem:[%s4703_s1 + $0x50] sm:$0xff]   ;;  %v535_v37 = vunpack.c.l.s4 %v3847_v36 }
   0x2   :  { %v3564_v1 = vld [vmem:[%s4703_s1 + $0xc0] sm:$0xff]   ;;  %3209 = vmatprep.subr.bf16.mxu0 %v3563_v0  ;;  %v3568_v5 = vld [vmem:[%s4703_s1 + $0xc8] sm:$0xff]   ;;  %v3572_v9 = vld [vmem:[%s4703_s1 + $0xd0] sm:$0xff]   ;;  %v538_v33 = vshrl.u32 %v537_v28, 7 }
   0x3   :  { %v3565_v2 = vld [vmem:[%s4703_s1] sm:$0xff]   ;;  %3231 = vmatprep.subr.bf16.mxu1 %v3564_v1  ;;  %v3569_v6 = vld [vmem:[%s4703_s1 + $0x8] sm:$0xff]   ;;  %v3573_v10 = vld [vmem:[%s4703_s1 + $0x10] sm:$0xff]   ;;  %v536_v40 = vunpack.c.0.s8 %v535_v37 }
   0x4   :  { %v3566_v3 = vld [vmem:[%s4703_s1 + $0x80] sm:$0xff]   ;;  %3210 = vmatpush3.bf16.msra.mxu0 %v3565_v2  ;;  %v3570_v7 = vld [vmem:[%s4703_s1 + $0x88] sm:$0xff]   ;;  %v3574_v11 = vld [vmem:[%s4703_s1 + $0x90] sm:$0xff]  }
   0x5   :  { %3232 = vmatpush3.bf16.msra.mxu1 %v3566_v3  ;;  %3211 = vmatprep.subr.bf16.mxu0 %v3567_v4  ;;  %v3575_v12 = vld [vmem:[%s4703_s1 + $0x58] sm:$0xff]   ;;  %v3579_v16 = vld [vmem:[%s4703_s1 + $0x60] sm:$0xff]   ;;  %v3583_v20 = vld [vmem:[%s4703_s1 + $0x68] sm:$0xff]   ;;  %v3969_v41 = vsub.s32 %v536_v40, %v538_v33 }
   0x6   :  { %3233 = vmatprep.subr.bf16.mxu1 %v3568_v5  ;;  %v3576_v13 = vld [vmem:[%s4703_s1 + $0xd8] sm:$0xff]   ;;  %v3580_v17 = vld [vmem:[%s4703_s1 + $0xe0] sm:$0xff]   ;;  %v3584_v21 = vld [vmem:[%s4703_s1 + $0xe8] sm:$0xff]  }
   0x7   :  { %v3577_v14 = vld [vmem:[%s4703_s1 + $0x18] sm:$0xff]   ;;  %v3581_v18 = vld [vmem:[%s4703_s1 + $0x20] sm:$0xff]   ;;  %v3585_v22 = vld [vmem:[%s4703_s1 + $0x28] sm:$0xff]  }
   0x8   :  { %3212 = vmatpush3.bf16.msra.mxu0 %v3569_v6  ;;  %v3578_v15 = vld [vmem:[%s4703_s1 + $0x98] sm:$0xff]   ;;  %v3582_v19 = vld [vmem:[%s4703_s1 + $0xa0] sm:$0xff]   ;;  %v3586_v23 = vld [vmem:[%s4703_s1 + $0xa8] sm:$0xff]  }
   0x9   :  { %3234 = vmatpush3.bf16.msra.mxu1 %v3570_v7  ;;  %3213 = vmatprep.subr.bf16.mxu0 %v3571_v8  ;;  %v3587_v24 = vld [vmem:[%s4703_s1 + $0x70] sm:$0xff]   ;;  %v3591_v29 = vld [vmem:[%s4703_s1 + $0x78] sm:$0xff]   ;;  %v13_v34 = vld [vmem:[%s4702_s0] sm:$0xff] }
   0xa   :  { %3235 = vmatprep.subr.bf16.mxu1 %v3572_v9  ;;  %v3588_v25 = vld [vmem:[%s4703_s1 + $0xf0] sm:$0xff]   ;;  %v3592_v30 = vld [vmem:[%s4703_s1 + $0xf8] sm:$0xff]   ;;  %v3596_v35 = vld [vmem:[%s4703_s1 + $0x140] sm:$0xff]   ;;  %v533_v39 = vcombine.high %v13_v34, %v13_v34  ;;  %v540_v42 = vrot.slane %v13_v34, %v3969_v41 }
   0xb   :  { %v3589_v26 = vld [vmem:[%s4703_s1 + $0x30] sm:$0xff]   ;;  %v3593_v31 = vld [vmem:[%s4703_s1 + $0x38] sm:$0xff]   ;;  %v3597_v38 = vld [vmem:[%s4703_s1 + $0x1c0] sm:$0xff]  }
   0xc   :  { %3214 = vmatpush3.bf16.msra.mxu0 %v3573_v10  ;;  %v3590_v27 = vld [vmem:[%s4703_s1 + $0xb0] sm:$0xff]   ;;  %v3594_v32 = vld [vmem:[%s4703_s1 + $0xb8] sm:$0xff]   ;;  %v3973_v43 = vrot.slane %v533_v39, %v3969_v41  ;;  %v548_v44 = vcombine.high %v540_v42, %v540_v42  ;;  %v556_v45 = vrot.slane %v540_v42, %v3969_v41  ;;  %v3598_v47 = vld [vmem:[%s4703_s1 + $0x100] sm:$0xff]  }
   0xd   :  { %3236 = vmatpush3.bf16.msra.mxu1 %v3574_v11  ;;  %3215 = vmatprep.subr.bf16.mxu0 %v3575_v12  ;;  %v3599_v49 = vld [vmem:[%s4703_s1 + $0x180] sm:$0xff]   ;;  %v3600_v52 = vld [vmem:[%s4703_s1 + $0x148] sm:$0xff]   ;;  %v3604_v58 = vld [vmem:[%s4703_s1 + $0x150] sm:$0xff]  }
   0xe   :  { %3237 = vmatprep.subr.bf16.mxu1 %v3576_v13  ;;  %v549_v46 = vcombine.high %v3973_v43, %v3973_v43  ;;  %v570_v48 = vrot.slane %v548_v44, %v3969_v41  ;;  %v578_v51 = vcombine.high %v556_v45, %v556_v45  ;;  %v3601_v54 = vld [vmem:[%s4703_s1 + $0x1c8] sm:$0xff]   ;;  %v3605_v59 = vld [vmem:[%s4703_s1 + $0x1d0] sm:$0xff]   ;;  %v3608_v62 = vld [vmem:[%s4703_s1 + $0x158] sm:$0xff]  }
   0xf   :  { %v3602_v55 = vld [vmem:[%s4703_s1 + $0x108] sm:$0xff]   ;;  %v3606_v60 = vld [vmem:[%s4703_s1 + $0x110] sm:$0xff]   ;;  %v3609_v63 = vld [vmem:[%s4703_s1 + $0x1d8] sm:$0xff]  }
  0x10   :  { %3216 = vmatpush3.bf16.msra.mxu0 %v3577_v14  ;;  %v577_v50 = vrot.slane %v549_v46, %v3969_v41  ;;  %2329 = vmatprep.mubr.bf16.mxu0 %v570_v48  ;;  %v580_v53 = vcombine.high %v570_v48, %v570_v48  ;;  %v3603_v57 = vld [vmem:[%s4703_s1 + $0x188] sm:$0xff]   ;;  %v3607_v61 = vld [vmem:[%s4703_s1 + $0x190] sm:$0xff]   ;;  %v3610_v0 = vld [vmem:[%s4703_s1 + $0x118] sm:$0xff]  }
  0x11   :  { %3238 = vmatpush3.bf16.msra.mxu1 %v3578_v15  ;;  %3217 = vmatprep.subr.bf16.mxu0 %v3579_v16  ;;  %v3611_v1 = vld [vmem:[%s4703_s1 + $0x198] sm:$0xff]   ;;  %v3612_v2 = vld [vmem:[%s4703_s1 + $0x160] sm:$0xff]   ;;  %v3616_v6 = vld [vmem:[%s4703_s1 + $0x168] sm:$0xff]  }
  0x12   :  { %3239 = vmatprep.subr.bf16.mxu1 %v3580_v17  ;;  %v581_v56 = vcombine.high %v577_v50, %v577_v50  ;;  %2369 = vmatprep.mubr.bf16.mxu1 %v580_v53  ;;  %v3613_v3 = vld [vmem:[%s4703_s1 + $0x1e0] sm:$0xff]   ;;  %v3617_v7 = vld [vmem:[%s4703_s1 + $0x1e8] sm:$0xff]   ;;  %v3620_v10 = vld [vmem:[%s4703_s1 + $0x170] sm:$0xff]  }
  0x13   :  { %v3614_v4 = vld [vmem:[%s4703_s1 + $0x120] sm:$0xff]   ;;  %v3618_v8 = vld [vmem:[%s4703_s1 + $0x128] sm:$0xff]   ;;  %v3621_v11 = vld [vmem:[%s4703_s1 + $0x1f0] sm:$0xff]  }
  0x14   :  { %3218 = vmatpush3.bf16.msra.mxu0 %v3581_v18  ;;  %v3615_v5 = vld [vmem:[%s4703_s1 + $0x1a0] sm:$0xff]   ;;  %v3619_v9 = vld [vmem:[%s4703_s1 + $0x1a8] sm:$0xff]   ;;  %v3622_v12 = vld [vmem:[%s4703_s1 + $0x130] sm:$0xff]   ;;  %v563_v18 = vrot.slane %v3973_v43, %v3969_v41 }
  0x15   :  { %3240 = vmatpush3.bf16.msra.mxu1 %v3582_v19  ;;  %3219 = vmatprep.subr.bf16.mxu0 %v3583_v20  ;;  %v3623_v13 = vld [vmem:[%s4703_s1 + $0x1b0] sm:$0xff]   ;;  %v3624_v14 = vld [vmem:[%s4703_s1 + $0x178] sm:$0xff]   ;;  %v3628_v19 = vld [vmem:[%s4703_s1 + $0x240] sm:$0xff]  }
  0x16   :  { %3241 = vmatprep.subr.bf16.mxu1 %v3584_v21  ;;  %v3625_v15 = vld [vmem:[%s4703_s1 + $0x1f8] sm:$0xff]   ;;  %v3629_v20 = vld [vmem:[%s4703_s1 + $0x2c0] sm:$0xff]   ;;  %v3636_v28 = vld [vmem:[%s4703_s1 + $0x250] sm:$0xff]  }
  0x17   :  { %v3626_v16 = vld [vmem:[%s4703_s1 + $0x138] sm:$0xff]   ;;  %v3630_v21 = vld [vmem:[%s4703_s1 + $0x200] sm:$0xff]   ;;  %v3648_v40 = vld [vmem:[%s4703_s1 + $0x268] sm:$0xff]  }
  0x18   :  { %3220 = vmatpush3.bf16.msra.mxu0 %v3585_v22  ;;  %v3627_v17 = vld [vmem:[%s4703_s1 + $0x1b8] sm:$0xff]   ;;  %v3631_v22 = vld [vmem:[%s4703_s1 + $0x280] sm:$0xff]   ;;  %v3649_v42 = vld [vmem:[%s4703_s1 + $0x2e8] sm:$0xff]  }
  0x19   :  { %3242 = vmatpush3.bf16.msra.mxu1 %v3586_v23  ;;  %3221 = vmatprep.subr.bf16.mxu0 %v3587_v24  ;;  %v579_v23 = vcombine.high %v563_v18, %v563_v18  ;;  %v3632_v24 = vld [vmem:[%s4703_s1 + $0x248] sm:$0xff]   ;;  %v3641_v33 = vld [vmem:[%s4703_s1 + $0x2d8] sm:$0xff]   ;;  %v3644_v36 = vld [vmem:[%s4703_s1 + $0x260] sm:$0xff]  }
  0x1a   :  { %3243 = vmatprep.subr.bf16.mxu1 %v3588_v25  ;;  %v3633_v25 = vld [vmem:[%s4703_s1 + $0x2c8] sm:$0xff]   ;;  %v3642_v34 = vld [vmem:[%s4703_s1 + $0x218] sm:$0xff]   ;;  %v3645_v37 = vld [vmem:[%s4703_s1 + $0x2e0] sm:$0xff]  }
  0x1b   :  { %v3647_v39 = vld [vmem:[%s4703_s1 + $0x2a0] sm:$0xff]   ;;  %v3650_v43 = vld [vmem:[%s4703_s1 + $0x228] sm:$0xff]  }
  0x1c   :  { %3222 = vmatpush3.bf16.msra.mxu0 %v3589_v26  ;;  %v3634_v26 = vld [vmem:[%s4703_s1 + $0x208] sm:$0xff]  }
  0x1d   :  { %3244 = vmatpush3.bf16.msra.mxu1 %v3590_v27  ;;  %3223 = vmatprep.subr.bf16.mxu0 %v3591_v29  ;;  %v3635_v27 = vld [vmem:[%s4703_s1 + $0x288] sm:$0xff]   ;;  %v3637_v29 = vld [vmem:[%s4703_s1 + $0x2d0] sm:$0xff]  }
  0x1e   :  { %3245 = vmatprep.subr.bf16.mxu1 %v3592_v30  ;;  %v3638_v30 = vld [vmem:[%s4703_s1 + $0x210] sm:$0xff]   ;;  %v3651_v44 = vld [vmem:[%s4703_s1 + $0x2a8] sm:$0xff]  }
  0x1f   :  { %v14_v46 = vld [vmem:[%s4702_s0 + $0x8] sm:$0xff] }
  0x20   :  { %3224 = vmatpush3.bf16.msra.mxu0 %v3593_v31  ;;  %v3639_v31 = vld [vmem:[%s4703_s1 + $0x290] sm:$0xff]   ;;  %v589_v48 = vrot.slane %v14_v46, %v3969_v41 }
  0x21   :  { %3246 = vmatpush3.bf16.msra.mxu1 %v3594_v32  ;;  %3253 = vmatprep.subr.bf16.mxu0 %v3596_v35  ;;  %v3640_v32 = vld [vmem:[%s4703_s1 + $0x258] sm:$0xff]  }
  0x22   :  { %3275 = vmatprep.subr.bf16.mxu1 %v3597_v38  ;;  %v3643_v35 = vld [vmem:[%s4703_s1 + $0x298] sm:$0xff]   ;;  %v3646_v38 = vld [vmem:[%s4703_s1 + $0x220] sm:$0xff]  }
  0x23   :  { %2330 = vmatmul.mubr.bf16.vlgmr.msra.gmra.mrb[0].mxu0 %v556_v45  ;;  %v3652_v45 = vld [vmem:[%s4703_s1 + $0x270] sm:$0xff]  }
  0x24   :  { %3254 = vmatpush3.bf16.msra.mxu0 %v3598_v47  ;;  %2370 = vmatmul.mubr.bf16.vlgmr.msra.gmra.mrb[0].mxu1 %v578_v51  ;;  %v3653_v47 = vld [vmem:[%s4703_s1 + $0x2f0] sm:$0xff]  }
  0x25   :  { %3255 = vmatprep.subr.bf16.mxu0 %v3600_v52  ;;  %3276 = vmatpush3.bf16.msra.mxu1 %v3599_v49  ;;  %v582_v49 = vcombine.high %v14_v46, %v14_v46  ;;  %v3655_v51 = vld [vmem:[%s4703_s1 + $0x2b0] sm:$0xff]   ;;  %v597_v52 = vcombine.high %v589_v48, %v589_v48 }
  0x26   :  { %2409 = vmatprep.mubr.bf16.mxu0 %v577_v50  ;;  %3277 = vmatprep.subr.bf16.mxu1 %v3601_v54  ;;  %v3654_v50 = vld [vmem:[%s4703_s1 + $0x230] sm:$0xff]   ;;  %v3656_v54 = vld [vmem:[%s4703_s1 + $0x278] sm:$0xff]  }
  0x27   :  { %2449 = vmatprep.mubr.bf16.mxu1 %v581_v56  ;;  %v4161_v53 = vrot.slane %v582_v49, %v3969_v41  ;;  %v619_v56 = vrot.slane %v597_v52, %v3969_v41  ;;  %v3703_v46 = vld [vmem:[%s4703_s1 + $0x410] sm:$0xff]   ;;  %v3706_v49 = vld [vmem:[%s4703_s1 + $0x4d8] sm:$0xff]   ;;  %v3709_v52 = vld [vmem:[%s4703_s1 + $0x460] sm:$0xff]  }
  0x28   :  { %3256 = vmatpush3.bf16.msra.mxu0 %v3602_v55  ;;  %v3657_v55 = vld [vmem:[%s4703_s1 + $0x2f8] sm:$0xff]  }
  0x29   :  { %3257 = vmatprep.subr.bf16.mxu0 %v3604_v58  ;;  %3278 = vmatpush3.bf16.msra.mxu1 %v3603_v57  ;;  %v598_v57 = vcombine.high %v4161_v53, %v4161_v53  ;;  %v3658_v58 = vld [vmem:[%s4703_s1 + $0x238] sm:$0xff]  }
  0x2a   :  { %3279 = vmatprep.subr.bf16.mxu1 %v3605_v59  ;;  %v3659_v59 = vld [vmem:[%s4703_s1 + $0x2b8] sm:$0xff]  }
  0x2c   :  { %3258 = vmatpush3.bf16.msra.mxu0 %v3606_v60  ;;  %v629_v60 = vcombine.high %v619_v56, %v619_v56 }
  0x2d   :  { %3259 = vmatprep.subr.bf16.mxu0 %v3608_v62  ;;  %3280 = vmatpush3.bf16.msra.mxu1 %v3607_v61  ;;  %v605_v61 = vrot.slane %v589_v48, %v3969_v41  ;;  %v3660_v62 = vld [vmem:[%s4703_s1 + $0x340] sm:$0xff]   ;;  %v3705_v48 = vld [vmem:[%s4703_s1 + $0x458] sm:$0xff]  }
  0x2e   :  { %3281 = vmatprep.subr.bf16.mxu1 %v3609_v63  ;;  %v3661_v63 = vld [vmem:[%s4703_s1 + $0x3c0] sm:$0xff]  }
  0x30   :  { %3260 = vmatpush3.bf16.msra.mxu0 %v3610_v0  ;;  %v626_v0 = vrot.slane %v598_v57, %v3969_v41  ;;  %v3714_v57 = vld [vmem:[%s4703_s1 + $0x4e8] sm:$0xff]  }
  0x31   :  { %3261 = vmatprep.subr.bf16.mxu0 %v3612_v2  ;;  %3282 = vmatpush3.bf16.msra.mxu1 %v3611_v1  ;;  %v3662_v1 = vld [vmem:[%s4703_s1 + $0x300] sm:$0xff]  }
  0x32   :  { %3283 = vmatprep.subr.bf16.mxu1 %v3613_v3  ;;  %v3663_v2 = vld [vmem:[%s4703_s1 + $0x380] sm:$0xff]   ;;  %v627_v3 = vcombine.high %v605_v61, %v605_v61 }
  0x34   :  { %3262 = vmatpush3.bf16.msra.mxu0 %v3614_v4  ;;  %v3664_v4 = vld [vmem:[%s4703_s1 + $0x348] sm:$0xff]  }
  0x35   :  { %3263 = vmatprep.subr.bf16.mxu0 %v3616_v6  ;;  %3284 = vmatpush3.bf16.msra.mxu1 %v3615_v5  ;;  %v3665_v5 = vld [vmem:[%s4703_s1 + $0x3c8] sm:$0xff]   ;;  %v630_v6 = vcombine.high %v626_v0, %v626_v0 }
  0x36   :  { %3285 = vmatprep.subr.bf16.mxu1 %v3617_v7  ;;  %v3666_v7 = vld [vmem:[%s4703_s1 + $0x308] sm:$0xff]  }
  0x38   :  { %3264 = vmatpush3.bf16.msra.mxu0 %v3618_v8  ;;  %v3667_v8 = vld [vmem:[%s4703_s1 + $0x388] sm:$0xff]  }
  0x39   :  { %3265 = vmatprep.subr.bf16.mxu0 %v3620_v10  ;;  %3286 = vmatpush3.bf16.msra.mxu1 %v3619_v9  ;;  %v3668_v9 = vld [vmem:[%s4703_s1 + $0x350] sm:$0xff]  }
  0x3a   :  { %3287 = vmatprep.subr.bf16.mxu1 %v3621_v11  ;;  %v3669_v10 = vld [vmem:[%s4703_s1 + $0x3d0] sm:$0xff]  }
  0x3b   :  { %v3670_v11 = vld [vmem:[%s4703_s1 + $0x310] sm:$0xff]  }
  0x3c   :  { %3266 = vmatpush3.bf16.msra.mxu0 %v3622_v12  ;;  %v3671_v12 = vld [vmem:[%s4703_s1 + $0x390] sm:$0xff]  }
  0x3d   :  { %3267 = vmatprep.subr.bf16.mxu0 %v3624_v14  ;;  %3288 = vmatpush3.bf16.msra.mxu1 %v3623_v13  ;;  %v3672_v13 = vld [vmem:[%s4703_s1 + $0x358] sm:$0xff]  }
  0x3e   :  { %3289 = vmatprep.subr.bf16.mxu1 %v3625_v15  ;;  %v3673_v14 = vld [vmem:[%s4703_s1 + $0x3d8] sm:$0xff]  }
  0x3f   :  { %v3674_v15 = vld [vmem:[%s4703_s1 + $0x318] sm:$0xff]  }
  0x40   :  { %3268 = vmatpush3.bf16.msra.mxu0 %v3626_v16  ;;  %v3675_v16 = vld [vmem:[%s4703_s1 + $0x398] sm:$0xff]  }
  0x41   :  { %3297 = vmatprep.subr.bf16.mxu0 %v3628_v19  ;;  %3290 = vmatpush3.bf16.msra.mxu1 %v3627_v17  ;;  %v3676_v17 = vld [vmem:[%s4703_s1 + $0x360] sm:$0xff]  }
  0x42   :  { %3319 = vmatprep.subr.bf16.mxu1 %v3629_v20  ;;  %v3678_v19 = vld [vmem:[%s4703_s1 + $0x320] sm:$0xff]  }
  0x43   :  { %2410 = vmatmul.mubr.bf16.vlgmr.msra.gmra.mrb[4].mxu0 %v563_v18  ;;  %v3677_v18 = vld [vmem:[%s4703_s1 + $0x3e0] sm:$0xff]  }
  0x44   :  { %3298 = vmatpush3.bf16.msra.mxu0 %v3630_v21  ;;  %2450 = vmatmul.mubr.bf16.vlgmr.msra.gmra.mrb[4].mxu1 %v579_v23  ;;  %v3679_v20 = vld [vmem:[%s4703_s1 + $0x3a0] sm:$0xff]   ;;  %v3680_v21 = vld [vmem:[%s4703_s1 + $0x368] sm:$0xff]  }
  0x45   :  { %3299 = vmatprep.subr.bf16.mxu0 %v3632_v24  ;;  %3320 = vmatpush3.bf16.msra.mxu1 %v3631_v22  ;;  %v3681_v22 = vld [vmem:[%s4703_s1 + $0x3e8] sm:$0xff]  }
  0x46   :  { %3321 = vmatprep.subr.bf16.mxu1 %v3633_v25  ;;  %2489 = vmatprep.mubr.bf16.mxu0 %v619_v56  ;;  %v3682_v23 = vld [vmem:[%s4703_s1 + $0x328] sm:$0xff]   ;;  %v3684_v25 = vld [vmem:[%s4703_s1 + $0x370] sm:$0xff]  }
  0x47   :  { %2529 = vmatprep.mubr.bf16.mxu1 %v629_v60  ;;  %v3683_v24 = vld [vmem:[%s4703_s1 + $0x3a8] sm:$0xff]   ;;  %v3717_v60 = vld [vmem:[%s4703_s1 + $0x470] sm:$0xff]  }
  0x48   :  { %3300 = vmatpush3.bf16.msra.mxu0 %v3634_v26  ;;  %v3685_v26 = vld [vmem:[%s4703_s1 + $0x3f0] sm:$0xff]   ;;  %v3713_v56 = vld [vmem:[%s4703_s1 + $0x468] sm:$0xff]  }
  0x49   :  { %3301 = vmatprep.subr.bf16.mxu0 %v3636_v28  ;;  %3322 = vmatpush3.bf16.msra.mxu1 %v3635_v27  ;;  %v3686_v27 = vld [vmem:[%s4703_s1 + $0x330] sm:$0xff]  }
  0x4a   :  { %3323 = vmatprep.subr.bf16.mxu1 %v3637_v29  ;;  %v3687_v28 = vld [vmem:[%s4703_s1 + $0x3b0] sm:$0xff]   ;;  %v3688_v29 = vld [vmem:[%s4703_s1 + $0x378] sm:$0xff]  }
  0x4c   :  { %3302 = vmatpush3.bf16.msra.mxu0 %v3638_v30  ;;  %v3689_v30 = vld [vmem:[%s4703_s1 + $0x3f8] sm:$0xff]  }
  0x4d   :  { %3303 = vmatprep.subr.bf16.mxu0 %v3640_v32  ;;  %3324 = vmatpush3.bf16.msra.mxu1 %v3639_v31  ;;  %v3690_v31 = vld [vmem:[%s4703_s1 + $0x338] sm:$0xff]  }
  0x4e   :  { %3325 = vmatprep.subr.bf16.mxu1 %v3641_v33  ;;  %v3691_v32 = vld [vmem:[%s4703_s1 + $0x3b8] sm:$0xff]   ;;  %v612_v33 = vrot.slane %v4161_v53, %v3969_v41  ;;  %v3710_v53 = vld [vmem:[%s4703_s1 + $0x4e0] sm:$0xff]  }
  0x50   :  { %3304 = vmatpush3.bf16.msra.mxu0 %v3642_v34  ;;  %v3693_v34 = vld [vmem:[%s4703_s1 + $0x440] sm:$0xff]  }
  0x51   :  { %3305 = vmatprep.subr.bf16.mxu0 %v3644_v36  ;;  %3326 = vmatpush3.bf16.msra.mxu1 %v3643_v35  ;;  %v3694_v35 = vld [vmem:[%s4703_s1 + $0x4c0] sm:$0xff]  }
  0x52   :  { %3327 = vmatprep.subr.bf16.mxu1 %v3645_v37  ;;  %v3695_v36 = vld [vmem:[%s4703_s1 + $0x400] sm:$0xff]  }
  0x53   :  { %v3696_v37 = vld [vmem:[%s4703_s1 + $0x480] sm:$0xff]  }
  0x54   :  { %3306 = vmatpush3.bf16.msra.mxu0 %v3646_v38  ;;  %v628_v38 = vcombine.high %v612_v33, %v612_v33 }
  0x55   :  { %3307 = vmatprep.subr.bf16.mxu0 %v3648_v40  ;;  %3328 = vmatpush3.bf16.msra.mxu1 %v3647_v39  ;;  %v3697_v39 = vld [vmem:[%s4703_s1 + $0x448] sm:$0xff]  }
  0x56   :  { %3329 = vmatprep.subr.bf16.mxu1 %v3649_v42  ;;  %v3698_v40 = vld [vmem:[%s4703_s1 + $0x4c8] sm:$0xff]  }
  0x57   :  { %v3699_v42 = vld [vmem:[%s4703_s1 + $0x408] sm:$0xff]  }
  0x58   :  { %3308 = vmatpush3.bf16.msra.mxu0 %v3650_v43  ;;  %v3700_v43 = vld [vmem:[%s4703_s1 + $0x488] sm:$0xff]  }
  0x59   :  { %3309 = vmatprep.subr.bf16.mxu0 %v3652_v45  ;;  %3330 = vmatpush3.bf16.msra.mxu1 %v3651_v44  ;;  %v3701_v44 = vld [vmem:[%s4703_s1 + $0x450] sm:$0xff]  }
  0x5a   :  { %3331 = vmatprep.subr.bf16.mxu1 %v3653_v47  ;;  %v3702_v45 = vld [vmem:[%s4703_s1 + $0x4d0] sm:$0xff]  }
  0x5b   :  { %v3704_v47 = vld [vmem:[%s4703_s1 + $0x490] sm:$0xff]  }
  0x5c   :  { %3310 = vmatpush3.bf16.msra.mxu0 %v3654_v50  ;;  %v3707_v50 = vld [vmem:[%s4703_s1 + $0x418] sm:$0xff]  }
  0x5d   :  { %3311 = vmatprep.subr.bf16.mxu0 %v3656_v54  ;;  %3332 = vmatpush3.bf16.msra.mxu1 %v3655_v51  ;;  %v3708_v51 = vld [vmem:[%s4703_s1 + $0x498] sm:$0xff]   ;;  %v3711_v54 = vld [vmem:[%s4703_s1 + $0x420] sm:$0xff]  }
  0x5e   :  { %3333 = vmatprep.subr.bf16.mxu1 %v3657_v55  ;;  %v3712_v55 = vld [vmem:[%s4703_s1 + $0x4a0] sm:$0xff]  }
  0x60   :  { %3312 = vmatpush3.bf16.msra.mxu0 %v3658_v58  ;;  %v3715_v58 = vld [vmem:[%s4703_s1 + $0x428] sm:$0xff]  }
  0x61   :  { %3341 = vmatprep.subr.bf16.mxu0 %v3660_v62  ;;  %3334 = vmatpush3.bf16.msra.mxu1 %v3659_v59  ;;  %v3716_v59 = vld [vmem:[%s4703_s1 + $0x4a8] sm:$0xff]   ;;  %v3718_v62 = vld [vmem:[%s4703_s1 + $0x4f0] sm:$0xff]  }
  0x62   :  { %3363 = vmatprep.subr.bf16.mxu1 %v3661_v63 }
  0x63   :  { %2490 = vmatmul.mubr.bf16.vlgmr.msra.gmra.mrb[8].mxu0 %v605_v61  ;;  %v15_v61 = vld [vmem:[%s4702_s0 + $0x10] sm:$0xff] }
  0x64   :  { %3342 = vmatpush3.bf16.msra.mxu0 %v3662_v1  ;;  %2569 = vmatprep.mubr.bf16.mxu0 %v626_v0  ;;  %v638_v63 = vrot.slane %v15_v61, %v3969_v41  ;;  %v631_v0 = vcombine.high %v15_v61, %v15_v61  ;;  %v3719_v1 = vld [vmem:[%s4703_s1 + $0x430] sm:$0xff]  }
  0x65   :  { %2530 = vmatmul.mubr.bf16.vlgmr.msra.gmra.mrb[8].mxu1 %v627_v3  ;;  %3343 = vmatprep.subr.bf16.mxu0 %v3664_v4  ;;  %v3768_v61 = vld [vmem:[%s4703_s1 + $0x610] sm:$0xff]  }
  0x66   :  { %3364 = vmatpush3.bf16.msra.mxu1 %v3663_v2  ;;  %2609 = vmatprep.mubr.bf16.mxu1 %v630_v6  ;;  %v3720_v2 = vld [vmem:[%s4703_s1 + $0x4b0] sm:$0xff]   ;;  %v646_v3 = vcombine.high %v638_v63, %v638_v63  ;;  %v4367_v4 = vrot.slane %v631_v0, %v3969_v41  ;;  %v3722_v6 = vld [vmem:[%s4703_s1 + $0x4f8] sm:$0xff]  }
  0x67   :  { %3365 = vmatprep.subr.bf16.mxu1 %v3665_v5  ;;  %v3721_v5 = vld [vmem:[%s4703_s1 + $0x478] sm:$0xff]  }
  0x68   :  { %3344 = vmatpush3.bf16.msra.mxu0 %v3666_v7  ;;  %v668_v7 = vrot.slane %v646_v3, %v3969_v41  ;;  %v3771_v0 = vld [vmem:[%s4703_s1 + $0x6d8] sm:$0xff]   ;;  %v3774_v3 = vld [vmem:[%s4703_s1 + $0x660] sm:$0xff]  }
  0x69   :  { %3345 = vmatprep.subr.bf16.mxu0 %v3668_v9  ;;  %v3723_v9 = vld [vmem:[%s4703_s1 + $0x438] sm:$0xff]  }
  0x6a   :  { %3366 = vmatpush3.bf16.msra.mxu1 %v3667_v8  ;;  %v647_v8 = vcombine.high %v4367_v4, %v4367_v4 }
  0x6b   :  { %3367 = vmatprep.subr.bf16.mxu1 %v3669_v10  ;;  %v3724_v10 = vld [vmem:[%s4703_s1 + $0x4b8] sm:$0xff]  }
  0x6c   :  { %3346 = vmatpush3.bf16.msra.mxu0 %v3670_v11  ;;  %v678_v11 = vcombine.high %v668_v7, %v668_v7 }
  0x6d   :  { %3347 = vmatprep.subr.bf16.mxu0 %v3672_v13  ;;  %v3725_v13 = vld [vmem:[%s4703_s1 + $0x540] sm:$0xff]  }
  0x6e   :  { %3368 = vmatpush3.bf16.msra.mxu1 %v3671_v12  ;;  %v654_v12 = vrot.slane %v638_v63, %v3969_v41  ;;  %v3770_v63 = vld [vmem:[%s4703_s1 + $0x658] sm:$0xff]  }
  0x6f   :  { %3369 = vmatprep.subr.bf16.mxu1 %v3673_v14  ;;  %v3726_v14 = vld [vmem:[%s4703_s1 + $0x5c0] sm:$0xff]  }
  0x70   :  { %3348 = vmatpush3.bf16.msra.mxu0 %v3674_v15  ;;  %v675_v15 = vrot.slane %v647_v8, %v3969_v41  ;;  %v3779_v8 = vld [vmem:[%s4703_s1 + $0x6e8] sm:$0xff]  }
  0x71   :  { %3349 = vmatprep.subr.bf16.mxu0 %v3676_v17  ;;  %v3728_v17 = vld [vmem:[%s4703_s1 + $0x580] sm:$0xff]  }
  0x72   :  { %3370 = vmatpush3.bf16.msra.mxu1 %v3675_v16  ;;  %v3727_v16 = vld [vmem:[%s4703_s1 + $0x500] sm:$0xff]  }
  0x73   :  { %3371 = vmatprep.subr.bf16.mxu1 %v3677_v18  ;;  %v676_v18 = vcombine.high %v654_v12, %v654_v12 }
  0x74   :  { %3350 = vmatpush3.bf16.msra.mxu0 %v3678_v19  ;;  %v3729_v19 = vld [vmem:[%s4703_s1 + $0x548] sm:$0xff]  }
  0x75   :  { %3351 = vmatprep.subr.bf16.mxu0 %v3680_v21  ;;  %v679_v21 = vcombine.high %v675_v15, %v675_v15 }
  0x76   :  { %3372 = vmatpush3.bf16.msra.mxu1 %v3679_v20  ;;  %v3730_v20 = vld [vmem:[%s4703_s1 + $0x5c8] sm:$0xff]  }
  0x77   :  { %3373 = vmatprep.subr.bf16.mxu1 %v3681_v22  ;;  %v3731_v22 = vld [vmem:[%s4703_s1 + $0x508] sm:$0xff]  }
  0x78   :  { %3352 = vmatpush3.bf16.msra.mxu0 %v3682_v23  ;;  %v3732_v23 = vld [vmem:[%s4703_s1 + $0x588] sm:$0xff]  }
  0x79   :  { %3353 = vmatprep.subr.bf16.mxu0 %v3684_v25  ;;  %v3734_v25 = vld [vmem:[%s4703_s1 + $0x5d0] sm:$0xff]  }
  0x7a   :  { %3374 = vmatpush3.bf16.msra.mxu1 %v3683_v24  ;;  %v3733_v24 = vld [vmem:[%s4703_s1 + $0x550] sm:$0xff]  }
  0x7b   :  { %3375 = vmatprep.subr.bf16.mxu1 %v3685_v26  ;;  %v3735_v26 = vld [vmem:[%s4703_s1 + $0x510] sm:$0xff]  }
  0x7c   :  { %3354 = vmatpush3.bf16.msra.mxu0 %v3686_v27  ;;  %v3736_v27 = vld [vmem:[%s4703_s1 + $0x590] sm:$0xff]  }
  0x7d   :  { %3355 = vmatprep.subr.bf16.mxu0 %v3688_v29  ;;  %v3738_v29 = vld [vmem:[%s4703_s1 + $0x5d8] sm:$0xff]  }
  0x7e   :  { %3376 = vmatpush3.bf16.msra.mxu1 %v3687_v28  ;;  %v3737_v28 = vld [vmem:[%s4703_s1 + $0x558] sm:$0xff]  }
  0x7f   :  { %3377 = vmatprep.subr.bf16.mxu1 %v3689_v30  ;;  %v3739_v30 = vld [vmem:[%s4703_s1 + $0x518] sm:$0xff]  }
  0x80   :  { %3356 = vmatpush3.bf16.msra.mxu0 %v3690_v31  ;;  %v3740_v31 = vld [vmem:[%s4703_s1 + $0x598] sm:$0xff]  }
  0x81   :  { %3385 = vmatprep.subr.bf16.mxu0 %v3693_v34  ;;  %v3743_v34 = vld [vmem:[%s4703_s1 + $0x520] sm:$0xff]  }
  0x82   :  { %3378 = vmatpush3.bf16.msra.mxu1 %v3691_v32  ;;  %v3741_v32 = vld [vmem:[%s4703_s1 + $0x560] sm:$0xff]  }
  0x83   :  { %2570 = vmatmul.mubr.bf16.vlgmr.msra.gmra.mrb[12].mxu0 %v612_v33  ;;  %3407 = vmatprep.subr.bf16.mxu1 %v3694_v35  ;;  %v3742_v33 = vld [vmem:[%s4703_s1 + $0x5e0] sm:$0xff]  }
  0x84   :  { %3386 = vmatpush3.bf16.msra.mxu0 %v3695_v36  ;;  %2649 = vmatprep.mubr.bf16.mxu0 %v668_v7  ;;  %v3744_v35 = vld [vmem:[%s4703_s1 + $0x5a0] sm:$0xff]   ;;  %v3745_v36 = vld [vmem:[%s4703_s1 + $0x568] sm:$0xff]  }
  0x85   :  { %2610 = vmatmul.mubr.bf16.vlgmr.msra.gmra.mrb[12].mxu1 %v628_v38  ;;  %3387 = vmatprep.subr.bf16.mxu0 %v3697_v39  ;;  %v3747_v38 = vld [vmem:[%s4703_s1 + $0x528] sm:$0xff]  }
  0x86   :  { %3408 = vmatpush3.bf16.msra.mxu1 %v3696_v37  ;;  %2689 = vmatprep.mubr.bf16.mxu1 %v678_v11  ;;  %v3746_v37 = vld [vmem:[%s4703_s1 + $0x5e8] sm:$0xff]   ;;  %v3782_v11 = vld [vmem:[%s4703_s1 + $0x670] sm:$0xff]  }
  0x87   :  { %3409 = vmatprep.subr.bf16.mxu1 %v3698_v40  ;;  %v3748_v39 = vld [vmem:[%s4703_s1 + $0x5a8] sm:$0xff]   ;;  %v3749_v40 = vld [vmem:[%s4703_s1 + $0x570] sm:$0xff]  }
  0x88   :  { %3388 = vmatpush3.bf16.msra.mxu0 %v3699_v42  ;;  %v3750_v42 = vld [vmem:[%s4703_s1 + $0x5f0] sm:$0xff]   ;;  %v3778_v7 = vld [vmem:[%s4703_s1 + $0x668] sm:$0xff]  }
  0x89   :  { %3389 = vmatprep.subr.bf16.mxu0 %v3701_v44  ;;  %v3752_v44 = vld [vmem:[%s4703_s1 + $0x5b0] sm:$0xff]  }
  0x8a   :  { %3410 = vmatpush3.bf16.msra.mxu1 %v3700_v43  ;;  %v3751_v43 = vld [vmem:[%s4703_s1 + $0x530] sm:$0xff]  }
  0x8b   :  { %3411 = vmatprep.subr.bf16.mxu1 %v3702_v45  ;;  %v3753_v45 = vld [vmem:[%s4703_s1 + $0x578] sm:$0xff]  }
  0x8c   :  { %3390 = vmatpush3.bf16.msra.mxu0 %v3703_v46  ;;  %v3754_v46 = vld [vmem:[%s4703_s1 + $0x5f8] sm:$0xff]  }
  0x8d   :  { %3391 = vmatprep.subr.bf16.mxu0 %v3705_v48  ;;  %v3756_v48 = vld [vmem:[%s4703_s1 + $0x5b8] sm:$0xff]  }
  0x8e   :  { %3412 = vmatpush3.bf16.msra.mxu1 %v3704_v47  ;;  %v3755_v47 = vld [vmem:[%s4703_s1 + $0x538] sm:$0xff]  }
  0x8f   :  { %3413 = vmatprep.subr.bf16.mxu1 %v3706_v49  ;;  %v661_v49 = vrot.slane %v4367_v4, %v3969_v41  ;;  %v3775_v4 = vld [vmem:[%s4703_s1 + $0x6e0] sm:$0xff]  }
  0x90   :  { %3392 = vmatpush3.bf16.msra.mxu0 %v3707_v50  ;;  %v3758_v50 = vld [vmem:[%s4703_s1 + $0x640] sm:$0xff]  }
  0x91   :  { %3393 = vmatprep.subr.bf16.mxu0 %v3709_v52  ;;  %v3760_v52 = vld [vmem:[%s4703_s1 + $0x600] sm:$0xff]  }
  0x92   :  { %3414 = vmatpush3.bf16.msra.mxu1 %v3708_v51  ;;  %v3759_v51 = vld [vmem:[%s4703_s1 + $0x6c0] sm:$0xff]  }
  0x93   :  { %3415 = vmatprep.subr.bf16.mxu1 %v3710_v53  ;;  %v3761_v53 = vld [vmem:[%s4703_s1 + $0x680] sm:$0xff]  }
  0x94   :  { %3394 = vmatpush3.bf16.msra.mxu0 %v3711_v54  ;;  %v677_v54 = vcombine.high %v661_v49, %v661_v49 }
  0x95   :  { %3395 = vmatprep.subr.bf16.mxu0 %v3713_v56  ;;  %v3763_v56 = vld [vmem:[%s4703_s1 + $0x6c8] sm:$0xff]  }
  0x96   :  { %3416 = vmatpush3.bf16.msra.mxu1 %v3712_v55  ;;  %v3762_v55 = vld [vmem:[%s4703_s1 + $0x648] sm:$0xff]  }
  0x97   :  { %3417 = vmatprep.subr.bf16.mxu1 %v3714_v57  ;;  %v3764_v57 = vld [vmem:[%s4703_s1 + $0x608] sm:$0xff]  }
  0x98   :  { %3396 = vmatpush3.bf16.msra.mxu0 %v3715_v58  ;;  %v3765_v58 = vld [vmem:[%s4703_s1 + $0x688] sm:$0xff]  }
  0x99   :  { %3397 = vmatprep.subr.bf16.mxu0 %v3717_v60  ;;  %v3767_v60 = vld [vmem:[%s4703_s1 + $0x6d0] sm:$0xff]  }
  0x9a   :  { %3418 = vmatpush3.bf16.msra.mxu1 %v3716_v59  ;;  %v3766_v59 = vld [vmem:[%s4703_s1 + $0x650] sm:$0xff]  }
  0x9b   :  { %3419 = vmatprep.subr.bf16.mxu1 %v3718_v62  ;;  %v3769_v62 = vld [vmem:[%s4703_s1 + $0x690] sm:$0xff]  }
  0x9c   :  { %3398 = vmatpush3.bf16.msra.mxu0 %v3719_v1  ;;  %v3772_v1 = vld [vmem:[%s4703_s1 + $0x618] sm:$0xff]  }
  0x9d   :  { %3399 = vmatprep.subr.bf16.mxu0 %v3721_v5  ;;  %v3776_v5 = vld [vmem:[%s4703_s1 + $0x620] sm:$0xff]  }
  0x9e   :  { %3420 = vmatpush3.bf16.msra.mxu1 %v3720_v2  ;;  %v3773_v2 = vld [vmem:[%s4703_s1 + $0x698] sm:$0xff]  }
  0x9f   :  { %3421 = vmatprep.subr.bf16.mxu1 %v3722_v6  ;;  %v3777_v6 = vld [vmem:[%s4703_s1 + $0x6a0] sm:$0xff]  }
  0xa0   :  { %3400 = vmatpush3.bf16.msra.mxu0 %v3723_v9  ;;  %v3780_v9 = vld [vmem:[%s4703_s1 + $0x628] sm:$0xff]  }
  0xa1   :  { %3429 = vmatprep.subr.bf16.mxu0 %v3725_v13  ;;  %v3783_v13 = vld [vmem:[%s4703_s1 + $0x6f0] sm:$0xff]  }
  0xa2   :  { %3422 = vmatpush3.bf16.msra.mxu1 %v3724_v10  ;;  %v3781_v10 = vld [vmem:[%s4703_s1 + $0x6a8] sm:$0xff]  }
  0xa3   :  { %2650 = vmatmul.mubr.bf16.vlgmr.msra.gmra.mrb[16].mxu0 %v654_v12  ;;  %3451 = vmatprep.subr.bf16.mxu1 %v3726_v14  ;;  %v16_v12 = vld [vmem:[%s4702_s0 + $0x18] sm:$0xff] }
  0xa4   :  { %3430 = vmatpush3.bf16.msra.mxu0 %v3727_v16  ;;  %2729 = vmatprep.mubr.bf16.mxu0 %v675_v15  ;;  %v687_v14 = vrot.slane %v16_v12, %v3969_v41  ;;  %v680_v15 = vcombine.high %v16_v12, %v16_v12  ;;  %v3784_v16 = vld [vmem:[%s4703_s1 + $0x630] sm:$0xff]  }
  0xa5   :  { %2690 = vmatmul.mubr.bf16.vlgmr.msra.gmra.mrb[16].mxu1 %v676_v18  ;;  %3431 = vmatprep.subr.bf16.mxu0 %v3729_v19 }
  0xa6   :  { %3452 = vmatpush3.bf16.msra.mxu1 %v3728_v17  ;;  %2769 = vmatprep.mubr.bf16.mxu1 %v679_v21  ;;  %v3786_v17 = vld [vmem:[%s4703_s1 + $0x678] sm:$0xff]   ;;  %v695_v18 = vcombine.high %v687_v14, %v687_v14  ;;  %v4573_v19 = vrot.slane %v680_v15, %v3969_v41 }
  0xa7   :  { %3453 = vmatprep.subr.bf16.mxu1 %v3730_v20  ;;  %v3785_v20 = vld [vmem:[%s4703_s1 + $0x6b0] sm:$0xff]   ;;  %v3787_v21 = vld [vmem:[%s4703_s1 + $0x6f8] sm:$0xff]  }
  0xa8   :  { %3432 = vmatpush3.bf16.msra.mxu0 %v3731_v22  ;;  %v717_v22 = vrot.slane %v695_v18, %v3969_v41 }
  0xa9   :  { %3433 = vmatprep.subr.bf16.mxu0 %v3733_v24  ;;  %v3788_v24 = vld [vmem:[%s4703_s1 + $0x638] sm:$0xff]  }
  0xaa   :  { %3454 = vmatpush3.bf16.msra.mxu1 %v3732_v23  ;;  %v696_v23 = vcombine.high %v4573_v19, %v4573_v19 }
  0xab   :  { %3455 = vmatprep.subr.bf16.mxu1 %v3734_v25  ;;  %v727_v25 = vcombine.high %v717_v22, %v717_v22 }
  0xac   :  { %3434 = vmatpush3.bf16.msra.mxu0 %v3735_v26  ;;  %v703_v26 = vrot.slane %v687_v14, %v3969_v41 }
  0xad   :  { %3435 = vmatprep.subr.bf16.mxu0 %v3737_v28  ;;  %v3789_v28 = vld [vmem:[%s4703_s1 + $0x6b8] sm:$0xff]  }
  0xae   :  { %3456 = vmatpush3.bf16.msra.mxu1 %v3736_v27  ;;  %v3790_v27 = vld [vmem:[%s4703_s1 + $0x740] sm:$0xff]  }
  0xaf   :  { %3457 = vmatprep.subr.bf16.mxu1 %v3738_v29  ;;  %v724_v29 = vrot.slane %v696_v23, %v3969_v41 }
  0xb0   :  { %3436 = vmatpush3.bf16.msra.mxu0 %v3739_v30  ;;  %v3791_v30 = vld [vmem:[%s4703_s1 + $0x7c0] sm:$0xff]  }
  0xb1   :  { %3437 = vmatprep.subr.bf16.mxu0 %v3741_v32  ;;  %v725_v32 = vcombine.high %v703_v26, %v703_v26 }
  0xb2   :  { %3458 = vmatpush3.bf16.msra.mxu1 %v3740_v31  ;;  %v3792_v31 = vld [vmem:[%s4703_s1 + $0x700] sm:$0xff]  }
  0xb3   :  { %3459 = vmatprep.subr.bf16.mxu1 %v3742_v33  ;;  %v3794_v33 = vld [vmem:[%s4703_s1 + $0x748] sm:$0xff]  }
  0xb4   :  { %3438 = vmatpush3.bf16.msra.mxu0 %v3743_v34  ;;  %v3793_v34 = vld [vmem:[%s4703_s1 + $0x780] sm:$0xff]  }
  0xb5   :  { %3439 = vmatprep.subr.bf16.mxu0 %v3745_v36  ;;  %v3795_v36 = vld [vmem:[%s4703_s1 + $0x7c8] sm:$0xff]  }
  0xb6   :  { %3460 = vmatpush3.bf16.msra.mxu1 %v3744_v35  ;;  %v728_v35 = vcombine.high %v724_v29, %v724_v29 }
  0xb7   :  { %3461 = vmatprep.subr.bf16.mxu1 %v3746_v37  ;;  %v3796_v37 = vld [vmem:[%s4703_s1 + $0x708] sm:$0xff]  }
  0xb8   :  { %3440 = vmatpush3.bf16.msra.mxu0 %v3747_v38  ;;  %v3798_v38 = vld [vmem:[%s4703_s1 + $0x750] sm:$0xff]  }
  0xb9   :  { %3441 = vmatprep.subr.bf16.mxu0 %v3749_v40  ;;  %v3799_v40 = vld [vmem:[%s4703_s1 + $0x7d0] sm:$0xff]  }
  0xba   :  { %3462 = vmatpush3.bf16.msra.mxu1 %v3748_v39  ;;  %v3797_v39 = vld [vmem:[%s4703_s1 + $0x788] sm:$0xff]  }
  0xbb   :  { %3463 = vmatprep.subr.bf16.mxu1 %v3750_v42  ;;  %v3800_v42 = vld [vmem:[%s4703_s1 + $0x710] sm:$0xff]  }
  0xbc   :  { %3442 = vmatpush3.bf16.msra.mxu0 %v3751_v43  ;;  %v3802_v43 = vld [vmem:[%s4703_s1 + $0x758] sm:$0xff]  }
  0xbd   :  { %3443 = vmatprep.subr.bf16.mxu0 %v3753_v45  ;;  %v3803_v45 = vld [vmem:[%s4703_s1 + $0x7d8] sm:$0xff]  }
  0xbe   :  { %3464 = vmatpush3.bf16.msra.mxu1 %v3752_v44  ;;  %v3801_v44 = vld [vmem:[%s4703_s1 + $0x790] sm:$0xff]  }
  0xbf   :  { %3465 = vmatprep.subr.bf16.mxu1 %v3754_v46  ;;  %v3804_v46 = vld [vmem:[%s4703_s1 + $0x718] sm:$0xff]  }
  0xc0   :  { %3444 = vmatpush3.bf16.msra.mxu0 %v3755_v47  ;;  %v3806_v47 = vld [vmem:[%s4703_s1 + $0x760] sm:$0xff]  }
  0xc1   :  { %3473 = vmatprep.subr.bf16.mxu0 %v3758_v50  ;;  %v3808_v50 = vld [vmem:[%s4703_s1 + $0x720] sm:$0xff]  }
  0xc2   :  { %3466 = vmatpush3.bf16.msra.mxu1 %v3756_v48  ;;  %v3805_v48 = vld [vmem:[%s4703_s1 + $0x798] sm:$0xff]  }
  0xc3   :  { %2730 = vmatmul.mubr.bf16.vlgmr.msra.gmra.mrb[20].mxu0 %v661_v49  ;;  %3495 = vmatprep.subr.bf16.mxu1 %v3759_v51  ;;  %v3807_v49 = vld [vmem:[%s4703_s1 + $0x7e0] sm:$0xff]   ;;  %v3810_v51 = vld [vmem:[%s4703_s1 + $0x768] sm:$0xff]  }
  0xc4   :  { %3474 = vmatpush3.bf16.msra.mxu0 %v3760_v52  ;;  %2809 = vmatprep.mubr.bf16.mxu0 %v717_v22  ;;  %v3809_v52 = vld [vmem:[%s4703_s1 + $0x7a0] sm:$0xff]  }
  0xc5   :  { %2770 = vmatmul.mubr.bf16.vlgmr.msra.gmra.mrb[20].mxu1 %v677_v54  ;;  %3475 = vmatprep.subr.bf16.mxu0 %v3762_v55  ;;  %v3812_v54 = vld [vmem:[%s4703_s1 + $0x728] sm:$0xff]   ;;  %v3814_v55 = vld [vmem:[%s4703_s1 + $0x770] sm:$0xff]  }
  0xc6   :  { %3496 = vmatpush3.bf16.msra.mxu1 %v3761_v53  ;;  %2849 = vmatprep.mubr.bf16.mxu1 %v727_v25  ;;  %v3811_v53 = vld [vmem:[%s4703_s1 + $0x7e8] sm:$0xff]  }
  0xc7   :  { %3497 = vmatprep.subr.bf16.mxu1 %v3763_v56 }
  0xc8   :  { %3476 = vmatpush3.bf16.msra.mxu0 %v3764_v57  ;;  %v3813_v57 = vld [vmem:[%s4703_s1 + $0x7a8] sm:$0xff]  }
  0xc9   :  { %3477 = vmatprep.subr.bf16.mxu0 %v3766_v59 }
  0xca   :  { %3498 = vmatpush3.bf16.msra.mxu1 %v3765_v58 }
  0xcb   :  { %3499 = vmatprep.subr.bf16.mxu1 %v3767_v60 }
  0xcc   :  { %3478 = vmatpush3.bf16.msra.mxu0 %v3768_v61 }
  0xcd   :  { %3479 = vmatprep.subr.bf16.mxu0 %v3770_v63 }
  0xce   :  { %3500 = vmatpush3.bf16.msra.mxu1 %v3769_v62 }
  0xcf   :  { %3501 = vmatprep.subr.bf16.mxu1 %v3771_v0 }
  0xd0   :  { %3480 = vmatpush3.bf16.msra.mxu0 %v3772_v1 }
  0xd1   :  { %3481 = vmatprep.subr.bf16.mxu0 %v3774_v3 }
  0xd2   :  { %3502 = vmatpush3.bf16.msra.mxu1 %v3773_v2 }
  0xd3   :  { %3503 = vmatprep.subr.bf16.mxu1 %v3775_v4 }
  0xd4   :  { %3482 = vmatpush3.bf16.msra.mxu0 %v3776_v5 }
  0xd5   :  { %3483 = vmatprep.subr.bf16.mxu0 %v3778_v7 }
  0xd6   :  { %3504 = vmatpush3.bf16.msra.mxu1 %v3777_v6 }
  0xd7   :  { %3505 = vmatprep.subr.bf16.mxu1 %v3779_v8 }
  0xd8   :  { %3484 = vmatpush3.bf16.msra.mxu0 %v3780_v9 }
  0xd9   :  { %3485 = vmatprep.subr.bf16.mxu0 %v3782_v11 }
  0xda   :  { %3506 = vmatpush3.bf16.msra.mxu1 %v3781_v10 }
  0xdb   :  { %3507 = vmatprep.subr.bf16.mxu1 %v3783_v13 }
  0xdc   :  { %3486 = vmatpush3.bf16.msra.mxu0 %v3784_v16 }
  0xdd   :  { %3487 = vmatprep.subr.bf16.mxu0 %v3786_v17 }
  0xde   :  { %3508 = vmatpush3.bf16.msra.mxu1 %v3785_v20 }
  0xdf   :  { %3509 = vmatprep.subr.bf16.mxu1 %v3787_v21 }
  0xe0   :  { %3488 = vmatpush3.bf16.msra.mxu0 %v3788_v24 }
  0xe1   :  { %3517 = vmatprep.subr.bf16.mxu0 %v3790_v27 }
  0xe2   :  { %3510 = vmatpush3.bf16.msra.mxu1 %v3789_v28 }
  0xe3   :  { %2810 = vmatmul.mubr.bf16.vlgmr.msra.gmra.mrb[24].mxu0 %v703_v26  ;;  %3539 = vmatprep.subr.bf16.mxu1 %v3791_v30 }
  0xe4   :  { %3518 = vmatpush3.bf16.msra.mxu0 %v3792_v31  ;;  %2889 = vmatprep.mubr.bf16.mxu0 %v724_v29 }
  0xe5   :  { %2850 = vmatmul.mubr.bf16.vlgmr.msra.gmra.mrb[24].mxu1 %v725_v32  ;;  %3519 = vmatprep.subr.bf16.mxu0 %v3794_v33 }
  0xe6   :  { %3540 = vmatpush3.bf16.msra.mxu1 %v3793_v34  ;;  %2929 = vmatprep.mubr.bf16.mxu1 %v728_v35 }
  0xe7   :  { %3541 = vmatprep.subr.bf16.mxu1 %v3795_v36 }
  0xe8   :  { %3520 = vmatpush3.bf16.msra.mxu0 %v3796_v37 }
  0xe9   :  { %3521 = vmatprep.subr.bf16.mxu0 %v3798_v38 }
  0xea   :  { %3542 = vmatpush3.bf16.msra.mxu1 %v3797_v39 }
  0xeb   :  { %3543 = vmatprep.subr.bf16.mxu1 %v3799_v40 }
  0xec   :  { %3522 = vmatpush3.bf16.msra.mxu0 %v3800_v42 }
  0xed   :  { %3523 = vmatprep.subr.bf16.mxu0 %v3802_v43 }
  0xee   :  { %3544 = vmatpush3.bf16.msra.mxu1 %v3801_v44 }
  0xef   :  { %3545 = vmatprep.subr.bf16.mxu1 %v3803_v45 }
  0xf0   :  { %3524 = vmatpush3.bf16.msra.mxu0 %v3804_v46 }
  0xf1   :  { %3525 = vmatprep.subr.bf16.mxu0 %v3806_v47 }
  0xf2   :  { %3546 = vmatpush3.bf16.msra.mxu1 %v3805_v48 }
  0xf3   :  { %3547 = vmatprep.subr.bf16.mxu1 %v3807_v49 }
  0xf4   :  { %3526 = vmatpush3.bf16.msra.mxu0 %v3808_v50 }
  0xf5   :  { %3527 = vmatprep.subr.bf16.mxu0 %v3810_v51 }
  0xf6   :  { %3548 = vmatpush3.bf16.msra.mxu1 %v3809_v52  ;;  %v3225_v56 = vpop.f32.mrb[0].mxu0 }
  0xf7   :  { %7 = vsyncpa [#allocation3], 0  ;;  %v3226_v58 = vpop.f32.mrb[1].mxu0  ;;  %3549 = vmatprep.subr.bf16.mxu1 %v3811_v53  ;;  %v3815_v59 = vld [vmem:[%s4703_s1 + $0x7f0] sm:$0xff]   ;;  %v3247_v60 = vpop.f32.mrb[0].mxu1  ;;  %v3818_v2 = vld [vmem:[%s4703_s1 + $0x778] sm:$0xff]   ;;  %v710_v10 = vrot.slane %v4573_v19, %v3969_v41 }
  0xf8   :  { %v3227_v61 = vadd.f32 %v3226_v58, %v3225_v56  ;;  %v3228_v62 = vpop.f32.mrb[2].mxu0  ;;  %3528 = vmatpush3.bf16.msra.mxu0 %v3812_v54  ;;  %v3816_v63 = vld [vmem:[%s4703_s1 + $0x730] sm:$0xff]   ;;  %v3248_v0 = vpop.f32.mrb[1].mxu1  ;;  %v3819_v7 = vld [vmem:[%s4703_s1 + $0x7f8] sm:$0xff]   ;;  %vm2937_vm0 = vcmask 74752  }
  0xf9   :  { %v3229_v1 = vpop.f32.mrb[3].mxu0  ;;  %3529 = vmatprep.subr.bf16.mxu0 %v3814_v55  ;;  %v3249_v3 = vadd.f32 %v3248_v0, %v3247_v60  ;;  %v3250_v4 = vpop.f32.mrb[2].mxu1  ;;  %v3817_v5 = vld [vmem:[%s4703_s1 + $0x7b0] sm:$0xff]   ;;  %v3820_v9 = vld [vmem:[%s4703_s1 + $0x738] sm:$0xff]   ;;  %v726_v12 = vcombine.high %v710_v10, %v710_v10 }
  0xfa   :  { %3550 = vmatpush3.bf16.msra.mxu1 %v3813_v57  ;;  %v3251_v6 = vpop.f32.mrb[3].mxu1  ;;  %v3821_v11 = vld [vmem:[%s4703_s1 + $0x7b8] sm:$0xff]   ;;  %s3848_s1 = smov [#allocation2]  }
  0xfb   :  { %3551 = vmatprep.subr.bf16.mxu1 %v3815_v59  ;;  %v2372_v8 = vadd.f32 %v3249_v3, %v3227_v61  ;;  %s2945_s22 = sshll.u32 %s3848_s1, 4  ;;  %s2946_s22 = int_to_ptr.vmem [resolvable:$true] %s2945_s22 }
  0xfc   :  { %3530 = vmatpush3.bf16.msra.mxu0 %v3816_v63  ;;  %s3823_s23 = scalar_lea.vmem %s2946_s22, 32  ;;  %p3828_p1 = scmp.lt.s32.totalorder %s2946_s22, %s2946_s22 }
  0xfd   :  { %3531 = vmatprep.subr.bf16.mxu0 %v3818_v2  ;;  %p3824_p0 = scmp.ne.s32.totalorder %s2946_s22, %s3823_s23  ;;  %p3829_p2 = scmp.lt.s32.totalorder %s3823_s23, %s3823_s23 }
  0xfe   :  { %3552 = vmatpush3.bf16.msra.mxu1 %v3817_v5 }
  0xff   :  { %3553 = vmatprep.subr.bf16.mxu1 %v3819_v7  ;;  %p3830_p3 = por %p3829_p2, %p3828_p1 }
 0x100   :  { %3532 = vmatpush3.bf16.msra.mxu0 %v3820_v9 }
 0x101   :  { %p3831_p4 = pnand %p3830_p3, %p3824_p0 }
 0x102   :  { %3554 = vmatpush3.bf16.msra.mxu1 %v3821_v11 }
 0x103   :  { %2890 = vmatmul.mubr.bf16.vlgmr.msra.gmra.mrb[28].mxu0 %v710_v10 }
 0x105   :  { %2930 = vmatmul.mubr.bf16.vlgmr.msra.gmra.mrb[28].mxu1 %v726_v12 }
 0x116   :  { %v3269_v13 = vpop.f32.mrb[4].mxu0 }
 0x117   :  { %v3270_v14 = vpop.f32.mrb[5].mxu0  ;;  %v3291_v15 = vpop.f32.mrb[4].mxu1 }
 0x118   :  { %v3271_v16 = vadd.f32 %v3270_v14, %v3269_v13  ;;  %v3272_v17 = vpop.f32.mrb[6].mxu0  ;;  %v3292_v18 = vpop.f32.mrb[5].mxu1 }
 0x119   :  { %v3273_v20 = vpop.f32.mrb[7].mxu0  ;;  %v3293_v41 = vadd.f32 %v3292_v18, %v3291_v15  ;;  %v3294_v19 = vpop.f32.mrb[6].mxu1 }
 0x11a   :  { %v2412_v21 = vadd.f32 %v3271_v16, %v2372_v8  ;;  %v3295_v22 = vpop.f32.mrb[7].mxu1 }
 0x11c   :  { %v2452_v23 = vadd.f32 %v3293_v41, %v2412_v21 }
 0x136   :  { %v3313_v24 = vpop.f32.mrb[8].mxu0 }
 0x137   :  { %v3314_v25 = vpop.f32.mrb[9].mxu0 }
 0x138   :  { %v3335_v26 = vpop.f32.mrb[8].mxu1  ;;  %v3315_v27 = vadd.f32 %v3314_v25, %v3313_v24  ;;  %v3316_v28 = vpop.f32.mrb[10].mxu0 }
 0x139   :  { %v3336_v29 = vpop.f32.mrb[9].mxu1  ;;  %v3317_v30 = vpop.f32.mrb[11].mxu0 }
 0x13a   :  { %v2492_v31 = vadd.f32 %v3315_v27, %v2452_v23  ;;  %v3337_v32 = vadd.f32 %v3336_v29, %v3335_v26  ;;  %v3338_v33 = vpop.f32.mrb[10].mxu1 }
 0x13b   :  { %v3339_v34 = vpop.f32.mrb[11].mxu1 }
 0x13c   :  { %v2532_v35 = vadd.f32 %v3337_v32, %v2492_v31 }
 0x156   :  { %v3357_v36 = vpop.f32.mrb[12].mxu0 }
 0x157   :  { %v3358_v37 = vpop.f32.mrb[13].mxu0 }
 0x158   :  { %v3379_v38 = vpop.f32.mrb[12].mxu1  ;;  %v3359_v39 = vadd.f32 %v3358_v37, %v3357_v36  ;;  %v3360_v40 = vpop.f32.mrb[14].mxu0 }
 0x159   :  { %v3380_v42 = vpop.f32.mrb[13].mxu1  ;;  %v3361_v43 = vpop.f32.mrb[15].mxu0 }
 0x15a   :  { %v2572_v44 = vadd.f32 %v3359_v39, %v2532_v35  ;;  %v3381_v45 = vadd.f32 %v3380_v42, %v3379_v38  ;;  %v3382_v46 = vpop.f32.mrb[14].mxu1 }
 0x15b   :  { %v3383_v47 = vpop.f32.mrb[15].mxu1 }
 0x15c   :  { %v2612_v48 = vadd.f32 %v3381_v45, %v2572_v44 }
 0x176   :  { %v3401_v49 = vpop.f32.mrb[16].mxu0 }
 0x177   :  { %v3402_v50 = vpop.f32.mrb[17].mxu0 }
 0x178   :  { %v3423_v51 = vpop.f32.mrb[16].mxu1  ;;  %v3403_v52 = vadd.f32 %v3402_v50, %v3401_v49  ;;  %v3404_v53 = vpop.f32.mrb[18].mxu0 }
 0x179   :  { %v3424_v54 = vpop.f32.mrb[17].mxu1  ;;  %v3405_v55 = vpop.f32.mrb[19].mxu0 }
 0x17a   :  { %v2652_v56 = vadd.f32 %v3403_v52, %v2612_v48  ;;  %v3425_v57 = vadd.f32 %v3424_v54, %v3423_v51  ;;  %v3426_v58 = vpop.f32.mrb[18].mxu1 }
 0x17b   :  { %v3427_v59 = vpop.f32.mrb[19].mxu1 }
 0x17c   :  { %v2692_v60 = vadd.f32 %v3425_v57, %v2652_v56 }
 0x196   :  { %v3445_v61 = vpop.f32.mrb[20].mxu0 }
 0x197   :  { %v3446_v62 = vpop.f32.mrb[21].mxu0 }
 0x198   :  { %v3467_v63 = vpop.f32.mrb[20].mxu1  ;;  %v3447_v0 = vadd.f32 %v3446_v62, %v3445_v61  ;;  %v3448_v1 = vpop.f32.mrb[22].mxu0 }
 0x199   :  { %v3468_v2 = vpop.f32.mrb[21].mxu1  ;;  %v3449_v3 = vpop.f32.mrb[23].mxu0 }
 0x19a   :  { %v2732_v4 = vadd.f32 %v3447_v0, %v2692_v60  ;;  %v3469_v5 = vadd.f32 %v3468_v2, %v3467_v63  ;;  %v3470_v6 = vpop.f32.mrb[22].mxu1 }
 0x19b   :  { %v3471_v7 = vpop.f32.mrb[23].mxu1 }
 0x19c   :  { %v2772_v8 = vadd.f32 %v3469_v5, %v2732_v4 }
 0x1b6   :  { %v3489_v9 = vpop.f32.mrb[24].mxu0 }
 0x1b7   :  { %v3490_v10 = vpop.f32.mrb[25].mxu0 }
 0x1b8   :  { %v3511_v11 = vpop.f32.mrb[24].mxu1  ;;  %v3491_v12 = vadd.f32 %v3490_v10, %v3489_v9  ;;  %v3492_v13 = vpop.f32.mrb[26].mxu0 }
 0x1b9   :  { %v3512_v14 = vpop.f32.mrb[25].mxu1  ;;  %v3493_v15 = vpop.f32.mrb[27].mxu0 }
 0x1ba   :  { %v2812_v16 = vadd.f32 %v3491_v12, %v2772_v8  ;;  %v3513_v17 = vadd.f32 %v3512_v14, %v3511_v11  ;;  %v3514_v18 = vpop.f32.mrb[26].mxu1 }
 0x1bb   :  { %v3515_v20 = vpop.f32.mrb[27].mxu1 }
 0x1bc   :  { %v2852_v21 = vadd.f32 %v3513_v17, %v2812_v16 }
 0x1d6   :  { %v3533_v41 = vpop.f32.mrb[28].mxu0 }
 0x1d7   :  { %v3534_v19 = vpop.f32.mrb[29].mxu0 }
 0x1d8   :  { %v3555_v22 = vpop.f32.mrb[28].mxu1  ;;  %v3535_v23 = vadd.f32 %v3534_v19, %v3533_v41  ;;  %v3536_v24 = vpop.f32.mrb[30].mxu0 }
 0x1d9   :  { %v3556_v25 = vpop.f32.mrb[29].mxu1  ;;  %v3537_v26 = vpop.f32.mrb[31].mxu0 }
 0x1da   :  { %v2892_v27 = vadd.f32 %v3535_v23, %v2852_v21  ;;  %v3557_v28 = vadd.f32 %v3556_v25, %v3555_v22  ;;  %v3558_v29 = vpop.f32.mrb[30].mxu1 }
 0x1db   :  { %v3559_v30 = vpop.f32.mrb[31].mxu1 }
 0x1dc   :  { %v2932_v31 = vadd.f32 %v3557_v28, %v2892_v27 }
 0x1de   :  { %2938 = vst.msk [vmem:[#allocation2] sm:$0x3] %vm2937_vm0, %v2932_v31 }
 0x1df   :  { %3834 = shalt.err (!%p3831_p4)
}
 0x1e0   :  { %s3835_s26 = scalar_lea.hbm %s4704_s2, 32 }
 0x1e1   :  { %p3836_p5 = scmp.ne.s32.totalorder %s4704_s2, %s3835_s26  ;;  %p3839_p6 = scmp.lt.u32.totalorder %s3835_s26, %s4704_s2 }
 0x1e3   :  { %p3841_p7 = pnand %p3839_p6, %p3836_p5 }
 0x1e5   :  { %3844 = shalt.err (!%p3841_p7)
}
 0x1e6   :  { %2948 = dma.vmem_to_hbm [thread:$0]  %s2946_s22, 32, %s4704_s2, [#allocation3]  }
 0x1e7   :  { %3845 = dma.done.wait [#allocation3], 32  }
 0x1e8   :  { %3846 = vsyncadd [#allocation3], 4294967264 }
 0x1e9   :  { %2952 = vsyncpa [#allocation3], 1 }

// kernel: simple_cnn_forward.2
= control target key start
LH: loop header
LB: loop body
LE: loop exit
PB: predicated region body
PF: predicated region fallthrough
CT: control target
= control target key end

     0   :  { %s9478_s18 = smov 0   ;;  %s13756_s0 = inlined_call_operand.vmem [shape: bf16[2,1024,27], index: 0, kind: input, shape index: {}]   ;;  %s13757_s1 = inlined_call_operand.vmem [shape: bf16[27,32], index: 1, kind: input, shape index: {}]   ;;  %s13758_s2 = inlined_call_operand.vmem [shape: f32[1,32], index: 2, kind: input, shape index: {}]   ;;  %s13759_s3 = inlined_call_operand.vmem [shape: bf16[288,64], index: 3, kind: input, shape index: {}]   ;;  %s13760_s4 = inlined_call_operand.vmem [shape: f32[1,64], index: 4, kind: input, shape index: {}]   ;;  %s13761_s5 = inlined_call_operand.vmem [shape: bf16[2,8,8,64], index: 5, kind: output, shape index: {}]  }
   0x1 LB: > { %s8622_s19 = sadd.s32 4294967295, %s9440_s18   ;;  %p8626_p0 = scmp.ge.s32.totalorder %s9440_s18, 1  ;;  %s9440_s18 = sphi %s9478_s18, %s15_s18  }
   0x2   : > { %p187_p1 = scmp.lt.s32.totalorder %s9440_s18, 3 }
   0x4   : > { %p188_p2 = pnand %p8626_p0, %p187_p1 }
   0x6   : > { %191 = sbr.rel (%p188_p2) target bundleno = 1722 (0x6ba), region = 40 }
   0xd   : > { %v9343_v0 = vld [vmem:[%s13757_s1] sm:$0xff]   ;;  %vm889_vm0 = vcmask 1044480   ;;  %v9344_v1 = vld [vmem:[%s13757_s1 + $0x8] sm:$0x3f]   ;;  %vm890_vm1 = vcmask 1045504   ;;  %p215_p3 = scmp.lt.s32.totalorder %s8622_s19, 1 }
   0xe   : > { %9157 = vmatprep.subr.bf16.mxu0 %v9343_v0  ;;  %9325 = vmatprep.subr.bf16.mxu1 %v9343_v0  ;;  %v9442_v2 = vmov 65535   ;;  %vm696_vm2 = vcmask 220160   ;;  %vm1569_vm3 = vcmask 261120   ;;  %vm3170_vm4 = vcmask 254976   ;;  %s9445_s7 = smov 64   ;;  %s9446_s8 = smov 32  }
   0xf   : > { %9158 = vmatpush3.bf16.msra.mxu0 %v9343_v0  ;;  %9327 = vmatpush3.bf16.msra.mxu1 %v9343_v0  ;;  %v891_v3 = vsel %vm889_vm0, 4294967295, %v9442_v2  ;;  %s14345_s19 = smov (!%p215_p3, %s8622_s19), 1  ;;  %vm5731_vm5 = vcmask 1042434   ;;  %vm5743_vm6 = vcmask 1041409   ;;  %vm5733_vm7 = vcmask 1043459   ;;  %s9447_s9 = smov 96  }
  0x10   : > { %v892_v4 = vsel %vm890_vm1, %v891_v3, 0  ;;  %s8879_s24 = sshll.u32 %s14345_s19, 9  ;;  %vm5735_vm8 = vcmask 1044484   ;;  %vm5737_vm9 = vcmask 1045509   ;;  %vm5739_vm10 = vcmask 1046534  }
  0x11   : > { %v894_v5 = vand.u32 %v9344_v1, %v892_v4  ;;  %s9498_s27 = scalar_lea.vmem %s13756_s0, %s8879_s24  ;;  %vm5741_vm11 = vcmask 1047559   ;;  %vm6010_vm12 = vcmask 1040384   ;;  %vm6011_vm13 = vsmask.f32 256 }
  0x12   : > { %v9345_v6 = vld [vmem:[%s9498_s27] sm:$0xff]   ;;  %v9347_v8 = vld [vmem:[%s9498_s27 + $0x8] sm:$0xff]   ;;  %v9349_v10 = vld [vmem:[%s9498_s27 + $0x10] sm:$0xff]   ;;  %vm6265_vm15 = vcmask 1046528   ;;  %vm6045_vm0 = vsmask.f32 7424 }
  0x13   : > { %9159 = vmatprep.subr.bf16.mxu0 %v894_v5  ;;  %9326 = vmatprep.subr.bf16.mxu1 %v894_v5  ;;  %v9346_v7 = vld [vmem:[%s9498_s27 + $0x1c0] sm:$0xff]   ;;  %v9348_v9 = vld [vmem:[%s9498_s27 + $0x1c8] sm:$0xff]   ;;  %v9350_v11 = vld [vmem:[%s9498_s27 + $0x1d0] sm:$0xff]   ;;  %vm6554_vm1 = vcmask 523264  }
  0x14   : > { %9160 = vmatpush3.bf16.msra.mxu0 %v894_v5  ;;  %9328 = vmatpush3.bf16.msra.mxu1 %v894_v5  ;;  %v9351_v12 = vld [vmem:[%s9498_s27 + $0x18] sm:$0xff]   ;;  %v9353_v14 = vld [vmem:[%s9498_s27 + $0x20] sm:$0xff]   ;;  %v9354_v15 = vld [vmem:[%s9498_s27 + $0x28] sm:$0xff]  }
  0x15   : > { %9161 = vmatprep.mubr.msk.bf16.mxu0 %vm696_vm2, %v9345_v6  ;;  %9273 = vmatprep.mubr.msk.bf16.mxu1 %vm696_vm2, %v9346_v7  ;;  %v9352_v13 = vld [vmem:[%s9498_s27 + $0x1d8] sm:$0xff]   ;;  %v9355_v16 = vld [vmem:[%s9498_s27 + $0x30] sm:$0xff]   ;;  %v9357_v18 = vld [vmem:[%s9498_s27 + $0x40] sm:$0xff]   ;;  %v9443_v7 = vmov 1983009808  }
  0x16   : > { %v9356_v17 = vld [vmem:[%s9498_s27 + $0x38] sm:$0xff]   ;;  %v9358_v19 = vld [vmem:[%s9498_s27 + $0x48] sm:$0xff]   ;;  %v9359_v20 = vld [vmem:[%s9498_s27 + $0x50] sm:$0xff]  }
  0x17   : > { %9162 = vmatmul.mubr.msk.bf16.vlgmr.msra.gmra.mrb[0].mxu0 %vm696_vm2, %v9347_v8  ;;  %9274 = vmatmul.mubr.msk.bf16.vlgmr.msra.gmra.mrb[0].mxu1 %vm696_vm2, %v9348_v9  ;;  %v9360_v21 = vld [vmem:[%s9498_s27 + $0x58] sm:$0xff]   ;;  %v9361_v22 = vld [vmem:[%s9498_s27 + $0x60] sm:$0xff]   ;;  %v9362_v23 = vld [vmem:[%s9498_s27 + $0x68] sm:$0xff]   ;;  %v1828_v8 = vunpack.c.l.s4 %v9443_v7  ;;  %v1830_v9 = vlaneseq }
  0x18   : > { %9165 = vmatprep.mubr.msk.bf16.mxu0 %vm696_vm2, %v9349_v10  ;;  %9277 = vmatprep.mubr.msk.bf16.mxu1 %vm696_vm2, %v9350_v11  ;;  %v9363_v24 = vld [vmem:[%s9498_s27 + $0x70] sm:$0xff]   ;;  %v9364_v25 = vld [vmem:[%s9498_s27 + $0x78] sm:$0xff]   ;;  %v9365_v26 = vld [vmem:[%s9498_s27 + $0x80] sm:$0xff]  }
  0x19   : > { %v9397_v27 = vld [vmem:[%s9498_s27 + $0x1e0] sm:$0xff]   ;;  %v9399_v28 = vld [vmem:[%s9498_s27 + $0x1e8] sm:$0xff]   ;;  %v9367_v30 = vld [vmem:[%s9498_s27 + $0x90] sm:$0xff]  }
  0x1a   : > { %v9366_v29 = vld [vmem:[%s9498_s27 + $0x88] sm:$0xff]   ;;  %v9401_v31 = vld [vmem:[%s9498_s27 + $0x1f0] sm:$0xff]   ;;  %v9403_v32 = vld [vmem:[%s9498_s27 + $0x1f8] sm:$0xff]  }
  0x1b   : > { %v9368_v33 = vld [vmem:[%s9498_s27 + $0x98] sm:$0xff]   ;;  %v9369_v34 = vld [vmem:[%s9498_s27 + $0xa0] sm:$0xff]   ;;  %v9370_v35 = vld [vmem:[%s9498_s27 + $0xa8] sm:$0xff]  }
  0x1c   : > { %v9371_v36 = vld [vmem:[%s9498_s27 + $0xb0] sm:$0xff]   ;;  %v9372_v37 = vld [vmem:[%s9498_s27 + $0xb8] sm:$0xff]   ;;  %v9373_v38 = vld [vmem:[%s9498_s27 + $0xc0] sm:$0xff]  }
  0x1d   : > { %v9374_v39 = vld [vmem:[%s9498_s27 + $0xc8] sm:$0xff]   ;;  %v9375_v40 = vld [vmem:[%s9498_s27 + $0xd0] sm:$0xff]   ;;  %v9376_v41 = vld [vmem:[%s9498_s27 + $0xd8] sm:$0xff]  }
  0x1e   : > { %v9377_v42 = vld [vmem:[%s9498_s27 + $0xe0] sm:$0xff]   ;;  %v9378_v43 = vld [vmem:[%s9498_s27 + $0xe8] sm:$0xff]   ;;  %v9379_v44 = vld [vmem:[%s9498_s27 + $0xf0] sm:$0xff]  }
  0x1f   : > { %9166 = vmatmul.mubr.msk.bf16.gmra.mrb[4].mxu0 %vm696_vm2, %v9351_v12  ;;  %9278 = vmatmul.mubr.msk.bf16.gmra.mrb[4].mxu1 %vm696_vm2, %v9352_v13  ;;  %v9380_v45 = vld [vmem:[%s9498_s27 + $0xf8] sm:$0xff]   ;;  %v9381_v46 = vld [vmem:[%s9498_s27 + $0x100] sm:$0xff]   ;;  %v9382_v47 = vld [vmem:[%s9498_s27 + $0x108] sm:$0xff]  }
  0x20   : > { %9169 = vmatprep.mubr.msk.bf16.mxu0 %vm696_vm2, %v9353_v14  ;;  %9281 = vmatprep.mubr.msk.bf16.mxu1 %vm696_vm2, %v9397_v27  ;;  %v9383_v48 = vld [vmem:[%s9498_s27 + $0x110] sm:$0xff]   ;;  %v9384_v49 = vld [vmem:[%s9498_s27 + $0x118] sm:$0xff]   ;;  %v9385_v50 = vld [vmem:[%s9498_s27 + $0x120] sm:$0xff]  }
  0x21   : > { %v9386_v51 = vld [vmem:[%s9498_s27 + $0x128] sm:$0xff]   ;;  %v9387_v52 = vld [vmem:[%s9498_s27 + $0x130] sm:$0xff]   ;;  %v9388_v53 = vld [vmem:[%s9498_s27 + $0x138] sm:$0xff]  }
  0x22   : > { %v9389_v54 = vld [vmem:[%s9498_s27 + $0x140] sm:$0xff]   ;;  %v9390_v55 = vld [vmem:[%s9498_s27 + $0x148] sm:$0xff]   ;;  %v9391_v56 = vld [vmem:[%s9498_s27 + $0x150] sm:$0xff]  }
  0x23   : > { %v9392_v57 = vld [vmem:[%s9498_s27 + $0x158] sm:$0xff]   ;;  %v9393_v58 = vld [vmem:[%s9498_s27 + $0x160] sm:$0xff]   ;;  %v9394_v59 = vld [vmem:[%s9498_s27 + $0x168] sm:$0xff]  }
  0x24   : > { %v9395_v60 = vld [vmem:[%s9498_s27 + $0x170] sm:$0xff]   ;;  %v9396_v61 = vld [vmem:[%s9498_s27 + $0x178] sm:$0xff]   ;;  %v9398_v62 = vld [vmem:[%s9498_s27 + $0x180] sm:$0xff]  }
  0x25   : > { %v9400_v63 = vld [vmem:[%s9498_s27 + $0x188] sm:$0xff]   ;;  %v9402_v0 = vld [vmem:[%s9498_s27 + $0x190] sm:$0xff]   ;;  %v9404_v1 = vld [vmem:[%s9498_s27 + $0x198] sm:$0xff]  }
  0x26   : > { %v9405_v2 = vld [vmem:[%s9498_s27 + $0x1a0] sm:$0xff]   ;;  %v9406_v3 = vld [vmem:[%s9498_s27 + $0x1a8] sm:$0xff]   ;;  %v9407_v4 = vld [vmem:[%s9498_s27 + $0x1b0] sm:$0xff]  }
  0x27   : > { %9170 = vmatmul.mubr.msk.bf16.gmra.mrb[8].mxu0 %vm696_vm2, %v9354_v15  ;;  %9282 = vmatmul.mubr.msk.bf16.gmra.mrb[8].mxu1 %vm696_vm2, %v9399_v28  ;;  %v9629_v5 = vld [vmem:[%s13758_s2] ss:$0 sm:$0xff]  ;;  %v9408_v12 = vld [vmem:[%s9498_s27 + $0x1b8] sm:$0xff]   ;;  %vm10310_vm14 = vmand %vm6010_vm12, %vm6011_vm13 }
  0x28   : > { %9173 = vmatprep.mubr.msk.bf16.mxu0 %vm696_vm2, %v9355_v16  ;;  %9285 = vmatprep.mubr.msk.bf16.mxu1 %vm696_vm2, %v9401_v31 }
  0x2f   : > { %9174 = vmatmul.mubr.msk.bf16.gmra.mrb[12].mxu0 %vm696_vm2, %v9356_v17  ;;  %9286 = vmatmul.mubr.msk.bf16.gmra.mrb[12].mxu1 %vm696_vm2, %v9403_v32 }
  0x30   : > { %9177 = vmatprep.mubr.msk.bf16.mxu0 %vm696_vm2, %v9357_v18 }
  0x37   : > { %9178 = vmatmul.mubr.msk.bf16.gmra.mrb[16].mxu0 %vm696_vm2, %v9358_v19 }
  0x38   : > { %9181 = vmatprep.mubr.msk.bf16.mxu0 %vm696_vm2, %v9359_v20 }
  0x3f   : > { %9182 = vmatmul.mubr.msk.bf16.gmra.mrb[20].mxu0 %vm696_vm2, %v9360_v21  ;;  %v1829_v21 = vunpack.c.0.s8 %v1828_v8 }
  0x40   : > { %9185 = vmatprep.mubr.msk.bf16.mxu0 %vm696_vm2, %v9361_v22  ;;  %v1831_v22 = vshrl.u32 %v1830_v9, 7 }
  0x47   : > { %9186 = vmatmul.mubr.msk.bf16.gmra.mrb[24].mxu0 %vm696_vm2, %v9362_v23 }
  0x48   : > { %9189 = vmatprep.mubr.msk.bf16.mxu0 %vm696_vm2, %v9363_v24 }
  0x4f   : > { %9190 = vmatmul.mubr.msk.bf16.gmra.mrb[28].mxu0 %vm696_vm2, %v9364_v25 }
  0x50   : > { %9193 = vmatprep.mubr.msk.bf16.mxu0 %vm696_vm2, %v9365_v26 }
  0x57   : > { %9194 = vmatmul.mubr.msk.bf16.gmra.mrb[32].mxu0 %vm696_vm2, %v9366_v29  ;;  %v9638_v29 = vsub.s32 %v1829_v21, %v1831_v22 }
  0x58   : > { %9197 = vmatprep.mubr.msk.bf16.mxu0 %vm696_vm2, %v9367_v30 }
  0x59   : > { %13835 = vst [vmem:[#allocation2_spill] sm:$0xff] %v9638_v29 }
  0x5f   : > { %9198 = vmatmul.mubr.msk.bf16.gmra.mrb[36].mxu0 %vm696_vm2, %v9368_v33 }
  0x60   : > { %9201 = vmatprep.mubr.msk.bf16.mxu0 %vm696_vm2, %v9369_v34 }
  0x67   : > { %9202 = vmatmul.mubr.msk.bf16.gmra.mrb[40].mxu0 %vm696_vm2, %v9370_v35 }
  0x68   : > { %9205 = vmatprep.mubr.msk.bf16.mxu0 %vm696_vm2, %v9371_v36 }
  0x6f   : > { %9206 = vmatmul.mubr.msk.bf16.gmra.mrb[44].mxu0 %vm696_vm2, %v9372_v37 }
  0x70   : > { %9209 = vmatprep.mubr.msk.bf16.mxu0 %vm696_vm2, %v9373_v38 }
  0x77   : > { %9210 = vmatmul.mubr.msk.bf16.gmra.mrb[48].mxu0 %vm696_vm2, %v9374_v39 }
  0x78   : > { %9213 = vmatprep.mubr.msk.bf16.mxu0 %vm696_vm2, %v9375_v40 }
  0x7f   : > { %9214 = vmatmul.mubr.msk.bf16.gmra.mrb[52].mxu0 %vm696_vm2, %v9376_v41 }
  0x80   : > { %9217 = vmatprep.mubr.msk.bf16.mxu0 %vm696_vm2, %v9377_v42 }
  0x87   : > { %9218 = vmatmul.mubr.msk.bf16.gmra.mrb[56].mxu0 %vm696_vm2, %v9378_v43 }
  0x88   : > { %9221 = vmatprep.mubr.msk.bf16.mxu0 %vm696_vm2, %v9379_v44 }
  0x8f   : > { %9222 = vmatmul.mubr.msk.bf16.gmra.mrb[60].mxu0 %vm696_vm2, %v9380_v45 }
  0x90   : > { %9225 = vmatprep.mubr.msk.bf16.mxu0 %vm696_vm2, %v9381_v46 }
  0x97   : > { %9226 = vmatmul.mubr.msk.bf16.gmra.mrb[64].mxu0 %vm696_vm2, %v9382_v47 }
  0x98   : > { %9229 = vmatprep.mubr.msk.bf16.mxu0 %vm696_vm2, %v9383_v48 }
  0x9f   : > { %9230 = vmatmul.mubr.msk.bf16.gmra.mrb[68].mxu0 %vm696_vm2, %v9384_v49 }
  0xa0   : > { %9233 = vmatprep.mubr.msk.bf16.mxu0 %vm696_vm2, %v9385_v50 }
  0xa7   : > { %9234 = vmatmul.mubr.msk.bf16.gmra.mrb[72].mxu0 %vm696_vm2, %v9386_v51 }
  0xa8   : > { %9237 = vmatprep.mubr.msk.bf16.mxu0 %vm696_vm2, %v9387_v52 }
  0xaf   : > { %9238 = vmatmul.mubr.msk.bf16.gmra.mrb[76].mxu0 %vm696_vm2, %v9388_v53 }
  0xb0   : > { %9241 = vmatprep.mubr.msk.bf16.mxu0 %vm696_vm2, %v9389_v54 }
  0xb7   : > { %9242 = vmatmul.mubr.msk.bf16.gmra.mrb[80].mxu0 %vm696_vm2, %v9390_v55 }
  0xb8   : > { %9245 = vmatprep.mubr.msk.bf16.mxu0 %vm696_vm2, %v9391_v56 }
  0xbf   : > { %9246 = vmatmul.mubr.msk.bf16.gmra.mrb[84].mxu0 %vm696_vm2, %v9392_v57 }
  0xc0   : > { %9249 = vmatprep.mubr.msk.bf16.mxu0 %vm696_vm2, %v9393_v58 }
  0xc7   : > { %9250 = vmatmul.mubr.msk.bf16.gmra.mrb[88].mxu0 %vm696_vm2, %v9394_v59 }
  0xc8   : > { %9253 = vmatprep.mubr.msk.bf16.mxu0 %vm696_vm2, %v9395_v60 }
  0xcf   : > { %9254 = vmatmul.mubr.msk.bf16.gmra.mrb[92].mxu0 %vm696_vm2, %v9396_v61 }
  0xd0   : > { %9257 = vmatprep.mubr.msk.bf16.mxu0 %vm696_vm2, %v9398_v62 }
  0xd7   : > { %9258 = vmatmul.mubr.msk.bf16.gmra.mrb[96].mxu0 %vm696_vm2, %v9400_v63 }
  0xd8   : > { %9261 = vmatprep.mubr.msk.bf16.mxu0 %vm696_vm2, %v9402_v0 }
  0xdf   : > { %9262 = vmatmul.mubr.msk.bf16.gmra.mrb[100].mxu0 %vm696_vm2, %v9404_v1 }
  0xe0   : > { %9265 = vmatprep.mubr.msk.bf16.mxu0 %vm696_vm2, %v9405_v2 }
  0xe7   : > { %9266 = vmatmul.mubr.msk.bf16.gmra.mrb[104].mxu0 %vm696_vm2, %v9406_v3 }
  0xe8   : > { %9269 = vmatprep.mubr.msk.bf16.mxu0 %vm696_vm2, %v9407_v4 }
  0xea   : > { %v9163_v6 = vpop.f32.mrb[0].mxu0  ;;  %v9275_v11 = vpop.f32.mrb[0].mxu1 }
  0xeb   : > { %v930_v10 = vpop.f32.mrb[1].mxu0  ;;  %v939_v13 = vadd.f32 %v9163_v6, %v9629_v5  ;;  %v1378_v15 = vpop.f32.mrb[1].mxu1  ;;  %v1387_v19 = vadd.f32 %v9275_v11, %v9629_v5 }
  0xec   : > { %v9164_v14 = vpop.f32.mrb[2].mxu0  ;;  %v9276_v17 = vpop.f32.mrb[2].mxu1  ;;  %v931_v18 = vadd.f32 %v9629_v5, %v930_v10  ;;  %v1379_v23 = vadd.f32 %v9629_v5, %v1378_v15 }
  0xed   : > { %v933_v16 = vpop.f32.mrb[3].mxu0  ;;  %v1381_v20 = vpop.f32.mrb[3].mxu1  ;;  %v1443_v24 = vmax.f32 %v939_v13, 0.0  ;;  %v942_v25 = vadd.f32 %v9164_v14, %v9629_v5  ;;  %v1555_v27 = vmax.f32 %v1387_v19, 0.0  ;;  %v9644_v32 = vadd.f32 %v9276_v17, %v9629_v5 }
  0xee   : > { %v1441_v26 = vmax.f32 %v931_v18, 0.0  ;;  %v9641_v30 = vadd.f32 %v9629_v5, %v933_v16  ;;  %v1553_v31 = vmax.f32 %v1379_v23, 0.0  ;;  %v9651_v42 = vadd.f32 %v9629_v5, %v1381_v20 }
  0xef   : > { %9270 = vmatmul.mubr.msk.bf16.gmra.mrb[108].mxu0 %vm696_vm2, %v9408_v12  ;;  %v1576_v36 = vsel %vm1569_vm3, %v1443_v24, -inf  ;;  %v1444_v37 = vmax.f32 %v942_v25, 0.0  ;;  %v1744_v49 = vsel %vm1569_vm3, %v1555_v27, -inf  ;;  %v1556_v8 = vmax.f32 %v9644_v32, 0.0 }
  0xf0   : > { %v1570_v48 = vsel %vm1569_vm3, %v1441_v26, -inf  ;;  %v1738_v53 = vsel %vm1569_vm3, %v1553_v31, -inf  ;;  %v1442_v7 = vmax.f32 %v9641_v30, 0.0  ;;  %v1554_v12 = vmax.f32 %v9651_v42, 0.0 }
  0xf1   : > { %v1579_v57 = vsel %vm1569_vm3, %v1444_v37, -inf  ;;  %vm6587_vm2 = vcmask 785408  }
  0xf2   : > { %v9167_v28 = vpop.f32.mrb[4].mxu0  ;;  %v9279_v34 = vpop.f32.mrb[4].mxu1 }
  0xf3   : > { %v955_v33 = vadd.f32 %v9167_v28, %v9629_v5  ;;  %v946_v35 = vpop.f32.mrb[5].mxu0  ;;  %v1403_v38 = vadd.f32 %v9279_v34, %v9629_v5  ;;  %v1394_v40 = vpop.f32.mrb[5].mxu1 }
  0xf4   : > { %v947_v39 = vadd.f32 %v9629_v5, %v946_v35  ;;  %v9168_v41 = vpop.f32.mrb[6].mxu0  ;;  %v1395_v44 = vadd.f32 %v9629_v5, %v1394_v40  ;;  %v9655_v46 = vpop.f32.mrb[6].mxu1 }
  0xf5   : > { %v1447_v43 = vmax.f32 %v955_v33, 0.0  ;;  %v958_v45 = vadd.f32 %v9168_v41, %v9629_v5  ;;  %v9657_v47 = vpop.f32.mrb[7].mxu0  ;;  %v1559_v50 = vmax.f32 %v1403_v38, 0.0  ;;  %v9661_v52 = vpop.f32.mrb[7].mxu1 }
  0xf6   : > { %v1445_v51 = vmax.f32 %v947_v39, 0.0  ;;  %v1557_v55 = vmax.f32 %v1395_v44, 0.0  ;;  %v9744_v32 = vadd.f32 %v9629_v5, %v9661_v52 }
  0xf7   : > { %v1577_v54 = vsel %vm1569_vm3, %v1447_v43, -inf  ;;  %v1448_v56 = vmax.f32 %v958_v45, 0.0  ;;  %v1745_v59 = vsel %vm1569_vm3, %v1559_v50, -inf }
  0xf8   : > { %v1578_v58 = vmax.f32 %v1576_v36, %v1577_v54  ;;  %v1571_v60 = vsel %vm1569_vm3, %v1445_v51, -inf  ;;  %v1746_v61 = vmax.f32 %v1744_v49, %v1745_v59  ;;  %v1739_v63 = vsel %vm1569_vm3, %v1557_v55, -inf }
  0xf9   : > { %v9668_v62 = vmax.f32 %v1570_v48, %v1571_v60  ;;  %v1580_v0 = vsel %vm1569_vm3, %v1448_v56, -inf  ;;  %v9673_v3 = vmax.f32 %v1738_v53, %v1739_v63 }
  0xfa   : > { %v1860_v1 = vcombine.high %v1578_v58, %v1578_v58  ;;  %v1867_v2 = vrot.slane %v1578_v58, %v9638_v29  ;;  %v9675_v4 = vmax.f32 %v1579_v57, %v1580_v0  ;;  %v9677_v6 = vpop.f32.mrb[8].mxu0  ;;  %v2812_v9 = vcombine.high %v1746_v61, %v1746_v61 }
  0xfb   : > { %v2819_v10 = vrot.slane %v1746_v61, %v9638_v29  ;;  %v9682_v11 = vpop.f32.mrb[9].mxu0 }
  0xfc   : > { %v1874_v13 = vrot.slane %v1860_v1, %v9638_v29  ;;  %v1875_v14 = vcombine.high %v1867_v2, %v1867_v2  ;;  %v3227_v15 = vsel %vm3170_vm4, %v1867_v2, -inf  ;;  %v9687_v16 = vpop.f32.mrb[10].mxu0  ;;  %v2826_v18 = vrot.slane %v2812_v9, %v9638_v29 }
  0xfd   : > { %v3228_v17 = vrot.slane %v3227_v15, 4  ;;  %v2827_v19 = vcombine.high %v2819_v10, %v2819_v10  ;;  %v4795_v20 = vsel %vm3170_vm4, %v2819_v10, -inf  ;;  %v9691_v21 = vpop.f32.mrb[11].mxu0 }
  0xfe   : > { %v1876_v22 = vcombine.high %v1874_v13, %v1874_v13  ;;  %v3234_v23 = vsel %vm3170_vm4, %v1875_v14, -inf  ;;  %v3241_v24 = vsel %vm3170_vm4, %v1874_v13, -inf  ;;  %v4796_v25 = vrot.slane %v4795_v20, 4 }
  0xff   : > { %v3229_v26 = vmax.f32 %v3227_v15, %v3228_v17  ;;  %v3235_v27 = vrot.slane %v3234_v23, 4  ;;  %v3242_v28 = vrot.slane %v3241_v24, 4  ;;  %v2828_v30 = vcombine.high %v2826_v18, %v2826_v18 }
 0x100   : > { %v3248_v31 = vsel %vm3170_vm4, %v1876_v22, -inf  ;;  %v4797_v33 = vmax.f32 %v4795_v20, %v4796_v25  ;;  %v4802_v34 = vsel %vm3170_vm4, %v2827_v19, -inf  ;;  %v4809_v35 = vsel %vm3170_vm4, %v2826_v18, -inf }
 0x101   : > { %v3230_v36 = vrot.slane %v3229_v26, 2  ;;  %v3236_v37 = vmax.f32 %v3234_v23, %v3235_v27  ;;  %v3243_v38 = vmax.f32 %v3241_v24, %v3242_v28  ;;  %v3249_v39 = vrot.slane %v3248_v31, 4 }
 0x102   : > { %v4798_v40 = vrot.slane %v4797_v33, 2  ;;  %v4803_v41 = vrot.slane %v4802_v34, 4  ;;  %v4810_v43 = vrot.slane %v4809_v35, 4  ;;  %v4816_v44 = vsel %vm3170_vm4, %v2828_v30, -inf  ;;  %v9699_v45 = vpop.f32.mrb[12].mxu0 }
 0x103   : > { %v3231_v48 = vmax.f32 %v3229_v26, %v3230_v36  ;;  %v3237_v49 = vrot.slane %v3236_v37, 2  ;;  %v3244_v50 = vrot.slane %v3243_v38, 2  ;;  %v3250_v51 = vmax.f32 %v3248_v31, %v3249_v39  ;;  %v9701_v53 = vpop.f32.mrb[13].mxu0 }
 0x104   : > { %v4799_v54 = vmax.f32 %v4797_v33, %v4798_v40  ;;  %v4804_v55 = vmax.f32 %v4802_v34, %v4803_v41  ;;  %v4811_v56 = vmax.f32 %v4809_v35, %v4810_v43  ;;  %v4817_v57 = vrot.slane %v4816_v44, 4  ;;  %v9703_v58 = vpop.f32.mrb[14].mxu0 }
 0x105   : > { %v3232_v59 = vrot.slane %v3231_v48, 1  ;;  %v3238_v60 = vmax.f32 %v3236_v37, %v3237_v49  ;;  %v3245_v61 = vmax.f32 %v3243_v38, %v3244_v50  ;;  %v3251_v63 = vrot.slane %v3250_v51, 2  ;;  %v9705_v0 = vpop.f32.mrb[15].mxu0 }
 0x106   : > { %v4800_v1 = vrot.slane %v4799_v54, 1  ;;  %v4805_v2 = vrot.slane %v4804_v55, 2  ;;  %v4812_v9 = vrot.slane %v4811_v56, 2  ;;  %v4818_v10 = vmax.f32 %v4816_v44, %v4817_v57 }
 0x107   : > { %v3233_v13 = vmax.f32 %v3231_v48, %v3232_v59  ;;  %v3239_v14 = vrot.slane %v3238_v60, 1  ;;  %v3246_v15 = vrot.slane %v3245_v61, 1  ;;  %v3252_v17 = vmax.f32 %v3250_v51, %v3251_v63 }
 0x108   : > { %v4806_v18 = vmax.f32 %v4804_v55, %v4805_v2  ;;  %v4813_v19 = vmax.f32 %v4811_v56, %v4812_v9  ;;  %v4819_v20 = vrot.slane %v4818_v10, 2  ;;  %v9708_v22 = vsel %vm1569_vm3, %v1442_v7, -inf }
 0x109   : > { %v9710_v23 = vmax.f32 %v4799_v54, %v4800_v1  ;;  %v1826_v24 = vcombine.high %v9668_v62, %v9668_v62  ;;  %v9716_v25 = vadd.f32 %v9655_v46, %v9629_v5  ;;  %v9718_v26 = vmax.f32 %v3238_v60, %v3239_v14 }
 0x10a   : > { %v9720_v27 = vmax.f32 %v3245_v61, %v3246_v15  ;;  %v3253_v28 = vrot.slane %v3252_v17, 1  ;;  %v1833_v30 = vrot.slane %v9668_v62, %v9638_v29  ;;  %v9724_v31 = vpop.f32.mrb[16].mxu0  ;;  %v9729_v7 = vsel %vm1569_vm3, %v1556_v8, -inf }
 0x10b   : > { %v9734_v46 = vsel %vm1569_vm3, %v1554_v12, -inf  ;;  %v4971_v33 = vpack.c.bf16 %v3233_v13, %v3233_v13  ;;  %v9738_v34 = vadd.f32 %v9629_v5, %v9657_v47  ;;  %v9740_v35 = vpop.f32.mrb[17].mxu0  ;;  %v4807_v62 = vrot.slane %v4806_v18, 1 }
 0x10c   : > { %v4814_v36 = vrot.slane %v4813_v19, 1  ;;  %v4820_v37 = vmax.f32 %v4818_v10, %v4819_v20  ;;  %v9746_v8 = vpop.f32.mrb[18].mxu0  ;;  %v1840_v12 = vrot.slane %v1826_v24, %v9638_v29  ;;  %v2778_v47 = vcombine.high %v9673_v3, %v9673_v3 }
 0x10d   : > { %v9754_v39 = vpop.f32.mrb[19].mxu0  ;;  %v9756_v40 = vmax.f32 %v3252_v17, %v3253_v28  ;;  %v4972_v52 = vpack.c.bf16 %v9718_v26, %v9718_v26  ;;  %v1841_v43 = vcombine.high %v1833_v30, %v1833_v30  ;;  %v9762_v44 = vunpack.c.l.b16 %v4971_v33 }
 0x10e   : > { %v1842_v48 = vcombine.high %v1840_v12, %v1840_v12  ;;  %v3171_v49 = vsel %vm3170_vm4, %v1833_v30, -inf  ;;  %v3185_v50 = vsel %vm3170_vm4, %v1840_v12, -inf  ;;  %v9766_v51 = vmax.f32 %v4806_v18, %v4807_v62 }
 0x10f   : > { %13836 = vst [vmem:[#allocation3_spill] sm:$0xff] %v9762_v44  ;;  %v9768_v54 = vmax.f32 %v4813_v19, %v4814_v36  ;;  %v4821_v55 = vrot.slane %v4820_v37, 1  ;;  %v3172_v56 = vrot.slane %v3171_v49, 4  ;;  %v3178_v57 = vsel %vm3170_vm4, %v1841_v43, -inf }
 0x110   : > { %v3186_v59 = vrot.slane %v3185_v50, 4  ;;  %v3192_v60 = vsel %vm3170_vm4, %v1842_v48, -inf  ;;  %v2785_v61 = vrot.slane %v9673_v3, %v9638_v29  ;;  %v4974_v63 = vpack.c.bf16 %v9756_v40, %v9756_v40 }
 0x111   : > { %v3173_v1 = vmax.f32 %v3171_v49, %v3172_v56  ;;  %v3179_v2 = vrot.slane %v3178_v57, 4  ;;  %v3193_v9 = vrot.slane %v3192_v60, 4  ;;  %v2792_v14 = vrot.slane %v2778_v47, %v9638_v29 }
 0x112   : > { %v9776_v10 = vpop.f32.mrb[20].mxu0  ;;  %v3187_v13 = vmax.f32 %v3185_v50, %v3186_v59  ;;  %v2793_v15 = vcombine.high %v2785_v61, %v2785_v61  ;;  %v4739_v17 = vsel %vm3170_vm4, %v2785_v61, -inf }
 0x113   : > { %v9780_v18 = vpop.f32.mrb[21].mxu0  ;;  %v3174_v19 = vrot.slane %v3173_v1, 2  ;;  %v3180_v20 = vmax.f32 %v3178_v57, %v3179_v2  ;;  %v3194_v24 = vmax.f32 %v3192_v60, %v3193_v9  ;;  %v4740_v3 = vrot.slane %v4739_v17, 4 }
 0x114   : > { %v9782_v26 = vpop.f32.mrb[22].mxu0  ;;  %v3188_v28 = vrot.slane %v3187_v13, 2  ;;  %v2794_v30 = vcombine.high %v2792_v14, %v2792_v14  ;;  %v4746_v33 = vsel %vm3170_vm4, %v2793_v15, -inf  ;;  %v4753_v62 = vsel %vm3170_vm4, %v2792_v14, -inf }
 0x115   : > { %v9786_v36 = vpop.f32.mrb[23].mxu0  ;;  %v3175_v12 = vmax.f32 %v3173_v1, %v3174_v19  ;;  %v3181_v47 = vrot.slane %v3180_v20, 2  ;;  %v3195_v40 = vrot.slane %v3194_v24, 2  ;;  %v4741_v43 = vmax.f32 %v4739_v17, %v4740_v3 }
 0x116   : > { %v3189_v48 = vmax.f32 %v3187_v13, %v3188_v28  ;;  %v4747_v49 = vrot.slane %v4746_v33, 4  ;;  %v4754_v50 = vrot.slane %v4753_v62, 4  ;;  %v4760_v56 = vsel %vm3170_vm4, %v2794_v30, -inf }
 0x117   : > { %v3176_v57 = vrot.slane %v3175_v12, 1  ;;  %v3182_v59 = vmax.f32 %v3180_v20, %v3181_v47  ;;  %v3196_v60 = vmax.f32 %v3194_v24, %v3195_v40  ;;  %v4742_v61 = vrot.slane %v4741_v43, 2 }
 0x118   : > { %v4822_v2 = vmax.f32 %v4820_v37, %v4821_v55  ;;  %v4748_v9 = vmax.f32 %v4746_v33, %v4747_v49  ;;  %v4755_v15 = vmax.f32 %v4753_v62, %v4754_v50  ;;  %v4761_v38 = vrot.slane %v4760_v56, 4 }
 0x119   : > { %v3177_v14 = vmax.f32 %v3175_v12, %v3176_v57  ;;  %v3183_v41 = vrot.slane %v3182_v59, 1  ;;  %v3190_v42 = vrot.slane %v3189_v48, 1  ;;  %v4743_v1 = vmax.f32 %v4741_v43, %v4742_v61 }
 0x11a   : > { %v3197_v19 = vrot.slane %v3196_v60, 1  ;;  %v4749_v44 = vrot.slane %v4748_v9, 2  ;;  %v4756_v17 = vrot.slane %v4755_v15, 2  ;;  %v4762_v13 = vmax.f32 %v4760_v56, %v4761_v38  ;;  %v9807_v50 = vpop.f32.mrb[24].mxu0 }
 0x11b   : > { %v5196_v3 = vpack.c.bf16 %v9766_v51, %v9766_v51  ;;  %v5197_v20 = vpack.c.bf16 %v9768_v54, %v9768_v54  ;;  %v13837_v37 = vpack.c.bf16 %v9710_v23, %v9710_v23  ;;  %v4744_v24 = vrot.slane %v4743_v1, 1  ;;  %v9815_v57 = vpop.f32.mrb[25].mxu0 }
 0x11c   : > { %v9798_v28 = vunpack.c.l.b16 %v4972_v52  ;;  %v4750_v30 = vmax.f32 %v4748_v9, %v4749_v44  ;;  %v4757_v33 = vmax.f32 %v4755_v15, %v4756_v17  ;;  %v4763_v62 = vrot.slane %v4762_v13, 2 }
 0x11d   : > { %v9796_v55 = vunpack.c.l.b16 %v13837_v37  ;;  %v13839_v38 = vpack.c.bf16 %v9720_v27, %v9720_v27  ;;  %v9805_v51 = vunpack.c.l.b16 %v4974_v63  ;;  %v5198_v47 = vpack.c.bf16 %v4822_v2, %v4822_v2 }
 0x11e   : > { %13838 = vst [vmem:[#allocation4_spill] sm:$0xff] %v9798_v28  ;;  %v3191_v54 = vmax.f32 %v3189_v48, %v3190_v42  ;;  %v3184_v40 = vmax.f32 %v3182_v59, %v3183_v41  ;;  %v3198_v43 = vmax.f32 %v3196_v60, %v3197_v19  ;;  %v4963_v23 = vpack.c.bf16 %v3177_v14, %v3177_v14 }
 0x11f   : > { %v9803_v12 = vunpack.c.l.b16 %v13839_v38  ;;  %13841 = vst [vmem:[#allocation6_spill] sm:$0xff] %v9805_v51  ;;  %v4764_v49 = vmax.f32 %v4762_v13, %v4763_v62  ;;  %v9809_v52 = vunpack.c.l.b16 %v5196_v3  ;;  %v9811_v44 = vunpack.c.l.b16 %v5197_v20  ;;  %v9828_v20 = vpop.f32.mrb[26].mxu0 }
 0x120   : > { %v4745_v56 = vmax.f32 %v4743_v1, %v4744_v24  ;;  %v1877_v27 = vcombine.high %v9675_v4, %v9675_v4  ;;  %v4751_v63 = vrot.slane %v4750_v30, 1  ;;  %v4758_v61 = vrot.slane %v4757_v33, 1  ;;  %v9830_v38 = vpop.f32.mrb[27].mxu0 }
 0x121   : > { %13840 = vst [vmem:[#allocation5_spill] sm:$0xff] %v9803_v12  ;;  %13842 = vst [vmem:[#allocation7_spill] sm:$0xff] %v9811_v44  ;;  %v4765_v2 = vrot.slane %v4764_v49, 1  ;;  %v1884_v42 = vrot.slane %v9675_v4, %v9638_v29  ;;  %v9819_v41 = vunpack.c.l.b16 %v5198_v47  ;;  %v4965_v48 = vpack.c.bf16 %v3191_v54, %v3191_v54 }
 0x122   : > { %v1891_v59 = vrot.slane %v1877_v27, %v9638_v29  ;;  %v13844_v60 = vmax.f32 %v9716_v25, 0.0  ;;  %v4964_v15 = vpack.c.bf16 %v3184_v40, %v3184_v40  ;;  %v4966_v14 = vpack.c.bf16 %v3198_v43, %v3198_v43 }
 0x123   : > { %13843 = vst [vmem:[#allocation8_spill] sm:$0xff] %v9819_v41  ;;  %v5475_v1 = vunpack.c.l.b16 %v4963_v23  ;;  %v1892_v19 = vcombine.high %v1884_v42, %v1884_v42  ;;  %v5187_v17 = vpack.c.bf16 %v4745_v56, %v4745_v56  ;;  %v3255_v13 = vsel %vm3170_vm4, %v1884_v42, -inf }
 0x124   : > { %v1748_v9 = vsel %vm1569_vm3, %v13844_v60, -inf  ;;  %v3269_v3 = vsel %vm3170_vm4, %v1891_v59, -inf  ;;  %v4752_v37 = vmax.f32 %v4750_v30, %v4751_v63  ;;  %v4759_v24 = vmax.f32 %v4757_v33, %v4758_v61 }
 0x125   : > { %v1749_v4 = vmax.f32 %v9729_v7, %v1748_v9  ;;  %v4766_v62 = vmax.f32 %v4764_v49, %v4765_v2  ;;  %v3256_v25 = vrot.slane %v3255_v13, 4  ;;  %v1893_v47 = vcombine.high %v1891_v59, %v1891_v59 }
 0x126   : > { %v3262_v54 = vsel %vm3170_vm4, %v1892_v19, -inf  ;;  %v3270_v40 = vrot.slane %v3269_v3, 4  ;;  %v5476_v23 = vunpack.c.l.b16 %v4964_v15  ;;  %v9833_v56 = vunpack.c.l.b16 %v4965_v48 }
 0x127   : > { %v2829_v43 = vcombine.high %v1749_v4, %v1749_v4  ;;  %v3257_v27 = vmax.f32 %v3255_v13, %v3256_v25  ;;  %v3263_v42 = vrot.slane %v3262_v54, 4  ;;  %v9835_v60 = vunpack.c.l.b16 %v4966_v14 }
 0x128   : > { %13845 = vst [vmem:[#allocation9_spill] sm:$0xff] %v9833_v56  ;;  %v3271_v7 = vmax.f32 %v3269_v3, %v3270_v40  ;;  %v2836_v30 = vrot.slane %v1749_v4, %v9638_v29  ;;  %v5188_v49 = vpack.c.bf16 %v4752_v37, %v4752_v37  ;;  %v5189_v63 = vpack.c.bf16 %v4759_v24, %v4759_v24 }
 0x129   : > { %13846 = vst [vmem:[#allocation10_spill] sm:$0xff] %v9835_v60  ;;  %v2843_v33 = vrot.slane %v2829_v43, %v9638_v29  ;;  %v5699_v61 = vunpack.c.l.b16 %v5187_v17  ;;  %v3264_v2 = vmax.f32 %v3262_v54, %v3263_v42  ;;  %v5190_v59 = vpack.c.bf16 %v4766_v62, %v4766_v62 }
 0x12a   : > { %v3258_v9 = vrot.slane %v3257_v27, 2  ;;  %v3276_v19 = vsel %vm3170_vm4, %v1893_v47, -inf  ;;  %v2844_v15 = vcombine.high %v2836_v30, %v2836_v30  ;;  %v3272_v48 = vrot.slane %v3271_v7, 2 }
 0x12b   : > { %v4823_v13 = vsel %vm3170_vm4, %v2836_v30, -inf  ;;  %v4837_v14 = vsel %vm3170_vm4, %v2843_v33, -inf  ;;  %v1446_v3 = vmax.f32 %v9738_v34, 0.0  ;;  %v3265_v25 = vrot.slane %v3264_v2, 2 }
 0x12c   : > { %v4824_v4 = vrot.slane %v4823_v13, 4  ;;  %v4830_v40 = vsel %vm3170_vm4, %v2844_v15, -inf  ;;  %v4838_v37 = vrot.slane %v4837_v14, 4  ;;  %v5700_v24 = vunpack.c.l.b16 %v5188_v49 }
 0x12d   : > { %v2845_v17 = vcombine.high %v2843_v33, %v2843_v33  ;;  %v4831_v54 = vrot.slane %v4830_v40, 4  ;;  %v1558_v62 = vmax.f32 %v9744_v32, 0.0  ;;  %v9846_v47 = vsel %vm5731_vm5, %v5476_v23, %v5475_v1 }
 0x12e   : > { %13847 = vst [vmem:[#allocation11_spill] sm:$0xff] %v9846_v47  ;;  %v3259_v43 = vmax.f32 %v3257_v27, %v3258_v9  ;;  %v4825_v42 = vmax.f32 %v4823_v13, %v4824_v4  ;;  %v4839_v30 = vmax.f32 %v4837_v14, %v4838_v37  ;;  %v9848_v51 = vmax.f32 %v3271_v7, %v3272_v48 }
 0x12f   : > { %v3277_v12 = vrot.slane %v3276_v19, 4  ;;  %v4832_v34 = vmax.f32 %v4830_v40, %v4831_v54  ;;  %v1574_v28 = vsel %vm1569_vm3, %v1446_v3, -inf  ;;  %v9851_v60 = vunpack.c.l.b16 %v5189_v63 }
 0x130   : > { %13848 = vst [vmem:[#allocation12_spill] sm:$0xff] %v9848_v51  ;;  %v9853_v15 = vunpack.c.l.b16 %v5190_v59  ;;  %v3266_v33 = vmax.f32 %v3264_v2, %v3265_v25  ;;  %v1575_v49 = vmax.f32 %v9708_v22, %v1574_v28  ;;  %v9857_v32 = vsel %vm5731_vm5, %v5700_v24, %v5699_v61 }
 0x131   : > { %v4826_v1 = vrot.slane %v4825_v42, 2  ;;  %v4844_v23 = vsel %vm3170_vm4, %v2845_v17, -inf  ;;  %v1742_v27 = vsel %vm1569_vm3, %v1558_v62, -inf  ;;  %v3260_v7 = vrot.slane %v3259_v43, 1 }
 0x132   : > { %v4840_v9 = vrot.slane %v4839_v30, 2  ;;  %v1843_v48 = vcombine.high %v1575_v49, %v1575_v49  ;;  %v1850_v13 = vrot.slane %v1575_v49, %v9638_v29  ;;  %v9863_v59 = vmax.f32 %v3276_v19, %v3277_v12 }
 0x133   : > { %v4833_v2 = vrot.slane %v4832_v34, 2  ;;  %v1743_v22 = vmax.f32 %v9734_v46, %v1742_v27  ;;  %v3267_v28 = vrot.slane %v3266_v33, 1  ;;  %v4845_v61 = vrot.slane %v4844_v23, 4 }
 0x134   : > { %13849 = vst [vmem:[#allocation13_spill] sm:$0xff] %v9863_v59  ;;  %v1857_v14 = vrot.slane %v1843_v48, %v9638_v29  ;;  %v1858_v3 = vcombine.high %v1850_v13, %v1850_v13  ;;  %v4827_v25 = vmax.f32 %v4825_v42, %v4826_v1  ;;  %v3199_v4 = vsel %vm3170_vm4, %v1850_v13, -inf }
 0x135   : > { %v2795_v40 = vcombine.high %v1743_v22, %v1743_v22  ;;  %v2802_v37 = vrot.slane %v1743_v22, %v9638_v29  ;;  %v3261_v24 = vmax.f32 %v3259_v43, %v3260_v7  ;;  %v4841_v17 = vmax.f32 %v4839_v30, %v4840_v9  ;;  %v9877_v22 = vpop.f32.mrb[28].mxu0 }
 0x136   : > { %v1859_v54 = vcombine.high %v1857_v14, %v1857_v14  ;;  %v3200_v62 = vrot.slane %v3199_v4, 4  ;;  %v4834_v12 = vmax.f32 %v4832_v34, %v4833_v2  ;;  %v3206_v19 = vsel %vm3170_vm4, %v1858_v3, -inf  ;;  %13851 = vst [vmem:[#allocation15_spill] sm:$0xff] %v9877_v22 }
 0x137   : > { %v3213_v46 = vsel %vm3170_vm4, %v1857_v14, -inf  ;;  %v2809_v49 = vrot.slane %v2795_v40, %v9638_v29  ;;  %v9872_v27 = vmax.f32 %v3266_v33, %v3267_v28  ;;  %v9874_v48 = vmax.f32 %v4844_v23, %v4845_v61 }
 0x138   : > { %v3201_v42 = vmax.f32 %v3199_v4, %v3200_v62  ;;  %v3207_v1 = vrot.slane %v3206_v19, 4  ;;  %v4828_v13 = vrot.slane %v4827_v25, 1  ;;  %v3214_v63 = vrot.slane %v3213_v46, 4 }
 0x139   : > { %13850 = vst [vmem:[#allocation14_spill] sm:$0xff] %v9874_v48  ;;  %v3220_v43 = vsel %vm3170_vm4, %v1859_v54, -inf  ;;  %v2810_v30 = vcombine.high %v2802_v37, %v2802_v37  ;;  %v4842_v7 = vrot.slane %v4841_v17, 1  ;;  %v4835_v14 = vrot.slane %v4834_v12, 1 }
 0x13a   : > { %v3202_v9 = vrot.slane %v3201_v42, 2  ;;  %v3208_v34 = vmax.f32 %v3206_v19, %v3207_v1  ;;  %v3221_v2 = vrot.slane %v3220_v43, 4  ;;  %v3215_v3 = vmax.f32 %v3213_v46, %v3214_v63 }
 0x13b   : > { %v2811_v40 = vcombine.high %v2809_v49, %v2809_v49  ;;  %v4767_v33 = vsel %vm3170_vm4, %v2802_v37, -inf  ;;  %v4829_v62 = vmax.f32 %v4827_v25, %v4828_v13  ;;  %v4774_v48 = vsel %vm3170_vm4, %v2810_v30, -inf }
 0x13c   : > { %v3203_v23 = vmax.f32 %v3201_v42, %v3202_v9  ;;  %v3209_v28 = vrot.slane %v3208_v34, 2  ;;  %v3222_v61 = vmax.f32 %v3220_v43, %v3221_v2  ;;  %v4768_v4 = vrot.slane %v4767_v33, 4 }
 0x13d   : > { %v4781_v54 = vsel %vm3170_vm4, %v2809_v49, -inf  ;;  %v4788_v59 = vsel %vm3170_vm4, %v2811_v40, -inf  ;;  %v4836_v47 = vmax.f32 %v4834_v12, %v4835_v14  ;;  %v4775_v63 = vrot.slane %v4774_v48, 4 }
 0x13e   : > { %v3204_v19 = vrot.slane %v3203_v23, 1  ;;  %v3210_v1 = vmax.f32 %v3208_v34, %v3209_v28  ;;  %v3223_v56 = vrot.slane %v3222_v61, 2  ;;  %v4769_v22 = vmax.f32 %v4767_v33, %v4768_v4 }
 0x13f   : > { %v4782_v46 = vrot.slane %v4781_v54, 4  ;;  %v4789_v51 = vrot.slane %v4788_v59, 4  ;;  %v3216_v42 = vrot.slane %v3215_v3, 2  ;;  %v4975_v2 = vpack.c.bf16 %v3261_v24, %v3261_v24 }
 0x140   : > { %v3211_v37 = vrot.slane %v3210_v1, 1  ;;  %v3224_v9 = vmax.f32 %v3222_v61, %v3223_v56  ;;  %v4770_v43 = vrot.slane %v4769_v22, 2  ;;  %v4776_v25 = vmax.f32 %v4774_v48, %v4775_v63 }
 0x141   : > { %v4783_v13 = vmax.f32 %v4781_v54, %v4782_v46  ;;  %v4790_v30 = vmax.f32 %v4788_v59, %v4789_v51  ;;  %v9883_v41 = vmax.f32 %v4841_v17, %v4842_v7  ;;  %v3205_v49 = vmax.f32 %v3203_v23, %v3204_v19 }
 0x142   : > { %v3225_v40 = vrot.slane %v3224_v9, 1  ;;  %v4771_v44 = vmax.f32 %v4769_v22, %v4770_v43  ;;  %v5199_v12 = vpack.c.bf16 %v4829_v62, %v4829_v62  ;;  %v4777_v14 = vrot.slane %v4776_v25, 2 }
 0x143   : > { %v4791_v33 = vrot.slane %v4790_v30, 2  ;;  %v5200_v28 = vpack.c.bf16 %v4836_v47, %v4836_v47  ;;  %v9887_v4 = vmax.f32 %v3210_v1, %v3211_v37  ;;  %v9889_v56 = vmax.f32 %v3215_v3, %v3216_v42 }
 0x144   : > { %v4784_v24 = vrot.slane %v4783_v13, 2  ;;  %v9891_v48 = vunpack.c.l.b16 %v4975_v2  ;;  %v4778_v51 = vmax.f32 %v4776_v25, %v4777_v14  ;;  %v971_v17 = vadd.f32 %v9677_v6, %v9629_v5 }
 0x145   : > { %v4792_v59 = vmax.f32 %v4790_v30, %v4791_v33  ;;  %v3226_v22 = vmax.f32 %v3224_v9, %v3225_v40  ;;  %v4967_v23 = vpack.c.bf16 %v3205_v49, %v3205_v49  ;;  %v4772_v61 = vrot.slane %v4771_v44, 1 }
 0x146   : > { %13852 = vst [vmem:[#allocation16_spill] sm:$0xff] %v9891_v48  ;;  %v9897_v47 = vunpack.c.l.b16 %v5199_v12  ;;  %v963_v3 = vadd.f32 %v9629_v5, %v9682_v11  ;;  %v974_v54 = vadd.f32 %v9687_v16, %v9629_v5  ;;  %v9903_v19 = vunpack.c.l.b16 %v5200_v28 }
 0x147   : > { %v4793_v62 = vrot.slane %v4792_v59, 1  ;;  %v4785_v63 = vmax.f32 %v4783_v13, %v4784_v24  ;;  %v4779_v46 = vrot.slane %v4778_v51, 1  ;;  %v1451_v42 = vmax.f32 %v971_v17, 0.0 }
 0x148   : > { %v966_v9 = vadd.f32 %v9629_v5, %v9691_v21  ;;  %v4970_v43 = vpack.c.bf16 %v3226_v22, %v3226_v22  ;;  %v9910_v2 = vunpack.c.l.b16 %v4967_v23  ;;  %v9912_v11 = vmax.f32 %v4771_v44, %v4772_v61 }
 0x149   : > { %v4794_v37 = vmax.f32 %v4792_v59, %v4793_v62  ;;  %v987_v16 = vadd.f32 %v9699_v45, %v9629_v5  ;;  %v1449_v30 = vmax.f32 %v963_v3, 0.0  ;;  %v1452_v49 = vmax.f32 %v974_v54, 0.0 }
 0x14a   : > { %13853 = vst [vmem:[#allocation17_spill] sm:$0xff] %v9910_v2  ;;  %v1450_v40 = vmax.f32 %v966_v9, 0.0  ;;  %v979_v13 = vadd.f32 %v9629_v5, %v9701_v53  ;;  %v990_v14 = vadd.f32 %v9703_v58, %v9629_v5  ;;  %v982_v21 = vadd.f32 %v9629_v5, %v9705_v0 }
 0x14b   : > { %v5194_v25 = vpack.c.bf16 %v4794_v37, %v4794_v37  ;;  %v1455_v12 = vmax.f32 %v987_v16, 0.0  ;;  %v9922_v33 = vmax.f32 %v4778_v51, %v4779_v46  ;;  %v4786_v44 = vrot.slane %v4785_v63, 1  ;;  %v9932_v51 = vpop.f32.mrb[29].mxu0 }
 0x14c   : > { %v1588_v45 = vsel %vm1569_vm3, %v1451_v42, -inf  ;;  %v1453_v59 = vmax.f32 %v979_v13, 0.0  ;;  %v1456_v17 = vmax.f32 %v990_v14, 0.0  ;;  %v1454_v22 = vmax.f32 %v982_v21, 0.0  ;;  %13854 = vst [vmem:[#allocation18_spill] sm:$0xff] %v9932_v51  ;;  %v9938_v46 = vpop.f32.mrb[30].mxu0 }
 0x14d   : > { %v5706_v28 = vunpack.c.l.b16 %v5194_v25  ;;  %v1589_v24 = vsel %vm1569_vm3, %v1455_v12, -inf  ;;  %v1582_v58 = vsel %vm1569_vm3, %v1449_v30, -inf  ;;  %v1591_v23 = vsel %vm1569_vm3, %v1452_v49, -inf  ;;  %13855 = vst [vmem:[#allocation19_spill] sm:$0xff] %v9938_v46  ;;  %v9943_v16 = vpop.f32.mrb[31].mxu0 }
 0x14e   : > { %v1590_v0 = vmax.f32 %v1588_v45, %v1589_v24  ;;  %v1585_v61 = vsel %vm1569_vm3, %v1450_v40, -inf  ;;  %v1583_v62 = vsel %vm1569_vm3, %v1453_v59, -inf  ;;  %v1592_v3 = vsel %vm1569_vm3, %v1456_v17, -inf  ;;  %13856 = vst [vmem:[#allocation20_spill] sm:$0xff] %v9943_v16 }
 0x14f   : > { %v9928_v53 = vsel %vm5743_vm6, %v9796_v55, %v5706_v28  ;;  %v1586_v54 = vsel %vm1569_vm3, %v1454_v22, -inf  ;;  %v1584_v42 = vmax.f32 %v1582_v58, %v1583_v62  ;;  %v9941_v9 = vmax.f32 %v1591_v23, %v1592_v3 }
 0x150   : > { %v1928_v37 = vcombine.high %v1590_v0, %v1590_v0  ;;  %v1935_v55 = vrot.slane %v1590_v0, %v9638_v29  ;;  %v9945_v25 = vunpack.c.l.b16 %v4970_v43  ;;  %v9947_v30 = vmax.f32 %v4785_v63, %v4786_v44 }
 0x151   : > { %v5191_v49 = vpack.c.bf16 %v9912_v11, %v9912_v11  ;;  %v9951_v40 = vmax.f32 %v1585_v61, %v1586_v54  ;;  %v1894_v21 = vcombine.high %v1584_v42, %v1584_v42  ;;  %v1901_v43 = vrot.slane %v1584_v42, %v9638_v29 }
 0x152   : > { %v1942_v12 = vrot.slane %v1928_v37, %v9638_v29  ;;  %v1943_v13 = vcombine.high %v1935_v55, %v1935_v55  ;;  %v3339_v14 = vsel %vm3170_vm4, %v1935_v55, -inf  ;;  %v9960_v63 = vadd.f32 %v9724_v31, %v9629_v5 }
 0x153   : > { %v3340_v45 = vrot.slane %v3339_v14, 4  ;;  %v1908_v59 = vrot.slane %v1894_v21, %v9638_v29  ;;  %v1909_v23 = vcombine.high %v1901_v43, %v1901_v43  ;;  %v3283_v62 = vsel %vm3170_vm4, %v1901_v43, -inf }
 0x154   : > { %v1944_v44 = vcombine.high %v1942_v12, %v1942_v12  ;;  %v3346_v11 = vsel %vm3170_vm4, %v1943_v13, -inf  ;;  %v3353_v24 = vsel %vm3170_vm4, %v1942_v12, -inf  ;;  %v3284_v42 = vrot.slane %v3283_v62, 4 }
 0x155   : > { %v3341_v17 = vmax.f32 %v3339_v14, %v3340_v45  ;;  %v3347_v22 = vrot.slane %v3346_v11, 4  ;;  %v3354_v58 = vrot.slane %v3353_v24, 4  ;;  %v1910_v61 = vcombine.high %v1908_v59, %v1908_v59 }
 0x156   : > { %v3360_v0 = vsel %vm3170_vm4, %v1944_v44, -inf  ;;  %v3297_v3 = vsel %vm3170_vm4, %v1908_v59, -inf  ;;  %v3290_v12 = vsel %vm3170_vm4, %v1909_v23, -inf  ;;  %v3285_v44 = vmax.f32 %v3283_v62, %v3284_v42 }
 0x157   : > { %v3342_v31 = vrot.slane %v3341_v17, 2  ;;  %v3348_v54 = vmax.f32 %v3346_v11, %v3347_v22  ;;  %v3355_v37 = vmax.f32 %v3353_v24, %v3354_v58  ;;  %v3361_v55 = vrot.slane %v3360_v0, 4 }
 0x158   : > { %v3298_v13 = vrot.slane %v3297_v3, 4  ;;  %v3304_v14 = vsel %vm3170_vm4, %v1910_v61, -inf  ;;  %v3291_v1 = vrot.slane %v3290_v12, 4  ;;  %v3286_v24 = vrot.slane %v3285_v44, 2 }
 0x159   : > { %v3343_v21 = vmax.f32 %v3341_v17, %v3342_v31  ;;  %v3349_v45 = vrot.slane %v3348_v54, 2  ;;  %v3356_v34 = vrot.slane %v3355_v37, 2  ;;  %v3362_v6 = vmax.f32 %v3360_v0, %v3361_v55 }
 0x15a   : > { %v3299_v7 = vmax.f32 %v3297_v3, %v3298_v13  ;;  %v3305_v43 = vrot.slane %v3304_v14, 4  ;;  %v3292_v22 = vmax.f32 %v3290_v12, %v3291_v1  ;;  %v3287_v17 = vmax.f32 %v3285_v44, %v3286_v24 }
 0x15b   : > { %v3344_v28 = vrot.slane %v3343_v21, 1  ;;  %v3350_v59 = vmax.f32 %v3348_v54, %v3349_v45  ;;  %v3357_v16 = vmax.f32 %v3355_v37, %v3356_v34  ;;  %v3363_v11 = vrot.slane %v3362_v6, 2 }
 0x15c   : > { %v3300_v58 = vrot.slane %v3299_v7, 2  ;;  %v3306_v46 = vmax.f32 %v3304_v14, %v3305_v43  ;;  %v3293_v31 = vrot.slane %v3292_v22, 2  ;;  %v1945_v54 = vcombine.high %v9941_v9, %v9941_v9 }
 0x15d   : > { %v3345_v23 = vmax.f32 %v3343_v21, %v3344_v28  ;;  %v3351_v51 = vrot.slane %v3350_v59, 1  ;;  %v3358_v48 = vrot.slane %v3357_v16, 1  ;;  %v3364_v61 = vmax.f32 %v3362_v6, %v3363_v11 }
 0x15e   : > { %v3301_v2 = vmax.f32 %v3299_v7, %v3300_v58  ;;  %v3307_v0 = vrot.slane %v3306_v46, 2  ;;  %v3294_v34 = vmax.f32 %v3292_v22, %v3293_v31  ;;  %v1459_v1 = vmax.f32 %v9960_v63, 0.0 }
 0x15f   : > { %v3352_v62 = vmax.f32 %v3350_v59, %v3351_v51  ;;  %v3359_v55 = vmax.f32 %v3357_v16, %v3358_v48  ;;  %v3365_v3 = vrot.slane %v3364_v61, 1  ;;  %v9975_v28 = vadd.f32 %v9629_v5, %v9740_v35 }
 0x160   : > { %v3308_v37 = vmax.f32 %v3306_v46, %v3307_v0  ;;  %v9977_v42 = vunpack.c.l.b16 %v5191_v49  ;;  %v3288_v6 = vrot.slane %v3287_v17, 1  ;;  %v1952_v7 = vrot.slane %v9941_v9, %v9638_v29 }
 0x161   : > { %v9983_v48 = vadd.f32 %v9746_v8, %v9629_v5  ;;  %v3366_v51 = vmax.f32 %v3364_v61, %v3365_v3  ;;  %v4987_v16 = vpack.c.bf16 %v3345_v23, %v3345_v23  ;;  %v4988_v12 = vpack.c.bf16 %v3352_v62, %v3352_v62 }
 0x162   : > { %v3302_v46 = vrot.slane %v3301_v2, 1  ;;  %v13857_v35 = vpack.c.bf16 %v9922_v33, %v9922_v33  ;;  %v4989_v13 = vpack.c.bf16 %v3359_v55, %v3359_v55  ;;  %v1959_v14 = vrot.slane %v1945_v54, %v9638_v29 }
 0x163   : > { %v3295_v9 = vrot.slane %v3294_v34, 1  ;;  %v3309_v21 = vrot.slane %v3308_v37, 1  ;;  %v9994_v5 = vsel %vm1569_vm3, %v1459_v1, -inf  ;;  %v3289_v45 = vmax.f32 %v3287_v17, %v3288_v6 }
 0x164   : > { %v9990_v49 = vunpack.c.l.b16 %v13857_v35  ;;  %v1960_v44 = vcombine.high %v1952_v7, %v1952_v7  ;;  %v3367_v43 = vsel %vm3170_vm4, %v1952_v7, -inf  ;;  %v4990_v11 = vpack.c.bf16 %v3366_v51, %v3366_v51 }
 0x165   : > { %v9999_v33 = vunpack.c.l.b16 %v4987_v16  ;;  %v10001_v24 = vunpack.c.l.b16 %v4988_v12  ;;  %v3303_v22 = vmax.f32 %v3301_v2, %v3302_v46  ;;  %v10003_v58 = vunpack.c.l.b16 %v4989_v13  ;;  %v10013_v12 = vpop.f32.mrb[32].mxu0 }
 0x166   : > { %v3368_v23 = vrot.slane %v3367_v43, 4  ;;  %v3374_v61 = vsel %vm3170_vm4, %v1960_v44, -inf  ;;  %v3381_v31 = vsel %vm3170_vm4, %v1959_v14, -inf  ;;  %v3296_v0 = vmax.f32 %v3294_v34, %v3295_v9  ;;  %v10016_v13 = vpop.f32.mrb[33].mxu0 }
 0x167   : > { %13858 = vst [vmem:[#allocation21_spill] sm:$0xff] %v10001_v24  ;;  %13859 = vst [vmem:[#allocation22_spill] sm:$0xff] %v10003_v58  ;;  %v3310_v17 = vmax.f32 %v3308_v37, %v3309_v21  ;;  %v3375_v62 = vrot.slane %v3374_v61, 4  ;;  %v3382_v55 = vrot.slane %v3381_v31, 4  ;;  %v4979_v3 = vpack.c.bf16 %v3289_v45, %v3289_v45 }
 0x168   : > { %v3369_v54 = vmax.f32 %v3367_v43, %v3368_v23  ;;  %v1911_v1 = vcombine.high %v9951_v40, %v9951_v40  ;;  %v1918_v6 = vrot.slane %v9951_v40, %v9638_v29  ;;  %v10011_v2 = vunpack.c.l.b16 %v4990_v11  ;;  %v10019_v40 = vpop.f32.mrb[34].mxu0 }
 0x169   : > { %v4981_v7 = vpack.c.bf16 %v3303_v22, %v3303_v22  ;;  %v3376_v51 = vmax.f32 %v3374_v61, %v3375_v62  ;;  %v3383_v16 = vmax.f32 %v3381_v31, %v3382_v55  ;;  %v1961_v46 = vcombine.high %v1959_v14, %v1959_v14  ;;  %13861 = vst [vmem:[#allocation24_spill] sm:$0xff] %v10019_v40  ;;  %v10022_v61 = vpop.f32.mrb[35].mxu0 }
 0x16a   : > { %13860 = vst [vmem:[#allocation23_spill] sm:$0xff] %v10011_v2  ;;  %v3370_v34 = vrot.slane %v3369_v54, 2  ;;  %v1925_v37 = vrot.slane %v1911_v1, %v9638_v29  ;;  %v1926_v35 = vcombine.high %v1918_v6, %v1918_v6  ;;  %v4980_v9 = vpack.c.bf16 %v3296_v0, %v3296_v0  ;;  %13862 = vst [vmem:[#allocation25_spill] sm:$0xff] %v10022_v61 }
 0x16b   : > { %v3377_v21 = vrot.slane %v3376_v51, 2  ;;  %v3384_v45 = vrot.slane %v3383_v16, 2  ;;  %v3311_v44 = vsel %vm3170_vm4, %v1918_v6, -inf  ;;  %v4982_v1 = vpack.c.bf16 %v3310_v17, %v3310_v17  ;;  %v10032_v17 = vld [vmem:[%s13758_s2] ss:$0 sm:$0xff] }
 0x16c   : > { %v3371_v43 = vmax.f32 %v3369_v54, %v3370_v34  ;;  %v1927_v11 = vcombine.high %v1925_v37, %v1925_v37  ;;  %v3312_v22 = vrot.slane %v3311_v44, 4  ;;  %v3318_v23 = vsel %vm3170_vm4, %v1926_v35, -inf }
 0x16d   : > { %v3378_v14 = vmax.f32 %v3376_v51, %v3377_v21  ;;  %v3385_v31 = vmax.f32 %v3383_v16, %v3384_v45  ;;  %v3319_v62 = vrot.slane %v3318_v23, 4  ;;  %v3325_v55 = vsel %vm3170_vm4, %v1925_v37, -inf }
 0x16e   : > { %v3313_v0 = vmax.f32 %v3311_v44, %v3312_v22  ;;  %v3326_v63 = vrot.slane %v3325_v55, 4  ;;  %v3332_v59 = vsel %vm3170_vm4, %v1927_v11, -inf  ;;  %v5492_v6 = vunpack.c.l.b16 %v4980_v9 }
 0x16f   : > { %v10027_v8 = vsel %vm3170_vm4, %v1961_v46, -inf  ;;  %v3320_v54 = vmax.f32 %v3318_v23, %v3319_v62  ;;  %v3333_v34 = vrot.slane %v3332_v59, 4  ;;  %v3372_v2 = vrot.slane %v3371_v43, 1 }
 0x170   : > { %v3379_v35 = vrot.slane %v3378_v14, 1  ;;  %v3314_v58 = vrot.slane %v3313_v0, 2  ;;  %v3327_v61 = vmax.f32 %v3325_v55, %v3326_v63  ;;  %v5491_v51 = vunpack.c.l.b16 %v4979_v3 }
 0x171   : > { %v3386_v16 = vrot.slane %v3385_v31, 1  ;;  %v3334_v21 = vmax.f32 %v3332_v59, %v3333_v34  ;;  %v998_v37 = vadd.f32 %v10032_v17, %v9754_v39  ;;  %v10036_v9 = vunpack.c.l.b16 %v4981_v7 }
 0x172   : > { %v10038_v46 = vunpack.c.l.b16 %v4982_v1  ;;  %v3315_v45 = vmax.f32 %v3313_v0, %v3314_v58  ;;  %v3321_v44 = vrot.slane %v3320_v54, 2  ;;  %v10041_v11 = vsel %vm5731_vm5, %v5492_v6, %v5491_v51  ;;  %v10066_v51 = vpop.f32.mrb[36].mxu0 }
 0x173   : > { %13863 = vst [vmem:[#allocation26_spill] sm:$0xff] %v10036_v9  ;;  %13865 = vst [vmem:[#allocation28_spill] sm:$0xff] %v10041_v11  ;;  %v3328_v59 = vrot.slane %v3327_v61, 2  ;;  %v3335_v3 = vrot.slane %v3334_v21, 2  ;;  %v10044_v22 = vmax.f32 %v3371_v43, %v3372_v2  ;;  %v10046_v23 = vmax.f32 %v3378_v14, %v3379_v35 }
 0x174   : > { %13864 = vst [vmem:[#allocation27_spill] sm:$0xff] %v10038_v46  ;;  %v13866_v62 = vmax.f32 %v9975_v28, 0.0  ;;  %v13867_v7 = vmax.f32 %v9983_v48, 0.0  ;;  %v10054_v55 = vmax.f32 %v3385_v31, %v3386_v16  ;;  %v1458_v0 = vmax.f32 %v998_v37, 0.0  ;;  %13868 = vst [vmem:[#allocation29_spill] sm:$0xff] %v10066_v51 }
 0x175   : > { %v3336_v1 = vmax.f32 %v3334_v21, %v3335_v3  ;;  %v1019_v6 = vadd.f32 %v10032_v17, %v9776_v10  ;;  %v3316_v34 = vrot.slane %v3315_v45, 1  ;;  %v3322_v2 = vmax.f32 %v3320_v54, %v3321_v44 }
 0x176   : > { %v1594_v39 = vsel %vm1569_vm3, %v13866_v62, -inf  ;;  %v1603_v58 = vsel %vm1569_vm3, %v13867_v7, -inf  ;;  %v1011_v43 = vadd.f32 %v10032_v17, %v9780_v18  ;;  %v1022_v28 = vadd.f32 %v10032_v17, %v9782_v26 }
 0x177   : > { %v10062_v14 = vmax.f32 %v3327_v61, %v3328_v59  ;;  %v3337_v48 = vrot.slane %v3336_v1, 1  ;;  %v1463_v35 = vmax.f32 %v1019_v6, 0.0  ;;  %v1014_v31 = vadd.f32 %v10032_v17, %v9786_v36 }
 0x178   : > { %v1461_v16 = vmax.f32 %v1011_v43, 0.0  ;;  %v1464_v18 = vmax.f32 %v1022_v28, 0.0  ;;  %v1597_v26 = vsel %vm1569_vm3, %v1458_v0, -inf  ;;  %v10074_v44 = vmax.f32 %v3315_v45, %v3316_v34 }
 0x179   : > { %v3338_v21 = vmax.f32 %v3336_v1, %v3337_v48  ;;  %v1601_v61 = vsel %vm1569_vm3, %v1463_v35, -inf  ;;  %v1462_v37 = vmax.f32 %v1014_v31, 0.0  ;;  %v3323_v59 = vrot.slane %v3322_v2, 1 }
 0x17a   : > { %v1602_v36 = vmax.f32 %v9994_v5, %v1601_v61  ;;  %v1595_v3 = vsel %vm1569_vm3, %v1461_v16, -inf  ;;  %v1604_v43 = vsel %vm1569_vm3, %v1464_v18, -inf }
 0x17b   : > { %v4986_v7 = vpack.c.bf16 %v3338_v21, %v3338_v21  ;;  %v1596_v6 = vmax.f32 %v1594_v39, %v1595_v3  ;;  %v10081_v0 = vmax.f32 %v1603_v58, %v1604_v43  ;;  %v1598_v48 = vsel %vm1569_vm3, %v1462_v37, -inf }
 0x17c   : > { %v1996_v28 = vcombine.high %v1602_v36, %v1602_v36  ;;  %v2003_v1 = vrot.slane %v1602_v36, %v9638_v29  ;;  %v10085_v5 = vmax.f32 %v1597_v26, %v1598_v48  ;;  %v10087_v31 = vmax.f32 %v3322_v2, %v3323_v59 }
 0x17d   : > { %v5498_v45 = vunpack.c.l.b16 %v4986_v7  ;;  %v1962_v34 = vcombine.high %v1596_v6, %v1596_v6  ;;  %v1969_v35 = vrot.slane %v1596_v6, %v9638_v29 }
 0x17e   : > { %v2010_v16 = vrot.slane %v1996_v28, %v9638_v29  ;;  %v2011_v39 = vcombine.high %v2003_v1, %v2003_v1  ;;  %v3451_v18 = vsel %vm3170_vm4, %v2003_v1, -inf }
 0x17f   : > { %v10093_v21 = vsel %vm5743_vm6, %v9999_v33, %v5498_v45  ;;  %v3452_v58 = vrot.slane %v3451_v18, 4  ;;  %v1976_v61 = vrot.slane %v1962_v34, %v9638_v29  ;;  %v1977_v37 = vcombine.high %v1969_v35, %v1969_v35 }
 0x180   : > { %13869 = vst [vmem:[#allocation30_spill] sm:$0xff] %v10093_v21  ;;  %v2012_v36 = vcombine.high %v2010_v16, %v2010_v16  ;;  %v3458_v3 = vsel %vm3170_vm4, %v2011_v39, -inf  ;;  %v3465_v26 = vsel %vm3170_vm4, %v2010_v16, -inf  ;;  %v3395_v2 = vsel %vm3170_vm4, %v1969_v35, -inf }
 0x181   : > { %v3453_v59 = vmax.f32 %v3451_v18, %v3452_v58  ;;  %v3459_v7 = vrot.slane %v3458_v3, 4  ;;  %v3466_v6 = vrot.slane %v3465_v26, 4  ;;  %v1978_v43 = vcombine.high %v1976_v61, %v1976_v61  ;;  %v10103_v18 = vpop.f32.mrb[37].mxu0 }
 0x182   : > { %v3472_v28 = vsel %vm3170_vm4, %v2012_v36, -inf  ;;  %v3396_v1 = vrot.slane %v3395_v2, 4  ;;  %v3402_v33 = vsel %vm3170_vm4, %v1977_v37, -inf  ;;  %v3409_v48 = vsel %vm3170_vm4, %v1976_v61, -inf  ;;  %13870 = vst [vmem:[#allocation31_spill] sm:$0xff] %v10103_v18  ;;  %v10105_v51 = vpop.f32.mrb[38].mxu0 }
 0x183   : > { %v3454_v45 = vrot.slane %v3453_v59, 2  ;;  %v3460_v34 = vmax.f32 %v3458_v3, %v3459_v7  ;;  %v3467_v54 = vmax.f32 %v3465_v26, %v3466_v6  ;;  %v3473_v10 = vrot.slane %v3472_v28, 4  ;;  %13871 = vst [vmem:[#allocation32_spill] sm:$0xff] %v10105_v51  ;;  %v10107_v3 = vpop.f32.mrb[39].mxu0 }
 0x184   : > { %v3397_v39 = vmax.f32 %v3395_v2, %v3396_v1  ;;  %v3403_v62 = vrot.slane %v3402_v33, 4  ;;  %v3410_v16 = vrot.slane %v3409_v48, 4  ;;  %v3416_v35 = vsel %vm3170_vm4, %v1978_v43, -inf  ;;  %13872 = vst [vmem:[#allocation33_spill] sm:$0xff] %v10107_v3 }
 0x185   : > { %v3455_v58 = vmax.f32 %v3453_v59, %v3454_v45  ;;  %v3461_v63 = vrot.slane %v3460_v34, 2  ;;  %v3468_v46 = vrot.slane %v3467_v54, 2  ;;  %v3474_v36 = vmax.f32 %v3472_v28, %v3473_v10 }
 0x186   : > { %v3398_v37 = vrot.slane %v3397_v39, 2  ;;  %v3404_v24 = vmax.f32 %v3402_v33, %v3403_v62  ;;  %v3411_v61 = vmax.f32 %v3409_v48, %v3410_v16  ;;  %v3417_v21 = vrot.slane %v3416_v35, 4 }
 0x187   : > { %v3456_v26 = vrot.slane %v3455_v58, 1  ;;  %v3462_v2 = vmax.f32 %v3460_v34, %v3461_v63  ;;  %v3469_v7 = vmax.f32 %v3467_v54, %v3468_v46  ;;  %v3475_v6 = vrot.slane %v3474_v36, 2 }
 0x188   : > { %v3399_v1 = vmax.f32 %v3397_v39, %v3398_v37  ;;  %v3405_v43 = vrot.slane %v3404_v24, 2  ;;  %v3412_v9 = vrot.slane %v3411_v61, 2  ;;  %v3418_v18 = vmax.f32 %v3416_v35, %v3417_v21 }
 0x189   : > { %v3457_v59 = vmax.f32 %v3455_v58, %v3456_v26  ;;  %v3463_v45 = vrot.slane %v3462_v2, 1  ;;  %v3470_v11 = vrot.slane %v3469_v7, 1  ;;  %v3476_v10 = vmax.f32 %v3474_v36, %v3475_v6 }
 0x18a   : > { %v3400_v28 = vrot.slane %v3399_v1, 1  ;;  %v3406_v51 = vmax.f32 %v3404_v24, %v3405_v43  ;;  %v3413_v40 = vmax.f32 %v3411_v61, %v3412_v9  ;;  %v3419_v62 = vrot.slane %v3418_v18, 2 }
 0x18b   : > { %v13873_v33 = vrot.slane %v10027_v8, 4  ;;  %v13874_v46 = vrot.slane %v10062_v14, 1  ;;  %v4983_v54 = vpack.c.bf16 %v10074_v44, %v10074_v44  ;;  %v3477_v21 = vrot.slane %v3476_v10, 1 }
 0x18c   : > { %v4984_v34 = vpack.c.bf16 %v10087_v31, %v10087_v31  ;;  %v3464_v24 = vmax.f32 %v3462_v2, %v3463_v45  ;;  %v3471_v9 = vmax.f32 %v3469_v7, %v3470_v11  ;;  %v5003_v39 = vpack.c.bf16 %v3457_v59, %v3457_v59 }
 0x18d   : > { %v10112_v48 = vmax.f32 %v10027_v8, %v13873_v33  ;;  %v10117_v63 = vmax.f32 %v10062_v14, %v13874_v46  ;;  %v13875_v8 = vpack.c.bf16 %v10044_v22, %v10044_v22  ;;  %v3420_v14 = vmax.f32 %v3418_v18, %v3419_v62 }
 0x18e   : > { %v2013_v58 = vcombine.high %v10081_v0, %v10081_v0  ;;  %v13876_v44 = vpack.c.bf16 %v10046_v23, %v10046_v23  ;;  %v10137_v31 = vmax.f32 %v3399_v1, %v3400_v28  ;;  %v3407_v11 = vrot.slane %v3406_v51, 1 }
 0x18f   : > { %v10128_v35 = vunpack.c.l.b16 %v13875_v8  ;;  %v3414_v37 = vrot.slane %v3413_v40, 1  ;;  %v10141_v26 = vunpack.c.l.b16 %v4983_v54  ;;  %v10143_v22 = vmax.f32 %v3476_v10, %v3477_v21 }
 0x190   : > { %v10135_v36 = vunpack.c.l.b16 %v13876_v44  ;;  %v2020_v18 = vrot.slane %v10081_v0, %v9638_v29  ;;  %v10147_v2 = vunpack.c.l.b16 %v4984_v34  ;;  %v5004_v7 = vpack.c.bf16 %v3464_v24, %v3464_v24 }
 0x191   : > { %v5005_v23 = vpack.c.bf16 %v3471_v9, %v3471_v9  ;;  %v10149_v6 = vunpack.c.l.b16 %v5003_v39  ;;  %v3421_v1 = vrot.slane %v3420_v14, 1  ;;  %v2027_v43 = vrot.slane %v2013_v58, %v9638_v29 }
 0x192   : > { %v2028_v59 = vcombine.high %v2020_v18, %v2020_v18  ;;  %v3479_v45 = vsel %vm3170_vm4, %v2020_v18, -inf  ;;  %v3408_v28 = vmax.f32 %v3406_v51, %v3407_v11  ;;  %v10153_v62 = vmax.f32 %v3413_v40, %v3414_v37 }
 0x193   : > { %v4995_v10 = vpack.c.bf16 %v10137_v31, %v10137_v31  ;;  %v3480_v33 = vrot.slane %v3479_v45, 4  ;;  %v3493_v54 = vsel %vm3170_vm4, %v2027_v43, -inf  ;;  %v1979_v21 = vcombine.high %v10085_v5, %v10085_v5 }
 0x194   : > { %v3486_v46 = vsel %vm3170_vm4, %v2028_v59, -inf  ;;  %v10163_v34 = vunpack.c.l.b16 %v5004_v7  ;;  %v10165_v24 = vunpack.c.l.b16 %v5005_v23  ;;  %v10167_v9 = vmax.f32 %v3420_v14, %v3421_v1 }
 0x195   : > { %v3481_v40 = vmax.f32 %v3479_v45, %v3480_v33  ;;  %v3487_v51 = vrot.slane %v3486_v46, 4  ;;  %v3494_v39 = vrot.slane %v3493_v54, 4  ;;  %v1986_v8 = vrot.slane %v10085_v5, %v9638_v29 }
 0x196   : > { %13877 = vst [vmem:[#allocation34_spill] sm:$0xff] %v10163_v34  ;;  %13878 = vst [vmem:[#allocation35_spill] sm:$0xff] %v10165_v24  ;;  %v1993_v58 = vrot.slane %v1979_v21, %v9638_v29  ;;  %v4996_v44 = vpack.c.bf16 %v3408_v28, %v3408_v28  ;;  %v2029_v31 = vcombine.high %v2027_v43, %v2027_v43 }
 0x197   : > { %v3482_v11 = vrot.slane %v3481_v40, 2  ;;  %v3488_v37 = vmax.f32 %v3486_v46, %v3487_v51  ;;  %v3495_v18 = vmax.f32 %v3493_v54, %v3494_v39  ;;  %v1994_v59 = vcombine.high %v1986_v8, %v1986_v8 }
 0x198   : > { %v1995_v7 = vcombine.high %v1993_v58, %v1993_v58  ;;  %v3423_v23 = vsel %vm3170_vm4, %v1986_v8, -inf  ;;  %v3437_v61 = vsel %vm3170_vm4, %v1993_v58, -inf  ;;  %v13766_v39 = vmov 0  }
 0x199   : > { %v3483_v16 = vmax.f32 %v3481_v40, %v3482_v11  ;;  %v3489_v45 = vrot.slane %v3488_v37, 2  ;;  %v3424_v33 = vrot.slane %v3423_v23, 4  ;;  %v3496_v14 = vrot.slane %v3495_v18, 2 }
 0x19a   : > { %v3430_v1 = vsel %vm3170_vm4, %v1994_v59, -inf  ;;  %v3444_v5 = vsel %vm3170_vm4, %v1995_v7, -inf  ;;  %v3438_v54 = vrot.slane %v3437_v61, 4  ;;  %v10177_v8 = vrot.slane %v13766_v39, 1 }
 0x19b   : > { %v3484_v21 = vrot.slane %v3483_v16, 1  ;;  %v3490_v28 = vmax.f32 %v3488_v37, %v3489_v45  ;;  %v3425_v43 = vmax.f32 %v3423_v23, %v3424_v33  ;;  %v3431_v0 = vrot.slane %v3430_v1, 4 }
 0x19c   : > { %v3497_v46 = vmax.f32 %v3495_v18, %v3496_v14  ;;  %v3445_v51 = vrot.slane %v3444_v5, 4  ;;  %13879 = vst [vmem:[#allocation36_spill] sm:$0xff] %v10177_v8  ;;  %v3500_v11 = vsel %vm3170_vm4, %v2029_v31, -inf  ;;  %v3439_v3 = vmax.f32 %v3437_v61, %v3438_v54  ;;  %6362 = vrot.lane.b32.xlu1 %v10177_v8, %s9445_s7  ;;  %6330 = vrot.lane.b32.xlu0 %v10177_v8, %s9446_s8 }
 0x19d   : > { %v3485_v40 = vmax.f32 %v3483_v16, %v3484_v21  ;;  %v3426_v24 = vrot.slane %v3425_v43, 2  ;;  %v3432_v59 = vmax.f32 %v3430_v1, %v3431_v0  ;;  %v3491_v34 = vrot.slane %v3490_v28, 1 }
 0x19e   : > { %v3498_v58 = vrot.slane %v3497_v46, 1  ;;  %v3446_v7 = vmax.f32 %v3444_v5, %v3445_v51  ;;  %v4997_v37 = vpack.c.bf16 %v10153_v62, %v10153_v62  ;;  %v1035_v0 = vadd.f32 %v10032_v17, %v9807_v50 }
 0x19f   : > { %v3427_v16 = vmax.f32 %v3425_v43, %v3426_v24  ;;  %v3433_v18 = vrot.slane %v3432_v59, 2  ;;  %v4998_v61 = vpack.c.bf16 %v10167_v9, %v10167_v9  ;;  %v5507_v31 = vunpack.c.l.b16 %v4995_v10 }
 0x1a0   : > { %v3440_v23 = vrot.slane %v3439_v3, 2  ;;  %v3447_v45 = vrot.slane %v3446_v7, 2  ;;  %v5508_v33 = vunpack.c.l.b16 %v4996_v44  ;;  %v3501_v14 = vrot.slane %v3500_v11, 4 }
 0x1a1   : > { %v3428_v1 = vrot.slane %v3427_v16, 1  ;;  %v3434_v5 = vmax.f32 %v3432_v59, %v3433_v18  ;;  %v10190_v21 = vmax.f32 %v3490_v28, %v3491_v34  ;;  %v10192_v54 = vmax.f32 %v3497_v46, %v3498_v58  ;;  %v10236_v18 = vpop.f32.mrb[40].mxu0 }
 0x1a2   : > { %v5007_v62 = vpack.c.bf16 %v3485_v40, %v3485_v40  ;;  %v3448_v24 = vmax.f32 %v3446_v7, %v3447_v45  ;;  %v13880_v43 = vpack.c.bf16 %v10143_v22, %v10143_v22  ;;  %v10199_v9 = vmax.f32 %v3439_v3, %v3440_v23 }
 0x1a3   : > { %v3435_v51 = vrot.slane %v3434_v5, 1  ;;  %v1467_v10 = vmax.f32 %v1035_v0, 0.0  ;;  %v10201_v39 = vunpack.c.l.b16 %v4997_v37  ;;  %v10203_v44 = vmax.f32 %v3427_v16, %v3428_v1 }
 0x1a4   : > { %v10197_v50 = vunpack.c.l.b16 %v13880_v43  ;;  %v3449_v59 = vrot.slane %v3448_v24, 1  ;;  %v10207_v34 = vadd.f32 %v10032_v17, %v9815_v57  ;;  %v10209_v28 = vunpack.c.l.b16 %v4998_v61 }
 0x1a5   : > { %v10212_v46 = vsel %vm5731_vm5, %v5508_v33, %v5507_v31  ;;  %v10214_v22 = vmax.f32 %v3500_v11, %v3501_v14  ;;  %v10218_v3 = vadd.f32 %v10032_v17, %v9828_v20  ;;  %v10224_v7 = vunpack.c.l.b16 %v5007_v62  ;;  %v10244_v33 = vpop.f32.mrb[41].mxu0 }
 0x1a6   : > { %v3450_v57 = vmax.f32 %v3448_v24, %v3449_v59  ;;  %v10226_v37 = vmax.f32 %v3434_v5, %v3435_v51  ;;  %v3442_v16 = vrot.slane %v10199_v9, 1  ;;  %v10230_v11 = vsel %vm1569_vm3, %v1467_v10, -inf  ;;  %v10250_v5 = vpop.f32.mrb[42].mxu0 }
 0x1a7   : > { %13881 = vst [vmem:[#allocation37_spill] sm:$0xff] %v10214_v22  ;;  %13882 = vst [vmem:[#allocation38_spill] sm:$0xff] %v10224_v7  ;;  %v10234_v20 = vadd.f32 %v10032_v17, %v9830_v38  ;;  %v1465_v31 = vmax.f32 %v10207_v34, 0.0  ;;  %v13883_v23 = vpack.c.bf16 %v9947_v30, %v9947_v30  ;;  %v1468_v14 = vmax.f32 %v10218_v3, 0.0  ;;  %v10255_v24 = vpop.f32.mrb[43].mxu0 }
 0x1a8   : > { %v5002_v61 = vpack.c.bf16 %v3450_v57, %v3450_v57  ;;  %v13884_v38 = vpack.c.bf16 %v9883_v41, %v9883_v41  ;;  %v5921_v30 = vsel %vm5733_vm7, %v9851_v60, %v9857_v32  ;;  %v5927_v41 = vsel %vm5731_vm5, %v9809_v52, %v9928_v53  ;;  %v10262_v51 = vpop.f32.mrb[44].mxu0  ;;  %v13885_v32 = vld [vmem:[#allocation7_spill] sm:$0xff]  ;;  %v13887_v53 = vld [vmem:[#allocation8_spill] sm:$0xff] }
 0x1a9   : > { %v5705_v45 = vunpack.c.l.b16 %v13883_v23  ;;  %v5922_v43 = vsel %vm5735_vm8, %v9853_v15, %v5921_v30  ;;  %v5928_v59 = vsel %vm5733_vm7, %v13885_v32, %v5927_v41  ;;  %v13886_v57 = vrot.slane %v9889_v56, 1  ;;  %v13888_v23 = vld [vmem:[#allocation12_spill] sm:$0xff]  ;;  %v13892_v32 = vld [vmem:[#allocation9_spill] sm:$0xff] }
 0x1aa   : > { %v5713_v1 = vunpack.c.l.b16 %v13884_v38  ;;  %v5514_v62 = vunpack.c.l.b16 %v5002_v61  ;;  %v5923_v60 = vsel %vm5737_vm9, %v9977_v42, %v5922_v43  ;;  %v5929_v61 = vsel %vm5735_vm8, %v13887_v53, %v5928_v59 }
 0x1ab   : > { %v3219_v15 = vmax.f32 %v9889_v56, %v13886_v57  ;;  %v5924_v52 = vsel %vm5739_vm10, %v9990_v49, %v5923_v60  ;;  %v13890_v56 = vpack.c.bf16 %v9887_v4, %v9887_v4  ;;  %v13891_v60 = vld [vmem:[#allocation11_spill] sm:$0xff]  ;;  %v13895_v4 = vld [vmem:[#allocation10_spill] sm:$0xff] }
 0x1ac   : > { %v10266_v10 = vsel %vm5743_vm6, %v10149_v6, %v5514_v62  ;;  %v13889_v6 = vrot.slane %v13888_v23, 1  ;;  %v5925_v42 = vsel %vm5741_vm11, %v5705_v45, %v5924_v52  ;;  %v5930_v62 = vsel %vm5737_vm9, %v9897_v47, %v5929_v61  ;;  %v13893_v57 = vld [vmem:[#allocation3_spill] sm:$0xff]  ;;  %v13896_v61 = vld [vmem:[#allocation4_spill] sm:$0xff] }
 0x1ad   : > { %v4969_v30 = vpack.c.bf16 %v3219_v15, %v3219_v15  ;;  %v5480_v43 = vunpack.c.l.b16 %v13890_v56  ;;  %v5931_v49 = vsel %vm5739_vm10, %v9903_v19, %v5930_v62  ;;  %v5734_v59 = vsel %vm5733_vm7, %v13892_v32, %v13891_v60  ;;  %v13898_v56 = vld [vmem:[#allocation5_spill] sm:$0xff]  ;;  %v13902_v32 = vld [vmem:[#allocation15_spill] sm:$0xff] }
 0x1ae   : > { %v3275_v38 = vmax.f32 %v13888_v23, %v13889_v6  ;;  %v5744_v45 = vsel %vm5743_vm6, %v13893_v57, %v9945_v25  ;;  %v5932_v52 = vsel %vm5741_vm11, %v5713_v1, %v5931_v49  ;;  %v13894_v47 = vpack.c.bf16 %v9872_v27, %v9872_v27  ;;  %v13901_v49 = vld [vmem:[#allocation6_spill] sm:$0xff] }
 0x1af   : > { %v5736_v53 = vsel %vm5735_vm8, %v13895_v4, %v5734_v59  ;;  %v5745_v19 = vsel %vm5731_vm5, %v13896_v61, %v5744_v45  ;;  %v5974_v23 = vpack.c.b16 %v5932_v52, %v5925_v42  ;;  %v5481_v6 = vunpack.c.l.b16 %v4969_v30  ;;  %v13903_v30 = vld [vmem:[#allocation13_spill] sm:$0xff] }
 0x1b0   : > { %v4977_v41 = vpack.c.bf16 %v3275_v38, %v3275_v38  ;;  %v5488_v15 = vunpack.c.l.b16 %v13894_v47  ;;  %v13897_v38 = vld [vmem:[#allocation17_spill] sm:$0xff]  ;;  %v5746_v25 = vsel %vm5733_vm7, %v13898_v56, %v5745_v19  ;;  %v1051_v42 = vadd.f32 %v10032_v17, %v13902_v32  ;;  %v13905_v47 = vld [vmem:[#allocation16_spill] sm:$0xff]  ;;  %v13906_v19 = vld [vmem:[#allocation18_spill] sm:$0xff] }
 0x1b1   : > { %v5738_v62 = vsel %vm5737_vm9, %v13897_v38, %v5736_v53  ;;  %v5747_v60 = vsel %vm5735_vm8, %v13901_v49, %v5746_v25  ;;  %v3279_v59 = vrot.slane %v13903_v30, 2  ;;  %v10322_v57 = vsel %vm10310_vm14, 0, %v5974_v23  ;;  %v13908_v56 = vld [vmem:[#allocation20_spill] sm:$0xff] }
 0x1b2   : > { %v5740_v27 = vsel %vm5739_vm10, %v5480_v43, %v5738_v62  ;;  %13904 = vst [vmem:[#allocation7_spill] sm:$0xff] %v10322_v57  ;;  %v5489_v45 = vunpack.c.l.b16 %v4977_v41  ;;  %v5748_v4 = vsel %vm5737_vm9, %v13905_v47, %v5747_v60  ;;  %6484 = vrot.lane.b32.xlu0 %v10322_v57, %s9445_s7  ;;  %v1471_v53 = vmax.f32 %v1051_v42, 0.0 }
 0x1b3   : > { %v5742_v52 = vsel %vm5741_vm11, %v5481_v6, %v5740_v27  ;;  %v5749_v43 = vsel %vm5739_vm10, %v5488_v15, %v5748_v4  ;;  %v3280_v61 = vmax.f32 %v13903_v30, %v3279_v59  ;;  %v1043_v38 = vadd.f32 %v10032_v17, %v13906_v19  ;;  %v13907_v6 = vld [vmem:[#allocation19_spill] sm:$0xff] }
 0x1b4   : > { %v10334_v23 = vmax.f32 %v10199_v9, %v3442_v16  ;;  %v5750_v41 = vsel %vm5741_vm11, %v5489_v45, %v5749_v43  ;;  %v1054_v62 = vadd.f32 %v10032_v17, %v13907_v6  ;;  %v10341_v25 = vadd.f32 %v10032_v17, %v13908_v56  ;;  %v10372_v56 = vpop.f32.mrb[45].mxu0 }
 0x1b5   : > { %v5946_v27 = vpack.c.b16 %v5750_v41, %v5742_v52  ;;  %v1613_v15 = vsel %vm1569_vm3, %v1471_v53, -inf  ;;  %v3281_v49 = vrot.slane %v3280_v61, 1  ;;  %v1469_v60 = vmax.f32 %v1043_v38, 0.0  ;;  %13910 = vst [vmem:[#allocation12_spill] sm:$0xff] %v10372_v56 }
 0x1b6   : > { %v1606_v32 = vsel %vm1569_vm3, %v1465_v31, -inf  ;;  %v1614_v16 = vmax.f32 %v10230_v11, %v1613_v15  ;;  %v1472_v42 = vmax.f32 %v1054_v62, 0.0  ;;  %v1615_v30 = vsel %vm1569_vm3, %v1468_v14, -inf }
 0x1b7   : > { %v10354_v59 = vsel %vm10310_vm14, 0, %v5946_v27  ;;  %v3282_v45 = vmax.f32 %v3280_v61, %v3281_v49  ;;  %v1607_v52 = vsel %vm1569_vm3, %v1469_v60, -inf }
 0x1b8   : > { %13909 = vst [vmem:[#allocation8_spill] sm:$0xff] %v10354_v59  ;;  %6394 = vrot.lane.b32.xlu1 %v10354_v59, %s9447_s9  ;;  %v2064_v34 = vcombine.high %v1614_v16, %v1614_v16  ;;  %v2071_v31 = vrot.slane %v1614_v16, %v9638_v29  ;;  %v1608_v11 = vmax.f32 %v1606_v32, %v1607_v52  ;;  %v6268_v3 = vrot.slane %v10354_v59, 1 }
 0x1b9   : > { %v8881_v47 = vpack.c.bf16 %v3282_v45, %v3282_v45  ;;  %v1616_v14 = vsel %vm1569_vm3, %v1472_v42, -inf }
 0x1ba   : > { %v2078_v43 = vrot.slane %v2064_v34, %v9638_v29  ;;  %v2079_v53 = vcombine.high %v2071_v31, %v2071_v31  ;;  %v3563_v61 = vsel %vm3170_vm4, %v2071_v31, -inf  ;;  %v2030_v19 = vcombine.high %v1608_v11, %v1608_v11 }
 0x1bb   : > { %v3564_v38 = vrot.slane %v3563_v61, 4  ;;  %v10367_v41 = vsel %vm10310_vm14, %v8881_v47, 0  ;;  %v2037_v6 = vrot.slane %v1608_v11, %v9638_v29  ;;  %v10370_v62 = vmax.f32 %v1615_v30, %v1616_v14  ;;  %v10381_v11 = vpop.f32.mrb[46].mxu0 }
 0x1bc   : > { %v2080_v27 = vcombine.high %v2078_v43, %v2078_v43  ;;  %v3570_v15 = vsel %vm3170_vm4, %v2079_v53, -inf  ;;  %v3577_v49 = vsel %vm3170_vm4, %v2078_v43, -inf  ;;  %v6269_v60 = vrot.slane %v10367_v41, 1  ;;  %13911 = vst [vmem:[#allocation11_spill] sm:$0xff] %v10381_v11 }
 0x1bd   : > { %v3565_v32 = vmax.f32 %v3563_v61, %v3564_v38  ;;  %v3571_v16 = vrot.slane %v3570_v15, 4  ;;  %v3578_v42 = vrot.slane %v3577_v49, 4  ;;  %v2044_v45 = vrot.slane %v2030_v19, %v9638_v29  ;;  %v10385_v61 = vpop.f32.mrb[47].mxu0 }
 0x1be   : > { %v3584_v52 = vsel %vm3170_vm4, %v2080_v27, -inf  ;;  %v6270_v34 = vsel %vm6265_vm15, %v6268_v3, %v6269_v60  ;;  %v2045_v30 = vcombine.high %v2037_v6, %v2037_v6  ;;  %v3507_v31 = vsel %vm3170_vm4, %v2037_v6, -inf  ;;  %13912 = vst [vmem:[#allocation9_spill] sm:$0xff] %v10385_v61 }
 0x1bf   : > { %v3566_v47 = vrot.slane %v3565_v32, 2  ;;  %v3572_v14 = vmax.f32 %v3570_v15, %v3571_v16  ;;  %v3579_v53 = vmax.f32 %v3577_v49, %v3578_v42  ;;  %v3585_v43 = vrot.slane %v3584_v52, 4  ;;  %6364 = vrot.lane.b32.xlu1 %v6270_v34, %s9445_s7  ;;  %6426 = vrot.lane.b32.xlu0 %v6270_v34, %s9446_s8 }
 0x1c0   : > { %v2046_v19 = vcombine.high %v2044_v45, %v2044_v45  ;;  %v3508_v38 = vrot.slane %v3507_v31, 4  ;;  %v3514_v27 = vsel %vm3170_vm4, %v2045_v30, -inf  ;;  %v3521_v3 = vsel %vm3170_vm4, %v2044_v45, -inf }
 0x1c1   : > { %v3567_v60 = vmax.f32 %v3565_v32, %v3566_v47  ;;  %v3573_v6 = vrot.slane %v3572_v14, 2  ;;  %v3580_v58 = vrot.slane %v3579_v53, 2  ;;  %v3586_v4 = vmax.f32 %v3584_v52, %v3585_v43 }
 0x1c2   : > { %v3509_v9 = vmax.f32 %v3507_v31, %v3508_v38  ;;  %v3515_v15 = vrot.slane %v3514_v27, 4  ;;  %v3522_v49 = vrot.slane %v3521_v3, 4  ;;  %v3528_v16 = vsel %vm3170_vm4, %v2046_v19, -inf }
 0x1c3   : > { %v3568_v42 = vrot.slane %v3567_v60, 1  ;;  %v3574_v0 = vmax.f32 %v3572_v14, %v3573_v6  ;;  %v3581_v34 = vmax.f32 %v3579_v53, %v3580_v58  ;;  %v3587_v40 = vrot.slane %v3586_v4, 2 }
 0x1c4   : > { %v3510_v8 = vrot.slane %v3509_v9, 2  ;;  %v3516_v61 = vmax.f32 %v3514_v27, %v3515_v15  ;;  %v3523_v11 = vmax.f32 %v3521_v3, %v3522_v49  ;;  %v3529_v56 = vrot.slane %v3528_v16, 4 }
 0x1c5   : > { %v3569_v30 = vmax.f32 %v3567_v60, %v3568_v42  ;;  %v3575_v7 = vrot.slane %v3574_v0, 1  ;;  %v3582_v45 = vrot.slane %v3581_v34, 1  ;;  %v3588_v32 = vmax.f32 %v3586_v4, %v3587_v40 }
 0x1c6   : > { %v3511_v47 = vmax.f32 %v3509_v9, %v3510_v8  ;;  %v3517_v22 = vrot.slane %v3516_v61, 2  ;;  %v3524_v52 = vrot.slane %v3523_v11, 2  ;;  %v3530_v31 = vmax.f32 %v3528_v16, %v3529_v56 }
 0x1c7   : > { %v13913_v43 = vpack.c.bf16 %v10190_v21, %v10190_v21  ;;  %v5000_v58 = vpack.c.bf16 %v10226_v37, %v10226_v37  ;;  %v3576_v14 = vmax.f32 %v3574_v0, %v3575_v7  ;;  %v3589_v53 = vrot.slane %v3588_v32, 1 }
 0x1c8   : > { %v3583_v38 = vmax.f32 %v3581_v34, %v3582_v45  ;;  %v3518_v27 = vmax.f32 %v3516_v61, %v3517_v22  ;;  %v3525_v3 = vmax.f32 %v3523_v11, %v3524_v52  ;;  %v3531_v60 = vrot.slane %v3530_v31, 2 }
 0x1c9   : > { %v10393_v19 = vunpack.c.l.b16 %v13913_v43  ;;  %v13914_v40 = vpack.c.bf16 %v10203_v44, %v10203_v44  ;;  %v13915_v21 = vmax.f32 %v10234_v20, 0.0  ;;  %v3512_v56 = vrot.slane %v3511_v47, 1 }
 0x1ca   : > { %v3590_v37 = vmax.f32 %v3588_v32, %v3589_v53  ;;  %v5019_v7 = vpack.c.bf16 %v3569_v30, %v3569_v30  ;;  %v3532_v0 = vmax.f32 %v3530_v31, %v3531_v60  ;;  %v13916_v22 = vmax.f32 %v10341_v25, 0.0 }
 0x1cb   : > { %v10402_v9 = vunpack.c.l.b16 %v13914_v40  ;;  %v1609_v4 = vsel %vm1569_vm3, %v13915_v21, -inf  ;;  %v10410_v61 = vunpack.c.l.b16 %v5000_v58  ;;  %v3519_v6 = vrot.slane %v3518_v27, 1 }
 0x1cc   : > { %v1610_v11 = vsel %vm1569_vm3, %v13916_v22, -inf  ;;  %v2081_v44 = vcombine.high %v10370_v62, %v10370_v62  ;;  %v10416_v15 = vadd.f32 %v10032_v17, %v10013_v12  ;;  %v5020_v20 = vpack.c.bf16 %v3576_v14, %v3576_v14 }
 0x1cd   : > { %v5021_v49 = vpack.c.bf16 %v3583_v38, %v3583_v38  ;;  %v3526_v16 = vrot.slane %v3525_v3, 1  ;;  %v10420_v42 = vadd.f32 %v10032_v17, %v10016_v13  ;;  %v10422_v25 = vmax.f32 %v3511_v47, %v3512_v56 }
 0x1ce   : > { %v2088_v34 = vrot.slane %v10370_v62, %v9638_v29  ;;  %v2095_v30 = vrot.slane %v2081_v44, %v9638_v29  ;;  %v1611_v45 = vmax.f32 %v1609_v4, %v1610_v11  ;;  %v5022_v32 = vpack.c.bf16 %v3590_v37, %v3590_v37 }
 0x1cf   : > { %v10427_v52 = vunpack.c.l.b16 %v5019_v7  ;;  %v3533_v12 = vrot.slane %v3532_v0, 1  ;;  %v6055_v31 = vshrl.u32 %v10354_v59, 16  ;;  %v3520_v43 = vmax.f32 %v3518_v27, %v3519_v6 }
 0x1d0   : > { %v2096_v58 = vcombine.high %v2088_v34, %v2088_v34  ;;  %v3591_v14 = vsel %vm3170_vm4, %v2088_v34, -inf  ;;  %v3605_v13 = vsel %vm3170_vm4, %v2095_v30, -inf  ;;  %v10432_v47 = vunpack.c.l.b16 %v5020_v20 }
 0x1d1   : > { %v10434_v53 = vunpack.c.l.b16 %v5021_v49  ;;  %v10436_v62 = vmax.f32 %v3525_v3, %v3526_v16  ;;  %v3592_v38 = vrot.slane %v3591_v14, 4  ;;  %v5011_v60 = vpack.c.bf16 %v10422_v25, %v10422_v25 }
 0x1d2   : > { %13917 = vst [vmem:[#allocation3_spill] sm:$0xff] %v10432_v47  ;;  %v3598_v40 = vsel %vm3170_vm4, %v2096_v58, -inf  ;;  %v3606_v21 = vrot.slane %v3605_v13, 4  ;;  %v2047_v4 = vcombine.high %v1611_v45, %v1611_v45  ;;  %v10441_v27 = vunpack.c.l.b16 %v5022_v32  ;;  %v10456_v47 = vpop.f32.mrb[48].mxu0 }
 0x1d3   : > { %13918 = vst [vmem:[#allocation10_spill] sm:$0xff] %v10434_v53  ;;  %v10443_v56 = vmax.f32 %v3532_v0, %v3533_v12  ;;  %v3593_v37 = vmax.f32 %v3591_v14, %v3592_v38  ;;  %v3599_v7 = vrot.slane %v3598_v40, 4  ;;  %v5012_v22 = vpack.c.bf16 %v3520_v43, %v3520_v43 }
 0x1d4   : > { %13919 = vst [vmem:[#allocation4_spill] sm:$0xff] %v10441_v27  ;;  %v3607_v11 = vmax.f32 %v3605_v13, %v3606_v21  ;;  %v2054_v6 = vrot.slane %v1611_v45, %v9638_v29  ;;  %v2061_v3 = vrot.slane %v2047_v4, %v9638_v29  ;;  %v5013_v44 = vpack.c.bf16 %v10436_v62, %v10436_v62 }
 0x1d5   : > { %v2097_v20 = vcombine.high %v2095_v30, %v2095_v30  ;;  %v3594_v49 = vrot.slane %v3593_v37, 2  ;;  %v3600_v16 = vmax.f32 %v3598_v40, %v3599_v7  ;;  %v6057_v0 = vshll.u32 %v10354_v59, 16 }
 0x1d6   : > { %v3608_v25 = vrot.slane %v3607_v11, 2  ;;  %v2062_v34 = vcombine.high %v2054_v6, %v2054_v6  ;;  %v2063_v32 = vcombine.high %v2061_v3, %v2061_v3  ;;  %v3535_v43 = vsel %vm3170_vm4, %v2054_v6, -inf }
 0x1d7   : > { %v3595_v12 = vmax.f32 %v3593_v37, %v3594_v49  ;;  %v3601_v58 = vrot.slane %v3600_v16, 2  ;;  %v3549_v45 = vsel %vm3170_vm4, %v2061_v3, -inf  ;;  %v3536_v13 = vrot.slane %v3535_v43, 4 }
 0x1d8   : > { %v3609_v14 = vmax.f32 %v3607_v11, %v3608_v25  ;;  %v3542_v38 = vsel %vm3170_vm4, %v2062_v34, -inf  ;;  %v3550_v62 = vrot.slane %v3549_v45, 4  ;;  %v3556_v4 = vsel %vm3170_vm4, %v2063_v32, -inf }
 0x1d9   : > { %v3596_v30 = vrot.slane %v3595_v12, 1  ;;  %v3602_v21 = vmax.f32 %v3600_v16, %v3601_v58  ;;  %v3543_v40 = vrot.slane %v3542_v38, 4  ;;  %v3612_v7 = vsel %vm3170_vm4, %v2097_v20, -inf }
 0x1da   : > { %v3537_v8 = vmax.f32 %v3535_v43, %v3536_v13  ;;  %v3551_v59 = vmax.f32 %v3549_v45, %v3550_v62  ;;  %v3557_v37 = vrot.slane %v3556_v4, 4  ;;  %v3610_v49 = vrot.slane %v3609_v14, 1  ;;  %v10460_v43 = vpop.f32.mrb[49].mxu0 }
 0x1db   : > { %v3544_v27 = vmax.f32 %v3542_v38, %v3543_v40  ;;  %v6059_v6 = vrot.slane %v6057_v0, 1  ;;  %v6062_v3 = vshll.u32 %v10367_v41, 16  ;;  %v3597_v11 = vmax.f32 %v3595_v12, %v3596_v30  ;;  %13920 = vst [vmem:[#allocation17_spill] sm:$0xff] %v10460_v43  ;;  %v10462_v62 = vpop.f32.mrb[50].mxu0 }
 0x1dc   : > { %v3603_v25 = vrot.slane %v3602_v21, 1  ;;  %v3538_v53 = vrot.slane %v3537_v8, 2  ;;  %v3558_v34 = vmax.f32 %v3556_v4, %v3557_v37  ;;  %v5014_v16 = vpack.c.bf16 %v10443_v56, %v10443_v56  ;;  %v10466_v4 = vpop.f32.mrb[51].mxu0 }
 0x1dd   : > { %v3545_v32 = vrot.slane %v3544_v27, 2  ;;  %v3552_v58 = vrot.slane %v3551_v59, 2  ;;  %v6060_v20 = vor.u32 %v6059_v6, %v6055_v31  ;;  %v5524_v45 = vunpack.c.l.b16 %v5012_v22  ;;  %v10472_v43 = vpop.f32.mrb[52].mxu0 }
 0x1de   : > { %v3613_v13 = vrot.slane %v3612_v7, 4  ;;  %v3539_v38 = vmax.f32 %v3537_v8, %v3538_v53  ;;  %v3559_v0 = vrot.slane %v3558_v34, 2  ;;  %v5523_v41 = vunpack.c.l.b16 %v5011_v60  ;;  %13921 = vst [vmem:[#allocation5_spill] sm:$0xff] %v10472_v43 }
 0x1df   : > { %v10464_v12 = vmax.f32 %v3609_v14, %v3610_v49  ;;  %v3546_v30 = vmax.f32 %v3544_v27, %v3545_v32  ;;  %v6064_v40 = vrot.slane %v6062_v3, 1  ;;  %v10468_v37 = vunpack.c.l.b16 %v5013_v44 }
 0x1e0   : > { %v10470_v56 = vmax.f32 %v3602_v21, %v3603_v25  ;;  %v5023_v31 = vpack.c.bf16 %v3597_v11, %v3597_v11  ;;  %v3560_v6 = vmax.f32 %v3558_v34, %v3559_v0  ;;  %v3540_v22 = vrot.slane %v3539_v38, 1  ;;  %v13924_v11 = vld [vmem:[#allocation24_spill] sm:$0xff] }
 0x1e1   : > { %v10474_v8 = vmax.f32 %v3551_v59, %v3552_v58  ;;  %v10477_v53 = vsel %vm6045_vm0, %v6060_v20, %v6064_v40  ;;  %v1475_v60 = vmax.f32 %v10416_v15, 0.0  ;;  %v10480_v27 = vunpack.c.l.b16 %v5014_v16  ;;  %v13926_v16 = vld [vmem:[#allocation14_spill] sm:$0xff]  ;;  %v13933_v20 = vld [vmem:[#allocation29_spill] sm:$0xff] }
 0x1e2   : > { %13922 = vst [vmem:[#allocation6_spill] sm:$0xff] %v10477_v53  ;;  %v10483_v14 = vsel %vm5731_vm5, %v5524_v45, %v5523_v41  ;;  %v10485_v44 = vmax.f32 %v3612_v7, %v3613_v13  ;;  %v3561_v21 = vrot.slane %v3560_v6, 1  ;;  %6332 = vrot.lane.b32.xlu1 %v10477_v53, %s9446_s8  ;;  %v3547_v49 = vrot.slane %v3546_v30, 1  ;;  %v13930_v59 = vld [vmem:[#allocation26_spill] sm:$0xff] }
 0x1e3   : > { %v1473_v3 = vmax.f32 %v10420_v42, 0.0  ;;  %v1070_v15 = vadd.f32 %v10032_v17, %v13924_v11  ;;  %v10496_v34 = vunpack.c.l.b16 %v5023_v31  ;;  %v4847_v32 = vrot.slane %v13926_v16, 2 }
 0x1e4   : > { %13923 = vst [vmem:[#allocation15_spill] sm:$0xff] %v10485_v44  ;;  %v3562_v7 = vmax.f32 %v3560_v6, %v3561_v21  ;;  %v10499_v58 = vmax.f32 %v3539_v38, %v3540_v22  ;;  %v1624_v45 = vsel %vm1569_vm3, %v1475_v60, -inf  ;;  %v6223_v41 = vshrl.u32 %v10322_v57, 16 }
 0x1e5   : > { %13925 = vst [vmem:[#allocation13_spill] sm:$0xff] %v10496_v34  ;;  %v1476_v13 = vmax.f32 %v1070_v15, 0.0  ;;  %v4848_v42 = vmax.f32 %v13926_v16, %v4847_v32  ;;  %v6225_v40 = vshll.u32 %v10322_v57, 16  ;;  %v10506_v11 = vmax.f32 %v3546_v30, %v3547_v49  ;;  %v13929_v32 = vld [vmem:[#allocation28_spill] sm:$0xff]  ;;  %v13931_v49 = vld [vmem:[#allocation30_spill] sm:$0xff] }
 0x1e6   : > { %v5018_v0 = vpack.c.bf16 %v3562_v7, %v3562_v7  ;;  %v1618_v31 = vsel %vm1569_vm3, %v1473_v3, -inf  ;;  %v13927_v38 = vpack.c.bf16 %v10117_v63, %v10117_v63  ;;  %v13928_v7 = vpack.c.bf16 %v10054_v55, %v10054_v55  ;;  %v13932_v3 = vld [vmem:[#allocation21_spill] sm:$0xff] }
 0x1e7   : > { %v10510_v6 = vsel %vm1569_vm3, %v1476_v13, -inf  ;;  %v4849_v21 = vrot.slane %v4848_v42, 1  ;;  %v6227_v15 = vrot.slane %v6225_v40, 1  ;;  %v5752_v30 = vsel %vm5733_vm7, %v13930_v59, %v13929_v32  ;;  %v13935_v32 = vld [vmem:[#allocation22_spill] sm:$0xff] }
 0x1e8   : > { %v5497_v22 = vunpack.c.l.b16 %v13927_v38  ;;  %v5530_v60 = vunpack.c.l.b16 %v5018_v0  ;;  %v5505_v16 = vunpack.c.l.b16 %v13928_v7  ;;  %v5758_v13 = vsel %vm5731_vm5, %v13932_v3, %v13931_v49  ;;  %v13934_v38 = vld [vmem:[#allocation27_spill] sm:$0xff] }
 0x1e9   : > { %v3391_v25 = vrot.slane %v10112_v48, 2  ;;  %v1083_v63 = vadd.f32 %v10032_v17, %v13933_v20  ;;  %v4850_v40 = vmax.f32 %v4848_v42, %v4849_v21  ;;  %v6228_v55 = vor.u32 %v6227_v15, %v6223_v41  ;;  %v10545_v42 = vld [vmem:[%s13758_s2] ss:$0 sm:$0xff]  ;;  %v13937_v41 = vld [vmem:[#allocation31_spill] sm:$0xff] }
 0x1ea   : > { %v10529_v0 = vsel %vm5743_vm6, %v10427_v52, %v5530_v60  ;;  %v5753_v7 = vsel %vm5735_vm8, %v13934_v38, %v5752_v30  ;;  %v5759_v49 = vsel %vm5733_vm7, %v13935_v32, %v5758_v13  ;;  %v13936_v52 = vld [vmem:[#allocation23_spill] sm:$0xff]  ;;  %v13939_v38 = vld [vmem:[#allocation32_spill] sm:$0xff] }
 0x1eb   : > { %v5754_v59 = vsel %vm5737_vm9, %v10141_v26, %v5753_v7  ;;  %v3392_v3 = vmax.f32 %v10112_v48, %v3391_v25  ;;  %v1479_v57 = vmax.f32 %v1083_v63, 0.0  ;;  %v8895_v53 = vpack.c.bf16 %v4850_v40, %v4850_v40 }
 0x1ec   : > { %v5755_v17 = vsel %vm5739_vm10, %v10147_v2, %v5754_v59  ;;  %v5760_v20 = vsel %vm5735_vm8, %v13936_v52, %v5759_v49  ;;  %v1075_v26 = vadd.f32 %v10545_v42, %v13937_v41 }
 0x1ed   : > { %v5756_v60 = vsel %vm5741_vm11, %v5497_v22, %v5755_v17  ;;  %v5761_v48 = vsel %vm5737_vm9, %v10128_v35, %v5760_v20  ;;  %v3393_v25 = vrot.slane %v3392_v3, 1  ;;  %v1625_v21 = vsel %vm1569_vm3, %v1479_v57, -inf }
 0x1ee   : > { %v10555_v2 = vsel %vm10310_vm14, %v8895_v53, 0  ;;  %v5762_v15 = vsel %vm5739_vm10, %v10135_v36, %v5761_v48  ;;  %v1626_v30 = vmax.f32 %v1624_v45, %v1625_v21  ;;  %v1477_v13 = vmax.f32 %v1075_v26, 0.0  ;;  %v10586_v21 = vpop.f32.mrb[53].mxu0 }
 0x1ef   : > { %13938 = vst [vmem:[#allocation16_spill] sm:$0xff] %v10555_v2  ;;  %v6230_v63 = vshll.u32 %v10555_v2, 16  ;;  %v5763_v40 = vsel %vm5741_vm11, %v5505_v16, %v5762_v15  ;;  %v3394_v22 = vmax.f32 %v3392_v3, %v3393_v25  ;;  %v1086_v35 = vadd.f32 %v10545_v42, %v13939_v38  ;;  %13942 = vst [vmem:[#allocation20_spill] sm:$0xff] %v10586_v21 }
 0x1f0   : > { %v5948_v7 = vpack.c.b16 %v5763_v40, %v5756_v60  ;;  %v2132_v59 = vcombine.high %v1626_v30, %v1626_v30  ;;  %v2139_v57 = vrot.slane %v1626_v30, %v9638_v29  ;;  %v1619_v53 = vsel %vm1569_vm3, %v1477_v13, -inf }
 0x1f1   : > { %v6232_v32 = vrot.slane %v6230_v63, 1  ;;  %v8882_v49 = vpack.c.bf16 %v3394_v22, %v3394_v22  ;;  %v1620_v17 = vmax.f32 %v1618_v31, %v1619_v53  ;;  %v1480_v36 = vmax.f32 %v1086_v35, 0.0 }
 0x1f2   : > { %v10567_v45 = vsel %vm10310_vm14, 0, %v5948_v7  ;;  %v2146_v16 = vrot.slane %v2132_v59, %v9638_v29  ;;  %v2147_v3 = vcombine.high %v2139_v57, %v2139_v57  ;;  %v3675_v52 = vsel %vm3170_vm4, %v2139_v57, -inf  ;;  %v10594_v7 = vpop.f32.mrb[54].mxu0 }
 0x1f3   : > { %13940 = vst [vmem:[#allocation18_spill] sm:$0xff] %v10567_v45  ;;  %v10572_v20 = vsel %vm6045_vm0, %v6228_v55, %v6232_v32  ;;  %6458 = vrot.lane.b32.xlu1 %v10567_v45, %s9445_s7  ;;  %v10578_v41 = vsel %vm10310_vm14, %v8882_v49, 0  ;;  %v6271_v31 = vrot.slane %v10567_v45, 1  ;;  %v3676_v26 = vrot.slane %v3675_v52, 4  ;;  %13944 = vst [vmem:[#allocation14_spill] sm:$0xff] %v10594_v7  ;;  %v10598_v49 = vpop.f32.mrb[55].mxu0 }
 0x1f4   : > { %13941 = vst [vmem:[#allocation19_spill] sm:$0xff] %v10572_v20  ;;  %6516 = vrot.lane.b32.xlu0 %v10572_v20, %s9447_s9  ;;  %v6272_v60 = vrot.slane %v10578_v41, 1  ;;  %v2148_v48 = vcombine.high %v2146_v16, %v2146_v16  ;;  %v3682_v25 = vsel %vm3170_vm4, %v2147_v3, -inf  ;;  %v3689_v55 = vsel %vm3170_vm4, %v2146_v16, -inf  ;;  %13945 = vst [vmem:[#allocation28_spill] sm:$0xff] %v10598_v49 }
 0x1f5   : > { %v3677_v15 = vmax.f32 %v3675_v52, %v3676_v26  ;;  %v3683_v30 = vrot.slane %v3682_v25, 4  ;;  %v3690_v13 = vrot.slane %v3689_v55, 4  ;;  %v2098_v63 = vcombine.high %v1620_v17, %v1620_v17 }
 0x1f6   : > { %v10589_v40 = vsel %vm6265_vm15, %v6271_v31, %v6272_v60  ;;  %v3696_v22 = vsel %vm3170_vm4, %v2148_v48, -inf  ;;  %v2105_v38 = vrot.slane %v1620_v17, %v9638_v29  ;;  %v1628_v35 = vsel %vm1569_vm3, %v1480_v36, -inf }
 0x1f7   : > { %13943 = vst [vmem:[#allocation24_spill] sm:$0xff] %v10589_v40  ;;  %v3678_v59 = vrot.slane %v3677_v15, 2  ;;  %v3684_v57 = vmax.f32 %v3682_v25, %v3683_v30  ;;  %v3691_v53 = vmax.f32 %v3689_v55, %v3690_v13  ;;  %v3697_v32 = vrot.slane %v3696_v22, 4  ;;  %6396 = vrot.lane.b32.xlu1 %v10567_v45, %s9447_s9 }
 0x1f8   : > { %6428 = vrot.lane.b32.xlu0 %v10589_v40, %s9446_s8  ;;  %v2112_v16 = vrot.slane %v2098_v63, %v9638_v29  ;;  %v2113_v3 = vcombine.high %v2105_v38, %v2105_v38  ;;  %v3619_v17 = vsel %vm3170_vm4, %v2105_v38, -inf  ;;  %v1629_v36 = vmax.f32 %v10510_v6, %v1628_v35  ;;  %v13946_v35 = vld [vmem:[#allocation25_spill] sm:$0xff] }
 0x1f9   : > { %v3679_v52 = vmax.f32 %v3677_v15, %v3678_v59  ;;  %v3685_v31 = vrot.slane %v3684_v57, 2  ;;  %v3692_v26 = vrot.slane %v3691_v53, 2  ;;  %v3698_v60 = vmax.f32 %v3696_v22, %v3697_v32 }
 0x1fa   : > { %v2114_v48 = vcombine.high %v2112_v16, %v2112_v16  ;;  %v3620_v25 = vrot.slane %v3619_v17, 4  ;;  %v3626_v55 = vsel %vm3170_vm4, %v2113_v3, -inf  ;;  %v3633_v30 = vsel %vm3170_vm4, %v2112_v16, -inf }
 0x1fb   : > { %v3680_v13 = vrot.slane %v3679_v52, 1  ;;  %v3686_v20 = vmax.f32 %v3684_v57, %v3685_v31  ;;  %v3693_v2 = vmax.f32 %v3691_v53, %v3692_v26  ;;  %v3699_v49 = vrot.slane %v3698_v60, 2  ;;  %6366 = vrot.lane.b32.xlu1 %v10589_v40, %s9445_s7 }
 0x1fc   : > { %v3621_v63 = vmax.f32 %v3619_v17, %v3620_v25  ;;  %v3627_v38 = vrot.slane %v3626_v55, 4  ;;  %v3634_v6 = vrot.slane %v3633_v30, 4  ;;  %v3640_v15 = vsel %vm3170_vm4, %v2114_v48, -inf }
 0x1fd   : > { %v1062_v22 = vadd.f32 %v10545_v42, %v13946_v35  ;;  %v3687_v59 = vrot.slane %v3686_v20, 1  ;;  %v3694_v32 = vrot.slane %v3693_v2, 1  ;;  %v3700_v3 = vmax.f32 %v3698_v60, %v3699_v49 }
 0x1fe   : > { %v3622_v7 = vrot.slane %v3621_v63, 2  ;;  %v3628_v16 = vmax.f32 %v3626_v55, %v3627_v38  ;;  %v3635_v21 = vmax.f32 %v3633_v30, %v3634_v6  ;;  %v3641_v57 = vrot.slane %v3640_v15, 4 }
 0x1ff   : > { %v13947_v53 = vrot.slane %v10474_v8, 1  ;;  %v5015_v17 = vpack.c.bf16 %v10499_v58, %v10499_v58  ;;  %v3681_v26 = vmax.f32 %v3679_v52, %v3680_v13  ;;  %v3701_v48 = vrot.slane %v3700_v3, 1 }
 0x200   : > { %v3623_v25 = vmax.f32 %v3621_v63, %v3622_v7  ;;  %v3629_v40 = vrot.slane %v3628_v16, 2  ;;  %v3636_v35 = vrot.slane %v3635_v21, 2  ;;  %v3642_v44 = vmax.f32 %v3640_v15, %v3641_v57 }
 0x201   : > { %v10615_v31 = vmax.f32 %v10474_v8, %v13947_v53  ;;  %v5016_v49 = vpack.c.bf16 %v10506_v11, %v10506_v11  ;;  %v1474_v60 = vmax.f32 %v1062_v22, 0.0  ;;  %v3688_v55 = vmax.f32 %v3686_v20, %v3687_v59 }
 0x202   : > { %v3695_v30 = vmax.f32 %v3693_v2, %v3694_v32  ;;  %v3624_v38 = vrot.slane %v3623_v25, 1  ;;  %v3630_v6 = vmax.f32 %v3628_v16, %v3629_v40  ;;  %v3637_v34 = vmax.f32 %v3635_v21, %v3636_v35 }
 0x203   : > { %v3643_v8 = vrot.slane %v3642_v44, 2  ;;  %v13948_v53 = vpack.c.bf16 %v10470_v56, %v10470_v56  ;;  %v10628_v52 = vunpack.c.l.b16 %v5015_v17  ;;  %v2149_v13 = vcombine.high %v1629_v36, %v1629_v36 }
 0x204   : > { %v3702_v63 = vmax.f32 %v3700_v3, %v3701_v48  ;;  %v5035_v11 = vpack.c.bf16 %v3681_v26, %v3681_v26  ;;  %v3631_v15 = vrot.slane %v3630_v6, 1  ;;  %v10630_v2 = vunpack.c.l.b16 %v5016_v49  ;;  %v13950_v26 = vld [vmem:[#allocation33_spill] sm:$0xff] }
 0x205   : > { %v10624_v58 = vunpack.c.l.b16 %v13948_v53  ;;  %v3644_v20 = vmax.f32 %v3642_v44, %v3643_v8  ;;  %v3638_v40 = vrot.slane %v3637_v34, 1  ;;  %v2156_v21 = vrot.slane %v1629_v36, %v9638_v29 }
 0x206   : > { %v2163_v22 = vrot.slane %v2149_v13, %v9638_v29  ;;  %v1621_v56 = vsel %vm1569_vm3, %v1474_v60, -inf  ;;  %v5036_v59 = vpack.c.bf16 %v3688_v55, %v3688_v55  ;;  %v5037_v32 = vpack.c.bf16 %v3695_v30, %v3695_v30 }
 0x207   : > { %13949 = vst [vmem:[#allocation26_spill] sm:$0xff] %v10624_v58  ;;  %v3625_v16 = vmax.f32 %v3623_v25, %v3624_v38  ;;  %v2164_v57 = vcombine.high %v2156_v21, %v2156_v21  ;;  %v3703_v17 = vsel %vm3170_vm4, %v2156_v21, -inf  ;;  %v1078_v44 = vadd.f32 %v10545_v42, %v13950_v26 }
 0x208   : > { %v3717_v3 = vsel %vm3170_vm4, %v2163_v22, -inf  ;;  %v5038_v48 = vpack.c.bf16 %v3702_v63, %v3702_v63  ;;  %v10639_v35 = vunpack.c.l.b16 %v5035_v11  ;;  %v3632_v49 = vmax.f32 %v3630_v6, %v3631_v15 }
 0x209   : > { %v3645_v36 = vrot.slane %v3644_v20, 1  ;;  %v3639_v8 = vmax.f32 %v3637_v34, %v3638_v40  ;;  %v3704_v53 = vrot.slane %v3703_v17, 4  ;;  %v3710_v60 = vsel %vm3170_vm4, %v2164_v57, -inf }
 0x20a   : > { %v3718_v55 = vrot.slane %v3717_v3, 4  ;;  %v10642_v30 = vunpack.c.l.b16 %v5036_v59  ;;  %v10644_v25 = vunpack.c.l.b16 %v5037_v32  ;;  %v5027_v38 = vpack.c.bf16 %v3625_v16, %v3625_v16 }
 0x20b   : > { %v3711_v13 = vrot.slane %v3710_v60, 4  ;;  %v2165_v21 = vcombine.high %v2163_v22, %v2163_v22  ;;  %v3705_v7 = vmax.f32 %v3703_v17, %v3704_v53  ;;  %v1478_v26 = vmax.f32 %v1078_v44, 0.0 }
 0x20c   : > { %13951 = vst [vmem:[#allocation30_spill] sm:$0xff] %v10642_v30  ;;  %13952 = vst [vmem:[#allocation21_spill] sm:$0xff] %v10644_v25  ;;  %v3719_v58 = vmax.f32 %v3717_v3, %v3718_v55  ;;  %v10646_v63 = vunpack.c.l.b16 %v5038_v48  ;;  %v3646_v11 = vmax.f32 %v3644_v20, %v3645_v36  ;;  %v5028_v6 = vpack.c.bf16 %v3632_v49, %v3632_v49  ;;  %v10650_v25 = vpop.f32.mrb[56].mxu0 }
 0x20d   : > { %v3712_v15 = vmax.f32 %v3710_v60, %v3711_v13  ;;  %v5029_v34 = vpack.c.bf16 %v3639_v8, %v3639_v8  ;;  %v3706_v40 = vrot.slane %v3705_v7, 2  ;;  %v1622_v57 = vsel %vm1569_vm3, %v1478_v26, -inf  ;;  %v10654_v44 = vpop.f32.mrb[57].mxu0 }
 0x20e   : > { %13953 = vst [vmem:[#allocation29_spill] sm:$0xff] %v10646_v63  ;;  %v3720_v43 = vrot.slane %v3719_v58, 2  ;;  %v5539_v59 = vunpack.c.l.b16 %v5027_v38  ;;  %v1623_v32 = vmax.f32 %v1621_v56, %v1622_v57  ;;  %v6069_v16 = vshll.u32 %v10567_v45, 16  ;;  %v10657_v53 = vpop.f32.mrb[58].mxu0 }
 0x20f   : > { %v3713_v30 = vrot.slane %v3712_v15, 2  ;;  %v3707_v22 = vmax.f32 %v3705_v7, %v3706_v40  ;;  %v3724_v3 = vsel %vm3170_vm4, %v2165_v21, -inf  ;;  %v6074_v20 = vshll.u32 %v10578_v41, 16 }
 0x210   : > { %v3721_v17 = vmax.f32 %v3719_v58, %v3720_v43  ;;  %v2115_v49 = vcombine.high %v1623_v32, %v1623_v32  ;;  %v2122_v36 = vrot.slane %v1623_v32, %v9638_v29  ;;  %v6071_v8 = vrot.slane %v6069_v16, 1  ;;  %v10662_v58 = vpop.f32.mrb[59].mxu0 }
 0x211   : > { %v3714_v48 = vmax.f32 %v3712_v15, %v3713_v30  ;;  %v5030_v56 = vpack.c.bf16 %v3646_v11, %v3646_v11  ;;  %v5540_v60 = vunpack.c.l.b16 %v5028_v6  ;;  %v6067_v55 = vshrl.u32 %v10567_v45, 16  ;;  %13954 = vst [vmem:[#allocation27_spill] sm:$0xff] %v10662_v58 }
 0x212   : > { %v1099_v43 = vadd.f32 %v10545_v42, %v10236_v18  ;;  %v3708_v7 = vrot.slane %v3707_v22, 1  ;;  %v2129_v41 = vrot.slane %v2115_v49, %v9638_v29  ;;  %v2130_v38 = vcombine.high %v2122_v36, %v2122_v36 }
 0x213   : > { %v3647_v30 = vsel %vm3170_vm4, %v2122_v36, -inf  ;;  %v3722_v13 = vrot.slane %v3721_v17, 1  ;;  %v6072_v26 = vor.u32 %v6071_v8, %v6067_v55  ;;  %v6076_v15 = vrot.slane %v6074_v20, 1  ;;  %v10676_v20 = vpop.f32.mrb[60].mxu0 }
 0x214   : > { %v3648_v21 = vrot.slane %v3647_v30, 4  ;;  %v3715_v40 = vrot.slane %v3714_v48, 1  ;;  %v2131_v11 = vcombine.high %v2129_v41, %v2129_v41  ;;  %v3654_v6 = vsel %vm3170_vm4, %v2130_v38, -inf }
 0x215   : > { %v3661_v57 = vsel %vm3170_vm4, %v2129_v41, -inf  ;;  %v10668_v32 = vunpack.c.l.b16 %v5029_v34  ;;  %v3655_v16 = vrot.slane %v3654_v6, 4  ;;  %v1091_v49 = vadd.f32 %v10545_v42, %v10244_v33 }
 0x216   : > { %v3649_v18 = vmax.f32 %v3647_v30, %v3648_v21  ;;  %v3725_v45 = vrot.slane %v3724_v3, 4  ;;  %v3662_v58 = vrot.slane %v3661_v57, 4  ;;  %v3668_v36 = vsel %vm3170_vm4, %v2131_v11, -inf }
 0x217   : > { %v10674_v8 = vsel %vm6045_vm0, %v6072_v26, %v6076_v15  ;;  %v10678_v55 = vmax.f32 %v3707_v22, %v3708_v7  ;;  %v3656_v41 = vmax.f32 %v3654_v6, %v3655_v16  ;;  %v3669_v34 = vrot.slane %v3668_v36, 4 }
 0x218   : > { %13955 = vst [vmem:[#allocation22_spill] sm:$0xff] %v10674_v8  ;;  %v3650_v38 = vrot.slane %v3649_v18, 2  ;;  %6490 = vrot.lane.b32.xlu0 %v10674_v8, %s9447_s9  ;;  %6334 = vrot.lane.b32.xlu1 %v10674_v8, %s9446_s8  ;;  %v10684_v33 = vmax.f32 %v3714_v48, %v3715_v40  ;;  %v10686_v30 = vmax.f32 %v3721_v17, %v3722_v13  ;;  %v1483_v26 = vmax.f32 %v1099_v43, 0.0 }
 0x219   : > { %v3663_v21 = vmax.f32 %v3661_v57, %v3662_v58  ;;  %v3657_v11 = vrot.slane %v3656_v41, 2  ;;  %v3670_v63 = vmax.f32 %v3668_v36, %v3669_v34  ;;  %v1481_v22 = vmax.f32 %v1091_v49, 0.0  ;;  %v13957_v36 = vld [vmem:[#allocation34_spill] sm:$0xff] }
 0x21a   : > { %v3651_v15 = vmax.f32 %v3649_v18, %v3650_v38  ;;  %v10688_v7 = vunpack.c.l.b16 %v5030_v56  ;;  %v10691_v6 = vsel %vm5731_vm5, %v5540_v60, %v5539_v59  ;;  %v10693_v16 = vmax.f32 %v3724_v3, %v3725_v45 }
 0x21b   : > { %v1102_v8 = vadd.f32 %v10545_v42, %v10250_v5  ;;  %v3664_v48 = vrot.slane %v3663_v21, 2  ;;  %v3671_v58 = vrot.slane %v3670_v63, 2  ;;  %v10701_v43 = vadd.f32 %v10545_v42, %v10255_v24 }
 0x21c   : > { %v1636_v45 = vsel %vm1569_vm3, %v1483_v26, -inf  ;;  %v5765_v5 = vsel %vm5733_vm7, %v10201_v39, %v10212_v46  ;;  %v3652_v3 = vrot.slane %v3651_v15, 1  ;;  %v3658_v60 = vmax.f32 %v3656_v41, %v3657_v11 }
 0x21d   : > { %v3672_v13 = vmax.f32 %v3670_v63, %v3671_v58  ;;  %v1630_v40 = vsel %vm1569_vm3, %v1481_v22, -inf  ;;  %v1484_v57 = vmax.f32 %v1102_v8, 0.0  ;;  %v13956_v24 = vpack.c.bf16 %v10334_v23, %v10334_v23 }
 0x21e   : > { %v5766_v49 = vsel %vm5735_vm8, %v10209_v28, %v5765_v5  ;;  %v5771_v38 = vsel %vm5731_vm5, %v13957_v36, %v10266_v10  ;;  %v10720_v34 = vmax.f32 %v3663_v21, %v3664_v48  ;;  %v13958_v8 = vpack.c.bf16 %v10192_v54, %v10192_v54  ;;  %v13959_v28 = vld [vmem:[#allocation35_spill] sm:$0xff]  ;;  %v13960_v5 = vld [vmem:[#allocation37_spill] sm:$0xff]  ;;  %v13961_v36 = vld [vmem:[#allocation38_spill] sm:$0xff] }
 0x21f   : > { %v5513_v18 = vunpack.c.l.b16 %v13956_v24  ;;  %v3673_v39 = vrot.slane %v3672_v13, 1  ;;  %v5767_v63 = vsel %vm5737_vm9, %v10402_v9, %v5766_v49  ;;  %v5772_v26 = vsel %vm5733_vm7, %v13959_v28, %v5771_v38 }
 0x220   : > { %v5521_v23 = vunpack.c.l.b16 %v13958_v8  ;;  %v5768_v41 = vsel %vm5739_vm10, %v10410_v61, %v5767_v63  ;;  %v1115_v10 = vadd.f32 %v10545_v42, %v10262_v51  ;;  %v10734_v21 = vmax.f32 %v3651_v15, %v3652_v3  ;;  %v13962_v15 = vld [vmem:[#allocation12_spill] sm:$0xff] }
 0x221   : > { %v3659_v11 = vrot.slane %v3658_v60, 1  ;;  %v3674_v22 = vmax.f32 %v3672_v13, %v3673_v39  ;;  %v5769_v48 = vsel %vm5741_vm11, %v5513_v18, %v5768_v41  ;;  %v1639_v9 = vsel %vm1569_vm3, %v1484_v57, -inf }
 0x222   : > { %v5773_v54 = vsel %vm5735_vm8, %v10197_v50, %v5772_v26  ;;  %v1487_v58 = vmax.f32 %v1115_v10, 0.0  ;;  %v3503_v61 = vrot.slane %v13960_v5, 2  ;;  %v1107_v3 = vadd.f32 %v10545_v42, %v13962_v15  ;;  %v13963_v50 = vld [vmem:[#allocation11_spill] sm:$0xff] }
 0x223   : > { %v5034_v49 = vpack.c.bf16 %v3674_v22, %v3674_v22  ;;  %v5774_v51 = vsel %vm5737_vm9, %v13961_v36, %v5773_v54  ;;  %v1118_v38 = vadd.f32 %v10545_v42, %v13963_v50  ;;  %v10753_v28 = vmax.f32 %v3658_v60, %v3659_v11 }
 0x224   : > { %v5775_v13 = vsel %vm5739_vm10, %v10393_v19, %v5774_v51  ;;  %v1637_v57 = vsel %vm1569_vm3, %v1487_v58, -inf  ;;  %v3504_v18 = vmax.f32 %v13960_v5, %v3503_v61  ;;  %v1485_v41 = vmax.f32 %v1107_v3, 0.0  ;;  %v10774_v3 = vpop.f32.mrb[61].mxu0 }
 0x225   : > { %v5546_v39 = vunpack.c.l.b16 %v5034_v49  ;;  %v5776_v63 = vsel %vm5741_vm11, %v5521_v23, %v5775_v13  ;;  %v1638_v8 = vmax.f32 %v1636_v45, %v1637_v57  ;;  %v1488_v22 = vmax.f32 %v1118_v38, 0.0  ;;  %13965 = vst [vmem:[#allocation31_spill] sm:$0xff] %v10774_v3 }
 0x226   : > { %v5950_v26 = vpack.c.b16 %v5776_v63, %v5769_v48  ;;  %v3505_v10 = vrot.slane %v3504_v18, 1  ;;  %v1631_v5 = vsel %vm1569_vm3, %v1485_v41, -inf  ;;  %v10784_v41 = vpop.f32.mrb[62].mxu0 }
 0x227   : > { %v10757_v19 = vsel %vm5743_vm6, %v10639_v35, %v5546_v39  ;;  %v2200_v54 = vcombine.high %v1638_v8, %v1638_v8  ;;  %v2207_v58 = vrot.slane %v1638_v8, %v9638_v29  ;;  %v1632_v23 = vmax.f32 %v1630_v40, %v1631_v5  ;;  %13966 = vst [vmem:[#allocation32_spill] sm:$0xff] %v10784_v41 }
 0x228   : > { %v10763_v61 = vsel %vm10310_vm14, 0, %v5950_v26  ;;  %v3506_v45 = vmax.f32 %v3504_v18, %v3505_v10  ;;  %v1640_v60 = vsel %vm1569_vm3, %v1488_v22, -inf }
 0x229   : > { %13964 = vst [vmem:[#allocation23_spill] sm:$0xff] %v10763_v61  ;;  %6460 = vrot.lane.b32.xlu0 %v10763_v61, %s9445_s7  ;;  %6398 = vrot.lane.b32.xlu1 %v10763_v61, %s9447_s9  ;;  %v2214_v35 = vrot.slane %v2200_v54, %v9638_v29  ;;  %v2215_v11 = vcombine.high %v2207_v58, %v2207_v58  ;;  %v3787_v48 = vsel %vm3170_vm4, %v2207_v58, -inf  ;;  %v6274_v49 = vrot.slane %v10763_v61, 1  ;;  %v10789_v58 = vpop.f32.mrb[63].mxu0 }
 0x22a   : > { %v3788_v36 = vrot.slane %v3787_v48, 4  ;;  %v8883_v51 = vpack.c.bf16 %v3506_v45, %v3506_v45  ;;  %v2166_v15 = vcombine.high %v1632_v23, %v1632_v23  ;;  %v2173_v40 = vrot.slane %v1632_v23, %v9638_v29  ;;  %13967 = vst [vmem:[#allocation25_spill] sm:$0xff] %v10789_v58 }
 0x22b   : > { %v2216_v13 = vcombine.high %v2214_v35, %v2214_v35  ;;  %v3794_v57 = vsel %vm3170_vm4, %v2215_v11, -inf  ;;  %v3801_v18 = vsel %vm3170_vm4, %v2214_v35, -inf  ;;  %v10778_v50 = vmax.f32 %v1639_v9, %v1640_v60 }
 0x22c   : > { %v3789_v38 = vmax.f32 %v3787_v48, %v3788_v36  ;;  %v3795_v39 = vrot.slane %v3794_v57, 4  ;;  %v3802_v63 = vrot.slane %v3801_v18, 4  ;;  %v10782_v8 = vsel %vm10310_vm14, %v8883_v51, 0 }
 0x22d   : > { %v3808_v26 = vsel %vm3170_vm4, %v2216_v13, -inf  ;;  %v6275_v10 = vrot.slane %v10782_v8, 1  ;;  %v2180_v22 = vrot.slane %v2166_v15, %v9638_v29  ;;  %v2181_v54 = vcombine.high %v2173_v40, %v2173_v40 }
 0x22e   : > { %v3790_v9 = vrot.slane %v3789_v38, 2  ;;  %v3796_v5 = vmax.f32 %v3794_v57, %v3795_v39  ;;  %v3803_v45 = vmax.f32 %v3801_v18, %v3802_v63  ;;  %v3809_v23 = vrot.slane %v3808_v26, 4 }
 0x22f   : > { %v10792_v60 = vsel %vm6265_vm15, %v6274_v49, %v6275_v10  ;;  %v2182_v35 = vcombine.high %v2180_v22, %v2180_v22  ;;  %v3731_v11 = vsel %vm3170_vm4, %v2173_v40, -inf  ;;  %v3738_v48 = vsel %vm3170_vm4, %v2181_v54, -inf }
 0x230   : > { %13968 = vst [vmem:[#allocation33_spill] sm:$0xff] %v10792_v60  ;;  %v3791_v36 = vmax.f32 %v3789_v38, %v3790_v9  ;;  %v3797_v51 = vrot.slane %v3796_v5, 2  ;;  %v3804_v13 = vrot.slane %v3803_v45, 2  ;;  %v3810_v59 = vmax.f32 %v3808_v26, %v3809_v23  ;;  %6430 = vrot.lane.b32.xlu0 %v10792_v60, %s9446_s8  ;;  %6368 = vrot.lane.b32.xlu1 %v10792_v60, %s9445_s7 }
 0x231   : > { %v3732_v15 = vrot.slane %v3731_v11, 4  ;;  %v3739_v57 = vrot.slane %v3738_v48, 4  ;;  %v3745_v49 = vsel %vm3170_vm4, %v2180_v22, -inf  ;;  %v3752_v18 = vsel %vm3170_vm4, %v2182_v35, -inf }
 0x232   : > { %v3792_v39 = vrot.slane %v3791_v36, 1  ;;  %v3798_v40 = vmax.f32 %v3796_v5, %v3797_v51  ;;  %v3805_v63 = vmax.f32 %v3803_v45, %v3804_v13  ;;  %v3811_v10 = vrot.slane %v3810_v59, 2 }
 0x233   : > { %v3733_v38 = vmax.f32 %v3731_v11, %v3732_v15  ;;  %v3740_v54 = vmax.f32 %v3738_v48, %v3739_v57  ;;  %v3746_v9 = vrot.slane %v3745_v49, 4  ;;  %v3753_v26 = vrot.slane %v3752_v18, 4 }
 0x234   : > { %v5031_v23 = vpack.c.bf16 %v10734_v21, %v10734_v21  ;;  %v3799_v46 = vrot.slane %v3798_v40, 1  ;;  %v3806_v24 = vrot.slane %v3805_v63, 1  ;;  %v3812_v56 = vmax.f32 %v3810_v59, %v3811_v10 }
 0x235   : > { %v3734_v17 = vrot.slane %v3733_v38, 2  ;;  %v3741_v60 = vrot.slane %v3740_v54, 2  ;;  %v3747_v58 = vmax.f32 %v3745_v49, %v3746_v9  ;;  %v3754_v22 = vmax.f32 %v3752_v18, %v3753_v26 }
 0x236   : > { %v3793_v41 = vmax.f32 %v3791_v36, %v3792_v39  ;;  %v3800_v35 = vmax.f32 %v3798_v40, %v3799_v46  ;;  %v3807_v3 = vmax.f32 %v3805_v63, %v3806_v24  ;;  %v3813_v5 = vrot.slane %v3812_v56, 1  ;;  %v13973_v40 = vld [vmem:[#allocation9_spill] sm:$0xff] }
 0x237   : > { %v3735_v45 = vmax.f32 %v3733_v38, %v3734_v17  ;;  %v3742_v51 = vmax.f32 %v3740_v54, %v3741_v60  ;;  %v3748_v11 = vrot.slane %v3747_v58, 2  ;;  %v3755_v48 = vrot.slane %v3754_v22, 2 }
 0x238   : > { %v13969_v13 = vpack.c.bf16 %v10678_v55, %v10678_v55  ;;  %v13970_v59 = vpack.c.bf16 %v10684_v33, %v10684_v33  ;;  %v13971_v57 = vrot.slane %v10720_v34, 1  ;;  %v3814_v24 = vmax.f32 %v3812_v56, %v3813_v5 }
 0x239   : > { %v3736_v17 = vrot.slane %v3735_v45, 1  ;;  %v3743_v60 = vrot.slane %v3742_v51, 1  ;;  %v3749_v36 = vmax.f32 %v3747_v58, %v3748_v11  ;;  %v3756_v49 = vmax.f32 %v3754_v22, %v3755_v48 }
 0x23a   : > { %v10807_v15 = vunpack.c.l.b16 %v13969_v13  ;;  %v10812_v21 = vunpack.c.l.b16 %v13970_v59  ;;  %v10817_v46 = vmax.f32 %v10720_v34, %v13971_v57  ;;  %v5032_v55 = vpack.c.bf16 %v10753_v28, %v10753_v28 }
 0x23b   : > { %v13972_v18 = vmax.f32 %v10701_v43, 0.0  ;;  %v2217_v33 = vcombine.high %v10778_v50, %v10778_v50  ;;  %v1110_v63 = vadd.f32 %v10545_v42, %v13973_v40  ;;  %v10828_v34 = vunpack.c.l.b16 %v5031_v23 }
 0x23c   : > { %v5051_v56 = vpack.c.bf16 %v3793_v41, %v3793_v41  ;;  %v5052_v10 = vpack.c.bf16 %v3800_v35, %v3800_v35  ;;  %v5053_v38 = vpack.c.bf16 %v3807_v3, %v3807_v3  ;;  %v3750_v54 = vrot.slane %v3749_v36, 1 }
 0x23d   : > { %v1633_v39 = vsel %vm1569_vm3, %v13972_v18, -inf  ;;  %v2224_v43 = vrot.slane %v10778_v50, %v9638_v29  ;;  %v10835_v28 = vrot.slane %v2217_v33, %v9638_v29  ;;  %v5054_v9 = vpack.c.bf16 %v3814_v24, %v3814_v24 }
 0x23e   : > { %v3737_v26 = vmax.f32 %v3735_v45, %v3736_v17  ;;  %v3744_v22 = vmax.f32 %v3742_v51, %v3743_v60  ;;  %v3757_v5 = vrot.slane %v3756_v49, 1  ;;  %v1486_v41 = vmax.f32 %v1110_v63, 0.0 }
 0x23f   : > { %v2232_v11 = vcombine.high %v2224_v43, %v2224_v43  ;;  %v3815_v23 = vsel %vm3170_vm4, %v2224_v43, -inf  ;;  %v3829_v3 = vsel %vm3170_vm4, %v10835_v28, -inf  ;;  %v10840_v35 = vunpack.c.l.b16 %v5032_v55 }
 0x240   : > { %v10842_v48 = vunpack.c.l.b16 %v5051_v56  ;;  %v10844_v13 = vunpack.c.l.b16 %v5052_v10  ;;  %v10846_v50 = vunpack.c.l.b16 %v5053_v38  ;;  %v3751_v59 = vmax.f32 %v3749_v36, %v3750_v54 }
 0x241   : > { %v3816_v57 = vrot.slane %v3815_v23, 4  ;;  %v3822_v45 = vsel %vm3170_vm4, %v2232_v11, -inf  ;;  %v3830_v51 = vrot.slane %v3829_v3, 4  ;;  %v10849_v24 = vunpack.c.l.b16 %v5054_v9 }
 0x242   : > { %13974 = vst [vmem:[#allocation34_spill] sm:$0xff] %v10844_v13  ;;  %13975 = vst [vmem:[#allocation35_spill] sm:$0xff] %v10846_v50  ;;  %v3758_v17 = vmax.f32 %v3756_v49, %v3757_v5  ;;  %v5043_v60 = vpack.c.bf16 %v3737_v26, %v3737_v26  ;;  %v3823_v18 = vrot.slane %v3822_v45, 4  ;;  %v5044_v33 = vpack.c.bf16 %v3744_v22, %v3744_v22 }
 0x243   : > { %13976 = vst [vmem:[#allocation37_spill] sm:$0xff] %v10849_v24  ;;  %v3817_v40 = vmax.f32 %v3815_v23, %v3816_v57  ;;  %v3831_v55 = vmax.f32 %v3829_v3, %v3830_v51  ;;  %v1634_v63 = vsel %vm1569_vm3, %v1486_v41, -inf  ;;  %v2233_v56 = vcombine.high %v10835_v28, %v10835_v28  ;;  %v10858_v28 = vpop.f32.mrb[64].mxu0  ;;  %v13981_v24 = vld [vmem:[#allocation17_spill] sm:$0xff] }
 0x244   : > { %v3824_v10 = vmax.f32 %v3822_v45, %v3823_v18  ;;  %v1635_v38 = vmax.f32 %v1633_v39, %v1634_v63  ;;  %v6081_v36 = vshll.u32 %v10763_v61, 16  ;;  %v5045_v54 = vpack.c.bf16 %v3751_v59, %v3751_v59  ;;  %v10862_v18 = vpop.f32.mrb[65].mxu0 }
 0x245   : > { %v3818_v43 = vrot.slane %v3817_v40, 2  ;;  %v3832_v11 = vrot.slane %v3831_v55, 2  ;;  %v6086_v9 = vshll.u32 %v10782_v8, 16  ;;  %v5046_v23 = vpack.c.bf16 %v3758_v17, %v3758_v17 }
 0x246   : > { %v3825_v49 = vrot.slane %v3824_v10, 2  ;;  %v2183_v26 = vcombine.high %v1635_v38, %v1635_v38  ;;  %v2190_v22 = vrot.slane %v1635_v38, %v9638_v29  ;;  %v6083_v5 = vrot.slane %v6081_v36, 1  ;;  %v10864_v36 = vpop.f32.mrb[66].mxu0 }
 0x247   : > { %v5555_v3 = vunpack.c.l.b16 %v5043_v60  ;;  %v3819_v41 = vmax.f32 %v3817_v40, %v3818_v43  ;;  %v6079_v57 = vshrl.u32 %v10763_v61, 16  ;;  %v5556_v8 = vunpack.c.l.b16 %v5044_v33 }
 0x248   : > { %v3826_v39 = vmax.f32 %v3824_v10, %v3825_v49  ;;  %v2197_v45 = vrot.slane %v2183_v26, %v9638_v29  ;;  %v2198_v59 = vcombine.high %v2190_v22, %v2190_v22  ;;  %v3759_v51 = vsel %vm3170_vm4, %v2190_v22, -inf  ;;  %v10868_v10 = vpop.f32.mrb[67].mxu0 }
 0x249   : > { %v3833_v63 = vmax.f32 %v3831_v55, %v3832_v11  ;;  %v3760_v58 = vrot.slane %v3759_v51, 4  ;;  %v6084_v38 = vor.u32 %v6083_v5, %v6079_v57  ;;  %v6088_v43 = vrot.slane %v6086_v9, 1 }
 0x24a   : > { %v2199_v17 = vcombine.high %v2197_v45, %v2197_v45  ;;  %v3766_v60 = vsel %vm3170_vm4, %v2198_v59, -inf  ;;  %v3773_v40 = vsel %vm3170_vm4, %v2197_v45, -inf  ;;  %v3820_v49 = vrot.slane %v3819_v41, 1 }
 0x24b   : > { %v3761_v26 = vmax.f32 %v3759_v51, %v3760_v58  ;;  %v3767_v61 = vrot.slane %v3766_v60, 4  ;;  %v1131_v22 = vadd.f32 %v10545_v42, %v10456_v47  ;;  %v3827_v33 = vrot.slane %v3826_v39, 1  ;;  %v10885_v47 = vpop.f32.mrb[68].mxu0 }
 0x24c   : > { %v3774_v55 = vrot.slane %v3773_v40, 4  ;;  %v3780_v11 = vsel %vm3170_vm4, %v2199_v17, -inf  ;;  %v10874_v5 = vsel %vm6045_vm0, %v6084_v38, %v6088_v43  ;;  %v10876_v57 = vunpack.c.l.b16 %v5045_v54  ;;  %13979 = vst [vmem:[#allocation11_spill] sm:$0xff] %v10885_v47 }
 0x24d   : > { %13977 = vst [vmem:[#allocation38_spill] sm:$0xff] %v10874_v5  ;;  %v10879_v45 = vsel %vm3170_vm4, %v2233_v56, -inf  ;;  %v3762_v9 = vrot.slane %v3761_v26, 2  ;;  %v3768_v59 = vmax.f32 %v3766_v60, %v3767_v61  ;;  %6492 = vrot.lane.b32.xlu0 %v10874_v5, %s9447_s9  ;;  %6336 = vrot.lane.b32.xlu1 %v10874_v5, %s9446_s8  ;;  %v10887_v58 = vunpack.c.l.b16 %v5046_v23 }
 0x24e   : > { %13978 = vst [vmem:[#allocation12_spill] sm:$0xff] %v10876_v57  ;;  %v3834_v51 = vrot.slane %v3833_v63, 1  ;;  %v3775_v38 = vmax.f32 %v3773_v40, %v3774_v55  ;;  %v3781_v17 = vrot.slane %v3780_v11, 4  ;;  %v10889_v54 = vmax.f32 %v3819_v41, %v3820_v49 }
 0x24f   : > { %13980 = vst [vmem:[#allocation9_spill] sm:$0xff] %v10887_v58  ;;  %v3763_v43 = vmax.f32 %v3761_v26, %v3762_v9  ;;  %v3769_v56 = vrot.slane %v3768_v59, 2  ;;  %v1123_v61 = vadd.f32 %v10545_v42, %v13981_v24  ;;  %v10893_v60 = vmax.f32 %v3826_v39, %v3827_v33 }
 0x250   : > { %v3776_v50 = vrot.slane %v3775_v38, 2  ;;  %v3782_v13 = vmax.f32 %v3780_v11, %v3781_v17  ;;  %v1491_v57 = vmax.f32 %v1131_v22, 0.0  ;;  %v10896_v5 = vsel %vm5731_vm5, %v5556_v8, %v5555_v3 }
 0x251   : > { %v3764_v23 = vrot.slane %v3763_v43, 1  ;;  %v3770_v58 = vmax.f32 %v3768_v59, %v3769_v56  ;;  %v1134_v40 = vadd.f32 %v10545_v42, %v10462_v62  ;;  %v1489_v26 = vmax.f32 %v1123_v61, 0.0  ;;  %v13984_v61 = vld [vmem:[#allocation3_spill] sm:$0xff] }
 0x252   : > { %v10900_v41 = vmax.f32 %v3775_v38, %v3776_v50  ;;  %v3783_v49 = vrot.slane %v3782_v13, 2  ;;  %v1126_v24 = vadd.f32 %v10545_v42, %v10466_v4  ;;  %v10904_v39 = vmax.f32 %v3833_v63, %v3834_v51 }
 0x253   : > { %v3771_v8 = vrot.slane %v3770_v58, 1  ;;  %v1648_v62 = vsel %vm1569_vm3, %v1491_v57, -inf  ;;  %v1492_v50 = vmax.f32 %v1134_v40, 0.0  ;;  %v10912_v11 = vmax.f32 %v3763_v43, %v3764_v23 }
 0x254   : > { %v3784_v55 = vmax.f32 %v3782_v13, %v3783_v49  ;;  %v1490_v9 = vmax.f32 %v1126_v24, 0.0  ;;  %v13982_v4 = vpack.c.bf16 %v10615_v31, %v10615_v31  ;;  %v5778_v59 = vsel %vm5733_vm7, %v10468_v37, %v10483_v14  ;;  %v13987_v24 = vld [vmem:[#allocation5_spill] sm:$0xff] }
 0x255   : > { %v1642_v17 = vsel %vm1569_vm3, %v1489_v26, -inf  ;;  %v5779_v13 = vsel %vm5735_vm8, %v10480_v27, %v5778_v59  ;;  %v10924_v57 = vmax.f32 %v3770_v58, %v3771_v8  ;;  %v13983_v43 = vpack.c.bf16 %v10464_v12, %v10464_v12  ;;  %v13985_v27 = vld [vmem:[#allocation10_spill] sm:$0xff]  ;;  %v13986_v26 = vld [vmem:[#allocation4_spill] sm:$0xff] }
 0x256   : > { %v5529_v63 = vunpack.c.l.b16 %v13982_v4  ;;  %v3785_v38 = vrot.slane %v3784_v55, 1  ;;  %v5780_v31 = vsel %vm5737_vm9, %v10628_v52, %v5779_v13  ;;  %v5784_v37 = vsel %vm5731_vm5, %v13984_v61, %v10529_v0  ;;  %v13989_v4 = vld [vmem:[#allocation15_spill] sm:$0xff]  ;;  %v13991_v13 = vld [vmem:[#allocation26_spill] sm:$0xff]  ;;  %v13993_v61 = vld [vmem:[#allocation28_spill] sm:$0xff] }
 0x257   : > { %v5537_v56 = vunpack.c.l.b16 %v13983_v43  ;;  %v1651_v23 = vsel %vm1569_vm3, %v1492_v50, -inf  ;;  %v5781_v40 = vsel %vm5739_vm10, %v10630_v2, %v5780_v31  ;;  %v5785_v58 = vsel %vm5733_vm7, %v13985_v27, %v5784_v37  ;;  %v13990_v2 = vld [vmem:[#allocation20_spill] sm:$0xff] }
 0x258   : > { %v3786_v14 = vmax.f32 %v3784_v55, %v3785_v38  ;;  %v1645_v49 = vsel %vm1569_vm3, %v1490_v9, -inf  ;;  %v5782_v12 = vsel %vm5741_vm11, %v5529_v63, %v5781_v40  ;;  %v5786_v52 = vsel %vm5735_vm8, %v13986_v26, %v5785_v58  ;;  %v13988_v55 = vld [vmem:[#allocation13_spill] sm:$0xff]  ;;  %v13992_v63 = vld [vmem:[#allocation14_spill] sm:$0xff] }
 0x259   : > { %v1147_v8 = vadd.f32 %v10545_v42, %v13987_v24  ;;  %v5787_v50 = vsel %vm5737_vm9, %v13988_v55, %v5786_v52  ;;  %v3615_v59 = vrot.slane %v13989_v4, 2  ;;  %v1139_v38 = vadd.f32 %v10545_v42, %v13990_v2 }
 0x25a   : > { %v5050_v0 = vpack.c.bf16 %v3786_v14, %v3786_v14  ;;  %v5788_v9 = vsel %vm5739_vm10, %v13991_v13, %v5787_v50  ;;  %v1150_v31 = vadd.f32 %v10545_v42, %v13992_v63  ;;  %v1142_v37 = vadd.f32 %v10545_v42, %v13993_v61 }
 0x25b   : > { %v1495_v43 = vmax.f32 %v1147_v8, 0.0  ;;  %v5789_v14 = vsel %vm5741_vm11, %v5537_v56, %v5788_v9  ;;  %v3616_v27 = vmax.f32 %v13989_v4, %v3615_v59  ;;  %v1493_v58 = vmax.f32 %v1139_v38, 0.0  ;;  %v10976_v38 = vpop.f32.mrb[69].mxu0 }
 0x25c   : > { %v5562_v40 = vunpack.c.l.b16 %v5050_v0  ;;  %v5952_v26 = vpack.c.b16 %v5789_v14, %v5782_v12  ;;  %v1496_v24 = vmax.f32 %v1150_v31, 0.0  ;;  %v1494_v55 = vmax.f32 %v1142_v37, 0.0  ;;  %13996 = vst [vmem:[#allocation10_spill] sm:$0xff] %v10976_v38 }
 0x25d   : > { %v1649_v52 = vsel %vm1569_vm3, %v1495_v43, -inf  ;;  %v3617_v2 = vrot.slane %v3616_v27, 1  ;;  %v1643_v13 = vsel %vm1569_vm3, %v1493_v58, -inf }
 0x25e   : > { %v10961_v8 = vsel %vm5743_vm6, %v10842_v48, %v5562_v40  ;;  %v1650_v50 = vmax.f32 %v1648_v62, %v1649_v52  ;;  %v10966_v42 = vsel %vm10310_vm14, 0, %v5952_v26  ;;  %v1644_v56 = vmax.f32 %v1642_v17, %v1643_v13  ;;  %v10987_v52 = vpop.f32.mrb[70].mxu0 }
 0x25f   : > { %13994 = vst [vmem:[#allocation17_spill] sm:$0xff] %v10961_v8  ;;  %13995 = vst [vmem:[#allocation3_spill] sm:$0xff] %v10966_v42  ;;  %v1652_v0 = vsel %vm1569_vm3, %v1496_v24, -inf  ;;  %v1646_v12 = vsel %vm1569_vm3, %v1494_v55, -inf  ;;  %6462 = vrot.lane.b32.xlu0 %v10966_v42, %s9445_s7  ;;  %6400 = vrot.lane.b32.xlu1 %v10966_v42, %s9447_s9  ;;  %v3618_v4 = vmax.f32 %v3616_v27, %v3617_v2  ;;  %v6277_v59 = vrot.slane %v10966_v42, 1 }
 0x260   : > { %v2268_v48 = vcombine.high %v1650_v50, %v1650_v50  ;;  %v2275_v62 = vrot.slane %v1650_v50, %v9638_v29  ;;  %v2234_v9 = vcombine.high %v1644_v56, %v1644_v56  ;;  %v2241_v17 = vrot.slane %v1644_v56, %v9638_v29  ;;  %13997 = vst [vmem:[#allocation4_spill] sm:$0xff] %v10987_v52  ;;  %v10995_v50 = vpop.f32.mrb[71].mxu0 }
 0x261   : > { %v10979_v43 = vmax.f32 %v1651_v23, %v1652_v0  ;;  %v10981_v63 = vmax.f32 %v1645_v49, %v1646_v12  ;;  %v8884_v40 = vpack.c.bf16 %v3618_v4, %v3618_v4  ;;  %13998 = vst [vmem:[#allocation5_spill] sm:$0xff] %v10995_v50 }
 0x262   : > { %v2282_v31 = vrot.slane %v2268_v48, %v9638_v29  ;;  %v2283_v61 = vcombine.high %v2275_v62, %v2275_v62  ;;  %v3899_v37 = vsel %vm3170_vm4, %v2275_v62, -inf  ;;  %v2248_v27 = vrot.slane %v2234_v9, %v9638_v29 }
 0x263   : > { %v3900_v14 = vrot.slane %v3899_v37, 4  ;;  %v2249_v58 = vcombine.high %v2241_v17, %v2241_v17  ;;  %v3843_v26 = vsel %vm3170_vm4, %v2241_v17, -inf  ;;  %v10993_v55 = vsel %vm10310_vm14, %v8884_v40, 0 }
 0x264   : > { %v2284_v24 = vcombine.high %v2282_v31, %v2282_v31  ;;  %v3906_v23 = vsel %vm3170_vm4, %v2283_v61, -inf  ;;  %v3913_v49 = vsel %vm3170_vm4, %v2282_v31, -inf  ;;  %v6278_v0 = vrot.slane %v10993_v55, 1 }
 0x265   : > { %v3901_v2 = vmax.f32 %v3899_v37, %v3900_v14  ;;  %v3907_v13 = vrot.slane %v3906_v23, 4  ;;  %v3914_v56 = vrot.slane %v3913_v49, 4  ;;  %v2250_v48 = vcombine.high %v2248_v27, %v2248_v27 }
 0x266   : > { %v3920_v12 = vsel %vm3170_vm4, %v2284_v24, -inf  ;;  %v3844_v62 = vrot.slane %v3843_v26, 4  ;;  %v3850_v4 = vsel %vm3170_vm4, %v2249_v58, -inf  ;;  %v11001_v40 = vsel %vm6265_vm15, %v6277_v59, %v6278_v0 }
 0x267   : > { %v3902_v9 = vrot.slane %v3901_v2, 2  ;;  %v3908_v17 = vmax.f32 %v3906_v23, %v3907_v13  ;;  %v3915_v31 = vmax.f32 %v3913_v49, %v3914_v56  ;;  %v3921_v61 = vrot.slane %v3920_v12, 4  ;;  %13999 = vst [vmem:[#allocation13_spill] sm:$0xff] %v11001_v40  ;;  %6432 = vrot.lane.b32.xlu0 %v11001_v40, %s9446_s8  ;;  %6370 = vrot.lane.b32.xlu1 %v11001_v40, %s9445_s7 }
 0x268   : > { %v3845_v22 = vmax.f32 %v3843_v26, %v3844_v62  ;;  %v3851_v3 = vrot.slane %v3850_v4, 4  ;;  %v3857_v37 = vsel %vm3170_vm4, %v2248_v27, -inf  ;;  %v3864_v59 = vsel %vm3170_vm4, %v2250_v48, -inf }
 0x269   : > { %v3903_v14 = vmax.f32 %v3901_v2, %v3902_v9  ;;  %v3909_v33 = vrot.slane %v3908_v17, 2  ;;  %v3916_v51 = vrot.slane %v3915_v31, 2  ;;  %v3922_v50 = vmax.f32 %v3920_v12, %v3921_v61 }
 0x26a   : > { %v3846_v58 = vrot.slane %v3845_v22, 2  ;;  %v3852_v24 = vmax.f32 %v3850_v4, %v3851_v3  ;;  %v3858_v23 = vrot.slane %v3857_v37, 4  ;;  %v3865_v62 = vrot.slane %v3864_v59, 4 }
 0x26b   : > { %v3904_v49 = vrot.slane %v3903_v14, 1  ;;  %v3910_v26 = vmax.f32 %v3908_v17, %v3909_v33  ;;  %v3917_v13 = vmax.f32 %v3915_v31, %v3916_v51  ;;  %v3923_v56 = vrot.slane %v3922_v50, 2 }
 0x26c   : > { %v3847_v27 = vmax.f32 %v3845_v22, %v3846_v58  ;;  %v3853_v2 = vrot.slane %v3852_v24, 2  ;;  %v3859_v0 = vmax.f32 %v3857_v37, %v3858_v23  ;;  %v3866_v8 = vmax.f32 %v3864_v59, %v3865_v62 }
 0x26d   : > { %v3905_v12 = vmax.f32 %v3903_v14, %v3904_v49  ;;  %v3911_v9 = vrot.slane %v3910_v26, 1  ;;  %v3918_v61 = vrot.slane %v3917_v13, 1  ;;  %v3924_v52 = vmax.f32 %v3922_v50, %v3923_v56 }
 0x26e   : > { %v3848_v38 = vrot.slane %v3847_v27, 1  ;;  %v3854_v47 = vmax.f32 %v3852_v24, %v3853_v2  ;;  %v3860_v40 = vrot.slane %v3859_v0, 2  ;;  %v14000_v3 = vrot.slane %v10900_v41, 1 }
 0x26f   : > { %v5047_v33 = vpack.c.bf16 %v10912_v11, %v10912_v11  ;;  %v5048_v22 = vpack.c.bf16 %v10924_v57, %v10924_v57  ;;  %v3925_v51 = vrot.slane %v3924_v52, 1  ;;  %v3912_v4 = vmax.f32 %v3910_v26, %v3911_v9 }
 0x270   : > { %v11012_v48 = vmax.f32 %v10900_v41, %v14000_v3  ;;  %v3919_v17 = vmax.f32 %v3917_v13, %v3918_v61  ;;  %v3861_v31 = vmax.f32 %v3859_v0, %v3860_v40  ;;  %v3867_v50 = vrot.slane %v3866_v8, 2 }
 0x271   : > { %v14001_v37 = vrot.slane %v10879_v45, 4  ;;  %v14002_v58 = vpack.c.bf16 %v10889_v54, %v10889_v54  ;;  %v3855_v24 = vrot.slane %v3854_v47, 1  ;;  %v11030_v57 = vmax.f32 %v3924_v52, %v3925_v51 }
 0x272   : > { %v5067_v23 = vpack.c.bf16 %v3905_v12, %v3905_v12  ;;  %v3849_v59 = vmax.f32 %v3847_v27, %v3848_v38  ;;  %v3868_v40 = vmax.f32 %v3866_v8, %v3867_v50  ;;  %v14004_v49 = vpack.c.bf16 %v10893_v60, %v10893_v60 }
 0x273   : > { %v11021_v14 = vmax.f32 %v10879_v45, %v14001_v37  ;;  %v11028_v11 = vunpack.c.l.b16 %v14002_v58  ;;  %v11039_v13 = vunpack.c.l.b16 %v5047_v33  ;;  %v2285_v54 = vcombine.high %v10979_v43, %v10979_v43 }
 0x274   : > { %v11035_v26 = vunpack.c.l.b16 %v14004_v49  ;;  %v11043_v56 = vunpack.c.l.b16 %v5048_v22  ;;  %v5068_v52 = vpack.c.bf16 %v3912_v4, %v3912_v4  ;;  %v5069_v2 = vpack.c.bf16 %v3919_v17, %v3919_v17 }
 0x275   : > { %14003 = vst [vmem:[#allocation15_spill] sm:$0xff] %v11028_v11  ;;  %v3862_v0 = vrot.slane %v3861_v31, 1  ;;  %v11045_v38 = vmax.f32 %v3854_v47, %v3855_v24  ;;  %v2292_v60 = vrot.slane %v10979_v43, %v9638_v29  ;;  %v2299_v8 = vrot.slane %v2285_v54, %v9638_v29 }
 0x276   : > { %14005 = vst [vmem:[#allocation20_spill] sm:$0xff] %v11035_v26  ;;  %v2251_v27 = vcombine.high %v10981_v63, %v10981_v63  ;;  %v5070_v62 = vpack.c.bf16 %v11030_v57, %v11030_v57  ;;  %v11054_v12 = vunpack.c.l.b16 %v5067_v23  ;;  %v3869_v9 = vrot.slane %v3868_v40, 1 }
 0x277   : > { %v5059_v61 = vpack.c.bf16 %v3849_v59, %v3849_v59  ;;  %v2300_v3 = vcombine.high %v2292_v60, %v2292_v60  ;;  %v3927_v33 = vsel %vm3170_vm4, %v2292_v60, -inf  ;;  %v3941_v47 = vsel %vm3170_vm4, %v2299_v8, -inf }
 0x278   : > { %v2258_v43 = vrot.slane %v10981_v63, %v9638_v29  ;;  %v11060_v22 = vunpack.c.l.b16 %v5068_v52  ;;  %v11062_v51 = vunpack.c.l.b16 %v5069_v2  ;;  %v3863_v4 = vmax.f32 %v3861_v31, %v3862_v0 }
 0x279   : > { %v3928_v17 = vrot.slane %v3927_v33, 4  ;;  %v5060_v50 = vpack.c.bf16 %v11045_v38, %v11045_v38  ;;  %v3934_v37 = vsel %vm3170_vm4, %v2300_v3, -inf  ;;  %v3942_v58 = vrot.slane %v3941_v47, 4 }
 0x27a   : > { %14006 = vst [vmem:[#allocation26_spill] sm:$0xff] %v11060_v22  ;;  %14007 = vst [vmem:[#allocation14_spill] sm:$0xff] %v11062_v51  ;;  %v2265_v24 = vrot.slane %v2251_v27, %v9638_v29  ;;  %v11068_v57 = vmax.f32 %v3868_v40, %v3869_v9  ;;  %v11070_v23 = vunpack.c.l.b16 %v5059_v61  ;;  %v3935_v63 = vrot.slane %v3934_v37, 4 }
 0x27b   : > { %v3929_v59 = vmax.f32 %v3927_v33, %v3928_v17  ;;  %v3943_v49 = vmax.f32 %v3941_v47, %v3942_v58  ;;  %v2266_v54 = vcombine.high %v2258_v43, %v2258_v43  ;;  %v3871_v31 = vsel %vm3170_vm4, %v2258_v43, -inf  ;;  %v11076_v43 = vpop.f32.mrb[72].mxu0 }
 0x27c   : > { %v2267_v52 = vcombine.high %v2265_v24, %v2265_v24  ;;  %v2301_v2 = vcombine.high %v2299_v8, %v2299_v8  ;;  %v3936_v60 = vmax.f32 %v3934_v37, %v3935_v63  ;;  %v3872_v38 = vrot.slane %v3871_v31, 4  ;;  %14008 = vst [vmem:[#allocation28_spill] sm:$0xff] %v11076_v43  ;;  %v11078_v26 = vpop.f32.mrb[73].mxu0 }
 0x27d   : > { %v3930_v0 = vrot.slane %v3929_v59, 2  ;;  %v3944_v41 = vrot.slane %v3943_v49, 2  ;;  %v3878_v3 = vsel %vm3170_vm4, %v2266_v54, -inf  ;;  %v3885_v27 = vsel %vm3170_vm4, %v2265_v24, -inf  ;;  %14009 = vst [vmem:[#allocation39_spill] sm:$0xff] %v11078_v26 }
 0x27e   : > { %v3892_v40 = vsel %vm3170_vm4, %v2267_v52, -inf  ;;  %v3937_v61 = vrot.slane %v3936_v60, 2  ;;  %v3873_v33 = vmax.f32 %v3871_v31, %v3872_v38  ;;  %v3879_v17 = vrot.slane %v3878_v3, 4  ;;  %v11082_v31 = vpop.f32.mrb[74].mxu0 }
 0x27f   : > { %v3931_v9 = vmax.f32 %v3929_v59, %v3930_v0  ;;  %v5061_v47 = vpack.c.bf16 %v3863_v4, %v3863_v4  ;;  %v3945_v58 = vmax.f32 %v3943_v49, %v3944_v41  ;;  %v3886_v45 = vrot.slane %v3885_v27, 4  ;;  %14010 = vst [vmem:[#allocation40_spill] sm:$0xff] %v11082_v31  ;;  %v11084_v38 = vpop.f32.mrb[75].mxu0 }
 0x280   : > { %v3893_v51 = vrot.slane %v3892_v40, 4  ;;  %v3938_v37 = vmax.f32 %v3936_v60, %v3937_v61  ;;  %v3874_v63 = vrot.slane %v3873_v33, 2  ;;  %v3880_v22 = vmax.f32 %v3878_v3, %v3879_v17  ;;  %v11086_v17 = vpop.f32.mrb[76].mxu0 }
 0x281   : > { %v3932_v8 = vrot.slane %v3931_v9, 1  ;;  %v3948_v24 = vsel %vm3170_vm4, %v2301_v2, -inf  ;;  %v3887_v54 = vmax.f32 %v3885_v27, %v3886_v45  ;;  %v6093_v59 = vshll.u32 %v10966_v42, 16  ;;  %14011 = vst [vmem:[#allocation41_spill] sm:$0xff] %v11086_v17 }
 0x282   : > { %v3894_v52 = vmax.f32 %v3892_v40, %v3893_v51  ;;  %v3939_v4 = vrot.slane %v3938_v37, 1  ;;  %v3946_v41 = vrot.slane %v3945_v58, 1  ;;  %v3875_v49 = vmax.f32 %v3873_v33, %v3874_v63 }
 0x283   : > { %v3881_v0 = vrot.slane %v3880_v22, 2  ;;  %v3933_v43 = vmax.f32 %v3931_v9, %v3932_v8  ;;  %v3888_v60 = vrot.slane %v3887_v54, 2  ;;  %v6095_v3 = vrot.slane %v6093_v59, 1 }
 0x284   : > { %v3895_v61 = vrot.slane %v3894_v52, 2  ;;  %v11088_v26 = vunpack.c.l.b16 %v5070_v62  ;;  %v3940_v45 = vmax.f32 %v3938_v37, %v3939_v4  ;;  %v3876_v51 = vrot.slane %v3875_v49, 1 }
 0x285   : > { %v3882_v2 = vmax.f32 %v3880_v22, %v3881_v0  ;;  %v5572_v27 = vunpack.c.l.b16 %v5060_v50  ;;  %v3889_v40 = vmax.f32 %v3887_v54, %v3888_v60  ;;  %v6091_v11 = vshrl.u32 %v10966_v42, 16 }
 0x286   : > { %v3896_v31 = vmax.f32 %v3894_v52, %v3895_v61  ;;  %v5062_v33 = vpack.c.bf16 %v11068_v57, %v11068_v57  ;;  %v11093_v63 = vunpack.c.l.b16 %v5061_v47  ;;  %v11095_v9 = vmax.f32 %v3945_v58, %v3946_v41  ;;  %v11103_v57 = vld [vmem:[%s13758_s2] ss:$0 sm:$0xff] }
 0x287   : > { %v3949_v8 = vrot.slane %v3948_v24, 4  ;;  %v5071_v59 = vpack.c.bf16 %v3933_v43, %v3933_v43  ;;  %v6096_v62 = vor.u32 %v6095_v3, %v6091_v11  ;;  %v6098_v37 = vshll.u32 %v10993_v55, 16 }
 0x288   : > { %v3897_v17 = vrot.slane %v3896_v31, 1  ;;  %v5072_v4 = vpack.c.bf16 %v3940_v45, %v3940_v45  ;;  %v11098_v22 = vmax.f32 %v3875_v49, %v3876_v51  ;;  %v3883_v50 = vrot.slane %v3882_v2, 1 }
 0x289   : > { %v3890_v54 = vrot.slane %v3889_v40, 1  ;;  %v6100_v0 = vrot.slane %v6098_v37, 1  ;;  %v1163_v47 = vadd.f32 %v11103_v57, %v10650_v25  ;;  %v1155_v11 = vadd.f32 %v11103_v57, %v10654_v44 }
 0x28a   : > { %v3898_v52 = vmax.f32 %v3896_v31, %v3897_v17  ;;  %v11109_v58 = vunpack.c.l.b16 %v5062_v33  ;;  %v11113_v55 = vsel %vm5731_vm5, %v5572_v27, %v11070_v23  ;;  %v11115_v43 = vmax.f32 %v3948_v24, %v3949_v8  ;;  %v14015_v33 = vld [vmem:[#allocation30_spill] sm:$0xff] }
 0x28b   : > { %v1166_v31 = vadd.f32 %v11103_v57, %v10657_v53  ;;  %v11121_v49 = vunpack.c.l.b16 %v5071_v59  ;;  %v11124_v60 = vsel %vm6045_vm0, %v6096_v62, %v6100_v0  ;;  %v11126_v44 = vunpack.c.l.b16 %v5072_v4  ;;  %v14018_v4 = vld [vmem:[#allocation29_spill] sm:$0xff]  ;;  %v14019_v0 = vld [vmem:[#allocation31_spill] sm:$0xff] }
 0x28c   : > { %v5066_v25 = vpack.c.bf16 %v3898_v52, %v3898_v52  ;;  %14012 = vst [vmem:[#allocation42_spill] sm:$0xff] %v11124_v60  ;;  %v11128_v61 = vmax.f32 %v3882_v2, %v3883_v50  ;;  %v11130_v23 = vmax.f32 %v3889_v40, %v3890_v54  ;;  %6494 = vrot.lane.b32.xlu0 %v11124_v60, %s9447_s9  ;;  %v1499_v3 = vmax.f32 %v1163_v47, 0.0 }
 0x28d   : > { %14013 = vst [vmem:[#allocation43_spill] sm:$0xff] %v11126_v44  ;;  %6338 = vrot.lane.b32.xlu1 %v11124_v60, %s9446_s8  ;;  %v1497_v17 = vmax.f32 %v1155_v11, 0.0  ;;  %v5791_v45 = vsel %vm5733_vm7, %v10668_v32, %v10691_v6  ;;  %v1500_v51 = vmax.f32 %v1166_v31, 0.0  ;;  %v14014_v2 = vpack.c.bf16 %v10817_v46, %v10817_v46  ;;  %v14016_v32 = vld [vmem:[#allocation21_spill] sm:$0xff]  ;;  %v14020_v11 = vld [vmem:[#allocation32_spill] sm:$0xff] }
 0x28e   : > { %v5578_v53 = vunpack.c.l.b16 %v5066_v25  ;;  %v5792_v40 = vsel %vm5735_vm8, %v10688_v7, %v5791_v45  ;;  %v5797_v8 = vsel %vm5731_vm5, %v14015_v33, %v10757_v19  ;;  %v1179_v46 = vadd.f32 %v11103_v57, %v10676_v20 }
 0x28f   : > { %v5545_v27 = vunpack.c.l.b16 %v14014_v2  ;;  %v5793_v62 = vsel %vm5737_vm9, %v10828_v34, %v5792_v40  ;;  %v5798_v6 = vsel %vm5733_vm7, %v14016_v32, %v5797_v8  ;;  %v14017_v7 = vpack.c.bf16 %v10686_v30, %v10686_v30 }
 0x290   : > { %v11151_v59 = vsel %vm5743_vm6, %v11054_v12, %v5578_v53  ;;  %v5794_v19 = vsel %vm5739_vm10, %v10840_v35, %v5793_v62  ;;  %v5799_v12 = vsel %vm5735_vm8, %v14018_v4, %v5798_v6  ;;  %v3727_v50 = vrot.slane %v10693_v16, 2  ;;  %v14021_v62 = vld [vmem:[#allocation27_spill] sm:$0xff] }
 0x291   : > { %v5553_v37 = vunpack.c.l.b16 %v14017_v7  ;;  %v5795_v34 = vsel %vm5741_vm11, %v5545_v27, %v5794_v19  ;;  %v5800_v54 = vsel %vm5737_vm9, %v10807_v15, %v5799_v12  ;;  %v1503_v52 = vmax.f32 %v1179_v46, 0.0  ;;  %v14023_v19 = vld [vmem:[#allocation25_spill] sm:$0xff]  ;;  %v11204_v12 = vpop.f32.mrb[77].mxu0 }
 0x292   : > { %v1171_v20 = vadd.f32 %v11103_v57, %v14019_v0  ;;  %v5801_v35 = vsel %vm5739_vm10, %v10812_v21, %v5800_v54  ;;  %v3728_v47 = vmax.f32 %v10693_v16, %v3727_v50  ;;  %v1182_v31 = vadd.f32 %v11103_v57, %v14020_v11  ;;  %v11211_v11 = vpop.f32.mrb[78].mxu0 }
 0x293   : > { %v1660_v25 = vsel %vm1569_vm3, %v1499_v3, -inf  ;;  %v5802_v53 = vsel %vm5741_vm11, %v5553_v37, %v5801_v35  ;;  %v1661_v15 = vsel %vm1569_vm3, %v1503_v52, -inf  ;;  %v1654_v8 = vsel %vm1569_vm3, %v1497_v17, -inf  ;;  %14024 = vst [vmem:[#allocation21_spill] sm:$0xff] %v11211_v11 }
 0x294   : > { %v1501_v45 = vmax.f32 %v1171_v20, 0.0  ;;  %v5954_v2 = vpack.c.b16 %v5802_v53, %v5795_v34  ;;  %v1662_v27 = vmax.f32 %v1660_v25, %v1661_v15  ;;  %v3729_v40 = vrot.slane %v3728_v47, 1 }
 0x295   : > { %v1504_v33 = vmax.f32 %v1182_v31, 0.0  ;;  %v1663_v21 = vsel %vm1569_vm3, %v1500_v51, -inf  ;;  %v11186_v16 = vadd.f32 %v11103_v57, %v14021_v62  ;;  %v11202_v4 = vadd.f32 %v11103_v57, %v14023_v19 }
 0x296   : > { %v1655_v32 = vsel %vm1569_vm3, %v1501_v45, -inf  ;;  %v11191_v3 = vsel %vm10310_vm14, 0, %v5954_v2  ;;  %v2336_v6 = vcombine.high %v1662_v27, %v1662_v27  ;;  %v2343_v46 = vrot.slane %v1662_v27, %v9638_v29  ;;  %v11219_v45 = vpop.f32.mrb[79].mxu0 }
 0x297   : > { %14022 = vst [vmem:[#allocation30_spill] sm:$0xff] %v11191_v3  ;;  %v3730_v7 = vmax.f32 %v3728_v47, %v3729_v40  ;;  %6464 = vrot.lane.b32.xlu0 %v11191_v3, %s9445_s7  ;;  %6402 = vrot.lane.b32.xlu1 %v11191_v3, %s9447_s9  ;;  %v6280_v17 = vrot.slane %v11191_v3, 1  ;;  %v1656_v51 = vmax.f32 %v1654_v8, %v1655_v32  ;;  %v1664_v37 = vsel %vm1569_vm3, %v1504_v33, -inf }
 0x298   : > { %v2350_v50 = vrot.slane %v2336_v6, %v9638_v29  ;;  %v2351_v34 = vcombine.high %v2343_v46, %v2343_v46  ;;  %v4011_v54 = vsel %vm3170_vm4, %v2343_v46, -inf  ;;  %v11209_v47 = vmax.f32 %v1663_v21, %v1664_v37  ;;  %14025 = vst [vmem:[#allocation29_spill] sm:$0xff] %v11219_v45 }
 0x299   : > { %v8885_v52 = vpack.c.bf16 %v3730_v7, %v3730_v7  ;;  %v4012_v0 = vrot.slane %v4011_v54, 4  ;;  %v2302_v20 = vcombine.high %v1656_v51, %v1656_v51  ;;  %v2309_v35 = vrot.slane %v1656_v51, %v9638_v29 }
 0x29a   : > { %v2352_v31 = vcombine.high %v2350_v50, %v2350_v50  ;;  %v4018_v25 = vsel %vm3170_vm4, %v2351_v34, -inf  ;;  %v4025_v53 = vsel %vm3170_vm4, %v2350_v50, -inf  ;;  %v1502_v24 = vmax.f32 %v11202_v4, 0.0 }
 0x29b   : > { %v11217_v15 = vsel %vm10310_vm14, %v8885_v52, 0  ;;  %v4013_v2 = vmax.f32 %v4011_v54, %v4012_v0  ;;  %v4019_v27 = vrot.slane %v4018_v25, 4  ;;  %v4026_v40 = vrot.slane %v4025_v53, 4 }
 0x29c   : > { %v6281_v33 = vrot.slane %v11217_v15, 1  ;;  %v4032_v8 = vsel %vm3170_vm4, %v2352_v31, -inf  ;;  %v2316_v21 = vrot.slane %v2302_v20, %v9638_v29  ;;  %v2317_v62 = vcombine.high %v2309_v35, %v2309_v35 }
 0x29d   : > { %v3955_v32 = vsel %vm3170_vm4, %v2309_v35, -inf  ;;  %v4014_v6 = vrot.slane %v4013_v2, 2  ;;  %v4020_v46 = vmax.f32 %v4018_v25, %v4019_v27  ;;  %v4027_v7 = vmax.f32 %v4025_v53, %v4026_v40 }
 0x29e   : > { %v4033_v51 = vrot.slane %v4032_v8, 4  ;;  %v11226_v37 = vsel %vm6265_vm15, %v6280_v17, %v6281_v33  ;;  %v2318_v19 = vcombine.high %v2316_v21, %v2316_v21  ;;  %v3956_v50 = vrot.slane %v3955_v32, 4 }
 0x29f   : > { %14026 = vst [vmem:[#allocation31_spill] sm:$0xff] %v11226_v37  ;;  %v3962_v34 = vsel %vm3170_vm4, %v2317_v62, -inf  ;;  %v4015_v54 = vmax.f32 %v4013_v2, %v4014_v6  ;;  %v4021_v52 = vrot.slane %v4020_v46, 2  ;;  %v4028_v0 = vrot.slane %v4027_v7, 2  ;;  %6434 = vrot.lane.b32.xlu0 %v11226_v37, %s9446_s8  ;;  %6372 = vrot.lane.b32.xlu1 %v11226_v37, %s9445_s7 }
 0x2a0   : > { %v4034_v31 = vmax.f32 %v4032_v8, %v4033_v51  ;;  %v3957_v20 = vmax.f32 %v3955_v32, %v3956_v50  ;;  %v3963_v35 = vrot.slane %v3962_v34, 4  ;;  %v3969_v25 = vsel %vm3170_vm4, %v2316_v21, -inf }
 0x2a1   : > { %v3976_v17 = vsel %vm3170_vm4, %v2318_v19, -inf  ;;  %v4016_v53 = vrot.slane %v4015_v54, 1  ;;  %v4022_v27 = vmax.f32 %v4020_v46, %v4021_v52  ;;  %v4029_v40 = vmax.f32 %v4027_v7, %v4028_v0 }
 0x2a2   : > { %v4035_v33 = vrot.slane %v4034_v31, 2  ;;  %v3958_v2 = vrot.slane %v3957_v20, 2  ;;  %v3964_v62 = vmax.f32 %v3962_v34, %v3963_v35  ;;  %v3970_v6 = vrot.slane %v3969_v25, 4 }
 0x2a3   : > { %v3977_v8 = vrot.slane %v3976_v17, 4  ;;  %v4023_v51 = vrot.slane %v4022_v27, 1  ;;  %v4030_v41 = vrot.slane %v4029_v40, 1  ;;  %v1498_v21 = vmax.f32 %v11186_v16, 0.0 }
 0x2a4   : > { %v4036_v30 = vmax.f32 %v4034_v31, %v4035_v33  ;;  %v3959_v37 = vmax.f32 %v3957_v20, %v3958_v2  ;;  %v3965_v32 = vrot.slane %v3964_v62, 2  ;;  %v3971_v50 = vmax.f32 %v3969_v25, %v3970_v6 }
 0x2a5   : > { %v3978_v42 = vmax.f32 %v3976_v17, %v3977_v8  ;;  %v4017_v19 = vmax.f32 %v4015_v54, %v4016_v53  ;;  %v11239_v46 = vadd.f32 %v11103_v57, %v10858_v28  ;;  %v4024_v7 = vmax.f32 %v4022_v27, %v4023_v51 }
 0x2a6   : > { %v4037_v60 = vrot.slane %v4036_v30, 1  ;;  %v3966_v34 = vmax.f32 %v3964_v62, %v3965_v32  ;;  %v3972_v52 = vrot.slane %v3971_v50, 2  ;;  %v14027_v4 = vpack.c.bf16 %v11098_v22, %v11098_v22 }
 0x2a7   : > { %v3979_v0 = vrot.slane %v3978_v42, 2  ;;  %v4031_v35 = vmax.f32 %v4029_v40, %v4030_v41  ;;  %v1658_v16 = vsel %vm1569_vm3, %v1502_v24, -inf  ;;  %v3960_v25 = vrot.slane %v3959_v37, 1 }
 0x2a8   : > { %v11246_v20 = vunpack.c.l.b16 %v14027_v4  ;;  %v4038_v54 = vmax.f32 %v4036_v30, %v4037_v60  ;;  %v3973_v17 = vmax.f32 %v3971_v50, %v3972_v52  ;;  %v14028_v53 = vpack.c.bf16 %v11128_v61, %v11128_v61 }
 0x2a9   : > { %v3980_v28 = vmax.f32 %v3978_v42, %v3979_v0  ;;  %v1657_v33 = vsel %vm1569_vm3, %v1498_v21, -inf  ;;  %v3967_v2 = vrot.slane %v3966_v34, 1  ;;  %v2353_v22 = vcombine.high %v11209_v47, %v11209_v47 }
 0x2aa   : > { %v11252_v27 = vunpack.c.l.b16 %v14028_v53  ;;  %v5083_v62 = vpack.c.bf16 %v4017_v19, %v4017_v19  ;;  %v5084_v6 = vpack.c.bf16 %v4024_v7, %v4024_v7  ;;  %v3974_v41 = vrot.slane %v3973_v17, 1 }
 0x2ab   : > { %v5085_v60 = vpack.c.bf16 %v4031_v35, %v4031_v35  ;;  %v2360_v42 = vrot.slane %v11209_v47, %v9638_v29  ;;  %v2367_v30 = vrot.slane %v2353_v22, %v9638_v29  ;;  %v1659_v61 = vmax.f32 %v1657_v33, %v1658_v16 }
 0x2ac   : > { %v5086_v40 = vpack.c.bf16 %v4038_v54, %v4038_v54  ;;  %v11261_v8 = vmax.f32 %v3959_v37, %v3960_v25  ;;  %v3981_v51 = vrot.slane %v3980_v28, 1  ;;  %v11265_v32 = vadd.f32 %v11103_v57, %v10862_v18 }
 0x2ad   : > { %v11267_v50 = vmax.f32 %v3966_v34, %v3967_v2  ;;  %v2368_v21 = vcombine.high %v2360_v42, %v2360_v42  ;;  %v4039_v19 = vsel %vm3170_vm4, %v2360_v42, -inf  ;;  %v4053_v7 = vsel %vm3170_vm4, %v2367_v30, -inf }
 0x2ae   : > { %v11271_v52 = vunpack.c.l.b16 %v5083_v62  ;;  %v11273_v47 = vunpack.c.l.b16 %v5084_v6  ;;  %v11275_v0 = vmax.f32 %v3973_v17, %v3974_v41  ;;  %v4040_v37 = vrot.slane %v4039_v19, 4 }
 0x2af   : > { %v11277_v4 = vunpack.c.l.b16 %v5085_v60  ;;  %v4046_v35 = vsel %vm3170_vm4, %v2368_v21, -inf  ;;  %v4054_v18 = vrot.slane %v4053_v7, 4  ;;  %v2319_v16 = vcombine.high %v1659_v61, %v1659_v61 }
 0x2b0   : > { %14029 = vst [vmem:[#allocation32_spill] sm:$0xff] %v11273_v47  ;;  %v11280_v34 = vunpack.c.l.b16 %v5086_v40  ;;  %v11282_v54 = vmax.f32 %v3980_v28, %v3981_v51  ;;  %v4041_v53 = vmax.f32 %v4039_v19, %v4040_v37  ;;  %v5076_v33 = vpack.c.bf16 %v11267_v50, %v11267_v50 }
 0x2b1   : > { %14030 = vst [vmem:[#allocation27_spill] sm:$0xff] %v11277_v4  ;;  %v4047_v17 = vrot.slane %v4046_v35, 4  ;;  %v4055_v2 = vmax.f32 %v4053_v7, %v4054_v18  ;;  %v2326_v22 = vrot.slane %v1659_v61, %v9638_v29  ;;  %v2369_v6 = vcombine.high %v2367_v30, %v2367_v30  ;;  %v11296_v30 = vpop.f32.mrb[80].mxu0 }
 0x2b2   : > { %14031 = vst [vmem:[#allocation25_spill] sm:$0xff] %v11280_v34  ;;  %v4042_v41 = vrot.slane %v4041_v53, 2  ;;  %v2333_v60 = vrot.slane %v2319_v16, %v9638_v29  ;;  %v6105_v51 = vshll.u32 %v11191_v3, 16  ;;  %14032 = vst [vmem:[#allocation44_spill] sm:$0xff] %v11296_v30  ;;  %v9410_v16 = vld [vmem:[%s13759_s3] sm:$0xff]  }
 0x2b3   : > { %v4048_v28 = vmax.f32 %v4046_v35, %v4047_v17  ;;  %v4056_v42 = vrot.slane %v4055_v2, 2  ;;  %v2334_v40 = vcombine.high %v2326_v22, %v2326_v22  ;;  %v3983_v50 = vsel %vm3170_vm4, %v2326_v22, -inf  ;;  %v9409_v35 = vld [vmem:[%s13759_s3 + $0x40] sm:$0xff]  }
 0x2b4   : > { %v4043_v21 = vmax.f32 %v4041_v53, %v4042_v41  ;;  %v2335_v19 = vcombine.high %v2333_v60, %v2333_v60  ;;  %v3997_v7 = vsel %vm3170_vm4, %v2333_v60, -inf  ;;  %v3984_v18 = vrot.slane %v3983_v50, 4  ;;  %v11305_v60 = vpop.f32.mrb[81].mxu0  ;;  %9027 = vmatprep.subr.bf16.mxu1 %v9409_v35 }
 0x2b5   : > { %v4049_v37 = vrot.slane %v4048_v28, 2  ;;  %v4057_v61 = vmax.f32 %v4055_v2, %v4056_v42  ;;  %v3990_v31 = vsel %vm3170_vm4, %v2334_v40, -inf  ;;  %v3998_v22 = vrot.slane %v3997_v7, 4  ;;  %14033 = vst [vmem:[#allocation45_spill] sm:$0xff] %v11305_v60  ;;  %v9411_v2 = vld [vmem:[%s13759_s3 + $0x48] sm:$0xff]   ;;  %v11311_v25 = vpop.f32.mrb[82].mxu0  ;;  %9028 = vmatpush3.bf16.msra.mxu1 %v9410_v16 }
 0x2b6   : > { %v4044_v53 = vrot.slane %v4043_v21, 1  ;;  %v3991_v17 = vrot.slane %v3990_v31, 4  ;;  %v4004_v41 = vsel %vm3170_vm4, %v2335_v19, -inf  ;;  %v4060_v40 = vsel %vm3170_vm4, %v2369_v6, -inf  ;;  %v11313_v19 = vpop.f32.mrb[83].mxu0  ;;  %9029 = vmatprep.subr.bf16.mxu1 %v9411_v2 }
 0x2b7   : > { %v4050_v42 = vmax.f32 %v4048_v28, %v4049_v37  ;;  %v3985_v24 = vmax.f32 %v3983_v50, %v3984_v18  ;;  %v4005_v62 = vrot.slane %v4004_v41, 4  ;;  %v4058_v34 = vrot.slane %v4057_v61, 1  ;;  %14034 = vst [vmem:[#allocation46_spill] sm:$0xff] %v11313_v19 }
 0x2b8   : > { %v3992_v4 = vmax.f32 %v3990_v31, %v3991_v17  ;;  %v3999_v47 = vmax.f32 %v3997_v7, %v3998_v22  ;;  %v6107_v30 = vrot.slane %v6105_v51, 1  ;;  %v4045_v60 = vmax.f32 %v4043_v21, %v4044_v53  ;;  %v9412_v31 = vld [vmem:[%s13759_s3 + $0x8] sm:$0xff]   ;;  %v11321_v21 = vpop.f32.mrb[84].mxu0 }
 0x2b9   : > { %v4051_v45 = vrot.slane %v4050_v42, 1  ;;  %v3986_v11 = vrot.slane %v3985_v24, 2  ;;  %v4006_v44 = vmax.f32 %v4004_v41, %v4005_v62  ;;  %v5078_v6 = vpack.c.bf16 %v11282_v54, %v11282_v54  ;;  %14035 = vst [vmem:[#allocation47_spill] sm:$0xff] %v11321_v21  ;;  %9030 = vmatpush3.bf16.msra.mxu1 %v9412_v31 }
 0x2ba   : > { %v3993_v28 = vrot.slane %v3992_v4, 2  ;;  %v4000_v50 = vrot.slane %v3999_v47, 2  ;;  %v6103_v37 = vshrl.u32 %v11191_v3, 16  ;;  %v5588_v51 = vunpack.c.l.b16 %v5076_v33 }
 0x2bb   : > { %v4061_v7 = vrot.slane %v4060_v40, 4  ;;  %v3987_v18 = vmax.f32 %v3985_v24, %v3986_v11  ;;  %v4007_v35 = vrot.slane %v4006_v44, 2  ;;  %v6110_v17 = vshll.u32 %v11217_v15, 16 }
 0x2bc   : > { %v3994_v16 = vmax.f32 %v3992_v4, %v3993_v28  ;;  %v4001_v62 = vmax.f32 %v3999_v47, %v4000_v50  ;;  %v6108_v53 = vor.u32 %v6107_v30, %v6103_v37  ;;  %v11324_v54 = vmax.f32 %v4050_v42, %v4051_v45 }
 0x2bd   : > { %v11326_v22 = vmax.f32 %v4057_v61, %v4058_v34  ;;  %v5087_v41 = vpack.c.bf16 %v4045_v60, %v4045_v60  ;;  %v4008_v2 = vmax.f32 %v4006_v44, %v4007_v35  ;;  %v14036_v33 = vpack.c.bf16 %v11261_v8, %v11261_v8 }
 0x2be   : > { %v3988_v11 = vrot.slane %v3987_v18, 1  ;;  %v3995_v24 = vrot.slane %v3994_v16, 1  ;;  %v6112_v19 = vrot.slane %v6110_v17, 1  ;;  %v14037_v47 = vpack.c.bf16 %v11275_v0, %v11275_v0  ;;  %v14045_v17 = vld [vmem:[#allocation11_spill] sm:$0xff] }
 0x2bf   : > { %v5587_v3 = vunpack.c.l.b16 %v14036_v33  ;;  %v4002_v15 = vrot.slane %v4001_v62, 1  ;;  %v4009_v30 = vrot.slane %v4008_v2, 1  ;;  %v1505_v45 = vmax.f32 %v11265_v32, 0.0 }
 0x2c0   : > { %v11334_v4 = vunpack.c.l.b16 %v14037_v47  ;;  %v11337_v34 = vunpack.c.l.b16 %v5078_v6  ;;  %v11342_v61 = vmax.f32 %v4060_v40, %v4061_v7  ;;  %v11345_v8 = vsel %vm6045_vm0, %v6108_v53, %v6112_v19  ;;  %v9413_v7 = vld [vmem:[%s13759_s3 + $0x50] sm:$0xff]  }
 0x2c1   : > { %v11340_v44 = vsel %vm5731_vm5, %v5588_v51, %v5587_v3  ;;  %14039 = vst [vmem:[#allocation49_spill] sm:$0xff] %v11345_v8  ;;  %v11351_v42 = vunpack.c.l.b16 %v5087_v41  ;;  %v4010_v28 = vmax.f32 %v4008_v2, %v4009_v30  ;;  %6496 = vrot.lane.b32.xlu0 %v11345_v8, %s9447_s9  ;;  %6340 = vrot.lane.b32.xlu1 %v11345_v8, %s9446_s8  ;;  %v14040_v40 = vmax.f32 %v11239_v46, 0.0  ;;  %v14059_v8 = vld [vmem:[#allocation5_spill] sm:$0xff] }
 0x2c2   : > { %14038 = vst [vmem:[#allocation48_spill] sm:$0xff] %v11342_v61  ;;  %v11357_v3 = vmax.f32 %v3987_v18, %v3988_v11  ;;  %v11359_v32 = vmax.f32 %v3994_v16, %v3995_v24  ;;  %v11366_v6 = vadd.f32 %v11103_v57, %v10864_v36  ;;  %v11368_v50 = vmax.f32 %v4001_v62, %v4002_v15  ;;  %v14042_v36 = vld [vmem:[#allocation12_spill] sm:$0xff]  ;;  %v14043_v16 = vld [vmem:[#allocation17_spill] sm:$0xff]  ;;  %v14044_v62 = vld [vmem:[#allocation34_spill] sm:$0xff] }
 0x2c3   : > { %v1672_v19 = vsel %vm1569_vm3, %v14040_v40, -inf  ;;  %v5082_v37 = vpack.c.bf16 %v4010_v28, %v4010_v28  ;;  %v1666_v31 = vsel %vm1569_vm3, %v1505_v45, -inf  ;;  %v11373_v51 = vadd.f32 %v11103_v57, %v10868_v10  ;;  %v14047_v11 = vld [vmem:[#allocation9_spill] sm:$0xff]  ;;  %v14048_v24 = vld [vmem:[#allocation35_spill] sm:$0xff]  ;;  %9031 = vmatprep.subr.bf16.mxu1 %v9413_v7  ;;  %v14051_v7 = vld [vmem:[#allocation10_spill] sm:$0xff] }
 0x2c4   : > { %v14041_v46 = vpack.c.bf16 %v11012_v48, %v11012_v48  ;;  %v5804_v35 = vsel %vm5733_vm7, %v14042_v36, %v10896_v5  ;;  %v5810_v53 = vsel %vm5731_vm5, %v14044_v62, %v14043_v16  ;;  %v1211_v10 = vadd.f32 %v11103_v57, %v14045_v17  ;;  %v14049_v15 = vld [vmem:[#allocation37_spill] sm:$0xff] }
 0x2c5   : > { %v5594_v41 = vunpack.c.l.b16 %v5082_v37  ;;  %v14046_v2 = vpack.c.bf16 %v10904_v39, %v10904_v39  ;;  %v5805_v48 = vsel %vm5735_vm8, %v14047_v11, %v5804_v35  ;;  %v5811_v47 = vsel %vm5733_vm7, %v14048_v24, %v5810_v53  ;;  %v14050_v37 = vld [vmem:[#allocation15_spill] sm:$0xff]  ;;  %v14052_v35 = vld [vmem:[#allocation20_spill] sm:$0xff] }
 0x2c6   : > { %v5561_v18 = vunpack.c.l.b16 %v14041_v46  ;;  %v5806_v5 = vsel %vm5737_vm9, %v11039_v13, %v5805_v48  ;;  %v5812_v30 = vsel %vm5735_vm8, %v14049_v15, %v5811_v47  ;;  %v1511_v45 = vmax.f32 %v1211_v10, 0.0 }
 0x2c7   : > { %v5569_v33 = vunpack.c.l.b16 %v14046_v2  ;;  %v3839_v28 = vrot.slane %v11021_v14, 2  ;;  %v11403_v39 = vsel %vm5743_vm6, %v11271_v52, %v5594_v41  ;;  %v5807_v40 = vsel %vm5739_vm10, %v11043_v56, %v5806_v5  ;;  %v14053_v56 = vld [vmem:[#allocation4_spill] sm:$0xff] }
 0x2c8   : > { %v5813_v46 = vsel %vm5737_vm9, %v14050_v37, %v5812_v30  ;;  %v1203_v36 = vadd.f32 %v11103_v57, %v14051_v7  ;;  %v5808_v13 = vsel %vm5741_vm11, %v5561_v18, %v5807_v40  ;;  %v1673_v62 = vsel %vm1569_vm3, %v1511_v45, -inf }
 0x2c9   : > { %v5814_v16 = vsel %vm5739_vm10, %v14052_v35, %v5813_v46  ;;  %v3840_v53 = vmax.f32 %v11021_v14, %v3839_v28  ;;  %v1674_v17 = vmax.f32 %v1672_v19, %v1673_v62  ;;  %v11419_v41 = vadd.f32 %v11103_v57, %v14053_v56 }
 0x2ca   : > { %v5815_v52 = vsel %vm5741_vm11, %v5569_v33, %v5814_v16  ;;  %v1509_v10 = vmax.f32 %v1203_v36, 0.0 }
 0x2cb   : > { %v5956_v11 = vpack.c.b16 %v5815_v52, %v5808_v13  ;;  %v3841_v48 = vrot.slane %v3840_v53, 1  ;;  %v2404_v47 = vcombine.high %v1674_v17, %v1674_v17  ;;  %v2411_v14 = vrot.slane %v1674_v17, %v9638_v29 }
 0x2cc   : > { %v1667_v19 = vsel %vm1569_vm3, %v1509_v10, -inf  ;;  %v1512_v37 = vmax.f32 %v11419_v41, 0.0  ;;  %v11451_v41 = vpop.f32.mrb[85].mxu0 }
 0x2cd   : > { %v11431_v5 = vsel %vm10310_vm14, 0, %v5956_v11  ;;  %v3842_v15 = vmax.f32 %v3840_v53, %v3841_v48  ;;  %v1668_v30 = vmax.f32 %v1666_v31, %v1667_v19  ;;  %v2418_v45 = vrot.slane %v2404_v47, %v9638_v29  ;;  %v9414_v31 = vld [vmem:[%s13759_s3 + $0x10] sm:$0xff]   ;;  %14055 = vst [vmem:[#allocation17_spill] sm:$0xff] %v11451_v41  ;;  %v11456_v19 = vpop.f32.mrb[86].mxu0 }
 0x2ce   : > { %14054 = vst [vmem:[#allocation12_spill] sm:$0xff] %v11431_v5  ;;  %6466 = vrot.lane.b32.xlu0 %v11431_v5, %s9445_s7  ;;  %6404 = vrot.lane.b32.xlu1 %v11431_v5, %s9447_s9  ;;  %v2419_v28 = vcombine.high %v2411_v14, %v2411_v14  ;;  %v4123_v40 = vsel %vm3170_vm4, %v2411_v14, -inf  ;;  %v6283_v53 = vrot.slane %v11431_v5, 1  ;;  %14056 = vst [vmem:[#allocation34_spill] sm:$0xff] %v11456_v19 }
 0x2cf   : > { %v4124_v46 = vrot.slane %v4123_v40, 4  ;;  %v8886_v7 = vpack.c.bf16 %v3842_v15, %v3842_v15  ;;  %v2370_v36 = vcombine.high %v1668_v30, %v1668_v30  ;;  %v2377_v13 = vrot.slane %v1668_v30, %v9638_v29  ;;  %9032 = vmatpush3.bf16.msra.mxu1 %v9414_v31  ;;  %v9415_v15 = vld [vmem:[%s13759_s3 + $0x58] sm:$0xff]  }
 0x2d0   : > { %v2420_v35 = vcombine.high %v2418_v45, %v2418_v45  ;;  %v4130_v16 = vsel %vm3170_vm4, %v2419_v28, -inf  ;;  %v4137_v62 = vsel %vm3170_vm4, %v2418_v45, -inf  ;;  %9033 = vmatprep.subr.bf16.mxu1 %v9415_v15 }
 0x2d1   : > { %v4125_v52 = vmax.f32 %v4123_v40, %v4124_v46  ;;  %v4131_v17 = vrot.slane %v4130_v16, 4  ;;  %v4138_v10 = vrot.slane %v4137_v62, 4  ;;  %v11449_v56 = vsel %vm10310_vm14, %v8886_v7, 0  ;;  %v11461_v46 = vpop.f32.mrb[87].mxu0 }
 0x2d2   : > { %v4144_v11 = vsel %vm3170_vm4, %v2420_v35, -inf  ;;  %v6284_v48 = vrot.slane %v11449_v56, 1  ;;  %v2384_v47 = vrot.slane %v2370_v36, %v9638_v29  ;;  %v2385_v14 = vcombine.high %v2377_v13, %v2377_v13  ;;  %14057 = vst [vmem:[#allocation11_spill] sm:$0xff] %v11461_v46 }
 0x2d3   : > { %v4126_v30 = vrot.slane %v4125_v52, 2  ;;  %v4132_v45 = vmax.f32 %v4130_v16, %v4131_v17  ;;  %v4139_v28 = vmax.f32 %v4137_v62, %v4138_v10  ;;  %v4145_v40 = vrot.slane %v4144_v11, 4 }
 0x2d4   : > { %v11464_v7 = vsel %vm6265_vm15, %v6283_v53, %v6284_v48  ;;  %v2386_v31 = vcombine.high %v2384_v47, %v2384_v47  ;;  %v4067_v35 = vsel %vm3170_vm4, %v2377_v13, -inf  ;;  %v4074_v36 = vsel %vm3170_vm4, %v2385_v14, -inf }
 0x2d5   : > { %14058 = vst [vmem:[#allocation9_spill] sm:$0xff] %v11464_v7  ;;  %v4127_v0 = vmax.f32 %v4125_v52, %v4126_v30  ;;  %v4133_v33 = vrot.slane %v4132_v45, 2  ;;  %v4140_v24 = vrot.slane %v4139_v28, 2  ;;  %v4146_v2 = vmax.f32 %v4144_v11, %v4145_v40  ;;  %6436 = vrot.lane.b32.xlu0 %v11464_v7, %s9446_s8  ;;  %6374 = vrot.lane.b32.xlu1 %v11464_v7, %s9445_s7 }
 0x2d6   : > { %v4068_v16 = vrot.slane %v4067_v35, 4  ;;  %v4075_v62 = vrot.slane %v4074_v36, 4  ;;  %v4081_v53 = vsel %vm3170_vm4, %v2384_v47, -inf  ;;  %v4088_v17 = vsel %vm3170_vm4, %v2386_v31, -inf }
 0x2d7   : > { %v4128_v13 = vrot.slane %v4127_v0, 1  ;;  %v4134_v10 = vmax.f32 %v4132_v45, %v4133_v33  ;;  %v4141_v48 = vmax.f32 %v4139_v28, %v4140_v24  ;;  %v4147_v14 = vrot.slane %v4146_v2, 2 }
 0x2d8   : > { %v4069_v52 = vmax.f32 %v4067_v35, %v4068_v16  ;;  %v4076_v15 = vmax.f32 %v4074_v36, %v4075_v62  ;;  %v4082_v30 = vrot.slane %v4081_v53, 4  ;;  %v4089_v11 = vrot.slane %v4088_v17, 4 }
 0x2d9   : > { %v4135_v40 = vrot.slane %v4134_v10, 1  ;;  %v4142_v18 = vrot.slane %v4141_v48, 1  ;;  %v4148_v60 = vmax.f32 %v4146_v2, %v4147_v14  ;;  %v1206_v7 = vadd.f32 %v11103_v57, %v14059_v8 }
 0x2da   : > { %v4070_v46 = vrot.slane %v4069_v52, 2  ;;  %v4077_v19 = vrot.slane %v4076_v15, 2  ;;  %v4083_v41 = vmax.f32 %v4081_v53, %v4082_v30  ;;  %v4090_v47 = vmax.f32 %v4088_v17, %v4089_v11 }
 0x2db   : > { %v4129_v61 = vmax.f32 %v4127_v0, %v4128_v13  ;;  %v4136_v31 = vmax.f32 %v4134_v10, %v4135_v40  ;;  %v4149_v21 = vrot.slane %v4148_v60, 1  ;;  %v1676_v24 = vsel %vm1569_vm3, %v1512_v37, -inf }
 0x2dc   : > { %v4143_v33 = vmax.f32 %v4141_v48, %v4142_v18  ;;  %v4078_v45 = vmax.f32 %v4076_v15, %v4077_v19  ;;  %v4084_v28 = vrot.slane %v4083_v41, 2  ;;  %v4091_v35 = vrot.slane %v4090_v47, 2  ;;  %v14065_v15 = vld [vmem:[#allocation28_spill] sm:$0xff] }
 0x2dd   : > { %v14060_v36 = vpack.c.bf16 %v11324_v54, %v11324_v54  ;;  %v14061_v16 = vmax.f32 %v11366_v6, 0.0  ;;  %v1510_v62 = vmax.f32 %v1206_v7, 0.0  ;;  %v4150_v53 = vmax.f32 %v4148_v60, %v4149_v21 }
 0x2de   : > { %v4071_v17 = vmax.f32 %v4069_v52, %v4070_v46  ;;  %v4085_v37 = vmax.f32 %v4083_v41, %v4084_v28  ;;  %v4092_v18 = vmax.f32 %v4090_v47, %v4091_v35  ;;  %v14062_v19 = vpack.c.bf16 %v11357_v3, %v11357_v3 }
 0x2df   : > { %v11480_v2 = vunpack.c.l.b16 %v14060_v36  ;;  %v1675_v0 = vsel %vm1569_vm3, %v14061_v16, -inf  ;;  %v14063_v54 = vpack.c.bf16 %v11359_v32, %v11359_v32  ;;  %v14064_v48 = vmax.f32 %v11373_v51, 0.0 }
 0x2e0   : > { %v11490_v13 = vunpack.c.l.b16 %v14062_v19  ;;  %v1677_v14 = vmax.f32 %v1675_v0, %v1676_v24  ;;  %v5099_v7 = vpack.c.bf16 %v4129_v61, %v4129_v61  ;;  %v5100_v21 = vpack.c.bf16 %v4136_v31, %v4136_v31 }
 0x2e1   : > { %v11495_v10 = vunpack.c.l.b16 %v14063_v54  ;;  %v1669_v6 = vsel %vm1569_vm3, %v14064_v48, -inf  ;;  %v5101_v60 = vpack.c.bf16 %v4143_v33, %v4143_v33  ;;  %v4079_v41 = vrot.slane %v4078_v45, 1 }
 0x2e2   : > { %v2421_v46 = vcombine.high %v1677_v14, %v1677_v14  ;;  %v2428_v52 = vrot.slane %v1677_v14, %v9638_v29  ;;  %v1670_v3 = vsel %vm1569_vm3, %v1510_v62, -inf  ;;  %v11504_v30 = vadd.f32 %v11103_v57, %v14065_v15 }
 0x2e3   : > { %v5102_v32 = vpack.c.bf16 %v4150_v53, %v4150_v53  ;;  %v4072_v11 = vrot.slane %v4071_v17, 1  ;;  %v4086_v40 = vrot.slane %v4085_v37, 1  ;;  %v4093_v51 = vrot.slane %v4092_v18, 1 }
 0x2e4   : > { %v2435_v47 = vrot.slane %v2421_v46, %v9638_v29  ;;  %v2436_v24 = vcombine.high %v2428_v52, %v2428_v52  ;;  %v4151_v61 = vsel %vm3170_vm4, %v2428_v52, -inf  ;;  %v1671_v31 = vmax.f32 %v1669_v6, %v1670_v3 }
 0x2e5   : > { %v11508_v33 = vunpack.c.l.b16 %v5099_v7  ;;  %v11510_v28 = vunpack.c.l.b16 %v5100_v21  ;;  %v11512_v35 = vunpack.c.l.b16 %v5101_v60  ;;  %v11514_v36 = vmax.f32 %v4078_v45, %v4079_v41 }
 0x2e6   : > { %v2437_v16 = vcombine.high %v2435_v47, %v2435_v47  ;;  %v4152_v0 = vrot.slane %v4151_v61, 4  ;;  %v4158_v62 = vsel %vm3170_vm4, %v2436_v24, -inf  ;;  %v4165_v53 = vsel %vm3170_vm4, %v2435_v47, -inf }
 0x2e7   : > { %14066 = vst [vmem:[#allocation35_spill] sm:$0xff] %v11510_v28  ;;  %14067 = vst [vmem:[#allocation37_spill] sm:$0xff] %v11512_v35  ;;  %v11518_v19 = vunpack.c.l.b16 %v5102_v32  ;;  %v11520_v54 = vmax.f32 %v4071_v17, %v4072_v11  ;;  %v11522_v48 = vmax.f32 %v4085_v37, %v4086_v40  ;;  %v4159_v6 = vrot.slane %v4158_v62, 4 }
 0x2e8   : > { %v11524_v14 = vmax.f32 %v4092_v18, %v4093_v51  ;;  %v4153_v7 = vmax.f32 %v4151_v61, %v4152_v0  ;;  %v4166_v21 = vrot.slane %v4165_v53, 4  ;;  %v2387_v60 = vcombine.high %v1671_v31, %v1671_v31 }
 0x2e9   : > { %14068 = vst [vmem:[#allocation15_spill] sm:$0xff] %v11518_v19  ;;  %v5092_v45 = vpack.c.bf16 %v11514_v36, %v11514_v36  ;;  %v4160_v41 = vmax.f32 %v4158_v62, %v4159_v6  ;;  %v11529_v46 = vsel %vm3170_vm4, %v2437_v16, -inf  ;;  %v2394_v52 = vrot.slane %v1671_v31, %v9638_v29 }
 0x2ea   : > { %v4154_v3 = vrot.slane %v4153_v7, 2  ;;  %v4167_v17 = vmax.f32 %v4165_v53, %v4166_v21  ;;  %v2401_v37 = vrot.slane %v2387_v60, %v9638_v29  ;;  %v6117_v15 = vshll.u32 %v11431_v5, 16 }
 0x2eb   : > { %v4161_v18 = vrot.slane %v4160_v41, 2  ;;  %v2402_v32 = vcombine.high %v2394_v52, %v2394_v52  ;;  %v4095_v11 = vsel %vm3170_vm4, %v2394_v52, -inf  ;;  %v6115_v40 = vshrl.u32 %v11431_v5, 16 }
 0x2ec   : > { %v4155_v51 = vmax.f32 %v4153_v7, %v4154_v3  ;;  %v4168_v47 = vrot.slane %v4167_v17, 2  ;;  %v2403_v24 = vcombine.high %v2401_v37, %v2401_v37  ;;  %v4096_v61 = vrot.slane %v4095_v11, 4  ;;  %v9416_v7 = vld [vmem:[%s13759_s3 + $0x18] sm:$0xff]   ;;  %v11542_v3 = vpop.f32.mrb[88].mxu0 }
 0x2ed   : > { %v4162_v36 = vmax.f32 %v4160_v41, %v4161_v18  ;;  %v4102_v16 = vsel %vm3170_vm4, %v2402_v32, -inf  ;;  %v4109_v31 = vsel %vm3170_vm4, %v2401_v37, -inf  ;;  %v6119_v0 = vrot.slane %v6117_v15, 1  ;;  %v9417_v41 = vld [vmem:[%s13759_s3 + $0x60] sm:$0xff]   ;;  %v11547_v32 = vpop.f32.mrb[89].mxu0  ;;  %9034 = vmatpush3.bf16.msra.mxu1 %v9416_v7  ;;  %v9419_v7 = vld [vmem:[%s13759_s3 + $0x68] sm:$0xff]  }
 0x2ee   : > { %v4156_v62 = vrot.slane %v4155_v51, 1  ;;  %v4169_v53 = vmax.f32 %v4167_v17, %v4168_v47  ;;  %v4097_v6 = vmax.f32 %v4095_v11, %v4096_v61  ;;  %v4103_v21 = vrot.slane %v4102_v16, 4  ;;  %v9418_v61 = vld [vmem:[%s13759_s3 + $0x20] sm:$0xff]   ;;  %9035 = vmatprep.subr.bf16.mxu1 %v9417_v41 }
 0x2ef   : > { %v4163_v60 = vrot.slane %v4162_v36, 1  ;;  %v4110_v8 = vrot.slane %v4109_v31, 4  ;;  %v4116_v52 = vsel %vm3170_vm4, %v2403_v24, -inf  ;;  %v6120_v19 = vor.u32 %v6119_v0, %v6115_v40  ;;  %v11553_v0 = vpop.f32.mrb[90].mxu0 }
 0x2f0   : > { %v4157_v37 = vmax.f32 %v4155_v51, %v4156_v62  ;;  %v4170_v15 = vrot.slane %v4169_v53, 1  ;;  %v4098_v17 = vrot.slane %v4097_v6, 2  ;;  %v4104_v18 = vmax.f32 %v4102_v16, %v4103_v21 }
 0x2f1   : > { %v4164_v11 = vmax.f32 %v4162_v36, %v4163_v60  ;;  %v4111_v47 = vmax.f32 %v4109_v31, %v4110_v8  ;;  %v4117_v24 = vrot.slane %v4116_v52, 4  ;;  %v6122_v40 = vshll.u32 %v11449_v56, 16  ;;  %v11559_v8 = vpop.f32.mrb[91].mxu0  ;;  %9036 = vmatpush3.bf16.msra.mxu1 %v9418_v61 }
 0x2f2   : > { %v5091_v51 = vpack.c.bf16 %v11520_v54, %v11520_v54  ;;  %v5093_v16 = vpack.c.bf16 %v11522_v48, %v11522_v48  ;;  %v4099_v62 = vmax.f32 %v4097_v6, %v4098_v17  ;;  %v4105_v21 = vrot.slane %v4104_v18, 2  ;;  %9037 = vmatprep.subr.bf16.mxu1 %v9419_v7 }
 0x2f3   : > { %v5094_v56 = vpack.c.bf16 %v11524_v14, %v11524_v14  ;;  %v4112_v36 = vrot.slane %v4111_v47, 2  ;;  %v4118_v31 = vmax.f32 %v4116_v52, %v4117_v24  ;;  %v6124_v60 = vrot.slane %v6122_v40, 1  ;;  %v9420_v14 = vld [vmem:[%s13759_s3 + $0x28] sm:$0xff]   ;;  %v11575_v52 = vpop.f32.mrb[92].mxu0 }
 0x2f4   : > { %v5604_v5 = vunpack.c.l.b16 %v5092_v45  ;;  %v11566_v54 = vmax.f32 %v4169_v53, %v4170_v15  ;;  %v4173_v48 = vrot.slane %v11529_v46, 4  ;;  %v4106_v6 = vmax.f32 %v4104_v18, %v4105_v21 }
 0x2f5   : > { %v5103_v17 = vpack.c.bf16 %v4157_v37, %v4157_v37  ;;  %v5104_v41 = vpack.c.bf16 %v4164_v11, %v4164_v11  ;;  %v4119_v35 = vrot.slane %v4118_v31, 2  ;;  %v11570_v28 = vsel %vm6045_vm0, %v6120_v19, %v6124_v60  ;;  %v14070_v37 = vld [vmem:[#allocation39_spill] sm:$0xff]  ;;  %9038 = vmatpush3.bf16.msra.mxu1 %v9420_v14 }
 0x2f6   : > { %14069 = vst [vmem:[#allocation10_spill] sm:$0xff] %v11570_v28  ;;  %v5603_v24 = vunpack.c.l.b16 %v5091_v51  ;;  %v4100_v45 = vrot.slane %v4099_v62, 1  ;;  %v4113_v53 = vmax.f32 %v4111_v47, %v4112_v36  ;;  %6498 = vrot.lane.b32.xlu0 %v11570_v28, %s9447_s9  ;;  %6342 = vrot.lane.b32.xlu1 %v11570_v28, %s9446_s8  ;;  %v1219_v19 = vadd.f32 %v11103_v57, %v14070_v37 }
 0x2f7   : > { %v11583_v15 = vunpack.c.l.b16 %v5093_v16  ;;  %v4107_v18 = vrot.slane %v4106_v6, 1  ;;  %v4120_v11 = vmax.f32 %v4118_v31, %v4119_v35  ;;  %v1515_v40 = vmax.f32 %v11504_v30, 0.0  ;;  %v14073_v31 = vld [vmem:[#allocation40_spill] sm:$0xff] }
 0x2f8   : > { %v11586_v61 = vunpack.c.l.b16 %v5094_v56  ;;  %v11589_v47 = vsel %vm5731_vm5, %v5604_v5, %v5603_v24  ;;  %v11592_v51 = vmax.f32 %v11529_v46, %v4173_v48  ;;  %v1513_v21 = vmax.f32 %v1219_v19, 0.0 }
 0x2f9   : > { %v11596_v60 = vunpack.c.l.b16 %v5103_v17  ;;  %v11598_v16 = vunpack.c.l.b16 %v5104_v41  ;;  %v4121_v35 = vrot.slane %v4120_v11, 1  ;;  %v11600_v30 = vmax.f32 %v4099_v62, %v4100_v45 }
 0x2fa   : > { %v4114_v56 = vrot.slane %v4113_v53, 1  ;;  %v11604_v5 = vadd.f32 %v11103_v57, %v14073_v31  ;;  %v11608_v46 = vadd.f32 %v11103_v57, %v11084_v38  ;;  %v11610_v7 = vmax.f32 %v4106_v6, %v4107_v18  ;;  %v14076_v6 = vld [vmem:[#allocation26_spill] sm:$0xff] }
 0x2fb   : > { %14071 = vst [vmem:[#allocation20_spill] sm:$0xff] %v11596_v60  ;;  %14072 = vst [vmem:[#allocation4_spill] sm:$0xff] %v11598_v16  ;;  %v4122_v48 = vmax.f32 %v4120_v11, %v4121_v35  ;;  %v1684_v17 = vsel %vm1569_vm3, %v1515_v40, -inf  ;;  %v1678_v41 = vsel %vm1569_vm3, %v1513_v21, -inf  ;;  %v14074_v62 = vpack.c.bf16 %v11130_v23, %v11130_v23  ;;  %v14077_v11 = vld [vmem:[#allocation14_spill] sm:$0xff]  ;;  %v14078_v40 = vld [vmem:[#allocation41_spill] sm:$0xff] }
 0x2fc   : > { %v14075_v24 = vpack.c.bf16 %v11095_v9, %v11095_v9  ;;  %v5817_v38 = vsel %vm5733_vm7, %v11093_v63, %v11113_v55  ;;  %v5823_v37 = vsel %vm5731_vm5, %v14076_v6, %v11151_v59  ;;  %v1243_v21 = vadd.f32 %v11103_v57, %v14078_v40  ;;  %v9421_v9 = vld [vmem:[%s13759_s3 + $0x70] sm:$0xff]  }
 0x2fd   : > { %v5577_v14 = vunpack.c.l.b16 %v14074_v62  ;;  %v5098_v19 = vpack.c.bf16 %v4122_v48, %v4122_v48  ;;  %v5818_v18 = vsel %vm5735_vm8, %v11109_v58, %v5817_v38  ;;  %v5824_v23 = vsel %vm5733_vm7, %v14077_v11, %v5823_v37  ;;  %v11643_v58 = vld [vmem:[%s13758_s2] ss:$0 sm:$0xff]  ;;  %9039 = vmatprep.subr.bf16.mxu1 %v9421_v9  ;;  %v14079_v62 = vld [vmem:[#allocation43_spill] sm:$0xff] }
 0x2fe   : > { %v5585_v45 = vunpack.c.l.b16 %v14075_v24  ;;  %v5819_v63 = vsel %vm5737_vm9, %v11246_v20, %v5818_v18  ;;  %v5825_v55 = vsel %vm5735_vm8, %v11088_v26, %v5824_v23  ;;  %v3951_v59 = vrot.slane %v11115_v43, 2 }
 0x2ff   : > { %v1235_v57 = vadd.f32 %v11643_v58, %v11204_v12  ;;  %v5610_v35 = vunpack.c.l.b16 %v5098_v19  ;;  %v5820_v31 = vsel %vm5739_vm10, %v11252_v27, %v5819_v63  ;;  %v5826_v20 = vsel %vm5737_vm9, %v11121_v49, %v5825_v55  ;;  %v14080_v19 = vld [vmem:[#allocation21_spill] sm:$0xff] }
 0x300   : > { %v1519_v48 = vmax.f32 %v1243_v21, 0.0  ;;  %v5821_v26 = vsel %vm5741_vm11, %v5577_v14, %v5820_v31  ;;  %v5827_v24 = vsel %vm5739_vm10, %v14079_v62, %v5826_v20  ;;  %v3952_v38 = vmax.f32 %v11115_v43, %v3951_v59  ;;  %v9422_v20 = vld [vmem:[%s13759_s3 + $0x30] sm:$0xff]  }
 0x301   : > { %v1517_v6 = vmax.f32 %v1235_v57, 0.0  ;;  %v11657_v12 = vsel %vm5743_vm6, %v11508_v33, %v5610_v35  ;;  %v5828_v37 = vsel %vm5741_vm11, %v5585_v45, %v5827_v24  ;;  %v11663_v49 = vadd.f32 %v11643_v58, %v14080_v19  ;;  %v11696_v19 = vpop.f32.mrb[93].mxu0  ;;  %9040 = vmatpush3.bf16.msra.mxu1 %v9422_v20 }
 0x302   : > { %v1685_v27 = vsel %vm1569_vm3, %v1519_v48, -inf  ;;  %v5958_v18 = vpack.c.b16 %v5828_v37, %v5821_v26  ;;  %v3953_v11 = vrot.slane %v3952_v38, 1  ;;  %v11666_v40 = vmax.f32 %v4113_v53, %v4114_v56  ;;  %14082 = vst [vmem:[#allocation28_spill] sm:$0xff] %v11696_v19 }
 0x303   : > { %v1686_v14 = vmax.f32 %v1684_v17, %v1685_v27  ;;  %v1679_v23 = vsel %vm1569_vm3, %v1517_v6, -inf }
 0x304   : > { %v1680_v21 = vmax.f32 %v1678_v41, %v1679_v23  ;;  %v11673_v45 = vsel %vm10310_vm14, 0, %v5958_v18  ;;  %v3954_v55 = vmax.f32 %v3952_v38, %v3953_v11 }
 0x305   : > { %14081 = vst [vmem:[#allocation5_spill] sm:$0xff] %v11673_v45  ;;  %v2472_v9 = vcombine.high %v1686_v14, %v1686_v14  ;;  %v2479_v63 = vrot.slane %v1686_v14, %v9638_v29  ;;  %6468 = vrot.lane.b32.xlu0 %v11673_v45, %s9445_s7  ;;  %6406 = vrot.lane.b32.xlu1 %v11673_v45, %s9447_s9  ;;  %v6286_v53 = vrot.slane %v11673_v45, 1 }
 0x306   : > { %v2438_v56 = vcombine.high %v1680_v21, %v1680_v21  ;;  %v2445_v17 = vrot.slane %v1680_v21, %v9638_v29  ;;  %v8887_v31 = vpack.c.bf16 %v3954_v55, %v3954_v55  ;;  %v11699_v21 = vpop.f32.mrb[94].mxu0 }
 0x307   : > { %v2486_v59 = vrot.slane %v2472_v9, %v9638_v29  ;;  %v2487_v57 = vcombine.high %v2479_v63, %v2479_v63  ;;  %v4235_v35 = vsel %vm3170_vm4, %v2479_v63, -inf  ;;  %14083 = vst [vmem:[#allocation39_spill] sm:$0xff] %v11699_v21  ;;  %v9423_v9 = vld [vmem:[%s13759_s3 + $0x78] sm:$0xff]  }
 0x308   : > { %v4236_v48 = vrot.slane %v4235_v35, 4  ;;  %v2452_v26 = vrot.slane %v2438_v56, %v9638_v29  ;;  %v2453_v62 = vcombine.high %v2445_v17, %v2445_v17  ;;  %v4179_v24 = vsel %vm3170_vm4, %v2445_v17, -inf  ;;  %9041 = vmatprep.subr.bf16.mxu1 %v9423_v9 }
 0x309   : > { %v2488_v38 = vcombine.high %v2486_v59, %v2486_v59  ;;  %v4242_v6 = vsel %vm3170_vm4, %v2487_v57, -inf  ;;  %v4249_v37 = vsel %vm3170_vm4, %v2486_v59, -inf  ;;  %v11694_v27 = vsel %vm10310_vm14, %v8887_v31, 0  ;;  %v11706_v59 = vpop.f32.mrb[95].mxu0 }
 0x30a   : > { %v4237_v18 = vmax.f32 %v4235_v35, %v4236_v48  ;;  %v4243_v14 = vrot.slane %v4242_v6, 4  ;;  %v4250_v11 = vrot.slane %v4249_v37, 4  ;;  %v6287_v23 = vrot.slane %v11694_v27, 1  ;;  %14084 = vst [vmem:[#allocation40_spill] sm:$0xff] %v11706_v59 }
 0x30b   : > { %v4256_v63 = vsel %vm3170_vm4, %v2488_v38, -inf  ;;  %v2454_v55 = vcombine.high %v2452_v26, %v2452_v26  ;;  %v4180_v56 = vrot.slane %v4179_v24, 4  ;;  %v4186_v17 = vsel %vm3170_vm4, %v2453_v62, -inf }
 0x30c   : > { %v4238_v57 = vrot.slane %v4237_v18, 2  ;;  %v4244_v35 = vmax.f32 %v4242_v6, %v4243_v14  ;;  %v4251_v31 = vmax.f32 %v4249_v37, %v4250_v11  ;;  %v4257_v20 = vrot.slane %v4256_v63, 4 }
 0x30d   : > { %v11709_v48 = vsel %vm6265_vm15, %v6286_v53, %v6287_v23  ;;  %v4181_v36 = vmax.f32 %v4179_v24, %v4180_v56  ;;  %v4187_v33 = vrot.slane %v4186_v17, 4  ;;  %v4193_v43 = vsel %vm3170_vm4, %v2452_v26, -inf }
 0x30e   : > { %14085 = vst [vmem:[#allocation26_spill] sm:$0xff] %v11709_v48  ;;  %v4239_v41 = vmax.f32 %v4237_v18, %v4238_v57  ;;  %v4245_v38 = vrot.slane %v4244_v35, 2  ;;  %v4252_v28 = vrot.slane %v4251_v31, 2  ;;  %v4258_v21 = vmax.f32 %v4256_v63, %v4257_v20  ;;  %6438 = vrot.lane.b32.xlu0 %v11709_v48, %s9446_s8  ;;  %6376 = vrot.lane.b32.xlu1 %v11709_v48, %s9445_s7 }
 0x30f   : > { %v4182_v62 = vrot.slane %v4181_v36, 2  ;;  %v4188_v6 = vmax.f32 %v4186_v17, %v4187_v33  ;;  %v4194_v37 = vrot.slane %v4193_v43, 4  ;;  %v4200_v53 = vsel %vm3170_vm4, %v2454_v55, -inf }
 0x310   : > { %v4240_v14 = vrot.slane %v4239_v41, 1  ;;  %v4246_v24 = vmax.f32 %v4244_v35, %v4245_v38  ;;  %v4253_v11 = vmax.f32 %v4251_v31, %v4252_v28  ;;  %v4259_v23 = vrot.slane %v4258_v21, 2 }
 0x311   : > { %v4183_v26 = vmax.f32 %v4181_v36, %v4182_v62  ;;  %v4189_v18 = vrot.slane %v4188_v6, 2  ;;  %v4195_v9 = vmax.f32 %v4193_v43, %v4194_v37  ;;  %v4201_v56 = vrot.slane %v4200_v53, 4 }
 0x312   : > { %v4241_v63 = vmax.f32 %v4239_v41, %v4240_v14  ;;  %v4247_v57 = vrot.slane %v4246_v24, 1  ;;  %v4254_v20 = vrot.slane %v4253_v11, 1  ;;  %v4260_v59 = vmax.f32 %v4258_v21, %v4259_v23 }
 0x313   : > { %v4184_v16 = vrot.slane %v4183_v26, 1  ;;  %v4190_v60 = vmax.f32 %v4188_v6, %v4189_v18  ;;  %v4196_v48 = vrot.slane %v4195_v9, 2  ;;  %v4202_v19 = vmax.f32 %v4200_v53, %v4201_v56  ;;  %v14091_v56 = vld [vmem:[#allocation44_spill] sm:$0xff] }
 0x314   : > { %v5096_v33 = vpack.c.bf16 %v11610_v7, %v11610_v7  ;;  %v1514_v55 = vmax.f32 %v11608_v46, 0.0  ;;  %v4261_v17 = vrot.slane %v4260_v59, 1  ;;  %v14086_v28 = vmax.f32 %v11663_v49, 0.0  ;;  %v14089_v46 = vld [vmem:[#allocation29_spill] sm:$0xff] }
 0x315   : > { %v4248_v43 = vmax.f32 %v4246_v24, %v4247_v57  ;;  %v4255_v35 = vmax.f32 %v4253_v11, %v4254_v20  ;;  %v4197_v41 = vmax.f32 %v4195_v9, %v4196_v48  ;;  %v4203_v31 = vrot.slane %v4202_v19, 2 }
 0x316   : > { %v1688_v36 = vsel %vm1569_vm3, %v14086_v28, -inf  ;;  %v14087_v21 = vpack.c.bf16 %v11600_v30, %v11600_v30  ;;  %v14088_v62 = vmax.f32 %v11604_v5, 0.0  ;;  %v4191_v6 = vrot.slane %v4190_v60, 1 }
 0x317   : > { %v1238_v37 = vadd.f32 %v11643_v58, %v14089_v46  ;;  %v11733_v49 = vmax.f32 %v4260_v59, %v4261_v17  ;;  %v5115_v53 = vpack.c.bf16 %v4241_v63, %v4241_v63  ;;  %v4185_v14 = vmax.f32 %v4183_v26, %v4184_v16 }
 0x318   : > { %v11726_v38 = vunpack.c.l.b16 %v14087_v21  ;;  %v1687_v7 = vsel %vm1569_vm3, %v14088_v62, -inf  ;;  %v4204_v24 = vmax.f32 %v4202_v19, %v4203_v31  ;;  %v11737_v11 = vunpack.c.l.b16 %v5096_v33 }
 0x319   : > { %v1681_v30 = vsel %vm1569_vm3, %v1514_v55, -inf  ;;  %v1689_v23 = vmax.f32 %v1687_v7, %v1688_v36  ;;  %v5116_v5 = vpack.c.bf16 %v4248_v43, %v4248_v43  ;;  %v5117_v18 = vpack.c.bf16 %v4255_v35, %v4255_v35 }
 0x31a   : > { %14090 = vst [vmem:[#allocation14_spill] sm:$0xff] %v11737_v11  ;;  %v4198_v9 = vrot.slane %v4197_v41, 1  ;;  %v11742_v57 = vadd.f32 %v11643_v58, %v14091_v56  ;;  %v4192_v59 = vmax.f32 %v4190_v60, %v4191_v6  ;;  %v1518_v19 = vmax.f32 %v1238_v37, 0.0 }
 0x31b   : > { %v2489_v20 = vcombine.high %v1689_v23, %v1689_v23  ;;  %v2496_v16 = vrot.slane %v1689_v23, %v9638_v29  ;;  %v11747_v63 = vunpack.c.l.b16 %v5115_v53  ;;  %v4205_v33 = vrot.slane %v4204_v24, 1 }
 0x31c   : > { %v5107_v55 = vpack.c.bf16 %v4185_v14, %v4185_v14  ;;  %v1682_v43 = vsel %vm1569_vm3, %v1518_v19, -inf  ;;  %v11752_v35 = vunpack.c.l.b16 %v5116_v5  ;;  %v11754_v60 = vunpack.c.l.b16 %v5117_v18 }
 0x31d   : > { %v2503_v17 = vrot.slane %v2489_v20, %v9638_v29  ;;  %v2504_v28 = vcombine.high %v2496_v16, %v2496_v16  ;;  %v4263_v36 = vsel %vm3170_vm4, %v2496_v16, -inf  ;;  %v11756_v31 = vmax.f32 %v4197_v41, %v4198_v9 }
 0x31e   : > { %14092 = vst [vmem:[#allocation41_spill] sm:$0xff] %v11752_v35  ;;  %14093 = vst [vmem:[#allocation43_spill] sm:$0xff] %v11754_v60  ;;  %v4264_v21 = vrot.slane %v4263_v36, 4  ;;  %v5108_v62 = vpack.c.bf16 %v4192_v59, %v4192_v59  ;;  %v1683_v46 = vmax.f32 %v1681_v30, %v1682_v43  ;;  %v11760_v37 = vunpack.c.l.b16 %v5107_v55 }
 0x31f   : > { %v4270_v7 = vsel %vm3170_vm4, %v2504_v28, -inf  ;;  %v4277_v6 = vsel %vm3170_vm4, %v2503_v17, -inf  ;;  %v11762_v56 = vmax.f32 %v4204_v24, %v4205_v33  ;;  %v6129_v41 = vshll.u32 %v11673_v45, 16 }
 0x320   : > { %v4265_v53 = vmax.f32 %v4263_v36, %v4264_v21  ;;  %v4271_v14 = vrot.slane %v4270_v7, 4  ;;  %v4278_v23 = vrot.slane %v4277_v6, 4  ;;  %v2455_v5 = vcombine.high %v1683_v46, %v1683_v46 }
 0x321   : > { %v2462_v18 = vrot.slane %v1683_v46, %v9638_v29  ;;  %v6127_v16 = vshrl.u32 %v11673_v45, 16  ;;  %v2505_v19 = vcombine.high %v2503_v17, %v2503_v17  ;;  %v6131_v33 = vrot.slane %v6129_v41, 1  ;;  %v9424_v17 = vld [vmem:[%s13759_s3 + $0x38] sm:$0xff]  }
 0x322   : > { %v4266_v9 = vrot.slane %v4265_v53, 2  ;;  %v4272_v20 = vmax.f32 %v4270_v7, %v4271_v14  ;;  %v4279_v59 = vmax.f32 %v4277_v6, %v4278_v23  ;;  %v2469_v30 = vrot.slane %v2455_v5, %v9638_v29  ;;  %9042 = vmatpush3.bf16.msra.mxu1 %v9424_v17 }
 0x323   : > { %v2470_v55 = vcombine.high %v2462_v18, %v2462_v18  ;;  %v4207_v28 = vsel %vm3170_vm4, %v2462_v18, -inf }
 0x324   : > { %v4267_v36 = vmax.f32 %v4265_v53, %v4266_v9  ;;  %v4273_v43 = vrot.slane %v4272_v20, 2  ;;  %v4280_v24 = vrot.slane %v4279_v59, 2  ;;  %v2471_v21 = vcombine.high %v2469_v30, %v2469_v30  ;;  %v11777_v9 = vpop.f32.mrb[96].mxu0 }
 0x325   : > { %v4208_v48 = vrot.slane %v4207_v28, 4  ;;  %v4214_v46 = vsel %vm3170_vm4, %v2470_v55, -inf  ;;  %v4221_v26 = vsel %vm3170_vm4, %v2469_v30, -inf  ;;  %v5109_v53 = vpack.c.bf16 %v11756_v31, %v11756_v31  ;;  %14094 = vst [vmem:[#allocation21_spill] sm:$0xff] %v11777_v9  ;;  %v11779_v55 = vpop.f32.mrb[8].mxu1 }
 0x326   : > { %v4268_v7 = vrot.slane %v4267_v36, 1  ;;  %v4274_v6 = vmax.f32 %v4272_v20, %v4273_v43  ;;  %v4281_v14 = vmax.f32 %v4279_v59, %v4280_v24  ;;  %v4215_v23 = vrot.slane %v4214_v46, 4  ;;  %14095 = vst [vmem:[#allocation29_spill] sm:$0xff] %v11779_v55  ;;  %v11782_v24 = vpop.f32.mrb[97].mxu0  ;;  %v11784_v45 = vpop.f32.mrb[9].mxu1 }
 0x327   : > { %v4209_v5 = vmax.f32 %v4207_v28, %v4208_v48  ;;  %v4222_v18 = vrot.slane %v4221_v26, 4  ;;  %v4228_v41 = vsel %vm3170_vm4, %v2471_v21, -inf  ;;  %v5620_v30 = vunpack.c.l.b16 %v5108_v62  ;;  %14096 = vst [vmem:[#allocation44_spill] sm:$0xff] %v11784_v45  ;;  %v11787_v21 = vpop.f32.mrb[98].mxu0 }
 0x328   : > { %v4284_v20 = vsel %vm3170_vm4, %v2505_v19, -inf  ;;  %v4216_v59 = vmax.f32 %v4214_v46, %v4215_v23  ;;  %v6132_v43 = vor.u32 %v6131_v33, %v6127_v16  ;;  %v4229_v48 = vrot.slane %v4228_v41, 4  ;;  %14097 = vst [vmem:[#allocation50_spill] sm:$0xff] %v11787_v21  ;;  %v11789_v11 = vpop.f32.mrb[99].mxu0 }
 0x329   : > { %v4210_v60 = vrot.slane %v4209_v5, 2  ;;  %v4223_v31 = vmax.f32 %v4221_v26, %v4222_v18  ;;  %v6134_v28 = vshll.u32 %v11694_v27, 16  ;;  %v4269_v35 = vmax.f32 %v4267_v36, %v4268_v7 }
 0x32a   : > { %v4275_v9 = vrot.slane %v4274_v6, 1  ;;  %v4282_v55 = vrot.slane %v4281_v14, 1  ;;  %v4217_v62 = vrot.slane %v4216_v59, 2  ;;  %v4230_v33 = vmax.f32 %v4228_v41, %v4229_v48 }
 0x32b   : > { %v4211_v19 = vmax.f32 %v4209_v5, %v4210_v60  ;;  %v4224_v16 = vrot.slane %v4223_v31, 2  ;;  %v6136_v46 = vrot.slane %v6134_v28, 1  ;;  %v14098_v23 = vpack.c.bf16 %v11733_v49, %v11733_v49 }
 0x32c   : > { %v5110_v27 = vpack.c.bf16 %v11762_v56, %v11762_v56  ;;  %v4285_v26 = vrot.slane %v4284_v20, 4  ;;  %v4218_v18 = vmax.f32 %v4216_v59, %v4217_v62  ;;  %v4231_v45 = vrot.slane %v4230_v33, 2 }
 0x32d   : > { %v11794_v17 = vunpack.c.l.b16 %v14098_v23  ;;  %v4212_v36 = vrot.slane %v4211_v19, 1  ;;  %v4225_v7 = vmax.f32 %v4223_v31, %v4224_v16  ;;  %v11799_v21 = vsel %vm6045_vm0, %v6132_v43, %v6136_v46  ;;  %v11816_v31 = vpop.f32.mrb[10].mxu1 }
 0x32e   : > { %14100 = vst [vmem:[#allocation52_spill] sm:$0xff] %v11799_v21  ;;  %v11801_v60 = vunpack.c.l.b16 %v5109_v53  ;;  %v11805_v5 = vsel %vm5731_vm5, %v5620_v30, %v11760_v37  ;;  %v11807_v49 = vmax.f32 %v4274_v6, %v4275_v9  ;;  %v11809_v41 = vmax.f32 %v4281_v14, %v4282_v55  ;;  %6500 = vrot.lane.b32.xlu0 %v11799_v21, %s9447_s9  ;;  %v14103_v14 = vld [vmem:[#allocation45_spill] sm:$0xff]  ;;  %v6331_v55 = vpop.permute.xlu0 %6330  ;;  %v11824_v30 = vpop.f32.mrb[11].mxu1 }
 0x32f   : > { %14099 = vst [vmem:[#allocation51_spill] sm:$0xff] %v11794_v17  ;;  %6344 = vrot.lane.b32.xlu1 %v11799_v21, %s9446_s8  ;;  %v5119_v56 = vpack.c.bf16 %v4269_v35, %v4269_v35  ;;  %v4219_v59 = vrot.slane %v4218_v18, 1  ;;  %v4232_v43 = vmax.f32 %v4230_v33, %v4231_v45  ;;  %v1523_v53 = vmax.f32 %v11742_v57, 0.0  ;;  %14102 = vst [vmem:[#allocation54_spill] sm:$0xff] %v11816_v31  ;;  %v11829_v57 = vpop.f32.mrb[12].mxu1  ;;  %v14107_v33 = vld [vmem:[#allocation46_spill] sm:$0xff] }
 0x330   : > { %14101 = vst [vmem:[#allocation53_spill] sm:$0xff] %v11809_v41  ;;  %v11818_v48 = vunpack.c.l.b16 %v5110_v27  ;;  %v11820_v37 = vmax.f32 %v4211_v19, %v4212_v36  ;;  %v4226_v6 = vrot.slane %v4225_v7, 1  ;;  %v1251_v9 = vadd.f32 %v11643_v58, %v14103_v14  ;;  %14104 = vst [vmem:[#allocation45_spill] sm:$0xff] %v11824_v30  ;;  %v6363_v36 = vpop.permute.xlu1 %6362 }
 0x331   : > { %v11826_v28 = vmax.f32 %v4284_v20, %v4285_v26  ;;  %v4233_v35 = vrot.slane %v4232_v43, 1  ;;  %v6523_v45 = vsel %vm1569_vm3, 0, %v6331_v55  ;;  %14106 = vst [vmem:[#allocation56_spill] sm:$0xff] %v11829_v57  ;;  %v1262_v16 = vadd.f32 %v11643_v58, %v11311_v25 }
 0x332   : > { %v1254_v46 = vadd.f32 %v11643_v58, %v14107_v33  ;;  %v11839_v20 = vunpack.c.l.b16 %v5119_v56  ;;  %v11841_v23 = vmax.f32 %v4218_v18, %v4219_v59  ;;  %v1696_v26 = vsel %vm1569_vm3, %v1523_v53, -inf  ;;  %v14110_v59 = vld [vmem:[#allocation32_spill] sm:$0xff] }
 0x333   : > { %14105 = vst [vmem:[#allocation55_spill] sm:$0xff] %v11826_v28  ;;  %v4234_v27 = vmax.f32 %v4232_v43, %v4233_v35  ;;  %v11844_v14 = vmax.f32 %v4225_v7, %v4226_v6  ;;  %v1521_v19 = vmax.f32 %v1251_v9, 0.0  ;;  %v11849_v62 = vsel %vm6554_vm1, %v6523_v45, %v6363_v36  ;;  %v14111_v9 = vld [vmem:[#allocation27_spill] sm:$0xff] }
 0x334   : > { %14108 = vst [vmem:[#allocation46_spill] sm:$0xff] %v11839_v20  ;;  %v14109_v56 = vpack.c.bf16 %v11368_v50, %v11368_v50  ;;  %v5830_v18 = vsel %vm5733_vm7, %v11334_v4, %v11340_v44  ;;  %v5836_v7 = vsel %vm5731_vm5, %v14110_v59, %v11403_v39  ;;  %v1524_v43 = vmax.f32 %v1262_v16, 0.0  ;;  %v14113_v44 = vld [vmem:[#allocation25_spill] sm:$0xff]  ;;  %v14114_v16 = vld [vmem:[#allocation47_spill] sm:$0xff] }
 0x335   : > { %v5114_v25 = vpack.c.bf16 %v4234_v27, %v4234_v27  ;;  %v1522_v53 = vmax.f32 %v1254_v46, 0.0  ;;  %v5831_v6 = vsel %vm5735_vm8, %v11337_v34, %v5830_v18  ;;  %v5837_v35 = vsel %vm5733_vm7, %v14111_v9, %v5836_v7  ;;  %v14116_v59 = vld [vmem:[#allocation17_spill] sm:$0xff]  ;;  %v14117_v9 = vld [vmem:[#allocation34_spill] sm:$0xff] }
 0x336   : > { %v5593_v33 = vunpack.c.l.b16 %v14109_v56  ;;  %v14112_v50 = vpack.c.bf16 %v11326_v22, %v11326_v22  ;;  %v5832_v4 = vsel %vm5737_vm9, %v11490_v13, %v5831_v6  ;;  %v5838_v36 = vsel %vm5735_vm8, %v14113_v44, %v5837_v35 }
 0x337   : > { %v5626_v45 = vunpack.c.l.b16 %v5114_v25  ;;  %v5833_v39 = vsel %vm5739_vm10, %v11495_v10, %v5832_v4  ;;  %v5839_v34 = vsel %vm5737_vm9, %v11351_v42, %v5838_v36  ;;  %v1275_v46 = vadd.f32 %v11643_v58, %v14114_v16  ;;  %v14115_v25 = vld [vmem:[#allocation48_spill] sm:$0xff] }
 0x338   : > { %v5601_v27 = vunpack.c.l.b16 %v14112_v50  ;;  %v4063_v56 = vrot.slane %v14115_v25, 2  ;;  %v5834_v13 = vsel %vm5741_vm11, %v5593_v33, %v5833_v39  ;;  %v5840_v18 = vsel %vm5739_vm10, %v11480_v2, %v5839_v34  ;;  %v11891_v50 = vpop.f32.mrb[100].mxu0  ;;  %v14120_v2 = vld [vmem:[#allocation11_spill] sm:$0xff] }
 0x339   : > { %v11880_v22 = vsel %vm5743_vm6, %v11747_v63, %v5626_v45  ;;  %v1267_v10 = vadd.f32 %v11643_v58, %v14116_v59  ;;  %v1527_v42 = vmax.f32 %v1275_v46, 0.0  ;;  %v1278_v35 = vadd.f32 %v11643_v58, %v14117_v9  ;;  %14118 = vst [vmem:[#allocation32_spill] sm:$0xff] %v11891_v50  ;;  %v11893_v63 = vpop.f32.mrb[13].mxu1 }
 0x33a   : > { %v5841_v7 = vsel %vm5741_vm11, %v5601_v27, %v5840_v18  ;;  %v4064_v6 = vmax.f32 %v14115_v25, %v4063_v56  ;;  %14119 = vst [vmem:[#allocation27_spill] sm:$0xff] %v11893_v63  ;;  %v1690_v33 = vsel %vm1569_vm3, %v1521_v19, -inf  ;;  %v1270_v44 = vadd.f32 %v11643_v58, %v14120_v2 }
 0x33b   : > { %v5960_v45 = vpack.c.b16 %v5841_v7, %v5834_v13  ;;  %v1525_v4 = vmax.f32 %v1267_v10, 0.0  ;;  %v1699_v36 = vsel %vm1569_vm3, %v1524_v43, -inf  ;;  %v1697_v27 = vsel %vm1569_vm3, %v1527_v42, -inf }
 0x33c   : > { %v4065_v39 = vrot.slane %v4064_v6, 1  ;;  %v1528_v34 = vmax.f32 %v1278_v35, 0.0  ;;  %v1698_v46 = vmax.f32 %v1696_v26, %v1697_v27  ;;  %v1526_v56 = vmax.f32 %v1270_v44, 0.0 }
 0x33d   : > { %v11902_v16 = vsel %vm10310_vm14, 0, %v5960_v45  ;;  %v1691_v25 = vsel %vm1569_vm3, %v1525_v4, -inf  ;;  %v1693_v19 = vsel %vm1569_vm3, %v1522_v53, -inf }
 0x33e   : > { %14121 = vst [vmem:[#allocation25_spill] sm:$0xff] %v11902_v16  ;;  %6470 = vrot.lane.b32.xlu0 %v11902_v16, %s9445_s7  ;;  %6408 = vrot.lane.b32.xlu1 %v11902_v16, %s9447_s9  ;;  %v4066_v43 = vmax.f32 %v4064_v6, %v4065_v39  ;;  %v1692_v13 = vmax.f32 %v1690_v33, %v1691_v25  ;;  %v1700_v18 = vsel %vm1569_vm3, %v1528_v34, -inf  ;;  %v1694_v26 = vsel %vm1569_vm3, %v1526_v56, -inf }
 0x33f   : > { %v2540_v59 = vcombine.high %v1698_v46, %v1698_v46  ;;  %v2547_v10 = vrot.slane %v1698_v46, %v9638_v29  ;;  %v11912_v7 = vmax.f32 %v1699_v36, %v1700_v18  ;;  %v11916_v35 = vmax.f32 %v1693_v19, %v1694_v26 }
 0x340   : > { %v8888_v42 = vpack.c.bf16 %v4066_v43, %v4066_v43  ;;  %v2506_v9 = vcombine.high %v1692_v13, %v1692_v13  ;;  %v2513_v53 = vrot.slane %v1692_v13, %v9638_v29  ;;  %v6289_v33 = vrot.slane %v11902_v16, 1 }
 0x341   : > { %v2554_v45 = vrot.slane %v2540_v59, %v9638_v29  ;;  %v2555_v4 = vcombine.high %v2547_v10, %v2547_v10  ;;  %v4347_v6 = vsel %vm3170_vm4, %v2547_v10, -inf }
 0x342   : > { %v4348_v2 = vrot.slane %v4347_v6, 4  ;;  %v11923_v44 = vsel %vm10310_vm14, %v8888_v42, 0  ;;  %v2520_v36 = vrot.slane %v2506_v9, %v9638_v29  ;;  %v2521_v27 = vcombine.high %v2513_v53, %v2513_v53  ;;  %v6395_v42 = vpop.permute.xlu1 %6394 }
 0x343   : > { %v2556_v39 = vcombine.high %v2554_v45, %v2554_v45  ;;  %v4354_v34 = vsel %vm3170_vm4, %v2555_v4, -inf  ;;  %v4361_v46 = vsel %vm3170_vm4, %v2554_v45, -inf  ;;  %v6290_v25 = vrot.slane %v11923_v44, 1 }
 0x344   : > { %v4349_v56 = vmax.f32 %v4347_v6, %v4348_v2  ;;  %v4355_v19 = vrot.slane %v4354_v34, 4  ;;  %v4362_v43 = vrot.slane %v4361_v46, 4  ;;  %v2522_v13 = vcombine.high %v2520_v36, %v2520_v36 }
 0x345   : > { %v4368_v18 = vsel %vm3170_vm4, %v2556_v39, -inf  ;;  %v11931_v59 = vsel %vm6265_vm15, %v6289_v33, %v6290_v25  ;;  %v4291_v10 = vsel %vm3170_vm4, %v2513_v53, -inf  ;;  %v4298_v26 = vsel %vm3170_vm4, %v2521_v27, -inf }
 0x346   : > { %14122 = vst [vmem:[#allocation47_spill] sm:$0xff] %v11931_v59  ;;  %v4350_v9 = vrot.slane %v4349_v56, 2  ;;  %v4356_v4 = vmax.f32 %v4354_v34, %v4355_v19  ;;  %v4363_v55 = vmax.f32 %v4361_v46, %v4362_v43  ;;  %v4369_v45 = vrot.slane %v4368_v18, 4  ;;  %6440 = vrot.lane.b32.xlu0 %v11931_v59, %s9446_s8  ;;  %6378 = vrot.lane.b32.xlu1 %v11931_v59, %s9445_s7  ;;  %v11941_v43 = vpop.permute.xlu0 %6484  ;;  %v11943_v17 = vpop.permute.xlu1 %6364 }
 0x347   : > { %v4292_v6 = vrot.slane %v4291_v10, 4  ;;  %v4299_v2 = vrot.slane %v4298_v26, 4  ;;  %v4305_v33 = vsel %vm3170_vm4, %v2520_v36, -inf  ;;  %v4312_v39 = vsel %vm3170_vm4, %v2522_v13, -inf  ;;  %14123 = vst [vmem:[#allocation48_spill] sm:$0xff] %v11941_v43  ;;  %14124 = vst [vmem:[#allocation17_spill] sm:$0xff] %v11943_v17 }
 0x348   : > { %v4351_v53 = vmax.f32 %v4349_v56, %v4350_v9  ;;  %v4357_v25 = vrot.slane %v4356_v4, 2  ;;  %v4364_v27 = vrot.slane %v4363_v55, 2  ;;  %v4370_v21 = vmax.f32 %v4368_v18, %v4369_v45 }
 0x349   : > { %v4293_v28 = vmax.f32 %v4291_v10, %v4292_v6  ;;  %v4300_v34 = vmax.f32 %v4298_v26, %v4299_v2  ;;  %v4306_v46 = vrot.slane %v4305_v33, 4  ;;  %v4313_v19 = vrot.slane %v4312_v39, 4 }
 0x34a   : > { %v4352_v30 = vrot.slane %v4351_v53, 1  ;;  %v4358_v31 = vmax.f32 %v4356_v4, %v4357_v25  ;;  %v4365_v63 = vmax.f32 %v4363_v55, %v4364_v27  ;;  %v4371_v59 = vrot.slane %v4370_v21, 2 }
 0x34b   : > { %v4294_v50 = vrot.slane %v4293_v28, 2  ;;  %v4301_v57 = vrot.slane %v4300_v34, 2  ;;  %v4307_v20 = vmax.f32 %v4305_v33, %v4306_v46  ;;  %v4314_v36 = vmax.f32 %v4312_v39, %v4313_v19  ;;  %v6333_v19 = vpop.permute.xlu1 %6332 }
 0x34c   : > { %v4353_v41 = vmax.f32 %v4351_v53, %v4352_v30  ;;  %v4359_v13 = vrot.slane %v4358_v31, 1  ;;  %v4366_v56 = vrot.slane %v4365_v63, 1  ;;  %v4372_v9 = vmax.f32 %v4370_v21, %v4371_v59 }
 0x34d   : > { %v4295_v18 = vmax.f32 %v4293_v28, %v4294_v50  ;;  %v4302_v10 = vmax.f32 %v4300_v34, %v4301_v57  ;;  %v4308_v26 = vrot.slane %v4307_v20, 2  ;;  %v4315_v45 = vrot.slane %v4314_v36, 2  ;;  %v12011_v28 = vpop.f32.mrb[14].mxu1 }
 0x34e   : > { %v5112_v6 = vpack.c.bf16 %v11841_v23, %v11841_v23  ;;  %v4360_v4 = vmax.f32 %v4358_v31, %v4359_v13  ;;  %v4367_v55 = vmax.f32 %v4365_v63, %v4366_v56  ;;  %v4373_v2 = vrot.slane %v4372_v9, 1  ;;  %v6427_v23 = vpop.permute.xlu0 %6426  ;;  %v14129_v56 = vld [vmem:[#allocation6_spill] sm:$0xff]  ;;  %14136 = vst [vmem:[#allocation60_spill] sm:$0xff] %v12011_v28 }
 0x34f   : > { %v4296_v25 = vrot.slane %v4295_v18, 1  ;;  %v4309_v33 = vmax.f32 %v4307_v20, %v4308_v26  ;;  %v4316_v39 = vmax.f32 %v4314_v36, %v4315_v45  ;;  %v14125_v30 = vpack.c.bf16 %v11807_v49, %v11807_v49 }
 0x350   : > { %v4303_v57 = vrot.slane %v4302_v10, 1  ;;  %v2557_v50 = vcombine.high %v11912_v7, %v11912_v7  ;;  %v14127_v31 = vpack.c.bf16 %v11820_v37, %v11820_v37  ;;  %v4374_v20 = vmax.f32 %v4372_v9, %v4373_v2 }
 0x351   : > { %v11950_v21 = vunpack.c.l.b16 %v14125_v30  ;;  %v5131_v59 = vpack.c.bf16 %v4353_v41, %v4353_v41  ;;  %v5132_v53 = vpack.c.bf16 %v4360_v4, %v4360_v4  ;;  %v11961_v27 = vunpack.c.l.b16 %v5112_v6 }
 0x352   : > { %v11959_v63 = vunpack.c.l.b16 %v14127_v31  ;;  %v11965_v49 = vsel %vm6587_vm2, %v11849_v62, %v6395_v42  ;;  %v5133_v34 = vpack.c.bf16 %v4367_v55, %v4367_v55  ;;  %v2564_v46 = vrot.slane %v11912_v7, %v9638_v29 }
 0x353   : > { %14126 = vst [vmem:[#allocation34_spill] sm:$0xff] %v11950_v21  ;;  %14128 = vst [vmem:[#allocation11_spill] sm:$0xff] %v11961_v27  ;;  %v11969_v36 = vmax.f32 %v4295_v18, %v4296_v25  ;;  %v4310_v13 = vrot.slane %v4309_v33, 1  ;;  %v4317_v37 = vrot.slane %v4316_v39, 1  ;;  %v11973_v9 = vsel %vm1569_vm3, %v14129_v56, %v6427_v23  ;;  %v14131_v18 = vld [vmem:[#allocation8_spill] sm:$0xff] }
 0x354   : > { %v11975_v41 = vmax.f32 %v4302_v10, %v4303_v57  ;;  %v2571_v26 = vrot.slane %v2557_v50, %v9638_v29  ;;  %v2572_v45 = vcombine.high %v2564_v46, %v2564_v46  ;;  %v4375_v62 = vsel %vm3170_vm4, %v2564_v46, -inf }
 0x355   : > { %v5134_v42 = vpack.c.bf16 %v4374_v20, %v4374_v20  ;;  %v11979_v6 = vunpack.c.l.b16 %v5131_v59  ;;  %v11981_v7 = vunpack.c.l.b16 %v5132_v53  ;;  %v11985_v4 = vsel %vm1569_vm3, %v14131_v18, %v6333_v19 }
 0x356   : > { %14132 = vst [vmem:[#allocation8_spill] sm:$0xff] %v11985_v4  ;;  %v11987_v55 = vunpack.c.l.b16 %v5133_v34  ;;  %v4376_v2 = vrot.slane %v4375_v62, 4  ;;  %v4382_v10 = vsel %vm3170_vm4, %v2572_v45, -inf  ;;  %v4389_v25 = vsel %vm3170_vm4, %v2571_v26, -inf  ;;  %v12001_v34 = vpop.f32.mrb[101].mxu0 }
 0x357   : > { %14130 = vst [vmem:[#allocation6_spill] sm:$0xff] %v11981_v7  ;;  %v11991_v30 = vmax.f32 %v4309_v33, %v4310_v13  ;;  %v11993_v57 = vmax.f32 %v4316_v39, %v4317_v37  ;;  %v4383_v23 = vrot.slane %v4382_v10, 4  ;;  %v5124_v31 = vpack.c.bf16 %v11975_v41, %v11975_v41  ;;  %14134 = vst [vmem:[#allocation58_spill] sm:$0xff] %v12001_v34  ;;  %v12013_v50 = vpop.f32.mrb[102].mxu0 }
 0x358   : > { %14133 = vst [vmem:[#allocation57_spill] sm:$0xff] %v11987_v55  ;;  %v4377_v20 = vmax.f32 %v4375_v62, %v4376_v2  ;;  %v4390_v59 = vrot.slane %v4389_v25, 4  ;;  %v2523_v53 = vcombine.high %v11916_v35, %v11916_v35  ;;  %v12003_v46 = vunpack.c.l.b16 %v5134_v42  ;;  %14137 = vst [vmem:[#allocation61_spill] sm:$0xff] %v12013_v50 }
 0x359   : > { %v2573_v33 = vcombine.high %v2571_v26, %v2571_v26  ;;  %v4384_v19 = vmax.f32 %v4382_v10, %v4383_v23  ;;  %v2530_v39 = vrot.slane %v11916_v35, %v9638_v29  ;;  %v6141_v41 = vshll.u32 %v11902_v16, 16  ;;  %v12015_v35 = vpop.f32.mrb[15].mxu1 }
 0x35a   : > { %14135 = vst [vmem:[#allocation59_spill] sm:$0xff] %v12003_v46  ;;  %v4378_v13 = vrot.slane %v4377_v20, 2  ;;  %v4391_v37 = vmax.f32 %v4389_v25, %v4390_v59  ;;  %v2537_v56 = vrot.slane %v2523_v53, %v9638_v29  ;;  %v6139_v2 = vshrl.u32 %v11902_v16, 16  ;;  %14138 = vst [vmem:[#allocation62_spill] sm:$0xff] %v12015_v35 }
 0x35b   : > { %v4385_v45 = vrot.slane %v4384_v19, 2  ;;  %v2538_v62 = vcombine.high %v2530_v39, %v2530_v39  ;;  %v4319_v18 = vsel %vm3170_vm4, %v2530_v39, -inf  ;;  %v6143_v43 = vrot.slane %v6141_v41, 1 }
 0x35c   : > { %v4379_v42 = vmax.f32 %v4377_v20, %v4378_v13  ;;  %v4392_v26 = vrot.slane %v4391_v37, 2  ;;  %v2539_v10 = vcombine.high %v2537_v56, %v2537_v56  ;;  %v4320_v23 = vrot.slane %v4319_v18, 4 }
 0x35d   : > { %v4386_v25 = vmax.f32 %v4384_v19, %v4385_v45  ;;  %v4326_v59 = vsel %vm3170_vm4, %v2538_v62, -inf  ;;  %v4333_v53 = vsel %vm3170_vm4, %v2537_v56, -inf  ;;  %v5125_v20 = vpack.c.bf16 %v11991_v30, %v11991_v30 }
 0x35e   : > { %v4380_v46 = vrot.slane %v4379_v42, 1  ;;  %v4393_v39 = vmax.f32 %v4391_v37, %v4392_v26  ;;  %v4321_v55 = vmax.f32 %v4319_v18, %v4320_v23  ;;  %v4327_v16 = vrot.slane %v4326_v59, 4 }
 0x35f   : > { %v4387_v13 = vrot.slane %v4386_v25, 1  ;;  %v4334_v7 = vrot.slane %v4333_v53, 4  ;;  %v4340_v4 = vsel %vm3170_vm4, %v2539_v10, -inf  ;;  %v4396_v17 = vsel %vm3170_vm4, %v2573_v33, -inf }
 0x360   : > { %v4322_v35 = vrot.slane %v4321_v55, 2  ;;  %v4328_v19 = vmax.f32 %v4326_v59, %v4327_v16  ;;  %v6144_v45 = vor.u32 %v6143_v43, %v6139_v2  ;;  %v4394_v62 = vrot.slane %v4393_v39, 1 }
 0x361   : > { %v4335_v50 = vmax.f32 %v4333_v53, %v4334_v7  ;;  %v4341_v56 = vrot.slane %v4340_v4, 4  ;;  %v6146_v41 = vshll.u32 %v11923_v44, 16  ;;  %v4381_v37 = vmax.f32 %v4379_v42, %v4380_v46  ;;  %v12031_v46 = vpop.permute.xlu0 %6516 }
 0x362   : > { %v4388_v18 = vmax.f32 %v4386_v25, %v4387_v13  ;;  %v4323_v26 = vmax.f32 %v4321_v55, %v4322_v35  ;;  %v4329_v23 = vrot.slane %v4328_v19, 2  ;;  %v5126_v30 = vpack.c.bf16 %v11993_v57, %v11993_v57  ;;  %14140 = vst [vmem:[#allocation64_spill] sm:$0xff] %v12031_v46  ;;  %v12033_v55 = vpop.f32.mrb[103].mxu0 }
 0x363   : > { %v4336_v28 = vrot.slane %v4335_v50, 2  ;;  %v4342_v34 = vmax.f32 %v4340_v4, %v4341_v56  ;;  %v6148_v10 = vrot.slane %v6146_v41, 1  ;;  %v5636_v21 = vunpack.c.l.b16 %v5124_v31 }
 0x364   : > { %v4397_v33 = vrot.slane %v4396_v17, 4  ;;  %v4324_v27 = vrot.slane %v4323_v26, 1  ;;  %v4330_v16 = vmax.f32 %v4328_v19, %v4329_v23  ;;  %v12026_v43 = vmax.f32 %v4393_v39, %v4394_v62 }
 0x365   : > { %v4337_v7 = vmax.f32 %v4335_v50, %v4336_v28  ;;  %v4343_v2 = vrot.slane %v4342_v34, 2  ;;  %v12029_v44 = vsel %vm6045_vm0, %v6144_v45, %v6148_v10  ;;  %v14141_v57 = vpack.c.bf16 %v11969_v36, %v11969_v36 }
 0x366   : > { %14139 = vst [vmem:[#allocation63_spill] sm:$0xff] %v12029_v44  ;;  %v5135_v42 = vpack.c.bf16 %v4381_v37, %v4381_v37  ;;  %v5136_v31 = vpack.c.bf16 %v4388_v18, %v4388_v18  ;;  %6502 = vrot.lane.b32.xlu0 %v12029_v44, %s9447_s9  ;;  %6346 = vrot.lane.b32.xlu1 %v12029_v44, %s9446_s8  ;;  %v4331_v35 = vrot.slane %v4330_v16, 1  ;;  %v12048_v36 = vunpack.c.l.b16 %v5125_v20  ;;  %v12075_v37 = vpop.permute.xlu0 %6428 }
 0x367   : > { %v5635_v4 = vunpack.c.l.b16 %v14141_v57  ;;  %v1291_v28 = vadd.f32 %v11643_v58, %v11542_v3  ;;  %v12044_v50 = vmax.f32 %v4323_v26, %v4324_v27  ;;  %v4344_v25 = vmax.f32 %v4342_v34, %v4343_v2  ;;  %v14148_v57 = vld [vmem:[#allocation37_spill] sm:$0xff] }
 0x368   : > { %v1283_v59 = vadd.f32 %v11643_v58, %v11547_v32  ;;  %v12050_v53 = vunpack.c.l.b16 %v5126_v30  ;;  %v4338_v39 = vrot.slane %v4337_v7, 1  ;;  %v12055_v45 = vmax.f32 %v4396_v17, %v4397_v33 }
 0x369   : > { %v1531_v13 = vmax.f32 %v1291_v28, 0.0  ;;  %v12053_v19 = vsel %vm5731_vm5, %v5636_v21, %v5635_v4  ;;  %v4345_v27 = vrot.slane %v4344_v25, 1  ;;  %v12059_v62 = vunpack.c.l.b16 %v5135_v42  ;;  %v14149_v42 = vld [vmem:[#allocation14_spill] sm:$0xff] }
 0x36a   : > { %14142 = vst [vmem:[#allocation65_spill] sm:$0xff] %v12055_v45  ;;  %v12061_v34 = vunpack.c.l.b16 %v5136_v31  ;;  %v12065_v32 = vadd.f32 %v11643_v58, %v11553_v0  ;;  %v12069_v20 = vadd.f32 %v11643_v58, %v11559_v8  ;;  %v12071_v21 = vmax.f32 %v4330_v16, %v4331_v35  ;;  %v14151_v35 = vld [vmem:[#allocation28_spill] sm:$0xff] }
 0x36b   : > { %14143 = vst [vmem:[#allocation66_spill] sm:$0xff] %v12059_v62  ;;  %v4346_v17 = vmax.f32 %v4344_v25, %v4345_v27  ;;  %v1529_v41 = vmax.f32 %v1283_v59, 0.0  ;;  %v12077_v18 = vmax.f32 %v4337_v7, %v4338_v39  ;;  %v1708_v26 = vsel %vm1569_vm3, %v1531_v13, -inf  ;;  %v14147_v7 = vld [vmem:[#allocation35_spill] sm:$0xff]  ;;  %v14152_v25 = vld [vmem:[#allocation20_spill] sm:$0xff]  ;;  %v6459_v39 = vpop.permute.xlu1 %6458 }
 0x36c   : > { %14144 = vst [vmem:[#allocation67_spill] sm:$0xff] %v12061_v34  ;;  %v14145_v0 = vpack.c.bf16 %v11666_v40, %v11666_v40  ;;  %v5843_v8 = vsel %vm5733_vm7, %v11583_v15, %v11589_v47  ;;  %v14146_v10 = vpack.c.bf16 %v11566_v54, %v11566_v54  ;;  %v5849_v2 = vsel %vm5731_vm5, %v14147_v7, %v11657_v12 }
 0x36d   : > { %v5130_v30 = vpack.c.bf16 %v4346_v17, %v4346_v17  ;;  %v5844_v16 = vsel %vm5735_vm8, %v11586_v61, %v5843_v8  ;;  %v5850_v4 = vsel %vm5733_vm7, %v14148_v57, %v5849_v2  ;;  %v1307_v15 = vadd.f32 %v11643_v58, %v11575_v52  ;;  %v14150_v61 = vld [vmem:[#allocation15_spill] sm:$0xff] }
 0x36e   : > { %v5609_v23 = vunpack.c.l.b16 %v14145_v0  ;;  %v5617_v33 = vunpack.c.l.b16 %v14146_v10  ;;  %v5845_v40 = vsel %vm5737_vm9, %v11726_v38, %v5844_v16  ;;  %v4175_v47 = vrot.slane %v11592_v51, 2  ;;  %v14153_v0 = vld [vmem:[#allocation4_spill] sm:$0xff]  ;;  %v6491_v10 = vpop.permute.xlu0 %6490  ;;  %v14154_v2 = vld [vmem:[#allocation39_spill] sm:$0xff] }
 0x36f   : > { %v5642_v54 = vunpack.c.l.b16 %v5130_v30  ;;  %v5846_v31 = vsel %vm5739_vm10, %v14149_v42, %v5845_v40  ;;  %v5851_v28 = vsel %vm5735_vm8, %v14150_v61, %v5850_v4  ;;  %v1299_v12 = vadd.f32 %v11643_v58, %v14151_v35 }
 0x370   : > { %v5847_v38 = vsel %vm5741_vm11, %v5609_v23, %v5846_v31  ;;  %v5852_v59 = vsel %vm5737_vm9, %v14152_v25, %v5851_v28  ;;  %v1535_v13 = vmax.f32 %v1307_v15, 0.0  ;;  %v4176_v52 = vmax.f32 %v11592_v51, %v4175_v47 }
 0x371   : > { %v12113_v27 = vsel %vm5743_vm6, %v11979_v6, %v5642_v54  ;;  %v1702_v17 = vsel %vm1569_vm3, %v1529_v41, -inf  ;;  %v5853_v8 = vsel %vm5739_vm10, %v14153_v0, %v5852_v59  ;;  %v1533_v30 = vmax.f32 %v1299_v12, 0.0 }
 0x372   : > { %v5854_v23 = vsel %vm5741_vm11, %v5617_v33, %v5853_v8  ;;  %v1709_v16 = vsel %vm1569_vm3, %v1535_v13, -inf  ;;  %v4177_v7 = vrot.slane %v4176_v52, 1  ;;  %v12122_v40 = vadd.f32 %v11643_v58, %v14154_v2 }
 0x373   : > { %v5962_v51 = vpack.c.b16 %v5854_v23, %v5847_v38  ;;  %v6685_v6 = vsel %vm6554_vm1, %v11973_v9, %v6459_v39  ;;  %v1710_v57 = vmax.f32 %v1708_v26, %v1709_v16  ;;  %v1703_v41 = vsel %vm1569_vm3, %v1533_v30, -inf  ;;  %v12137_v9 = vld [vmem:[%s13758_s2] ss:$0 sm:$0xff]  ;;  %v14156_v26 = vld [vmem:[#allocation40_spill] sm:$0xff] }
 0x374   : > { %v4178_v15 = vmax.f32 %v4176_v52, %v4177_v7  ;;  %v1704_v47 = vmax.f32 %v1702_v17, %v1703_v41  ;;  %v6717_v33 = vsel %vm6587_vm2, %v6685_v6, %v6491_v10  ;;  %v12141_v31 = vadd.f32 %v12137_v9, %v14156_v26 }
 0x375   : > { %v12131_v54 = vsel %vm10310_vm14, 0, %v5962_v51  ;;  %v2608_v42 = vcombine.high %v1710_v57, %v1710_v57  ;;  %v2615_v58 = vrot.slane %v1710_v57, %v9638_v29  ;;  %6995 = vmatprep.mubr.bf16.mxu1 %v6717_v33  ;;  %v1536_v12 = vmax.f32 %v12122_v40, 0.0 }
 0x376   : > { %14155 = vst [vmem:[#allocation35_spill] sm:$0xff] %v12131_v54  ;;  %6472 = vrot.lane.b32.xlu0 %v12131_v54, %s9445_s7  ;;  %6410 = vrot.lane.b32.xlu1 %v12131_v54, %s9447_s9  ;;  %v8889_v61 = vpack.c.bf16 %v4178_v15, %v4178_v15  ;;  %v2574_v28 = vcombine.high %v1704_v47, %v1704_v47  ;;  %v6292_v39 = vrot.slane %v12131_v54, 1 }
 0x377   : > { %v2581_v35 = vrot.slane %v1704_v47, %v9638_v29  ;;  %v2622_v38 = vrot.slane %v2608_v42, %v9638_v29  ;;  %v2623_v25 = vcombine.high %v2615_v58, %v2615_v58  ;;  %v4459_v59 = vsel %vm3170_vm4, %v2615_v58, -inf  ;;  %6996 = vmatmul.mubr.bf16.vlgmr.msra.gmra.mrb[16].mxu1 %v11965_v49 }
 0x378   : > { %v4460_v13 = vrot.slane %v4459_v59, 4  ;;  %v12155_v52 = vsel %vm10310_vm14, %v8889_v61, 0  ;;  %v2588_v17 = vrot.slane %v2574_v28, %v9638_v29 }
 0x379   : > { %v2589_v0 = vcombine.high %v2581_v35, %v2581_v35  ;;  %v2624_v8 = vcombine.high %v2622_v38, %v2622_v38  ;;  %v4466_v30 = vsel %vm3170_vm4, %v2623_v25, -inf  ;;  %v4473_v10 = vsel %vm3170_vm4, %v2622_v38, -inf }
 0x37a   : > { %v6293_v23 = vrot.slane %v12155_v52, 1  ;;  %v4461_v16 = vmax.f32 %v4459_v59, %v4460_v13  ;;  %v4467_v7 = vrot.slane %v4466_v30, 4  ;;  %v4474_v2 = vrot.slane %v4473_v10, 4 }
 0x37b   : > { %v2590_v40 = vcombine.high %v2588_v17, %v2588_v17  ;;  %v4480_v49 = vsel %vm3170_vm4, %v2624_v8, -inf  ;;  %v4403_v6 = vsel %vm3170_vm4, %v2581_v35, -inf  ;;  %v4410_v57 = vsel %vm3170_vm4, %v2589_v0, -inf }
 0x37c   : > { %v12163_v51 = vsel %vm6265_vm15, %v6292_v39, %v6293_v23  ;;  %v4462_v41 = vrot.slane %v4461_v16, 2  ;;  %v4468_v15 = vmax.f32 %v4466_v30, %v4467_v7  ;;  %v4475_v47 = vmax.f32 %v4473_v10, %v4474_v2 }
 0x37d   : > { %14157 = vst [vmem:[#allocation37_spill] sm:$0xff] %v12163_v51  ;;  %v4481_v33 = vrot.slane %v4480_v49, 4  ;;  %6442 = vrot.lane.b32.xlu0 %v12163_v51, %s9446_s8  ;;  %6380 = vrot.lane.b32.xlu1 %v12163_v51, %s9445_s7  ;;  %v4404_v42 = vrot.slane %v4403_v6, 4  ;;  %v4411_v58 = vrot.slane %v4410_v57, 4  ;;  %v4417_v26 = vsel %vm3170_vm4, %v2588_v17, -inf }
 0x37e   : > { %v4424_v61 = vsel %vm3170_vm4, %v2590_v40, -inf  ;;  %v4463_v28 = vmax.f32 %v4461_v16, %v4462_v41  ;;  %v4469_v35 = vrot.slane %v4468_v15, 2  ;;  %v4476_v38 = vrot.slane %v4475_v47, 2 }
 0x37f   : > { %v4482_v25 = vmax.f32 %v4480_v49, %v4481_v33  ;;  %v4405_v59 = vmax.f32 %v4403_v6, %v4404_v42  ;;  %v4412_v39 = vmax.f32 %v4410_v57, %v4411_v58  ;;  %v4418_v13 = vrot.slane %v4417_v26, 4 }
 0x380   : > { %v4425_v0 = vrot.slane %v4424_v61, 4  ;;  %v4464_v8 = vrot.slane %v4463_v28, 1  ;;  %v4470_v30 = vmax.f32 %v4468_v15, %v4469_v35  ;;  %v4477_v10 = vmax.f32 %v4475_v47, %v4476_v38 }
 0x381   : > { %v4483_v23 = vrot.slane %v4482_v25, 2  ;;  %v4406_v7 = vrot.slane %v4405_v59, 2  ;;  %v4413_v2 = vrot.slane %v4412_v39, 2  ;;  %v4419_v3 = vmax.f32 %v4417_v26, %v4418_v13 }
 0x382   : > { %v4426_v4 = vmax.f32 %v4424_v61, %v4425_v0  ;;  %v4465_v56 = vmax.f32 %v4463_v28, %v4464_v8  ;;  %v4471_v17 = vrot.slane %v4470_v30, 1  ;;  %v4478_v51 = vrot.slane %v4477_v10, 1  ;;  %v14161_v0 = vld [vmem:[#allocation22_spill] sm:$0xff] }
 0x383   : > { %v4484_v40 = vmax.f32 %v4482_v25, %v4483_v23  ;;  %v4407_v16 = vmax.f32 %v4405_v59, %v4406_v7  ;;  %v4414_v41 = vmax.f32 %v4412_v39, %v4413_v2  ;;  %v4420_v46 = vrot.slane %v4419_v3, 2 }
 0x384   : > { %v4427_v49 = vrot.slane %v4426_v4, 2  ;;  %v5128_v6 = vpack.c.bf16 %v12071_v21, %v12071_v21  ;;  %v1530_v57 = vmax.f32 %v12069_v20, 0.0  ;;  %v1712_v47 = vsel %vm1569_vm3, %v1536_v12, -inf }
 0x385   : > { %v4485_v15 = vrot.slane %v4484_v40, 1  ;;  %v4472_v33 = vmax.f32 %v4470_v30, %v4471_v17  ;;  %v4479_v42 = vmax.f32 %v4477_v10, %v4478_v51  ;;  %v4421_v58 = vmax.f32 %v4419_v3, %v4420_v46 }
 0x386   : > { %v4428_v26 = vmax.f32 %v4426_v4, %v4427_v49  ;;  %v14158_v61 = vpack.c.bf16 %v12044_v50, %v12044_v50  ;;  %v14159_v35 = vmax.f32 %v12065_v32, 0.0  ;;  %v4408_v25 = vrot.slane %v4407_v16, 1 }
 0x387   : > { %v1534_v21 = vmax.f32 %v12141_v31, 0.0  ;;  %v4486_v20 = vmax.f32 %v4484_v40, %v4485_v15  ;;  %v5147_v59 = vpack.c.bf16 %v4465_v56, %v4465_v56  ;;  %v4415_v39 = vrot.slane %v4414_v41, 1  ;;  %v12206_v40 = vpop.f32.mrb[104].mxu0 }
 0x388   : > { %v12180_v28 = vunpack.c.l.b16 %v14158_v61  ;;  %v1711_v38 = vsel %vm1569_vm3, %v14159_v35, -inf  ;;  %v4422_v12 = vrot.slane %v4421_v58, 1  ;;  %v12188_v3 = vunpack.c.l.b16 %v5128_v6 }
 0x389   : > { %v1705_v50 = vsel %vm1569_vm3, %v1530_v57, -inf  ;;  %v1713_v4 = vmax.f32 %v1711_v38, %v1712_v47  ;;  %v5148_v51 = vpack.c.bf16 %v4472_v33, %v4472_v33  ;;  %v5149_v13 = vpack.c.bf16 %v4479_v42, %v4479_v42  ;;  %v12210_v57 = vpop.f32.mrb[105].mxu0 }
 0x38a   : > { %14160 = vst [vmem:[#allocation14_spill] sm:$0xff] %v12188_v3  ;;  %v4429_v32 = vrot.slane %v4428_v26, 1  ;;  %v12194_v8 = vsel %vm1569_vm3, %v14161_v0, %v12075_v37  ;;  %v12196_v31 = vmax.f32 %v4407_v16, %v4408_v25  ;;  %v1706_v10 = vsel %vm1569_vm3, %v1534_v21, -inf  ;;  %v12218_v42 = vpop.f32.mrb[106].mxu0 }
 0x38b   : > { %v2625_v56 = vcombine.high %v1713_v4, %v1713_v4  ;;  %v2632_v30 = vrot.slane %v1713_v4, %v9638_v29  ;;  %v5150_v23 = vpack.c.bf16 %v4486_v20, %v4486_v20  ;;  %v12200_v7 = vunpack.c.l.b16 %v5147_v59  ;;  %v12224_v25 = vpop.f32.mrb[107].mxu0 }
 0x38c   : > { %v12202_v2 = vmax.f32 %v4414_v41, %v4415_v39  ;;  %v12204_v17 = vmax.f32 %v4421_v58, %v4422_v12  ;;  %v1707_v6 = vmax.f32 %v1705_v50, %v1706_v10  ;;  %v12212_v15 = vunpack.c.l.b16 %v5148_v51 }
 0x38d   : > { %v2639_v49 = vrot.slane %v2625_v56, %v9638_v29  ;;  %v2640_v37 = vcombine.high %v2632_v30, %v2632_v30  ;;  %v4487_v16 = vsel %vm3170_vm4, %v2632_v30, -inf  ;;  %v12214_v47 = vunpack.c.l.b16 %v5149_v13 }
 0x38e   : > { %14162 = vst [vmem:[#allocation15_spill] sm:$0xff] %v12212_v15  ;;  %v12216_v33 = vmax.f32 %v4428_v26, %v4429_v32  ;;  %v4488_v41 = vrot.slane %v4487_v16, 4  ;;  %v2591_v38 = vcombine.high %v1707_v6, %v1707_v6  ;;  %v2598_v39 = vrot.slane %v1707_v6, %v9638_v29 }
 0x38f   : > { %14163 = vst [vmem:[#allocation28_spill] sm:$0xff] %v12214_v47  ;;  %v4494_v61 = vsel %vm3170_vm4, %v2640_v37, -inf  ;;  %v4501_v35 = vsel %vm3170_vm4, %v2639_v49, -inf  ;;  %v12227_v26 = vunpack.c.l.b16 %v5150_v23  ;;  %v5140_v12 = vpack.c.bf16 %v12202_v2, %v12202_v2  ;;  %v12237_v37 = vpop.f32.mrb[108].mxu0 }
 0x390   : > { %v4489_v21 = vmax.f32 %v4487_v16, %v4488_v41  ;;  %v4495_v20 = vrot.slane %v4494_v61, 4  ;;  %v4502_v59 = vrot.slane %v4501_v35, 4  ;;  %v5141_v50 = vpack.c.bf16 %v12204_v17, %v12204_v17  ;;  %14165 = vst [vmem:[#allocation4_spill] sm:$0xff] %v12237_v37  ;;  %v12239_v17 = vpop.permute.xlu1 %6396 }
 0x391   : > { %14164 = vst [vmem:[#allocation20_spill] sm:$0xff] %v12227_v26  ;;  %v2605_v4 = vrot.slane %v2591_v38, %v9638_v29  ;;  %v6153_v0 = vshll.u32 %v12131_v54, 16  ;;  %v2606_v56 = vcombine.high %v2598_v39, %v2598_v39  ;;  %v4431_v10 = vsel %vm3170_vm4, %v2598_v39, -inf }
 0x392   : > { %v4490_v51 = vrot.slane %v4489_v21, 2  ;;  %v4496_v13 = vmax.f32 %v4494_v61, %v4495_v20  ;;  %v4503_v32 = vmax.f32 %v4501_v35, %v4502_v59  ;;  %v2641_v16 = vcombine.high %v2639_v49, %v2639_v49 }
 0x393   : > { %v2607_v30 = vcombine.high %v2605_v4, %v2605_v4  ;;  %v4445_v23 = vsel %vm3170_vm4, %v2605_v4, -inf  ;;  %v4432_v38 = vrot.slane %v4431_v10, 4  ;;  %v4438_v61 = vsel %vm3170_vm4, %v2606_v56, -inf }
 0x394   : > { %v4491_v2 = vmax.f32 %v4489_v21, %v4490_v51  ;;  %v4497_v6 = vrot.slane %v4496_v13, 2  ;;  %v4504_v41 = vrot.slane %v4503_v32, 2  ;;  %v4446_v35 = vrot.slane %v4445_v23, 4 }
 0x395   : > { %v4452_v20 = vsel %vm3170_vm4, %v2607_v30, -inf  ;;  %v4439_v39 = vrot.slane %v4438_v61, 4  ;;  %v4433_v44 = vmax.f32 %v4431_v10, %v4432_v38  ;;  %v6155_v47 = vrot.slane %v6153_v0, 1  ;;  %v12248_v38 = vpop.permute.xlu1 %6366 }
 0x396   : > { %v4492_v59 = vrot.slane %v4491_v2, 1  ;;  %v4498_v46 = vmax.f32 %v4496_v13, %v4497_v6  ;;  %v4505_v58 = vmax.f32 %v4503_v32, %v4504_v41  ;;  %v4447_v4 = vmax.f32 %v4445_v23, %v4446_v35  ;;  %14166 = vst [vmem:[#allocation39_spill] sm:$0xff] %v12248_v38 }
 0x397   : > { %v4453_v26 = vrot.slane %v4452_v20, 4  ;;  %v5142_v49 = vpack.c.bf16 %v12216_v33, %v12216_v33  ;;  %v4440_v51 = vmax.f32 %v4438_v61, %v4439_v39  ;;  %v6151_v15 = vshrl.u32 %v12131_v54, 16 }
 0x398   : > { %v4499_v21 = vrot.slane %v4498_v46, 1  ;;  %v4508_v56 = vsel %vm3170_vm4, %v2641_v16, -inf  ;;  %v4434_v34 = vrot.slane %v4433_v44, 2  ;;  %v4448_v45 = vrot.slane %v4447_v4, 2 }
 0x399   : > { %v4454_v30 = vmax.f32 %v4452_v20, %v4453_v26  ;;  %v4493_v37 = vmax.f32 %v4491_v2, %v4492_v59  ;;  %v4506_v13 = vrot.slane %v4505_v58, 1  ;;  %v4441_v32 = vrot.slane %v4440_v51, 2  ;;  %v14168_v20 = vld [vmem:[#allocation21_spill] sm:$0xff] }
 0x39a   : > { %v6156_v6 = vor.u32 %v6155_v47, %v6151_v15  ;;  %v4435_v10 = vmax.f32 %v4433_v44, %v4434_v34  ;;  %v4449_v23 = vmax.f32 %v4447_v4, %v4448_v45  ;;  %v6158_v0 = vshll.u32 %v12155_v52, 16 }
 0x39b   : > { %v4455_v41 = vrot.slane %v4454_v30, 2  ;;  %v5652_v33 = vunpack.c.l.b16 %v5140_v12  ;;  %v4500_v61 = vmax.f32 %v4498_v46, %v4499_v21  ;;  %v4509_v35 = vrot.slane %v4508_v56, 4  ;;  %v6335_v21 = vpop.permute.xlu1 %6334 }
 0x39c   : > { %v4442_v39 = vmax.f32 %v4440_v51, %v4441_v32  ;;  %v4436_v54 = vrot.slane %v4435_v10, 1  ;;  %v4450_v16 = vrot.slane %v4449_v23, 1  ;;  %v6160_v3 = vrot.slane %v6158_v0, 1  ;;  %v14181_v0 = vld [vmem:[#allocation29_spill] sm:$0xff] }
 0x39d   : > { %v4456_v62 = vmax.f32 %v4454_v30, %v4455_v41  ;;  %v12250_v26 = vmax.f32 %v4505_v58, %v4506_v13  ;;  %v1323_v44 = vadd.f32 %v12137_v9, %v14168_v20  ;;  %v1315_v45 = vadd.f32 %v12137_v9, %v11782_v24  ;;  %v14176_v30 = vld [vmem:[#allocation50_spill] sm:$0xff] }
 0x39e   : > { %v4443_v2 = vrot.slane %v4442_v39, 1  ;;  %v5151_v34 = vpack.c.bf16 %v4493_v37, %v4493_v37  ;;  %v4437_v52 = vmax.f32 %v4435_v10, %v4436_v54  ;;  %v12257_v46 = vsel %vm6045_vm0, %v6156_v6, %v6160_v3  ;;  %v14179_v41 = vld [vmem:[#allocation18_spill] sm:$0xff] }
 0x39f   : > { %14167 = vst [vmem:[#allocation40_spill] sm:$0xff] %v12250_v26  ;;  %v4457_v15 = vrot.slane %v4456_v62, 1  ;;  %14169 = vst [vmem:[#allocation22_spill] sm:$0xff] %v12257_v46  ;;  %v14170_v47 = vpack.c.bf16 %v12196_v31, %v12196_v31  ;;  %v12262_v59 = vunpack.c.l.b16 %v5141_v50  ;;  %v5152_v58 = vpack.c.bf16 %v4500_v61, %v4500_v61  ;;  %6504 = vrot.lane.b32.xlu0 %v12257_v46, %s9447_s9 }
 0x3a0   : > { %v12264_v4 = vmax.f32 %v4449_v23, %v4450_v16  ;;  %6348 = vrot.lane.b32.xlu1 %v12257_v46, %s9446_s8  ;;  %v12270_v24 = vunpack.c.l.b16 %v5142_v49  ;;  %v4444_v54 = vmax.f32 %v4442_v39, %v4443_v2  ;;  %v1539_v37 = vmax.f32 %v1323_v44, 0.0  ;;  %v14182_v16 = vld [vmem:[#allocation44_spill] sm:$0xff] }
 0x3a1   : > { %v5651_v12 = vunpack.c.l.b16 %v14170_v47  ;;  %14171 = vst [vmem:[#allocation21_spill] sm:$0xff] %v12262_v59  ;;  %v4458_v3 = vmax.f32 %v4456_v62, %v4457_v15  ;;  %v12275_v50 = vmax.f32 %v4508_v56, %v4509_v35  ;;  %v1537_v51 = vmax.f32 %v1315_v45, 0.0 }
 0x3a2   : > { %14172 = vst [vmem:[#allocation68_spill] sm:$0xff] %v12264_v4  ;;  %14173 = vst [vmem:[#allocation69_spill] sm:$0xff] %v12270_v24  ;;  %v1326_v13 = vadd.f32 %v12137_v9, %v14176_v30  ;;  %v12281_v6 = vunpack.c.l.b16 %v5151_v34  ;;  %v5143_v49 = vpack.c.bf16 %v4437_v52, %v4437_v52  ;;  %v12283_v23 = vunpack.c.l.b16 %v5152_v58  ;;  %v14183_v34 = vld [vmem:[#allocation41_spill] sm:$0xff] }
 0x3a3   : > { %v12273_v31 = vsel %vm5731_vm5, %v5652_v33, %v5651_v12  ;;  %14175 = vst [vmem:[#allocation71_spill] sm:$0xff] %v12275_v50  ;;  %v5146_v10 = vpack.c.bf16 %v4458_v3, %v4458_v3  ;;  %v12289_v56 = vsel %vm1569_vm3, %v14179_v41, %v6335_v21  ;;  %v1419_v33 = vadd.f32 %v12137_v9, %v14181_v0  ;;  %v14187_v3 = vld [vmem:[#allocation43_spill] sm:$0xff]  ;;  %v12322_v21 = vpop.f32.mrb[109].mxu0  ;;  %v14193_v41 = vld [vmem:[#allocation46_spill] sm:$0xff] }
 0x3a4   : > { %14174 = vst [vmem:[#allocation70_spill] sm:$0xff] %v12273_v31  ;;  %14177 = vst [vmem:[#allocation50_spill] sm:$0xff] %v12281_v6  ;;  %v5144_v61 = vpack.c.bf16 %v4444_v54, %v4444_v54  ;;  %v1720_v39 = vsel %vm1569_vm3, %v1539_v37, -inf  ;;  %v1411_v2 = vadd.f32 %v12137_v9, %v14182_v16  ;;  %v12297_v20 = vsel %vm1569_vm3, %v1537_v51, -inf  ;;  %v14195_v16 = vld [vmem:[#allocation34_spill] sm:$0xff] }
 0x3a5   : > { %14178 = vst [vmem:[#allocation72_spill] sm:$0xff] %v12283_v23  ;;  %14180 = vst [vmem:[#allocation18_spill] sm:$0xff] %v12289_v56  ;;  %v5658_v35 = vunpack.c.l.b16 %v5146_v10  ;;  %v1540_v44 = vmax.f32 %v1326_v13, 0.0  ;;  %v5856_v45 = vsel %vm5733_vm7, %v11801_v60, %v11805_v5  ;;  %v5862_v52 = vsel %vm5731_vm5, %v14183_v34, %v11880_v22 }
 0x3a6   : > { %v12305_v15 = vunpack.c.l.b16 %v5143_v49  ;;  %v1318_v12 = vadd.f32 %v12137_v9, %v11789_v11  ;;  %v5857_v58 = vsel %vm5735_vm8, %v11818_v48, %v5856_v45  ;;  %v1563_v54 = vmax.f32 %v1419_v33, 0.0  ;;  %v14189_v11 = vld [vmem:[#allocation11_spill] sm:$0xff]  ;;  %v14191_v49 = vld [vmem:[#allocation53_spill] sm:$0xff]  ;;  %v14194_v33 = vld [vmem:[#allocation56_spill] sm:$0xff] }
 0x3a7   : > { %v12309_v47 = vsel %vm5743_vm6, %v12200_v7, %v5658_v35  ;;  %v14186_v60 = vpack.c.bf16 %v11844_v14, %v11844_v14  ;;  %v5858_v22 = vsel %vm5737_vm9, %v11959_v63, %v5857_v58  ;;  %v5863_v37 = vsel %vm5733_vm7, %v14187_v3, %v5862_v52  ;;  %v14190_v48 = vld [vmem:[#allocation51_spill] sm:$0xff]  ;;  %v14196_v45 = vld [vmem:[#allocation32_spill] sm:$0xff]  ;;  %v14198_v3 = vld [vmem:[#allocation54_spill] sm:$0xff] }
 0x3a8   : > { %14184 = vst [vmem:[#allocation29_spill] sm:$0xff] %v12305_v15  ;;  %14185 = vst [vmem:[#allocation44_spill] sm:$0xff] %v12309_v47  ;;  %v12324_v7 = vunpack.c.l.b16 %v5144_v61  ;;  %v1561_v51 = vmax.f32 %v1411_v2, 0.0  ;;  %v5859_v30 = vsel %vm5739_vm10, %v14189_v11, %v5858_v22  ;;  %v5864_v13 = vsel %vm5735_vm8, %v14190_v48, %v5863_v37  ;;  %v14197_v52 = vld [vmem:[#allocation27_spill] sm:$0xff] }
 0x3a9   : > { %v5625_v5 = vunpack.c.l.b16 %v14186_v60  ;;  %v14192_v14 = vpack.c.bf16 %v14191_v49, %v14191_v49  ;;  %v5865_v0 = vsel %vm5737_vm9, %v14193_v41, %v5864_v13  ;;  %v1435_v61 = vadd.f32 %v12137_v9, %v14194_v33  ;;  %v12344_v60 = vpop.f32.mrb[110].mxu0  ;;  %v14199_v49 = vld [vmem:[#allocation45_spill] sm:$0xff]  ;;  %v6461_v41 = vpop.permute.xlu0 %6460 }
 0x3aa   : > { %14188 = vst [vmem:[#allocation41_spill] sm:$0xff] %v12324_v7  ;;  %v1538_v35 = vmax.f32 %v1318_v12, 0.0  ;;  %v5866_v2 = vsel %vm5739_vm10, %v14195_v16, %v5865_v0  ;;  %v1339_v34 = vadd.f32 %v12137_v9, %v14196_v45  ;;  %v1427_v58 = vadd.f32 %v12137_v9, %v14197_v52  ;;  %v12369_v45 = vpop.f32.mrb[111].mxu0 }
 0x3ab   : > { %v5633_v10 = vunpack.c.l.b16 %v14192_v14  ;;  %v5860_v63 = vsel %vm5741_vm11, %v5625_v5, %v5859_v30  ;;  %v1756_v5 = vsel %vm1569_vm3, %v1563_v54, -inf  ;;  %v12350_v37 = vadd.f32 %v12137_v9, %v14198_v3  ;;  %v14200_v54 = vld [vmem:[#allocation55_spill] sm:$0xff] }
 0x3ac   : > { %v1567_v12 = vmax.f32 %v1435_v61, 0.0  ;;  %v1750_v11 = vsel %vm1569_vm3, %v1561_v51, -inf  ;;  %v1543_v48 = vmax.f32 %v1339_v34, 0.0  ;;  %v1565_v13 = vmax.f32 %v1427_v58, 0.0 }
 0x3ad   : > { %v5867_v22 = vsel %vm5741_vm11, %v5633_v10, %v5866_v2  ;;  %v12355_v14 = vadd.f32 %v12137_v9, %v14199_v49  ;;  %v4287_v33 = vrot.slane %v14200_v54, 2  ;;  %v14201_v10 = vld [vmem:[#allocation58_spill] sm:$0xff]  ;;  %v12372_v34 = vsel %vm1569_vm3, %v1540_v44, -inf }
 0x3ae   : > { %v5964_v30 = vpack.c.b16 %v5867_v22, %v5860_v63  ;;  %v1757_v0 = vsel %vm1569_vm3, %v1567_v12, -inf  ;;  %v12361_v16 = vadd.f32 %v12137_v9, %v14201_v10  ;;  %v1721_v63 = vsel %vm1569_vm3, %v1543_v48, -inf }
 0x3af   : > { %v1758_v51 = vmax.f32 %v1756_v5, %v1757_v0  ;;  %v1751_v2 = vsel %vm1569_vm3, %v1565_v13, -inf  ;;  %v12375_v52 = vsel %vm1569_vm3, %v1538_v35, -inf  ;;  %v1722_v58 = vmax.f32 %v1720_v39, %v1721_v63 }
 0x3b0   : > { %v12365_v61 = vsel %vm10310_vm14, 0, %v5964_v30  ;;  %v12381_v5 = vmax.f32 %v1750_v11, %v1751_v2  ;;  %v12386_v3 = vsel %vm6554_vm1, %v12194_v8, %v6461_v41  ;;  %v12392_v13 = vmax.f32 %v14200_v54, %v4287_v33 }
 0x3b1   : > { %14202 = vst [vmem:[#allocation43_spill] sm:$0xff] %v12365_v61  ;;  %6474 = vrot.lane.b32.xlu0 %v12365_v61, %s9445_s7  ;;  %6412 = vrot.lane.b32.xlu1 %v12365_v61, %s9447_s9  ;;  %v2880_v44 = vcombine.high %v1758_v51, %v1758_v51  ;;  %v2887_v12 = vrot.slane %v1758_v51, %v9638_v29 }
 0x3b2   : > { %v2676_v30 = vcombine.high %v1722_v58, %v1722_v58  ;;  %v2683_v48 = vrot.slane %v1722_v58, %v9638_v29 }
 0x3b3   : > { %v2894_v39 = vrot.slane %v2880_v44, %v9638_v29  ;;  %v2895_v11 = vcombine.high %v2887_v12, %v2887_v12  ;;  %v4907_v49 = vsel %vm3170_vm4, %v2887_v12, -inf }
 0x3b4   : > { %v4908_v8 = vrot.slane %v4907_v49, 4  ;;  %v2690_v41 = vrot.slane %v2676_v30, %v9638_v29  ;;  %v2691_v10 = vcombine.high %v2683_v48, %v2683_v48  ;;  %v4571_v51 = vsel %vm3170_vm4, %v2683_v48, -inf }
 0x3b5   : > { %v2896_v63 = vcombine.high %v2894_v39, %v2894_v39  ;;  %v4914_v2 = vsel %vm3170_vm4, %v2895_v11, -inf  ;;  %v4921_v58 = vsel %vm3170_vm4, %v2894_v39, -inf  ;;  %v4572_v54 = vrot.slane %v4571_v51, 4 }
 0x3b6   : > { %v4909_v33 = vmax.f32 %v4907_v49, %v4908_v8  ;;  %v4915_v32 = vrot.slane %v4914_v2, 4  ;;  %v4922_v44 = vrot.slane %v4921_v58, 4  ;;  %v2692_v62 = vcombine.high %v2690_v41, %v2690_v41 }
 0x3b7   : > { %v4928_v12 = vsel %vm3170_vm4, %v2896_v63, -inf  ;;  %v4573_v35 = vmax.f32 %v4571_v51, %v4572_v54  ;;  %v4578_v0 = vsel %vm3170_vm4, %v2691_v10, -inf  ;;  %v4585_v30 = vsel %vm3170_vm4, %v2690_v41, -inf }
 0x3b8   : > { %v4910_v22 = vrot.slane %v4909_v33, 2  ;;  %v4916_v46 = vmax.f32 %v4914_v2, %v4915_v32  ;;  %v4923_v48 = vmax.f32 %v4921_v58, %v4922_v44  ;;  %v4929_v50 = vrot.slane %v4928_v12, 4 }
 0x3b9   : > { %v4574_v23 = vrot.slane %v4573_v35, 2  ;;  %v4579_v11 = vrot.slane %v4578_v0, 4  ;;  %v4586_v6 = vrot.slane %v4585_v30, 4  ;;  %v4592_v39 = vsel %vm3170_vm4, %v2692_v62, -inf }
 0x3ba   : > { %v4911_v49 = vmax.f32 %v4909_v33, %v4910_v22  ;;  %v4917_v8 = vrot.slane %v4916_v46, 2  ;;  %v4924_v7 = vrot.slane %v4923_v48, 2  ;;  %v4930_v26 = vmax.f32 %v4928_v12, %v4929_v50 }
 0x3bb   : > { %v4575_v15 = vmax.f32 %v4573_v35, %v4574_v23  ;;  %v4580_v63 = vmax.f32 %v4578_v0, %v4579_v11  ;;  %v4587_v51 = vmax.f32 %v4585_v30, %v4586_v6  ;;  %v4593_v54 = vrot.slane %v4592_v39, 4 }
 0x3bc   : > { %v4912_v10 = vrot.slane %v4911_v49, 1  ;;  %v4918_v24 = vmax.f32 %v4916_v46, %v4917_v8  ;;  %v4925_v41 = vmax.f32 %v4923_v48, %v4924_v7  ;;  %v4931_v47 = vrot.slane %v4930_v26, 2  ;;  %v14203_v7 = vld [vmem:[#allocation60_spill] sm:$0xff] }
 0x3bd   : > { %v4576_v32 = vrot.slane %v4575_v15, 1  ;;  %v4581_v2 = vrot.slane %v4580_v63, 2  ;;  %v4588_v58 = vrot.slane %v4587_v51, 2  ;;  %v4594_v44 = vmax.f32 %v4592_v39, %v4593_v54 }
 0x3be   : > { %v4913_v59 = vmax.f32 %v4911_v49, %v4912_v10  ;;  %v4919_v31 = vrot.slane %v4918_v24, 1  ;;  %v4926_v4 = vrot.slane %v4925_v41, 1  ;;  %v4932_v62 = vmax.f32 %v4930_v26, %v4931_v47 }
 0x3bf   : > { %v4577_v22 = vmax.f32 %v4575_v15, %v4576_v32  ;;  %v4582_v33 = vmax.f32 %v4580_v63, %v4581_v2  ;;  %v4589_v56 = vmax.f32 %v4587_v51, %v4588_v58  ;;  %v4595_v50 = vrot.slane %v4594_v44, 2 }
 0x3c0   : > { %v4933_v23 = vrot.slane %v4932_v62, 1  ;;  %v2846_v6 = vcombine.high %v12381_v5, %v12381_v5  ;;  %v4289_v46 = vrot.slane %v12392_v13, 1  ;;  %v1438_v35 = vadd.f32 %v12137_v9, %v14203_v7 }
 0x3c1   : > { %v4920_v0 = vmax.f32 %v4918_v24, %v4919_v31  ;;  %v4927_v12 = vmax.f32 %v4925_v41, %v4926_v4  ;;  %v5211_v30 = vpack.c.bf16 %v4913_v59, %v4913_v59  ;;  %v2853_v48 = vrot.slane %v12381_v5, %v9638_v29 }
 0x3c2   : > { %v14204_v26 = vmax.f32 %v12350_v37, 0.0  ;;  %v14205_v47 = vmax.f32 %v12355_v14, 0.0  ;;  %v4583_v39 = vrot.slane %v4582_v33, 1  ;;  %v6295_v49 = vrot.slane %v12365_v61, 1 }
 0x3c3   : > { %v4590_v8 = vrot.slane %v4589_v56, 1  ;;  %v4596_v63 = vmax.f32 %v4594_v44, %v4595_v50  ;;  %v5163_v24 = vpack.c.bf16 %v4577_v22, %v4577_v22  ;;  %v14206_v59 = vmax.f32 %v12361_v16, 0.0 }
 0x3c4   : > { %v1759_v15 = vsel %vm1569_vm3, %v14204_v26, -inf  ;;  %v12418_v11 = vsel %vm1569_vm3, %v14205_v47, -inf  ;;  %v12424_v31 = vmax.f32 %v4932_v62, %v4933_v23  ;;  %v2860_v37 = vrot.slane %v2846_v6, %v9638_v29 }
 0x3c5   : > { %v1715_v4 = vsel %vm1569_vm3, %v14206_v59, -inf  ;;  %v4290_v5 = vmax.f32 %v12392_v13, %v4289_v46  ;;  %v1568_v14 = vmax.f32 %v1438_v35, 0.0  ;;  %v5212_v51 = vpack.c.bf16 %v4920_v0, %v4920_v0 }
 0x3c6   : > { %v5213_v54 = vpack.c.bf16 %v4927_v12, %v4927_v12  ;;  %v12428_v10 = vunpack.c.l.b16 %v5211_v30  ;;  %v2861_v41 = vcombine.high %v2853_v48, %v2853_v48  ;;  %v12430_v32 = vmax.f32 %v4582_v33, %v4583_v39 }
 0x3c7   : > { %v2862_v2 = vcombine.high %v2860_v37, %v2860_v37  ;;  %v4851_v58 = vsel %vm3170_vm4, %v2853_v48, -inf  ;;  %v4865_v16 = vsel %vm3170_vm4, %v2860_v37, -inf  ;;  %v12434_v44 = vmax.f32 %v4589_v56, %v4590_v8 }
 0x3c8   : > { %14207 = vst [vmem:[#allocation11_spill] sm:$0xff] %v12428_v10  ;;  %v4597_v62 = vrot.slane %v4596_v63, 1  ;;  %v12436_v22 = vunpack.c.l.b16 %v5163_v24  ;;  %v4852_v50 = vrot.slane %v4851_v58, 4  ;;  %v4858_v13 = vsel %vm3170_vm4, %v2861_v41, -inf }
 0x3c9   : > { %v4866_v23 = vrot.slane %v4865_v16, 4  ;;  %v4872_v6 = vsel %vm3170_vm4, %v2862_v2, -inf  ;;  %v8890_v46 = vpack.c.bf16 %v4290_v5, %v4290_v5  ;;  %v5214_v33 = vpack.c.bf16 %v12424_v31, %v12424_v31 }
 0x3ca   : > { %v4853_v7 = vmax.f32 %v4851_v58, %v4852_v50  ;;  %v4859_v35 = vrot.slane %v4858_v13, 4  ;;  %v4873_v0 = vrot.slane %v4872_v6, 4  ;;  %v1716_v30 = vmax.f32 %v12297_v20, %v1715_v4 }
 0x3cb   : > { %v4867_v12 = vmax.f32 %v4865_v16, %v4866_v23  ;;  %v12444_v56 = vsel %vm10310_vm14, %v8890_v46, 0  ;;  %v1760_v48 = vsel %vm1569_vm3, %v1568_v14, -inf  ;;  %v12453_v16 = vunpack.c.l.b16 %v5212_v51 }
 0x3cc   : > { %v4854_v26 = vrot.slane %v4853_v7, 2  ;;  %v4860_v47 = vmax.f32 %v4858_v13, %v4859_v35  ;;  %v4874_v39 = vmax.f32 %v4872_v6, %v4873_v0  ;;  %v6296_v8 = vrot.slane %v12444_v56, 1 }
 0x3cd   : > { %v4868_v24 = vrot.slane %v4867_v12, 2  ;;  %v2642_v59 = vcombine.high %v1716_v30, %v1716_v30  ;;  %v2649_v31 = vrot.slane %v1716_v30, %v9638_v29  ;;  %v1761_v37 = vmax.f32 %v1759_v15, %v1760_v48  ;;  %14209 = vst [vmem:[#allocation53_spill] sm:$0xff] %v12453_v16 }
 0x3ce   : > { %v4855_v5 = vmax.f32 %v4853_v7, %v4854_v26  ;;  %v4861_v41 = vrot.slane %v4860_v47, 2  ;;  %v4875_v2 = vrot.slane %v4874_v39, 2  ;;  %v12451_v58 = vsel %vm6265_vm15, %v6295_v49, %v6296_v8 }
 0x3cf   : > { %14208 = vst [vmem:[#allocation51_spill] sm:$0xff] %v12451_v58  ;;  %6444 = vrot.lane.b32.xlu0 %v12451_v58, %s9446_s8  ;;  %6382 = vrot.lane.b32.xlu1 %v12451_v58, %s9445_s7  ;;  %v2656_v20 = vrot.slane %v2642_v59, %v9638_v29  ;;  %v2657_v4 = vcombine.high %v2649_v31, %v2649_v31  ;;  %v4515_v14 = vsel %vm3170_vm4, %v2649_v31, -inf  ;;  %v12461_v6 = vunpack.c.l.b16 %v5213_v54 }
 0x3d0   : > { %v4862_v15 = vmax.f32 %v4860_v47, %v4861_v41  ;;  %v4869_v50 = vmax.f32 %v4867_v12, %v4868_v24  ;;  %v4876_v13 = vmax.f32 %v4874_v39, %v4875_v2  ;;  %v4516_v23 = vrot.slane %v4515_v14, 4 }
 0x3d1   : > { %14210 = vst [vmem:[#allocation46_spill] sm:$0xff] %v12461_v6  ;;  %v2658_v49 = vcombine.high %v2656_v20, %v2656_v20  ;;  %v4522_v51 = vsel %vm3170_vm4, %v2657_v4, -inf  ;;  %v4529_v46 = vsel %vm3170_vm4, %v2656_v20, -inf  ;;  %v4598_v7 = vmax.f32 %v4596_v63, %v4597_v62 }
 0x3d2   : > { %v4856_v35 = vrot.slane %v4855_v5, 1  ;;  %v4863_v0 = vrot.slane %v4862_v15, 1  ;;  %v4517_v30 = vmax.f32 %v4515_v14, %v4516_v23  ;;  %v5164_v48 = vpack.c.bf16 %v12430_v32, %v12430_v32 }
 0x3d3   : > { %v4523_v26 = vrot.slane %v4522_v51, 4  ;;  %v4530_v8 = vrot.slane %v4529_v46, 4  ;;  %v4536_v12 = vsel %vm3170_vm4, %v2658_v49, -inf  ;;  %v5165_v54 = vpack.c.bf16 %v12434_v44, %v12434_v44 }
 0x3d4   : > { %v4870_v47 = vrot.slane %v4869_v50, 1  ;;  %v4877_v39 = vrot.slane %v4876_v13, 1  ;;  %v4518_v24 = vrot.slane %v4517_v30, 2  ;;  %v12470_v59 = vunpack.c.l.b16 %v5214_v33 }
 0x3d5   : > { %v4524_v31 = vmax.f32 %v4522_v51, %v4523_v26  ;;  %v4531_v63 = vmax.f32 %v4529_v46, %v4530_v8  ;;  %v4537_v62 = vrot.slane %v4536_v12, 4  ;;  %v5166_v41 = vpack.c.bf16 %v4598_v7, %v4598_v7  ;;  %v14212_v8 = vld [vmem:[#allocation61_spill] sm:$0xff] }
 0x3d6   : > { %14211 = vst [vmem:[#allocation56_spill] sm:$0xff] %v12470_v59  ;;  %v4857_v2 = vmax.f32 %v4855_v5, %v4856_v35  ;;  %v4864_v20 = vmax.f32 %v4862_v15, %v4863_v0  ;;  %v4519_v4 = vmax.f32 %v4517_v30, %v4518_v24  ;;  %v12472_v32 = vunpack.c.l.b16 %v5164_v48 }
 0x3d7   : > { %v4525_v14 = vrot.slane %v4524_v31, 2  ;;  %v4532_v23 = vrot.slane %v4531_v63, 2  ;;  %v4538_v49 = vmax.f32 %v4536_v12, %v4537_v62  ;;  %v4871_v58 = vmax.f32 %v4869_v50, %v4870_v47 }
 0x3d8   : > { %v4878_v6 = vmax.f32 %v4876_v13, %v4877_v39  ;;  %v4520_v44 = vrot.slane %v4519_v4, 1  ;;  %v2897_v16 = vcombine.high %v1761_v37, %v1761_v37  ;;  %v2904_v51 = vrot.slane %v1761_v37, %v9638_v29 }
 0x3d9   : > { %v4526_v10 = vmax.f32 %v4524_v31, %v4525_v14  ;;  %v4533_v38 = vmax.f32 %v4531_v63, %v4532_v23  ;;  %v4539_v33 = vrot.slane %v4538_v49, 2  ;;  %v5203_v46 = vpack.c.bf16 %v4857_v2, %v4857_v2 }
 0x3da   : > { %v5204_v26 = vpack.c.bf16 %v4864_v20, %v4864_v20  ;;  %v4521_v7 = vmax.f32 %v4519_v4, %v4520_v44  ;;  %v2911_v5 = vrot.slane %v2897_v16, %v9638_v29  ;;  %v2912_v30 = vcombine.high %v2904_v51, %v2904_v51 }
 0x3db   : > { %v4527_v15 = vrot.slane %v4526_v10, 1  ;;  %v4534_v35 = vrot.slane %v4533_v38, 1  ;;  %v4540_v0 = vmax.f32 %v4538_v49, %v4539_v33  ;;  %v4935_v50 = vsel %vm3170_vm4, %v2904_v51, -inf }
 0x3dc   : > { %v2913_v48 = vcombine.high %v2911_v5, %v2911_v5  ;;  %v4949_v13 = vsel %vm3170_vm4, %v2911_v5, -inf  ;;  %v1342_v12 = vadd.f32 %v12137_v9, %v14212_v8  ;;  %v5205_v47 = vpack.c.bf16 %v4871_v58, %v4871_v58 }
 0x3dd   : > { %v4528_v39 = vmax.f32 %v4526_v10, %v4527_v15  ;;  %v4541_v37 = vrot.slane %v4540_v0, 1  ;;  %v4936_v24 = vrot.slane %v4935_v50, 4  ;;  %v5206_v31 = vpack.c.bf16 %v4878_v6, %v4878_v6 }
 0x3de   : > { %v4535_v63 = vmax.f32 %v4533_v38, %v4534_v35  ;;  %v4942_v16 = vsel %vm3170_vm4, %v2912_v30, -inf  ;;  %v4950_v62 = vrot.slane %v4949_v13, 4  ;;  %v5715_v2 = vunpack.c.l.b16 %v5203_v46 }
 0x3df   : > { %v5716_v20 = vunpack.c.l.b16 %v5204_v26  ;;  %v4937_v4 = vmax.f32 %v4935_v50, %v4936_v24  ;;  %v4956_v14 = vsel %vm3170_vm4, %v2913_v48, -inf  ;;  %v4542_v23 = vmax.f32 %v4540_v0, %v4541_v37  ;;  %v14216_v48 = vld [vmem:[#allocation62_spill] sm:$0xff] }
 0x3e0   : > { %v5155_v49 = vpack.c.bf16 %v4521_v7, %v4521_v7  ;;  %v5156_v44 = vpack.c.bf16 %v4528_v39, %v4528_v39  ;;  %v1544_v33 = vmax.f32 %v1342_v12, 0.0  ;;  %v12482_v51 = vunpack.c.l.b16 %v5165_v54 }
 0x3e1   : > { %v12484_v58 = vunpack.c.l.b16 %v5166_v41  ;;  %v12486_v10 = vunpack.c.l.b16 %v5205_v47  ;;  %v4943_v6 = vrot.slane %v4942_v16, 4  ;;  %v5157_v38 = vpack.c.bf16 %v4535_v63, %v4535_v63 }
 0x3e2   : > { %v4951_v5 = vmax.f32 %v4949_v13, %v4950_v62  ;;  %v4957_v15 = vrot.slane %v4956_v14, 4  ;;  %v1724_v46 = vsel %vm1569_vm3, %v1544_v33, -inf  ;;  %v12489_v26 = vunpack.c.l.b16 %v5206_v31 }
 0x3e3   : > { %14213 = vst [vmem:[#allocation34_spill] sm:$0xff] %v12486_v10  ;;  %v12492_v35 = vsel %vm5731_vm5, %v5716_v20, %v5715_v2  ;;  %v4938_v7 = vrot.slane %v4937_v4, 2  ;;  %v1725_v0 = vmax.f32 %v12372_v34, %v1724_v46  ;;  %v5158_v54 = vpack.c.bf16 %v4542_v23, %v4542_v23 }
 0x3e4   : > { %14214 = vst [vmem:[#allocation32_spill] sm:$0xff] %v12489_v26  ;;  %14215 = vst [vmem:[#allocation27_spill] sm:$0xff] %v12492_v35  ;;  %v5667_v30 = vunpack.c.l.b16 %v5155_v49  ;;  %v5668_v41 = vunpack.c.l.b16 %v5156_v44  ;;  %v1430_v50 = vadd.f32 %v12137_v9, %v14216_v48  ;;  %v4944_v8 = vmax.f32 %v4942_v16, %v4943_v6  ;;  %v6431_v49 = vpop.permute.xlu0 %6430 }
 0x3e5   : > { %v2693_v12 = vcombine.high %v1725_v0, %v1725_v0  ;;  %v2700_v13 = vrot.slane %v1725_v0, %v9638_v29  ;;  %v1334_v47 = vadd.f32 %v12137_v9, %v12033_v55  ;;  %v12500_v39 = vunpack.c.l.b16 %v5157_v38  ;;  %v14219_v0 = vld [vmem:[#allocation38_spill] sm:$0xff] }
 0x3e6   : > { %v4952_v37 = vrot.slane %v4951_v5, 2  ;;  %v12502_v24 = vmax.f32 %v4956_v14, %v4957_v15  ;;  %v1566_v31 = vmax.f32 %v1430_v50, 0.0  ;;  %v4939_v34 = vmax.f32 %v4937_v4, %v4938_v7 }
 0x3e7   : > { %v2707_v63 = vrot.slane %v2693_v12, %v9638_v29  ;;  %v2708_v62 = vcombine.high %v2700_v13, %v2700_v13  ;;  %v4599_v2 = vsel %vm3170_vm4, %v2700_v13, -inf  ;;  %v12506_v20 = vunpack.c.l.b16 %v5158_v54 }
 0x3e8   : > { %14217 = vst [vmem:[#allocation54_spill] sm:$0xff] %v12502_v24  ;;  %v4600_v16 = vrot.slane %v4599_v2, 4  ;;  %v1754_v23 = vsel %vm1569_vm3, %v1566_v31, -inf  ;;  %v1542_v44 = vmax.f32 %v1334_v47, 0.0  ;;  %v12510_v55 = vsel %vm5731_vm5, %v5668_v41, %v5667_v30 }
 0x3e9   : > { %v4945_v9 = vrot.slane %v4944_v8, 2  ;;  %v4606_v14 = vsel %vm3170_vm4, %v2708_v62, -inf  ;;  %v4613_v4 = vsel %vm3170_vm4, %v2707_v63, -inf  ;;  %v12514_v33 = vmax.f32 %v4951_v5, %v4952_v37 }
 0x3ea   : > { %v4601_v6 = vmax.f32 %v4599_v2, %v4600_v16  ;;  %v4607_v38 = vrot.slane %v4606_v14, 4  ;;  %v4614_v15 = vrot.slane %v4613_v4, 4  ;;  %v4940_v46 = vrot.slane %v4939_v34, 1 }
 0x3eb   : > { %14218 = vst [vmem:[#allocation45_spill] sm:$0xff] %v12514_v33  ;;  %v1755_v7 = vmax.f32 %v12418_v11, %v1754_v23  ;;  %v12519_v54 = vsel %vm1569_vm3, %v14219_v0, %v6431_v49  ;;  %v1718_v30 = vsel %vm1569_vm3, %v1542_v44, -inf  ;;  %v2709_v41 = vcombine.high %v2707_v63, %v2707_v63 }
 0x3ec   : > { %v4602_v48 = vrot.slane %v4601_v6, 2  ;;  %v4608_v50 = vmax.f32 %v4606_v14, %v4607_v38  ;;  %v4615_v12 = vmax.f32 %v4613_v4, %v4614_v15  ;;  %v4946_v13 = vmax.f32 %v4944_v8, %v4945_v9 }
 0x3ed   : > { %v2863_v47 = vcombine.high %v1755_v7, %v1755_v7  ;;  %v2870_v5 = vrot.slane %v1755_v7, %v9638_v29  ;;  %v1719_v37 = vmax.f32 %v12375_v52, %v1718_v30  ;;  %v12525_v16 = vmax.f32 %v4939_v34, %v4940_v46 }
 0x3ee   : > { %v4603_v62 = vmax.f32 %v4601_v6, %v4602_v48  ;;  %v4609_v11 = vrot.slane %v4608_v50, 2  ;;  %v4616_v2 = vrot.slane %v4615_v12, 2  ;;  %v4620_v8 = vsel %vm3170_vm4, %v2709_v41, -inf }
 0x3ef   : > { %14220 = vst [vmem:[#allocation55_spill] sm:$0xff] %v12525_v16  ;;  %v2877_v23 = vrot.slane %v2863_v47, %v9638_v29  ;;  %v2878_v49 = vcombine.high %v2870_v5, %v2870_v5  ;;  %v4879_v63 = vsel %vm3170_vm4, %v2870_v5, -inf  ;;  %v2659_v6 = vcombine.high %v1719_v37, %v1719_v37 }
 0x3f0   : > { %v4610_v44 = vmax.f32 %v4608_v50, %v4609_v11  ;;  %v4617_v14 = vmax.f32 %v4615_v12, %v4616_v2  ;;  %v4880_v9 = vrot.slane %v4879_v63, 4  ;;  %v4947_v15 = vrot.slane %v4946_v13, 1 }
 0x3f1   : > { %v2879_v4 = vcombine.high %v2877_v23, %v2877_v23  ;;  %v4886_v52 = vsel %vm3170_vm4, %v2878_v49, -inf  ;;  %v4893_v38 = vsel %vm3170_vm4, %v2877_v23, -inf  ;;  %v4604_v7 = vrot.slane %v4603_v62, 1 }
 0x3f2   : > { %v4611_v34 = vrot.slane %v4610_v44, 1  ;;  %v4881_v46 = vmax.f32 %v4879_v63, %v4880_v9  ;;  %v4887_v0 = vrot.slane %v4886_v52, 4  ;;  %v4894_v30 = vrot.slane %v4893_v38, 4 }
 0x3f3   : > { %v4900_v48 = vsel %vm3170_vm4, %v2879_v4, -inf  ;;  %v2666_v50 = vrot.slane %v1719_v37, %v9638_v29  ;;  %v4618_v12 = vrot.slane %v4617_v14, 1  ;;  %v4621_v47 = vrot.slane %v4620_v8, 4 }
 0x3f4   : > { %v6163_v5 = vshrl.u32 %v12365_v61, 16  ;;  %v4882_v11 = vrot.slane %v4881_v46, 2  ;;  %v4888_v2 = vmax.f32 %v4886_v52, %v4887_v0  ;;  %v4901_v23 = vrot.slane %v4900_v48, 4  ;;  %v12548_v0 = vpop.permute.xlu1 %6398 }
 0x3f5   : > { %v2673_v49 = vrot.slane %v2659_v6, %v9638_v29  ;;  %v12538_v31 = vmax.f32 %v4946_v13, %v4947_v15  ;;  %v4605_v63 = vmax.f32 %v4603_v62, %v4604_v7  ;;  %v12540_v9 = vmax.f32 %v4610_v44, %v4611_v34 }
 0x3f6   : > { %v6165_v4 = vshll.u32 %v12365_v61, 16  ;;  %v4889_v37 = vrot.slane %v4888_v2, 2  ;;  %v4895_v24 = vmax.f32 %v4893_v38, %v4894_v30  ;;  %v4902_v59 = vmax.f32 %v4900_v48, %v4901_v23 }
 0x3f7   : > { %14221 = vst [vmem:[#allocation58_spill] sm:$0xff] %v12538_v31  ;;  %v2674_v41 = vcombine.high %v2666_v50, %v2666_v50  ;;  %v12543_v26 = vmax.f32 %v4617_v14, %v4618_v12  ;;  %v12545_v10 = vmax.f32 %v4620_v8, %v4621_v47  ;;  %v2675_v35 = vcombine.high %v2673_v49, %v2673_v49 }
 0x3f8   : > { %v4543_v52 = vsel %vm3170_vm4, %v2666_v50, -inf  ;;  %v4883_v13 = vmax.f32 %v4881_v46, %v4882_v11  ;;  %v4890_v6 = vmax.f32 %v4888_v2, %v4889_v37  ;;  %v4903_v62 = vrot.slane %v4902_v59, 2  ;;  %v9425_v46 = vld [vmem:[%s13759_s3 + $0x80] sm:$0xff]   ;;  %v6493_v37 = vpop.permute.xlu0 %6492 }
 0x3f9   : > { %14222 = vst [vmem:[#allocation60_spill] sm:$0xff] %v12543_v26  ;;  %v4544_v44 = vrot.slane %v4543_v52, 4  ;;  %v5167_v15 = vpack.c.bf16 %v4605_v63, %v4605_v63  ;;  %v4550_v7 = vsel %vm3170_vm4, %v2674_v41, -inf  ;;  %v4557_v38 = vsel %vm3170_vm4, %v2673_v49, -inf  ;;  %9289 = vmatprep.subr.bf16.mxu1 %v9425_v46 }
 0x3fa   : > { %v4564_v34 = vsel %vm3170_vm4, %v2675_v35, -inf  ;;  %v5168_v14 = vpack.c.bf16 %v12540_v9, %v12540_v9  ;;  %v4896_v8 = vrot.slane %v4895_v24, 2  ;;  %v4904_v30 = vmax.f32 %v4902_v59, %v4903_v62  ;;  %9290 = vmatpush3.bf16.msra.mxu1 %v9425_v46 }
 0x3fb   : > { %v4545_v48 = vmax.f32 %v4543_v52, %v4544_v44  ;;  %v4551_v12 = vrot.slane %v4550_v7, 4  ;;  %v4558_v47 = vrot.slane %v4557_v38, 4  ;;  %v4565_v41 = vrot.slane %v4564_v34, 4  ;;  %v12564_v44 = vpop.permute.xlu1 %6368 }
 0x3fc   : > { %v4884_v11 = vrot.slane %v4883_v13, 1  ;;  %v4891_v2 = vrot.slane %v4890_v6, 1  ;;  %v6167_v35 = vrot.slane %v6165_v4, 1  ;;  %v12560_v49 = vunpack.c.l.b16 %v5167_v15  ;;  %v6463_v46 = vpop.permute.xlu0 %6462 }
 0x3fd   : > { %v4546_v23 = vrot.slane %v4545_v48, 2  ;;  %v4552_v63 = vmax.f32 %v4550_v7, %v4551_v12  ;;  %v4559_v59 = vmax.f32 %v4557_v38, %v4558_v47  ;;  %v4566_v9 = vmax.f32 %v4564_v34, %v4565_v41 }
 0x3fe   : > { %v12562_v52 = vmax.f32 %v4895_v24, %v4896_v8  ;;  %v4905_v62 = vrot.slane %v4904_v30, 1  ;;  %v6168_v61 = vor.u32 %v6167_v35, %v6163_v5  ;;  %v6170_v4 = vshll.u32 %v12444_v56, 16  ;;  %v12574_v24 = vld [vmem:[%s13758_s2] ss:$0 sm:$0xff] }
 0x3ff   : > { %v4547_v50 = vmax.f32 %v4545_v48, %v4546_v23  ;;  %v4553_v33 = vrot.slane %v4552_v63, 2  ;;  %v4560_v16 = vrot.slane %v4559_v59, 2  ;;  %v4567_v31 = vrot.slane %v4566_v9, 2 }
 0x400   : > { %14223 = vst [vmem:[#allocation61_spill] sm:$0xff] %v12562_v52  ;;  %v12567_v26 = vmax.f32 %v4883_v13, %v4884_v11  ;;  %v12569_v15 = vmax.f32 %v4890_v6, %v4891_v2  ;;  %v1355_v38 = vadd.f32 %v12574_v24, %v12206_v40  ;;  %v6172_v48 = vrot.slane %v6170_v4, 1  ;;  %v14230_v4 = vld [vmem:[#allocation23_spill] sm:$0xff] }
 0x401   : > { %v4548_v7 = vrot.slane %v4547_v50, 1  ;;  %v4554_v34 = vmax.f32 %v4552_v63, %v4553_v33  ;;  %v4561_v5 = vmax.f32 %v4559_v59, %v4560_v16  ;;  %v4568_v8 = vmax.f32 %v4566_v9, %v4567_v31  ;;  %v6337_v31 = vpop.permute.xlu1 %6336  ;;  %v14228_v16 = vld [vmem:[#allocation17_spill] sm:$0xff] }
 0x402   : > { %14224 = vst [vmem:[#allocation62_spill] sm:$0xff] %v12567_v26  ;;  %14225 = vst [vmem:[#allocation38_spill] sm:$0xff] %v12569_v15  ;;  %v12578_v12 = vmax.f32 %v4904_v30, %v4905_v62  ;;  %v1547_v13 = vmax.f32 %v1355_v38, 0.0  ;;  %v6720_v6 = vsel %vm6587_vm2, %v12386_v3, %v6493_v37  ;;  %v12583_v2 = vsel %vm6045_vm0, %v6168_v61, %v6172_v48  ;;  %v14229_v30 = vld [vmem:[#allocation8_spill] sm:$0xff]  ;;  %v12614_v38 = vpop.permute.xlu0 %6432 }
 0x403   : > { %v4549_v56 = vmax.f32 %v4547_v50, %v4548_v7  ;;  %v4555_v47 = vrot.slane %v4554_v34, 1  ;;  %v4562_v41 = vrot.slane %v4561_v5, 1  ;;  %v4569_v11 = vrot.slane %v4568_v8, 1  ;;  %14227 = vst [vmem:[#allocation74_spill] sm:$0xff] %v12583_v2  ;;  %7003 = vmatprep.mubr.bf16.mxu1 %v6720_v6  ;;  %6506 = vrot.lane.b32.xlu0 %v12583_v2, %s9447_s9 }
 0x404   : > { %14226 = vst [vmem:[#allocation73_spill] sm:$0xff] %v12578_v12  ;;  %v12585_v40 = vunpack.c.l.b16 %v5168_v14  ;;  %6350 = vrot.lane.b32.xlu1 %v12583_v2, %s9446_s8  ;;  %v1347_v3 = vadd.f32 %v12574_v24, %v12210_v57  ;;  %v6558_v50 = vsel %vm6554_vm1, %v14229_v30, %v14228_v16  ;;  %v1358_v57 = vadd.f32 %v12574_v24, %v12218_v42  ;;  %v14235_v30 = vld [vmem:[#allocation59_spill] sm:$0xff]  ;;  %v14265_v12 = vld [vmem:[#allocation41_spill] sm:$0xff] }
 0x405   : > { %v5159_v33 = vpack.c.bf16 %v4549_v56, %v4549_v56  ;;  %v4556_v61 = vmax.f32 %v4554_v34, %v4555_v47  ;;  %v12596_v23 = vmax.f32 %v4561_v5, %v4562_v41  ;;  %v4570_v14 = vmax.f32 %v4568_v8, %v4569_v11 }
 0x406   : > { %v6592_v35 = vsel %vm6587_vm2, %v6558_v50, %v12239_v17  ;;  %v12611_v7 = vsel %vm1569_vm3, %v14230_v4, %v6337_v31  ;;  %v1732_v17 = vsel %vm1569_vm3, %v1547_v13, -inf  ;;  %v1545_v8 = vmax.f32 %v1347_v3, 0.0  ;;  %v14231_v13 = vld [vmem:[#allocation6_spill] sm:$0xff]  ;;  %v14233_v31 = vld [vmem:[#allocation57_spill] sm:$0xff]  ;;  %v14240_v4 = vld [vmem:[#allocation67_spill] sm:$0xff] }
 0x407   : > { %7004 = vmatmul.mubr.bf16.gmra.mrb[20].mxu1 %v6592_v35  ;;  %v5162_v62 = vpack.c.bf16 %v4570_v14, %v4570_v14  ;;  %v5160_v34 = vpack.c.bf16 %v4556_v61, %v4556_v61  ;;  %v12616_v5 = vunpack.c.l.b16 %v5159_v33  ;;  %v12620_v48 = vadd.f32 %v12574_v24, %v12224_v25  ;;  %v14236_v50 = vld [vmem:[#allocation14_spill] sm:$0xff]  ;;  %v14238_v35 = vld [vmem:[#allocation4_spill] sm:$0xff] }
 0x408   : > { %v5869_v6 = vsel %vm5733_vm7, %v12048_v36, %v12053_v19  ;;  %v5875_v47 = vsel %vm5731_vm5, %v14231_v13, %v12113_v27  ;;  %v1548_v41 = vmax.f32 %v1358_v57, 0.0  ;;  %v14232_v11 = vpack.c.bf16 %v12077_v18, %v12077_v18  ;;  %v14237_v61 = vld [vmem:[#allocation66_spill] sm:$0xff]  ;;  %v14239_v57 = vld [vmem:[#allocation65_spill] sm:$0xff]  ;;  %v6495_v13 = vpop.permute.xlu0 %6494 }
 0x409   : > { %v5674_v56 = vunpack.c.l.b16 %v5162_v62  ;;  %v5870_v25 = vsel %vm5735_vm8, %v12050_v53, %v5869_v6  ;;  %v5876_v3 = vsel %vm5733_vm7, %v14233_v31, %v5875_v47  ;;  %v14234_v36 = vpack.c.bf16 %v12026_v43, %v12026_v43 }
 0x40a   : > { %v5641_v33 = vunpack.c.l.b16 %v14232_v11  ;;  %v5871_v27 = vsel %vm5737_vm9, %v12180_v28, %v5870_v25  ;;  %v5877_v18 = vsel %vm5735_vm8, %v14235_v30, %v5876_v3  ;;  %v4399_v62 = vrot.slane %v14239_v57, 2 }
 0x40b   : > { %v12639_v16 = vsel %vm5743_vm6, %v12436_v22, %v5674_v56  ;;  %v5649_v19 = vunpack.c.l.b16 %v14234_v36  ;;  %v5872_v53 = vsel %vm5739_vm10, %v14236_v50, %v5871_v27  ;;  %v5878_v14 = vsel %vm5737_vm9, %v14237_v61, %v5877_v18 }
 0x40c   : > { %v1371_v22 = vadd.f32 %v12574_v24, %v14238_v35  ;;  %v5873_v43 = vsel %vm5741_vm11, %v5641_v33, %v5872_v53  ;;  %v5879_v56 = vsel %vm5739_vm10, %v14240_v4, %v5878_v14  ;;  %v1363_v28 = vadd.f32 %v12574_v24, %v12322_v21 }
 0x40d   : > { %v1374_v6 = vadd.f32 %v12574_v24, %v12344_v60  ;;  %v1726_v47 = vsel %vm1569_vm3, %v1545_v8, -inf  ;;  %v5880_v11 = vsel %vm5741_vm11, %v5649_v19, %v5879_v56  ;;  %v4400_v31 = vmax.f32 %v14239_v57, %v4399_v62  ;;  %v12692_v56 = vpop.permute.xlu0 %6464 }
 0x40e   : > { %v1551_v25 = vmax.f32 %v1371_v22, 0.0  ;;  %v5966_v3 = vpack.c.b16 %v5880_v11, %v5873_v43  ;;  %v6689_v33 = vsel %vm6554_vm1, %v12519_v54, %v6463_v46  ;;  %v1549_v36 = vmax.f32 %v1363_v28, 0.0 }
 0x40f   : > { %v1552_v27 = vmax.f32 %v1374_v6, 0.0  ;;  %v1735_v30 = vsel %vm1569_vm3, %v1548_v41, -inf  ;;  %v4401_v18 = vrot.slane %v4400_v31, 1  ;;  %v6723_v60 = vsel %vm6587_vm2, %v6689_v33, %v6495_v13 }
 0x410   : > { %v1733_v21 = vsel %vm1569_vm3, %v1551_v25, -inf  ;;  %v12672_v8 = vsel %vm10310_vm14, 0, %v5966_v3  ;;  %v1727_v50 = vsel %vm1569_vm3, %v1549_v36, -inf  ;;  %7011 = vmatprep.mubr.bf16.mxu1 %v6723_v60  ;;  %v12683_v14 = vunpack.c.l.b16 %v5160_v34  ;;  %v12703_v25 = vpop.permute.xlu1 %6400 }
 0x411   : > { %14241 = vst [vmem:[#allocation17_spill] sm:$0xff] %v12672_v8  ;;  %v1734_v19 = vmax.f32 %v1732_v17, %v1733_v21  ;;  %v1736_v53 = vsel %vm1569_vm3, %v1552_v27, -inf  ;;  %6476 = vrot.lane.b32.xlu0 %v12672_v8, %s9445_s7  ;;  %6414 = vrot.lane.b32.xlu1 %v12672_v8, %s9447_s9  ;;  %v4402_v46 = vmax.f32 %v4400_v31, %v4401_v18  ;;  %v6298_v62 = vrot.slane %v12672_v8, 1 }
 0x412   : > { %v1728_v41 = vmax.f32 %v1726_v47, %v1727_v50  ;;  %v12681_v61 = vmax.f32 %v1735_v30, %v1736_v53  ;;  %v12688_v22 = vadd.f32 %v12574_v24, %v12369_v45 }
 0x413   : > { %v2744_v17 = vcombine.high %v1734_v19, %v1734_v19  ;;  %v2751_v35 = vrot.slane %v1734_v19, %v9638_v29  ;;  %v8891_v57 = vpack.c.bf16 %v4402_v46, %v4402_v46 }
 0x414   : > { %v2710_v43 = vcombine.high %v1728_v41, %v1728_v41  ;;  %v2717_v4 = vrot.slane %v1728_v41, %v9638_v29 }
 0x415   : > { %v2758_v28 = vrot.slane %v2744_v17, %v9638_v29  ;;  %v2759_v6 = vcombine.high %v2751_v35, %v2751_v35  ;;  %v4683_v34 = vsel %vm3170_vm4, %v2751_v35, -inf  ;;  %v12700_v45 = vsel %vm10310_vm14, %v8891_v57, 0  ;;  %v12718_v57 = vpop.permute.xlu0 %6434 }
 0x416   : > { %v4684_v47 = vrot.slane %v4683_v34, 4  ;;  %v2724_v24 = vrot.slane %v2710_v43, %v9638_v29  ;;  %v2725_v11 = vcombine.high %v2717_v4, %v2717_v4  ;;  %v6299_v36 = vrot.slane %v12700_v45, 1 }
 0x417   : > { %v2760_v31 = vcombine.high %v2758_v28, %v2758_v28  ;;  %v4690_v3 = vsel %vm3170_vm4, %v2759_v6, -inf  ;;  %v4697_v33 = vsel %vm3170_vm4, %v2758_v28, -inf  ;;  %v4627_v50 = vsel %vm3170_vm4, %v2717_v4, -inf }
 0x418   : > { %v4685_v27 = vmax.f32 %v4683_v34, %v4684_v47  ;;  %v4691_v30 = vrot.slane %v4690_v3, 4  ;;  %v4698_v21 = vrot.slane %v4697_v33, 4  ;;  %v2726_v18 = vcombine.high %v2724_v24, %v2724_v24 }
 0x419   : > { %v4704_v60 = vsel %vm3170_vm4, %v2760_v31, -inf  ;;  %v12710_v19 = vsel %vm6265_vm15, %v6298_v62, %v6299_v36  ;;  %v4634_v53 = vsel %vm3170_vm4, %v2725_v11, -inf  ;;  %v4628_v43 = vrot.slane %v4627_v50, 4 }
 0x41a   : > { %14242 = vst [vmem:[#allocation8_spill] sm:$0xff] %v12710_v19  ;;  %v4686_v46 = vrot.slane %v4685_v27, 2  ;;  %v4692_v41 = vmax.f32 %v4690_v3, %v4691_v30  ;;  %v4699_v17 = vmax.f32 %v4697_v33, %v4698_v21  ;;  %v4705_v35 = vrot.slane %v4704_v60, 4  ;;  %6446 = vrot.lane.b32.xlu0 %v12710_v19, %s9446_s8  ;;  %6384 = vrot.lane.b32.xlu1 %v12710_v19, %s9445_s7  ;;  %v12722_v30 = vpop.permute.xlu1 %6370  ;;  %v12724_v19 = vpop.permute.xlu0 %6496 }
 0x41b   : > { %v4635_v28 = vrot.slane %v4634_v53, 4  ;;  %v4641_v62 = vsel %vm3170_vm4, %v2724_v24, -inf  ;;  %v4648_v4 = vsel %vm3170_vm4, %v2726_v18, -inf  ;;  %v4629_v31 = vmax.f32 %v4627_v50, %v4628_v43 }
 0x41c   : > { %v4687_v6 = vmax.f32 %v4685_v27, %v4686_v46  ;;  %v4693_v34 = vrot.slane %v4692_v41, 2  ;;  %v4700_v47 = vrot.slane %v4699_v17, 2  ;;  %v4706_v11 = vmax.f32 %v4704_v60, %v4705_v35 }
 0x41d   : > { %v4636_v3 = vmax.f32 %v4634_v53, %v4635_v28  ;;  %v4642_v33 = vrot.slane %v4641_v62, 4  ;;  %v4649_v36 = vrot.slane %v4648_v4, 4  ;;  %v4630_v37 = vrot.slane %v4629_v31, 2 }
 0x41e   : > { %v4688_v21 = vrot.slane %v4687_v6, 1  ;;  %v4694_v9 = vmax.f32 %v4692_v41, %v4693_v34  ;;  %v4701_v59 = vmax.f32 %v4699_v17, %v4700_v47  ;;  %v4707_v63 = vrot.slane %v4706_v11, 2 }
 0x41f   : > { %v4637_v42 = vrot.slane %v4636_v3, 2  ;;  %v4643_v13 = vmax.f32 %v4641_v62, %v4642_v33  ;;  %v4650_v24 = vmax.f32 %v4648_v4, %v4649_v36  ;;  %v4631_v60 = vmax.f32 %v4629_v31, %v4630_v37  ;;  %v12728_v36 = vpop.permute.xlu0 %6466 }
 0x420   : > { %v4689_v54 = vmax.f32 %v4687_v6, %v4688_v21  ;;  %v4695_v18 = vrot.slane %v4694_v9, 1  ;;  %v4702_v27 = vrot.slane %v4701_v59, 1  ;;  %v4708_v46 = vmax.f32 %v4706_v11, %v4707_v63  ;;  %v6339_v6 = vpop.permute.xlu1 %6338 }
 0x421   : > { %v4638_v50 = vmax.f32 %v4636_v3, %v4637_v42  ;;  %v4644_v53 = vrot.slane %v4643_v13, 2  ;;  %v4651_v35 = vrot.slane %v4650_v24, 2  ;;  %v2768_v41 = vrot.slane %v12681_v61, %v9638_v29 }
 0x422   : > { %v4696_v43 = vmax.f32 %v4694_v9, %v4695_v18  ;;  %v4703_v28 = vmax.f32 %v4701_v59, %v4702_v27  ;;  %v4709_v2 = vrot.slane %v4708_v46, 1  ;;  %v4632_v17 = vrot.slane %v4631_v60, 1 }
 0x423   : > { %v4639_v34 = vrot.slane %v4638_v50, 1  ;;  %v4645_v62 = vmax.f32 %v4643_v13, %v4644_v53  ;;  %v4652_v4 = vmax.f32 %v4650_v24, %v4651_v35  ;;  %v5179_v33 = vpack.c.bf16 %v4689_v54, %v4689_v54  ;;  %v14246_v24 = vld [vmem:[#allocation3_spill] sm:$0xff] }
 0x424   : > { %v4710_v47 = vmax.f32 %v4708_v46, %v4709_v2  ;;  %v5180_v63 = vpack.c.bf16 %v4696_v43, %v4696_v43  ;;  %v5181_v11 = vpack.c.bf16 %v4703_v28, %v4703_v28  ;;  %v4633_v37 = vmax.f32 %v4631_v60, %v4632_v17  ;;  %v14245_v2 = vld [vmem:[#allocation42_spill] sm:$0xff] }
 0x425   : > { %v12730_v42 = vmax.f32 %v4638_v50, %v4639_v34  ;;  %v4646_v9 = vrot.slane %v4645_v62, 1  ;;  %v4653_v59 = vrot.slane %v4652_v4, 1  ;;  %v14243_v31 = vmax.f32 %v12620_v48, 0.0 }
 0x426   : > { %v14244_v13 = vcombine.high %v12681_v61, %v12681_v61  ;;  %v12742_v54 = vsel %vm1569_vm3, %v14245_v2, %v12614_v38  ;;  %v12746_v18 = vsel %vm1569_vm3, %v14246_v24, %v6339_v6  ;;  %v5182_v27 = vpack.c.bf16 %v4710_v47, %v4710_v47  ;;  %v12765_v6 = vpop.permute.xlu0 %6436 }
 0x427   : > { %v1729_v3 = vsel %vm1569_vm3, %v14243_v31, -inf  ;;  %v12748_v46 = vmax.f32 %v4645_v62, %v4646_v9  ;;  %v12750_v48 = vmax.f32 %v4652_v4, %v4653_v59  ;;  %v1550_v60 = vmax.f32 %v12688_v22, 0.0  ;;  %14247 = vst [vmem:[#allocation23_spill] sm:$0xff] %v12765_v6 }
 0x428   : > { %v2775_v21 = vrot.slane %v14244_v13, %v9638_v29  ;;  %v5171_v50 = vpack.c.bf16 %v4633_v37, %v4633_v37  ;;  %v2776_v53 = vcombine.high %v2768_v41, %v2768_v41  ;;  %v4711_v61 = vsel %vm3170_vm4, %v2768_v41, -inf }
 0x429   : > { %v6175_v35 = vshrl.u32 %v12672_v8, 16  ;;  %v12755_v43 = vunpack.c.l.b16 %v5179_v33  ;;  %v12757_v38 = vunpack.c.l.b16 %v5180_v63  ;;  %v12759_v28 = vunpack.c.l.b16 %v5181_v11 }
 0x42a   : > { %v5172_v17 = vpack.c.bf16 %v12730_v42, %v12730_v42  ;;  %v2777_v34 = vcombine.high %v2775_v21, %v2775_v21  ;;  %v4712_v62 = vrot.slane %v4711_v61, 4  ;;  %v4718_v4 = vsel %vm3170_vm4, %v2776_v53, -inf }
 0x42b   : > { %v4725_v22 = vsel %vm3170_vm4, %v2775_v21, -inf  ;;  %v12767_v41 = vunpack.c.l.b16 %v5182_v27  ;;  %v5173_v47 = vpack.c.bf16 %v12748_v46, %v12748_v46  ;;  %v5174_v33 = vpack.c.bf16 %v12750_v48, %v12750_v48  ;;  %v14248_v46 = vld [vmem:[#allocation39_spill] sm:$0xff]  ;;  %v14249_v48 = vld [vmem:[#allocation18_spill] sm:$0xff] }
 0x42c   : > { %v4719_v63 = vrot.slane %v4718_v4, 4  ;;  %v12773_v11 = vunpack.c.l.b16 %v5171_v50  ;;  %v4713_v37 = vmax.f32 %v4711_v61, %v4712_v62  ;;  %v4726_v42 = vrot.slane %v4725_v22, 4 }
 0x42d   : > { %v1730_v9 = vsel %vm1569_vm3, %v1550_v60, -inf  ;;  %v6177_v13 = vshll.u32 %v12672_v8, 16  ;;  %v6182_v21 = vshll.u32 %v12700_v45, 16  ;;  %v12779_v27 = vsel %vm3170_vm4, %v2777_v34, -inf }
 0x42e   : > { %v4720_v59 = vmax.f32 %v4718_v4, %v4719_v63  ;;  %v1731_v31 = vmax.f32 %v1729_v3, %v1730_v9  ;;  %v4714_v2 = vrot.slane %v4713_v37, 2  ;;  %v4727_v24 = vmax.f32 %v4725_v22, %v4726_v42  ;;  %v12787_v9 = vpop.permute.xlu0 %6498 }
 0x42f   : > { %v6560_v50 = vsel %vm6554_vm1, %v14249_v48, %v14248_v46  ;;  %v6179_v60 = vrot.slane %v6177_v13, 1  ;;  %v6184_v63 = vrot.slane %v6182_v21, 1 }
 0x430   : > { %v4721_v53 = vrot.slane %v4720_v59, 2  ;;  %v2727_v61 = vcombine.high %v1731_v31, %v1731_v31  ;;  %v2734_v62 = vrot.slane %v1731_v31, %v9638_v29  ;;  %v4715_v4 = vmax.f32 %v4713_v37, %v4714_v2 }
 0x431   : > { %v4728_v3 = vrot.slane %v4727_v24, 2  ;;  %v6595_v45 = vsel %vm6587_vm2, %v6560_v50, %v12548_v0  ;;  %v6180_v31 = vor.u32 %v6179_v60, %v6175_v35  ;;  %v12799_v35 = vpop.permute.xlu1 %6402  ;;  %v5684_v60 = vunpack.c.l.b16 %v5172_v17 }
 0x432   : > { %v4722_v22 = vmax.f32 %v4720_v59, %v4721_v53  ;;  %v2741_v34 = vrot.slane %v2727_v61, %v9638_v29  ;;  %v2742_v42 = vcombine.high %v2734_v62, %v2734_v62  ;;  %v4655_v8 = vsel %vm3170_vm4, %v2734_v62, -inf  ;;  %7012 = vmatmul.mubr.bf16.gmra.mrb[24].mxu1 %v6595_v45  ;;  %v12793_v53 = vpop.permute.xlu0 %6468 }
 0x433   : > { %v4716_v46 = vrot.slane %v4715_v4, 1  ;;  %v4729_v48 = vmax.f32 %v4727_v24, %v4728_v3  ;;  %v4656_v15 = vrot.slane %v4655_v8, 4  ;;  %14250 = vst [vmem:[#allocation6_spill] sm:$0xff] %v12793_v53  ;;  %v12797_v24 = vsel %vm6045_vm0, %v6180_v31, %v6184_v63  ;;  %v14255_v53 = vld [vmem:[#allocation21_spill] sm:$0xff] }
 0x434   : > { %v4723_v13 = vrot.slane %v4722_v22, 1  ;;  %v2743_v37 = vcombine.high %v2741_v34, %v2741_v34  ;;  %v4662_v21 = vsel %vm3170_vm4, %v2742_v42, -inf  ;;  %v4669_v2 = vsel %vm3170_vm4, %v2741_v34, -inf  ;;  %14251 = vst [vmem:[#allocation57_spill] sm:$0xff] %v12797_v24  ;;  %6508 = vrot.lane.b32.xlu0 %v12797_v24, %s9447_s9  ;;  %6352 = vrot.lane.b32.xlu1 %v12797_v24, %s9446_s8 }
 0x435   : > { %v4717_v0 = vmax.f32 %v4715_v4, %v4716_v46  ;;  %v4730_v50 = vrot.slane %v4729_v48, 1  ;;  %v4657_v26 = vmax.f32 %v4655_v8, %v4656_v15  ;;  %v4663_v59 = vrot.slane %v4662_v21, 4 }
 0x436   : > { %v4724_v61 = vmax.f32 %v4722_v22, %v4723_v13  ;;  %v4670_v29 = vrot.slane %v4669_v2, 4  ;;  %v4676_v62 = vsel %vm3170_vm4, %v2743_v37, -inf  ;;  %v12801_v3 = vunpack.c.l.b16 %v5173_v47  ;;  %v14252_v37 = vld [vmem:[#allocation68_spill] sm:$0xff] }
 0x437   : > { %v4658_v45 = vrot.slane %v4657_v26, 2  ;;  %v4664_v34 = vmax.f32 %v4662_v21, %v4663_v59  ;;  %v12807_v15 = vunpack.c.l.b16 %v5174_v33  ;;  %v4733_v8 = vrot.slane %v12779_v27, 4  ;;  %v14254_v33 = vld [vmem:[#allocation70_spill] sm:$0xff] }
 0x438   : > { %v4671_v4 = vmax.f32 %v4669_v2, %v4670_v29  ;;  %v4677_v63 = vrot.slane %v4676_v62, 4  ;;  %v12810_v22 = vmax.f32 %v4729_v48, %v4730_v50  ;;  %v5183_v42 = vpack.c.bf16 %v4717_v0, %v4717_v0  ;;  %v14256_v29 = vld [vmem:[#allocation44_spill] sm:$0xff]  ;;  %v14257_v2 = vld [vmem:[#allocation15_spill] sm:$0xff]  ;;  %v12821_v0 = vpop.permute.xlu0 %6438 }
 0x439   : > { %v4659_v17 = vmax.f32 %v4657_v26, %v4658_v45  ;;  %v4665_v47 = vrot.slane %v4664_v34, 2  ;;  %v5184_v46 = vpack.c.bf16 %v4724_v61, %v4724_v61  ;;  %v14253_v21 = vpack.c.bf16 %v14252_v37, %v14252_v37  ;;  %14258 = vst [vmem:[#allocation59_spill] sm:$0xff] %v12821_v0  ;;  %v14259_v61 = vld [vmem:[#allocation69_spill] sm:$0xff]  ;;  %v14260_v45 = vld [vmem:[#allocation28_spill] sm:$0xff]  ;;  %v12827_v37 = vpop.permute.xlu1 %6372 }
 0x43a   : > { %v4672_v31 = vrot.slane %v4671_v4, 2  ;;  %v4678_v13 = vmax.f32 %v4676_v62, %v4677_v63  ;;  %v5882_v6 = vsel %vm5733_vm7, %v14255_v53, %v14254_v33  ;;  %v5888_v48 = vsel %vm5731_vm5, %v14257_v2, %v14256_v29  ;;  %v14262_v33 = vld [vmem:[#allocation20_spill] sm:$0xff] }
 0x43b   : > { %v5657_v59 = vunpack.c.l.b16 %v14253_v21  ;;  %v4660_v52 = vrot.slane %v4659_v17, 1  ;;  %v4666_v24 = vmax.f32 %v4664_v34, %v4665_v47  ;;  %v5883_v62 = vsel %vm5735_vm8, %v14259_v61, %v5882_v6  ;;  %v14261_v21 = vld [vmem:[#allocation29_spill] sm:$0xff]  ;;  %v14263_v0 = vld [vmem:[#allocation40_spill] sm:$0xff]  ;;  %v14266_v61 = vld [vmem:[#allocation50_spill] sm:$0xff] }
 0x43c   : > { %v4673_v26 = vmax.f32 %v4671_v4, %v4672_v31  ;;  %v4679_v50 = vrot.slane %v4678_v13, 2  ;;  %v5889_v63 = vsel %vm5733_vm7, %v14260_v45, %v5888_v48  ;;  %v5884_v53 = vsel %vm5737_vm9, %v14261_v21, %v5883_v62  ;;  %v14267_v45 = vld [vmem:[#allocation72_spill] sm:$0xff] }
 0x43d   : > { %v4661_v34 = vmax.f32 %v4659_v17, %v4660_v52  ;;  %v4667_v47 = vrot.slane %v4666_v24, 1  ;;  %v5890_v29 = vsel %vm5735_vm8, %v14262_v33, %v5889_v63  ;;  %v14264_v4 = vpack.c.bf16 %v14263_v0, %v14263_v0 }
 0x43e   : > { %v4680_v2 = vmax.f32 %v4678_v13, %v4679_v50  ;;  %v5885_v6 = vsel %vm5739_vm10, %v14265_v12, %v5884_v53  ;;  %v5891_v48 = vsel %vm5737_vm9, %v14266_v61, %v5890_v29  ;;  %v12842_v52 = vsel %vm5731_vm5, %v5684_v60, %v12773_v11  ;;  %v14268_v60 = vld [vmem:[#allocation71_spill] sm:$0xff]  ;;  %v12856_v29 = vpop.permute.xlu0 %6500  ;;  %v14269_v61 = vld [vmem:[#allocation49_spill] sm:$0xff] }
 0x43f   : > { %v5665_v31 = vunpack.c.l.b16 %v14264_v4  ;;  %v4674_v17 = vrot.slane %v4673_v26, 1  ;;  %v5886_v62 = vsel %vm5741_vm11, %v5657_v59, %v5885_v6  ;;  %v5892_v13 = vsel %vm5739_vm10, %v14267_v45, %v5891_v48 }
 0x440   : > { %v12847_v50 = vmax.f32 %v4666_v24, %v4667_v47  ;;  %v4681_v0 = vrot.slane %v4680_v2, 1  ;;  %v5175_v63 = vpack.c.bf16 %v4661_v34, %v4661_v34  ;;  %v12851_v12 = vmax.f32 %v12779_v27, %v4733_v8  ;;  %v12865_v47 = vpop.permute.xlu1 %6340 }
 0x441   : > { %v5893_v21 = vsel %vm5741_vm11, %v5665_v31, %v5892_v13  ;;  %v5185_v53 = vpack.c.bf16 %v12810_v22, %v12810_v22  ;;  %v4511_v33 = vrot.slane %v14268_v60, 2  ;;  %v12858_v59 = vunpack.c.l.b16 %v5183_v42  ;;  %v14277_v22 = vld [vmem:[#allocation10_spill] sm:$0xff] }
 0x442   : > { %v5968_v11 = vpack.c.b16 %v5893_v21, %v5886_v62  ;;  %v12860_v4 = vunpack.c.l.b16 %v5184_v46  ;;  %v4682_v24 = vmax.f32 %v4680_v2, %v4681_v0  ;;  %v6691_v34 = vsel %vm6554_vm1, %v12742_v54, %v12692_v56 }
 0x443   : > { %v12867_v27 = vmax.f32 %v4673_v26, %v4674_v17  ;;  %v4512_v31 = vmax.f32 %v14268_v60, %v4511_v33  ;;  %v6726_v42 = vsel %vm6587_vm2, %v6691_v34, %v12724_v19  ;;  %v5176_v46 = vpack.c.bf16 %v12847_v50, %v12847_v50  ;;  %v12892_v17 = vpop.permute.xlu0 %6470 }
 0x444   : > { %v12871_v8 = vsel %vm10310_vm14, 0, %v5968_v11  ;;  %v5178_v2 = vpack.c.bf16 %v4682_v24, %v4682_v24  ;;  %v12878_v6 = vunpack.c.l.b16 %v5175_v63  ;;  %v6650_v19 = vsel %vm1569_vm3, %v14269_v61, %v12718_v57  ;;  %7019 = vmatprep.mubr.bf16.mxu1 %v6726_v42  ;;  %v12900_v63 = vpop.permute.xlu1 %6404  ;;  %v14271_v24 = vld [vmem:[#allocation60_spill] sm:$0xff] }
 0x445   : > { %6478 = vrot.lane.b32.xlu0 %v12871_v8, %s9445_s7  ;;  %6416 = vrot.lane.b32.xlu1 %v12871_v8, %s9447_s9  ;;  %v6189_v56 = vshll.u32 %v12871_v8, 16  ;;  %v4513_v54 = vrot.slane %v4512_v31, 1  ;;  %v6301_v26 = vrot.slane %v12871_v8, 1  ;;  %v6562_v48 = vsel %vm6554_vm1, %v12611_v7, %v12564_v44 }
 0x446   : > { %v5690_v62 = vunpack.c.l.b16 %v5178_v2  ;;  %v6187_v45 = vshrl.u32 %v12871_v8, 16  ;;  %v6598_v13 = vsel %vm6587_vm2, %v6562_v48, %v12703_v25  ;;  %v5895_v0 = vsel %vm5733_vm7, %v12500_v39, %v12510_v55  ;;  %v9426_v25 = vld [vmem:[%s13759_s3 + $0x88] sm:$0xff]  }
 0x447   : > { %v4514_v57 = vmax.f32 %v4512_v31, %v4513_v54  ;;  %7020 = vmatmul.mubr.bf16.gmra.mrb[28].mxu1 %v6598_v13  ;;  %v14270_v21 = vpack.c.bf16 %v12596_v23, %v12596_v23  ;;  %v5896_v7 = vsel %vm5735_vm8, %v12506_v20, %v5895_v0  ;;  %v5901_v11 = vsel %vm5731_vm5, %v12472_v32, %v12639_v16 }
 0x448   : > { %v5913_v39 = vsel %vm5743_vm6, %v12755_v43, %v5690_v62  ;;  %v6191_v55 = vrot.slane %v6189_v56, 1  ;;  %v5897_v60 = vsel %vm5737_vm9, %v12616_v5, %v5896_v7  ;;  %v5902_v23 = vsel %vm5733_vm7, %v12482_v51, %v5901_v11  ;;  %9291 = vmatprep.subr.bf16.mxu1 %v9426_v25  ;;  %v12939_v56 = vpop.permute.xlu0 %6440 }
 0x449   : > { %v5673_v44 = vunpack.c.l.b16 %v14270_v21  ;;  %v8892_v33 = vpack.c.bf16 %v4514_v57, %v4514_v57  ;;  %v5898_v20 = vsel %vm5739_vm10, %v12683_v14, %v5897_v60  ;;  %v5903_v32 = vsel %vm5735_vm8, %v12484_v58, %v5902_v23  ;;  %9292 = vmatpush3.bf16.msra.mxu1 %v9426_v25 }
 0x44a   : > { %v4623_v16 = vrot.slane %v12545_v10, 2  ;;  %v14272_v43 = vpack.c.bf16 %v14271_v24, %v14271_v24  ;;  %v5904_v5 = vsel %vm5737_vm9, %v12560_v49, %v5903_v32  ;;  %v6693_v51 = vsel %vm6554_vm1, %v6650_v19, %v12728_v36  ;;  %v12942_v36 = vpop.permute.xlu1 %6374  ;;  %v14274_v32 = vld [vmem:[#allocation73_spill] sm:$0xff] }
 0x44b   : > { %v5899_v31 = vsel %vm5741_vm11, %v5673_v44, %v5898_v20  ;;  %v6040_v14 = vsel %vm10310_vm14, %v8892_v33, 0  ;;  %v5905_v58 = vsel %vm5739_vm10, %v12585_v40, %v5904_v5  ;;  %v6729_v2 = vsel %vm6587_vm2, %v6693_v51, %v12787_v9 }
 0x44c   : > { %v5681_v34 = vunpack.c.l.b16 %v14272_v43  ;;  %v4624_v42 = vmax.f32 %v12545_v10, %v4623_v16  ;;  %v6302_v54 = vrot.slane %v6040_v14, 1  ;;  %v6192_v61 = vor.u32 %v6191_v55, %v6187_v45  ;;  %7027 = vmatprep.mubr.bf16.mxu1 %v6729_v2  ;;  %v12983_v50 = vpop.permute.xlu0 %6502  ;;  %v14276_v43 = vld [vmem:[#allocation23_spill] sm:$0xff] }
 0x44d   : > { %v6194_v49 = vshll.u32 %v6040_v14, 16  ;;  %v5177_v19 = vpack.c.bf16 %v12867_v27, %v12867_v27  ;;  %v6564_v10 = vsel %vm6554_vm1, %v12746_v18, %v12722_v30  ;;  %v5908_v0 = vsel %vm5733_vm7, %v12801_v3, %v12842_v52 }
 0x44e   : > { %v5906_v48 = vsel %vm5741_vm11, %v5681_v34, %v5905_v58  ;;  %v4625_v40 = vrot.slane %v4624_v42, 1  ;;  %v12950_v9 = vsel %vm6265_vm15, %v6301_v26, %v6302_v54  ;;  %v6601_v45 = vsel %vm6587_vm2, %v6564_v10, %v12799_v35  ;;  %v14273_v26 = vld [vmem:[#allocation30_spill] sm:$0xff]  ;;  %v6343_v11 = vpop.permute.xlu1 %6342 }
 0x44f   : > { %v5970_v62 = vpack.c.b16 %v5906_v48, %v5899_v31  ;;  %v6196_v13 = vrot.slane %v6194_v49, 1  ;;  %6448 = vrot.lane.b32.xlu0 %v12950_v9, %s9446_s8  ;;  %6386 = vrot.lane.b32.xlu1 %v12950_v9, %s9445_s7  ;;  %v5909_v27 = vsel %vm5735_vm8, %v12807_v15, %v5908_v0  ;;  %v5914_v35 = vsel %vm5731_vm5, %v12757_v38, %v5913_v39  ;;  %v14278_v58 = vld [vmem:[#allocation6_spill] sm:$0xff] }
 0x450   : > { %v4626_v18 = vmax.f32 %v4624_v42, %v4625_v40  ;;  %v5688_v3 = vunpack.c.l.b16 %v5176_v46  ;;  %v6533_v57 = vsel %vm1569_vm3, %v14273_v26, %v12865_v47  ;;  %7028 = vmatmul.mubr.bf16.gmra.mrb[32].mxu1 %v6601_v45  ;;  %v5689_v7 = vunpack.c.l.b16 %v5177_v19  ;;  %v13013_v31 = vpop.permute.xlu0 %6472 }
 0x451   : > { %v12963_v30 = vsel %vm10310_vm14, 0, %v5970_v62  ;;  %v12973_v52 = vsel %vm6045_vm0, %v6192_v61, %v6196_v13  ;;  %v5910_v15 = vsel %vm5737_vm9, %v12878_v6, %v5909_v27  ;;  %v5915_v38 = vsel %vm5733_vm7, %v12759_v28, %v5914_v35  ;;  %v14279_v61 = vld [vmem:[#allocation61_spill] sm:$0xff] }
 0x452   : > { %v6201_v21 = vshll.u32 %v12963_v30, 16  ;;  %v8893_v44 = vpack.c.bf16 %v4626_v18, %v4626_v18  ;;  %v5911_v25 = vsel %vm5739_vm10, %v5688_v3, %v5910_v15  ;;  %v5916_v47 = vsel %vm5735_vm8, %v12767_v41, %v5915_v38  ;;  %v13017_v42 = vpop.permute.xlu1 %6406  ;;  %v14284_v18 = vld [vmem:[#allocation62_spill] sm:$0xff] }
 0x453   : > { %v4735_v39 = vrot.slane %v12851_v12, 2  ;;  %6510 = vrot.lane.b32.xlu0 %v12973_v52, %s9447_s9  ;;  %6354 = vrot.lane.b32.xlu1 %v12973_v52, %s9446_s8  ;;  %v5697_v6 = vunpack.c.l.b16 %v5185_v53  ;;  %v5912_v55 = vsel %vm5741_vm11, %v5689_v7, %v5911_v25  ;;  %v5917_v41 = vsel %vm5737_vm9, %v12858_v59, %v5916_v47  ;;  %v14288_v7 = vld [vmem:[#allocation38_spill] sm:$0xff]  ;;  %v14290_v47 = vld [vmem:[#allocation27_spill] sm:$0xff] }
 0x454   : > { %v6203_v46 = vrot.slane %v6201_v21, 1  ;;  %v6041_v28 = vsel %vm10310_vm14, %v8893_v44, 0  ;;  %v6304_v60 = vrot.slane %v12963_v30, 1  ;;  %v6199_v23 = vshrl.u32 %v12963_v30, 16 }
 0x455   : > { %v6206_v33 = vshll.u32 %v6041_v28, 16  ;;  %v5918_v20 = vsel %vm5739_vm10, %v12860_v4, %v5917_v41  ;;  %v14275_v16 = vpack.c.bf16 %v14274_v32, %v14274_v32  ;;  %v6653_v53 = vsel %vm1569_vm3, %v14277_v22, %v14276_v43  ;;  %v13066_v41 = vpop.permute.xlu0 %6442  ;;  %v14295_v22 = vld [vmem:[#allocation12_spill] sm:$0xff] }
 0x456   : > { %v5919_v34 = vsel %vm5741_vm11, %v5697_v6, %v5918_v20  ;;  %v4736_v59 = vmax.f32 %v12851_v12, %v4735_v39  ;;  %v6305_v5 = vrot.slane %v6041_v28, 1  ;;  %v6204_v51 = vor.u32 %v6203_v46, %v6199_v23  ;;  %v14291_v39 = vld [vmem:[#allocation34_spill] sm:$0xff]  ;;  %v14292_v6 = vld [vmem:[#allocation11_spill] sm:$0xff]  ;;  %v14293_v20 = vld [vmem:[#allocation32_spill] sm:$0xff] }
 0x457   : > { %v5722_v24 = vunpack.c.l.b16 %v14275_v16  ;;  %v5972_v14 = vpack.c.b16 %v5919_v34, %v5912_v55  ;;  %v6695_v4 = vsel %vm6554_vm1, %v6653_v53, %v14278_v58  ;;  %6480 = vrot.lane.b32.xlu0 %v12963_v30, %s9445_s7  ;;  %6418 = vrot.lane.b32.xlu1 %v12963_v30, %s9447_s9  ;;  %v6566_v54 = vsel %vm6554_vm1, %v6533_v57, %v12827_v37  ;;  %v14282_v37 = vld [vmem:[#allocation55_spill] sm:$0xff]  ;;  %v14286_v57 = vld [vmem:[#allocation45_spill] sm:$0xff]  ;;  %v14298_v58 = vld [vmem:[#allocation52_spill] sm:$0xff] }
 0x458   : > { %v4737_v2 = vrot.slane %v4736_v59, 1  ;;  %v6732_v12 = vsel %vm6587_vm2, %v6695_v4, %v12856_v29  ;;  %v14280_v49 = vrot.slane %v14279_v61, 1  ;;  %v13031_v19 = vsel %vm6265_vm15, %v6304_v60, %v6305_v5  ;;  %v14281_v29 = vld [vmem:[#allocation58_spill] sm:$0xff]  ;;  %v13068_v60 = vpop.permute.xlu1 %6376  ;;  %v14294_v16 = vld [vmem:[#allocation53_spill] sm:$0xff] }
 0x459   : > { %v6208_v62 = vrot.slane %v6206_v33, 1  ;;  %v13035_v40 = vsel %vm10310_vm14, 0, %v5972_v14  ;;  %7035 = vmatprep.mubr.bf16.mxu1 %v6732_v12  ;;  %v6604_v10 = vsel %vm6587_vm2, %v6566_v54, %v12900_v63  ;;  %v5216_v13 = vpack.c.bf16 %v14281_v29, %v14281_v29  ;;  %v14296_v5 = vld [vmem:[#allocation46_spill] sm:$0xff]  ;;  %v14297_v14 = vld [vmem:[#allocation59_spill] sm:$0xff] }
 0x45a   : > { %v4899_v48 = vmax.f32 %v14279_v61, %v14280_v49  ;;  %v14283_v45 = vpack.c.bf16 %v14282_v37, %v14282_v37  ;;  %v14285_v27 = vpack.c.bf16 %v14284_v18, %v14284_v18  ;;  %v4738_v3 = vmax.f32 %v4736_v59, %v4737_v2  ;;  %7036 = vmatmul.mubr.bf16.gmra.mrb[36].mxu1 %v6604_v10  ;;  %v14299_v61 = vld [vmem:[#allocation56_spill] sm:$0xff] }
 0x45b   : > { %v13048_v26 = vsel %vm6045_vm0, %v6204_v51, %v6208_v62  ;;  %v14287_v21 = vrot.slane %v14286_v57, 1  ;;  %v14289_v15 = vpack.c.bf16 %v14288_v7, %v14288_v7  ;;  %6450 = vrot.lane.b32.xlu0 %v13031_v19, %s9446_s8  ;;  %6388 = vrot.lane.b32.xlu1 %v13031_v19, %s9445_s7  ;;  %v6213_v25 = vshll.u32 %v13035_v40, 16 }
 0x45c   : > { %v5727_v0 = vunpack.c.l.b16 %v14283_v45  ;;  %v5719_v35 = vunpack.c.l.b16 %v14285_v27  ;;  %v5209_v44 = vpack.c.bf16 %v4899_v48, %v4899_v48  ;;  %v8894_v46 = vpack.c.bf16 %v4738_v3, %v4738_v3  ;;  %v14300_v48 = vld [vmem:[#allocation54_spill] sm:$0xff]  ;;  %v6505_v3 = vpop.permute.xlu0 %6504 }
 0x45d   : > { %v4955_v63 = vmax.f32 %v14286_v57, %v14287_v21  ;;  %v5720_v38 = vunpack.c.l.b16 %v14289_v15  ;;  %v5934_v28 = vsel %vm5733_vm7, %v14291_v39, %v14290_v47  ;;  %v5939_v55 = vsel %vm5743_vm6, %v14292_v6, %v5722_v24  ;;  %v6345_v21 = vpop.permute.xlu1 %6344 }
 0x45e   : > { %v5721_v33 = vunpack.c.l.b16 %v5209_v44  ;;  %v5935_v32 = vsel %vm5735_vm8, %v14293_v20, %v5934_v28  ;;  %v5940_v43 = vsel %vm5731_vm5, %v14294_v16, %v5939_v55  ;;  %v6535_v53 = vsel %vm1569_vm3, %v14295_v22, %v6343_v11  ;;  %v14301_v44 = vld [vmem:[#allocation63_spill] sm:$0xff]  ;;  %v14304_v22 = vld [vmem:[#allocation16_spill] sm:$0xff] }
 0x45f   : > { %v5217_v23 = vpack.c.bf16 %v4955_v63, %v4955_v63  ;;  %v5728_v34 = vunpack.c.l.b16 %v5216_v13  ;;  %v5936_v59 = vsel %vm5737_vm9, %v5719_v35, %v5935_v32  ;;  %v5941_v24 = vsel %vm5733_vm7, %v14296_v5, %v5940_v43  ;;  %6512 = vrot.lane.b32.xlu0 %v13048_v26, %s9447_s9  ;;  %6356 = vrot.lane.b32.xlu1 %v13048_v26, %s9446_s8  ;;  %v14303_v16 = vld [vmem:[#allocation7_spill] sm:$0xff] }
 0x460   : > { %v6042_v51 = vsel %vm10310_vm14, %v8894_v46, 0  ;;  %v6656_v4 = vsel %vm1569_vm3, %v14298_v58, %v14297_v14  ;;  %v5937_v12 = vsel %vm5739_vm10, %v5720_v38, %v5936_v59  ;;  %v6307_v11 = vrot.slane %v13035_v40, 1  ;;  %v6475_v58 = vpop.permute.xlu0 %6474 }
 0x461   : > { %v5729_v2 = vunpack.c.l.b16 %v5217_v23  ;;  %v5938_v54 = vsel %vm5741_vm11, %v5721_v33, %v5937_v12  ;;  %v5942_v49 = vsel %vm5735_vm8, %v14299_v61, %v5941_v24  ;;  %v4959_v62 = vrot.slane %v14300_v48, 2  ;;  %v6409_v28 = vpop.permute.xlu1 %6408  ;;  %v9043_v61 = vpop.f32.mrb[16].mxu1 }
 0x462   : > { %v6211_v10 = vshrl.u32 %v13035_v40, 16  ;;  %v6215_v29 = vrot.slane %v6213_v25, 1  ;;  %v5943_v13 = vsel %vm5737_vm9, %v5727_v0, %v5942_v49  ;;  %v6697_v37 = vsel %vm6554_vm1, %v6656_v4, %v12892_v17  ;;  %v14305_v49 = vld [vmem:[#allocation19_spill] sm:$0xff] }
 0x463   : > { %v6308_v45 = vrot.slane %v6042_v51, 1  ;;  %v5944_v18 = vsel %vm5739_vm10, %v5728_v34, %v5943_v13  ;;  %v4960_v27 = vmax.f32 %v14300_v48, %v4959_v62  ;;  %v6735_v35 = vsel %vm6587_vm2, %v6697_v37, %v12983_v50  ;;  %6482 = vrot.lane.b32.xlu0 %v13035_v40, %s9445_s7  ;;  %6420 = vrot.lane.b32.xlu1 %v13035_v40, %s9447_s9  ;;  %v9044_v48 = vpop.f32.mrb[17].mxu1 }
 0x464   : > { %v6218_v57 = vshll.u32 %v6042_v51, 16  ;;  %v5945_v63 = vsel %vm5741_vm11, %v5729_v2, %v5944_v18  ;;  %v6659_v0 = vsel %vm1569_vm3, %v14301_v44, %v12939_v56  ;;  %7043 = vmatprep.mubr.bf16.mxu1 %v6735_v35  ;;  %v6568_v17 = vsel %vm6554_vm1, %v6535_v53, %v12942_v36  ;;  %v14307_v18 = vld [vmem:[#allocation22_spill] sm:$0xff] }
 0x465   : > { %v5976_v50 = vpack.c.b16 %v5945_v63, %v5938_v54  ;;  %v4961_v7 = vrot.slane %v4960_v27, 1  ;;  %v6607_v15 = vsel %vm6587_vm2, %v6568_v17, %v13017_v42  ;;  %v6699_v38 = vsel %vm6554_vm1, %v6659_v0, %v13013_v31  ;;  %v14302_v31 = vld [vmem:[#allocation5_spill] sm:$0xff]  ;;  %v6379_v2 = vpop.permute.xlu1 %6378  ;;  %v14309_v0 = vld [vmem:[#allocation36_spill] sm:$0xff] }
 0x466   : > { %v13117_v56 = vsel %vm6265_vm15, %v6307_v11, %v6308_v45  ;;  %v6216_v46 = vor.u32 %v6215_v29, %v6211_v10  ;;  %7044 = vmatmul.mubr.bf16.gmra.mrb[40].mxu1 %v6607_v15  ;;  %v6738_v36 = vsel %vm6587_vm2, %v6699_v38, %v6505_v3  ;;  %v6220_v39 = vrot.slane %v6218_v57, 1  ;;  %v6445_v11 = vpop.permute.xlu0 %6444  ;;  %v9046_v10 = vpop.f32.mrb[18].mxu1  ;;  %v14306_v29 = vld [vmem:[#allocation25_spill] sm:$0xff] }
 0x467   : > { %v6028_v25 = vsel %vm10310_vm14, 0, %v5976_v50  ;;  %v4962_v47 = vmax.f32 %v4960_v27, %v4961_v7  ;;  %7051 = vmatprep.mubr.bf16.mxu1 %v6738_v36  ;;  %6452 = vrot.lane.b32.xlu0 %v13117_v56, %s9446_s8  ;;  %v6537_v42 = vsel %vm1569_vm3, %v14302_v31, %v6345_v21  ;;  %v6310_v43 = vrot.slane %v14303_v16, 1  ;;  %v9047_v37 = vpop.f32.mrb[19].mxu1  ;;  %v14310_v36 = vld [vmem:[#allocation35_spill] sm:$0xff] }
 0x468   : > { %v6314_v6 = vshrl.u32 %v6028_v25, 16  ;;  %v6316_v55 = vshll.u32 %v6028_v25, 16  ;;  %6390 = vrot.lane.b32.xlu1 %v13117_v56, %s9445_s7  ;;  %v13129_v33 = vsel %vm6045_vm0, %v6216_v46, %v6220_v39  ;;  %v6327_v32 = vrot.slane %v6028_v25, 1 }
 0x469   : > { %v8896_v23 = vpack.c.bf16 %v4962_v47, %v4962_v47  ;;  %v6311_v53 = vrot.slane %v14304_v22, 1  ;;  %v6570_v51 = vsel %vm6554_vm1, %v6537_v42, %v13068_v60  ;;  %v6347_v54 = vpop.permute.xlu1 %6346  ;;  %v13158_v62 = vadd.f32 %v9044_v48, %v9043_v61 }
 0x46a   : > { %v6318_v20 = vrot.slane %v6316_v55, 1  ;;  %v6610_v14 = vsel %vm6587_vm2, %v6570_v51, %v6409_v28  ;;  %v6539_v13 = vsel %vm1569_vm3, %v14306_v29, %v6347_v54  ;;  %v6662_v27 = vsel %vm1569_vm3, %v14307_v18, %v13066_v41  ;;  %v14311_v28 = vld [vmem:[#allocation74_spill] sm:$0xff]  ;;  %v14313_v51 = vld [vmem:[#allocation57_spill] sm:$0xff] }
 0x46b   : > { %v6044_v34 = vsel %vm10310_vm14, %v8896_v23, 0  ;;  %6514 = vrot.lane.b32.xlu0 %v13129_v33, %s9447_s9  ;;  %v13146_v12 = vsel %vm6265_vm15, %v6310_v43, %v6311_v53  ;;  %v13165_v35 = vadd.f32 %v9047_v37, %v9046_v10  ;;  %v6701_v3 = vsel %vm6554_vm1, %v6662_v27, %v6475_v58  ;;  %v14314_v37 = vld [vmem:[#allocation17_spill] sm:$0xff] }
 0x46c   : > { %v6319_v59 = vor.u32 %v6318_v20, %v6314_v6  ;;  %v6321_v5 = vshll.u32 %v6044_v34, 16  ;;  %v6328_v24 = vrot.slane %v6044_v34, 1  ;;  %6422 = vrot.lane.b32.xlu1 %v14303_v16, %s9447_s9  ;;  %v6572_v63 = vsel %vm6554_vm1, %v6539_v13, %v6379_v2 }
 0x46d   : > { %v6411_v45 = vpop.permute.xlu1 %6410  ;;  %v14308_v41 = vmov 0   ;;  %v6665_v6 = vsel %vm1569_vm3, %v14311_v28, %v6445_v11  ;;  %vm8558_vm4 = vcmask 519168  }
 0x46e   : > { %v6323_v4 = vrot.slane %v6321_v5, 1  ;;  %v13143_v1 = vsel %vm6265_vm15, %v6327_v32, %v6328_v24  ;;  %7052 = vmatmul.mubr.bf16.gmra.mrb[44].mxu1 %v6610_v14  ;;  %v6613_v44 = vsel %vm6587_vm2, %v6572_v63, %v6411_v45  ;;  %v14312_v5 = vld [vmem:[#allocation43_spill] sm:$0xff] }
 0x46f   : > { %6454 = vrot.lane.b32.xlu0 %v13146_v12, %s9446_s8 }
 0x470   : > { %v13149_v60 = vsel %vm6045_vm0, %v6319_v59, %v6323_v4  ;;  %6358 = vrot.lane.b32.xlu1 %v13129_v33, %s9446_s8 }
 0x471   : > { %v6381_v17 = vpop.permute.xlu1 %6380 }
 0x473   : > { %6486 = vrot.lane.b32.xlu0 %v6028_v25, %s9445_s7 }
 0x474   : > { %6360 = vrot.lane.b32.xlu1 %v14305_v49, %s9446_s8 }
 0x475   : > { %v6507_v57 = vpop.permute.xlu0 %6506  ;;  %v6349_v50 = vpop.permute.xlu1 %6348 }
 0x476   : > { %v6741_v21 = vsel %vm6587_vm2, %v6701_v3, %v6507_v57  ;;  %v6541_v47 = vsel %vm1569_vm3, %v14310_v36, %v6349_v50 }
 0x477   : > { %6518 = vrot.lane.b32.xlu0 %v13149_v60, %s9447_s9  ;;  %7059 = vmatprep.mubr.bf16.mxu1 %v6741_v21  ;;  %v6574_v42 = vsel %vm6554_vm1, %v6541_v47, %v6381_v17 }
 0x478   : > { %6392 = vrot.lane.b32.xlu1 %v13146_v12, %s9445_s7  ;;  %7060 = vmatmul.mubr.bf16.gmra.mrb[48].mxu1 %v6613_v44 }
 0x479   : > { %v6413_v7 = vpop.permute.xlu1 %6412 }
 0x47a   : > { %v6616_v20 = vsel %vm6587_vm2, %v6574_v42, %v6413_v7 }
 0x47b   : > { %6456 = vrot.lane.b32.xlu0 %v13143_v1, %s9446_s8 }
 0x47c   : > { %6424 = vrot.lane.b32.xlu1 %v6028_v25, %s9447_s9 }
 0x47d   : > { %v6383_v38 = vpop.permute.xlu1 %6382 }
 0x47f   : > { %6488 = vrot.lane.b32.xlu0 %v14308_v41, %s9445_s7 }
 0x481   : > { %v6351_v39 = vpop.permute.xlu1 %6350 }
 0x482   : > { %v6543_v24 = vsel %vm1569_vm3, %v14312_v5, %v6351_v39 }
 0x483   : > { %6520 = vrot.lane.b32.xlu0 %v14309_v0, %s9447_s9  ;;  %v6477_v15 = vpop.permute.xlu0 %6476  ;;  %v6576_v54 = vsel %vm6554_vm1, %v6543_v24, %v6383_v38  ;;  %s8880_s9 = sshll.u32 %s14345_s19, 5 }
 0x484   : > { %v6703_v25 = vsel %vm6554_vm1, %v6665_v6, %v6477_v15  ;;  %s13475_s17 = scalar_lea.vmem %s13761_s5, %s8880_s9 }
 0x485   : > { %v6415_v23 = vpop.permute.xlu1 %6414 }
 0x486   : > { %v6619_v61 = vsel %vm6587_vm2, %v6576_v54, %v6415_v23 }
 0x48c   : > { %v6447_v46 = vpop.permute.xlu0 %6446  ;;  %v6385_v32 = vpop.permute.xlu1 %6384 }
 0x48d   : > { %v6668_v14 = vsel %vm1569_vm3, %v14313_v51, %v6447_v46 }
 0x4a6   : > { %v6509_v55 = vpop.permute.xlu0 %6508  ;;  %v6353_v43 = vpop.permute.xlu1 %6352 }
 0x4a7   : > { %v6744_v31 = vsel %vm6587_vm2, %v6703_v25, %v6509_v55  ;;  %v6545_v45 = vsel %vm1569_vm3, %v14314_v37, %v6353_v43  ;;  %v14315_v55 = vld [vmem:[#allocation48_spill] sm:$0xff] }
 0x4a8   : > { %7067 = vmatprep.mubr.bf16.mxu1 %v6744_v31  ;;  %v6578_v63 = vsel %vm6554_vm1, %v6545_v45, %v6385_v32 }
 0x4a9   : > { %7068 = vmatmul.mubr.bf16.gmra.mrb[52].mxu1 %v6616_v20 }
 0x4b7   : > { %v6479_v22 = vpop.permute.xlu0 %6478  ;;  %v6417_v53 = vpop.permute.xlu1 %6416 }
 0x4b8   : > { %v6705_v58 = vsel %vm6554_vm1, %v6668_v14, %v6479_v22  ;;  %v6622_v44 = vsel %vm6587_vm2, %v6578_v63, %v6417_v53 }
 0x4c1   : > { %v6449_v34 = vpop.permute.xlu0 %6448  ;;  %v6387_v59 = vpop.permute.xlu1 %6386 }
 0x4c2   : > { %v6671_v18 = vsel %vm1569_vm3, %v12973_v52, %v6449_v34 }
 0x4c5   : > { %v6511_v4 = vpop.permute.xlu0 %6510  ;;  %v6355_v2 = vpop.permute.xlu1 %6354 }
 0x4c6   : > { %v6747_v11 = vsel %vm6587_vm2, %v6705_v58, %v6511_v4  ;;  %v6547_v38 = vsel %vm1569_vm3, %v12871_v8, %v6355_v2 }
 0x4c7   : > { %7075 = vmatprep.mubr.bf16.mxu1 %v6747_v11  ;;  %v6580_v42 = vsel %vm6554_vm1, %v6547_v38, %v6387_v59  ;;  %v14325_v38 = vld [vmem:[#allocation51_spill] sm:$0xff] }
 0x4c8   : > { %7076 = vmatmul.mubr.bf16.gmra.mrb[56].mxu1 %v6619_v61 }
 0x4c9   : > { %v6481_v48 = vpop.permute.xlu0 %6480  ;;  %v6419_v10 = vpop.permute.xlu1 %6418 }
 0x4ca   : > { %v6707_v27 = vsel %vm6554_vm1, %v6671_v18, %v6481_v48  ;;  %v6625_v8 = vsel %vm6587_vm2, %v6580_v42, %v6419_v10 }
 0x4cd   : > { %v6451_v29 = vpop.permute.xlu0 %6450  ;;  %v6389_v13 = vpop.permute.xlu1 %6388 }
 0x4ce   : > { %v6674_v36 = vsel %vm1569_vm3, %v13048_v26, %v6451_v29  ;;  %v14316_v26 = vld [vmem:[#allocation64_spill] sm:$0xff] }
 0x4d1   : > { %v6513_v3 = vpop.permute.xlu0 %6512  ;;  %v6357_v57 = vpop.permute.xlu1 %6356 }
 0x4d2   : > { %v6750_v21 = vsel %vm6587_vm2, %v6707_v27, %v6513_v3  ;;  %v6549_v53 = vsel %vm1569_vm3, %v12963_v30, %v6357_v57  ;;  %v14317_v27 = vld [vmem:[#allocation24_spill] sm:$0xff]  ;;  %v14318_v3 = vld [vmem:[#allocation33_spill] sm:$0xff] }
 0x4d3   : > { %7083 = vmatprep.mubr.bf16.mxu1 %v6750_v21  ;;  %v6582_v5 = vsel %vm6554_vm1, %v6549_v53, %v6389_v13 }
 0x4d4   : > { %7084 = vmatmul.mubr.bf16.gmra.mrb[60].mxu1 %v6622_v44  ;;  %v14320_v44 = vld [vmem:[#allocation31_spill] sm:$0xff] }
 0x4d5   : > { %v6483_v41 = vpop.permute.xlu0 %6482  ;;  %v6421_v17 = vpop.permute.xlu1 %6420 }
 0x4d6   : > { %v6709_v28 = vsel %vm6554_vm1, %v6674_v36, %v6483_v41  ;;  %v6628_v59 = vsel %vm6587_vm2, %v6582_v5, %v6421_v17  ;;  %v14321_v17 = vld [vmem:[#allocation9_spill] sm:$0xff] }
 0x4d9   : > { %v6453_v50 = vpop.permute.xlu0 %6452 }
 0x4da   : > { %v6391_v7 = vpop.permute.xlu1 %6390  ;;  %v6677_v15 = vsel %vm1569_vm3, %v13129_v33, %v6453_v50  ;;  %v9049_v52 = vpop.f32.mrb[20].mxu1 }
 0x4db   : > { %v9050_v46 = vpop.f32.mrb[21].mxu1  ;;  %v6711_v31 = vsel %vm6554_vm1, %v6677_v15, %v14315_v55  ;;  %v14323_v15 = vld [vmem:[#allocation47_spill] sm:$0xff]  ;;  %v14326_v55 = vld [vmem:[#allocation8_spill] sm:$0xff] }
 0x4dc   : > { %v13212_v47 = vadd.f32 %v9050_v46, %v9049_v52  ;;  %v9052_v39 = vpop.f32.mrb[22].mxu1  ;;  %v6756_v32 = vsel %vm6587_vm2, %v6711_v31, %v14316_v26  ;;  %v14324_v52 = vld [vmem:[#allocation37_spill] sm:$0xff] }
 0x4dd   : > { %v6515_v6 = vpop.permute.xlu0 %6514  ;;  %v9053_v23 = vpop.f32.mrb[23].mxu1 }
 0x4de   : > { %v6423_v25 = vpop.permute.xlu1 %6422  ;;  %v6753_v33 = vsel %vm6587_vm2, %v6709_v28, %v6515_v6  ;;  %v13220_v20 = vadd.f32 %v9053_v23, %v9052_v39 }
 0x4df   : > { %7091 = vmatprep.mubr.bf16.mxu1 %v6753_v33 }
 0x4e0   : > { %7092 = vmatmul.mubr.bf16.gmra.mrb[64].mxu1 %v6625_v8 }
 0x4e1   : > { %v6455_v43 = vpop.permute.xlu0 %6454  ;;  %7099 = vmatprep.mubr.bf16.mxu1 %v6756_v32 }
 0x4e2   : > { %v6359_v22 = vpop.permute.xlu1 %6358  ;;  %v6680_v24 = vsel %vm1569_vm3, %v14305_v49, %v6455_v43 }
 0x4e3   : > { %v6551_v14 = vsel %vm1569_vm3, %v13035_v40, %v6359_v22 }
 0x4e4   : > { %v6584_v30 = vsel %vm6554_vm1, %v6551_v14, %v6391_v7  ;;  %v14322_v7 = vld [vmem:[#allocation26_spill] sm:$0xff] }
 0x4e5   : > { %v6487_v34 = vpop.permute.xlu0 %6486  ;;  %v6631_v61 = vsel %vm6587_vm2, %v6584_v30, %v6423_v25 }
 0x4e6   : > { %v6361_v51 = vpop.permute.xlu1 %6360  ;;  %v6713_v58 = vsel %vm6554_vm1, %v6680_v24, %v6487_v34 }
 0x4e7   : > { %v6553_v40 = vsel %vm1569_vm3, %v14303_v16, %v6361_v51 }
 0x4e8   : > { %7100 = vmatmul.mubr.bf16.gmra.mrb[68].mxu1 %v6628_v59 }
 0x4e9   : > { %v6519_v4 = vpop.permute.xlu0 %6518 }
 0x4ea   : > { %v6759_v2 = vsel %vm6587_vm2, %v6713_v58, %v6519_v4  ;;  %v6393_v54 = vpop.permute.xlu1 %6392 }
 0x4eb   : > { %7107 = vmatprep.mubr.bf16.mxu1 %v6759_v2  ;;  %v6586_v37 = vsel %vm6554_vm1, %v6553_v40, %v6393_v54 }
 0x4ed   : > { %v6457_v11 = vpop.permute.xlu0 %6456 }
 0x4ee   : > { %v6683_v49 = vsel %vm1569_vm3, %v13149_v60, %v6457_v11  ;;  %v6425_v10 = vpop.permute.xlu1 %6424  ;;  %v14319_v60 = vld [vmem:[#allocation13_spill] sm:$0xff] }
 0x4ef   : > { %v6634_v18 = vsel %vm6587_vm2, %v6586_v37, %v6425_v10 }
 0x4f0   : > { %7108 = vmatmul.mubr.bf16.gmra.mrb[72].mxu1 %v6631_v61 }
 0x4f1   : > { %v6489_v48 = vpop.permute.xlu0 %6488 }
 0x4f2   : > { %v6715_v29 = vsel %vm6554_vm1, %v6683_v49, %v6489_v48 }
 0x4f5   : > { %v6521_v13 = vpop.permute.xlu0 %6520 }
 0x4f6   : > { %v6762_v45 = vsel %vm6587_vm2, %v6715_v29, %v6521_v13 }
 0x4f7   : > { %7115 = vmatprep.mubr.bf16.mxu1 %v6762_v45 }
 0x4f8   : > { %7116 = vmatmul.mubr.bf16.gmra.mrb[76].mxu1 %v6634_v18 }
 0x4f9   : > { %9293 = vmatprep.mubr.msk.bf16.mxu1 %vm1569_vm3, %v14317_v27 }
 0x500   : > { %9294 = vmatmul.mubr.msk.bf16.vlgmr.msra.gmra.mrb[80].mxu1 %vm1569_vm3, %v14318_v3 }
 0x501   : > { %9297 = vmatprep.mubr.msk.bf16.mxu1 %vm1569_vm3, %v14319_v60 }
 0x505   : > { %v9055_v16 = vpop.f32.mrb[24].mxu1 }
 0x506   : > { %v9056_v57 = vpop.f32.mrb[25].mxu1 }
 0x507   : > { %v13250_v21 = vadd.f32 %v9056_v57, %v9055_v16  ;;  %v9058_v63 = vpop.f32.mrb[26].mxu1 }
 0x508   : > { %9298 = vmatmul.mubr.msk.bf16.gmra.mrb[84].mxu1 %vm1569_vm3, %v14320_v44  ;;  %v9059_v41 = vpop.f32.mrb[27].mxu1 }
 0x509   : > { %9301 = vmatprep.mubr.msk.bf16.mxu1 %vm1569_vm3, %v14321_v17  ;;  %v13256_v50 = vadd.f32 %v9059_v41, %v9058_v63 }
 0x510   : > { %9302 = vmatmul.mubr.msk.bf16.gmra.mrb[88].mxu1 %vm1569_vm3, %v14322_v7 }
 0x511   : > { %9305 = vmatprep.mubr.msk.bf16.mxu1 %vm1569_vm3, %v14323_v15 }
 0x518   : > { %9306 = vmatmul.mubr.msk.bf16.gmra.mrb[92].mxu1 %vm1569_vm3, %v14324_v52 }
 0x519   : > { %9309 = vmatprep.mubr.msk.bf16.mxu1 %vm1569_vm3, %v14325_v38 }
 0x51a   : > { %v9061_v46 = vpop.f32.mrb[28].mxu1 }
 0x51b   : > { %v9062_v36 = vpop.f32.mrb[29].mxu1 }
 0x51c   : > { %v13266_v39 = vadd.f32 %v9062_v36, %v9061_v46  ;;  %v9064_v28 = vpop.f32.mrb[30].mxu1 }
 0x51d   : > { %v9065_v6 = vpop.f32.mrb[31].mxu1 }
 0x51e   : > { %v13268_v25 = vadd.f32 %v9065_v6, %v9064_v28 }
 0x520   : > { %9310 = vmatmul.mubr.msk.bf16.gmra.mrb[96].mxu1 %vm1569_vm3, %v14326_v55 }
 0x521   : > { %9313 = vmatprep.mubr.msk.bf16.mxu1 %vm1569_vm3, %v12950_v9 }
 0x523   : > { %v9067_v31 = vpop.f32.mrb[32].mxu1 }
 0x524   : > { %v9068_v33 = vpop.f32.mrb[33].mxu1 }
 0x525   : > { %v13274_v42 = vadd.f32 %v9068_v33, %v9067_v31  ;;  %v9070_v23 = vpop.f32.mrb[34].mxu1 }
 0x526   : > { %v9071_v8 = vpop.f32.mrb[35].mxu1 }
 0x527   : > { %v13276_v26 = vadd.f32 %v9071_v8, %v9070_v23 }
 0x528   : > { %9314 = vmatmul.mubr.msk.bf16.gmra.mrb[100].mxu1 %vm1569_vm3, %v13031_v19 }
 0x529   : > { %9317 = vmatprep.mubr.msk.bf16.mxu1 %vm1569_vm3, %v13117_v56 }
 0x52d   : > { %v9073_v32 = vpop.f32.mrb[36].mxu1 }
 0x52e   : > { %v9074_v43 = vpop.f32.mrb[37].mxu1 }
 0x52f   : > { %v13282_v22 = vadd.f32 %v9074_v43, %v9073_v32  ;;  %v9076_v53 = vpop.f32.mrb[38].mxu1 }
 0x530   : > { %v9077_v9 = vpop.f32.mrb[39].mxu1  ;;  %9318 = vmatmul.mubr.msk.bf16.gmra.mrb[104].mxu1 %vm1569_vm3, %v13146_v12 }
 0x531   : > { %v13286_v34 = vadd.f32 %v9077_v9, %v9076_v53  ;;  %9321 = vmatprep.mubr.msk.bf16.mxu1 %vm1569_vm3, %v13143_v1 }
 0x538   : > { %9322 = vmatmul.mubr.msk.bf16.gmra.mrb[108].mxu1 %vm1569_vm3, %v14309_v0  ;;  %vm7717_vm3 = vcmask 517120  }
 0x539   : > { %v9079_v5 = vpop.f32.mrb[40].mxu1 }
 0x53a   : > { %v9080_v19 = vpop.f32.mrb[41].mxu1 }
 0x53b   : > { %v13292_v56 = vadd.f32 %v9080_v19, %v9079_v5  ;;  %v9082_v59 = vpop.f32.mrb[42].mxu1 }
 0x53c   : > { %v9083_v24 = vpop.f32.mrb[43].mxu1 }
 0x53d   : > { %v13294_v51 = vadd.f32 %v9083_v24, %v9082_v59 }
 0x541   : > { %v9085_v14 = vpop.f32.mrb[44].mxu1 }
 0x542   : > { %v9086_v58 = vpop.f32.mrb[45].mxu1 }
 0x543   : > { %v13296_v4 = vadd.f32 %v9086_v58, %v9085_v14  ;;  %v9088_v12 = vpop.f32.mrb[46].mxu1 }
 0x544   : > { %v9089_v2 = vpop.f32.mrb[47].mxu1 }
 0x545   : > { %v13298_v30 = vadd.f32 %v9089_v2, %v9088_v12 }
 0x54b   : > { %v9091_v1 = vpop.f32.mrb[48].mxu1 }
 0x54c   : > { %v9092_v11 = vpop.f32.mrb[49].mxu1 }
 0x54d   : > { %v13300_v54 = vadd.f32 %v9092_v11, %v9091_v1  ;;  %v9094_v0 = vpop.f32.mrb[50].mxu1  ;;  %v8778_v1 = vld [vmem:[%s13760_s4] ss:$0 sm:$0xff] }
 0x54e   : > { %v9095_v61 = vpop.f32.mrb[51].mxu1  ;;  %v7006_v11 = vadd.f32 %v13212_v47, %v8778_v1  ;;  %v13345_v47 = vadd.f32 %v13268_v25, %v8778_v1 }
 0x54f   : > { %v13302_v48 = vadd.f32 %v9095_v61, %v9094_v0  ;;  %v6998_v61 = vadd.f32 %v13158_v62, %v8778_v1  ;;  %v13348_v62 = vadd.f32 %v13274_v42, %v8778_v1  ;;  %v13361_v42 = vadd.f32 %v13292_v56, %v8778_v1 }
 0x551   : > { %v13378_v56 = vadd.f32 %v13302_v48, %v8778_v1 }
 0x57c   : > { %v9097_v49 = vpop.f32.mrb[52].mxu1 }
 0x57d   : > { %v9098_v10 = vpop.f32.mrb[53].mxu1 }
 0x57e   : > { %v13304_v40 = vadd.f32 %v9098_v10, %v9097_v49  ;;  %v9100_v29 = vpop.f32.mrb[54].mxu1  ;;  %v7001_v49 = vadd.f32 %v13165_v35, %v8778_v1 }
 0x57f   : > { %v9101_v13 = vpop.f32.mrb[55].mxu1 }
 0x580   : > { %v13306_v37 = vadd.f32 %v9101_v13, %v9100_v29  ;;  %v7009_v13 = vadd.f32 %v13220_v20, %v8778_v1  ;;  %v13351_v20 = vadd.f32 %v13276_v26, %v8778_v1 }
 0x59b   : > { %v9103_v45 = vpop.f32.mrb[56].mxu1 }
 0x59c   : > { %v9104_v18 = vpop.f32.mrb[57].mxu1 }
 0x59d   : > { %v13308_v27 = vadd.f32 %v9104_v18, %v9103_v45  ;;  %v9106_v3 = vpop.f32.mrb[58].mxu1  ;;  %v7014_v45 = vadd.f32 %v13250_v21, %v8778_v1  ;;  %v13341_v18 = vadd.f32 %v13256_v50, %v8778_v1 }
 0x59e   : > { %v9107_v60 = vpop.f32.mrb[59].mxu1 }
 0x59f   : > { %v13310_v16 = vadd.f32 %v9107_v60, %v9106_v3 }
 0x5a7   : > { %v9109_v57 = vpop.f32.mrb[60].mxu1 }
 0x5a8   : > { %v9110_v63 = vpop.f32.mrb[61].mxu1 }
 0x5a9   : > { %v13312_v44 = vadd.f32 %v9110_v63, %v9109_v57  ;;  %v9112_v41 = vpop.f32.mrb[62].mxu1  ;;  %v7022_v57 = vadd.f32 %v13266_v39, %v8778_v1  ;;  %v13357_v39 = vadd.f32 %v13286_v34, %v8778_v1 }
 0x5aa   : > { %v9113_v17 = vpop.f32.mrb[63].mxu1 }
 0x5ab   : > { %v13314_v7 = vadd.f32 %v9113_v17, %v9112_v41  ;;  %v13354_v17 = vadd.f32 %v13282_v22, %v8778_v1  ;;  %v13371_v22 = vadd.f32 %v13298_v30, %v8778_v1  ;;  %v13388_v30 = vadd.f32 %v13308_v27, %v8778_v1 }
 0x5ac   : > { %v13404_v27 = vadd.f32 %v13310_v16, %v8778_v1 }
 0x5b3   : > { %v9115_v15 = vpop.f32.mrb[64].mxu1 }
 0x5b4   : > { %v9116_v52 = vpop.f32.mrb[65].mxu1 }
 0x5b5   : > { %v13316_v38 = vadd.f32 %v9116_v52, %v9115_v15  ;;  %v9118_v46 = vpop.f32.mrb[66].mxu1  ;;  %v13364_v52 = vadd.f32 %v13294_v51, %v8778_v1 }
 0x5b6   : > { %v9119_v36 = vpop.f32.mrb[67].mxu1 }
 0x5b7   : > { %v13318_v28 = vadd.f32 %v9119_v36, %v9118_v46  ;;  %v13368_v36 = vadd.f32 %v13296_v4, %v8778_v1  ;;  %v13385_v4 = vadd.f32 %v13306_v37, %v8778_v1  ;;  %v13401_v37 = vadd.f32 %v13314_v7, %v8778_v1 }
 0x5b9   : > { %14327 = vst [vmem:[#allocation14_spill] sm:$0xff] %v13318_v28 }
 0x5bb   : > { %v9121_v6 = vpop.f32.mrb[68].mxu1 }
 0x5bc   : > { %v9122_v55 = vpop.f32.mrb[69].mxu1 }
 0x5bd   : > { %v13320_v31 = vadd.f32 %v9122_v55, %v9121_v6  ;;  %v9124_v33 = vpop.f32.mrb[70].mxu1  ;;  %v13375_v55 = vadd.f32 %v13300_v54, %v8778_v1 }
 0x5be   : > { %v9125_v23 = vpop.f32.mrb[71].mxu1 }
 0x5bf   : > { %v13322_v8 = vadd.f32 %v9125_v23, %v9124_v33  ;;  %v13382_v23 = vadd.f32 %v13304_v40, %v8778_v1  ;;  %v13398_v40 = vadd.f32 %v13312_v44, %v8778_v1 }
 0x5c1   : > { %14328 = vst [vmem:[#allocation66_spill] sm:$0xff] %v13322_v8 }
 0x5c3   : > { %v9127_v32 = vpop.f32.mrb[72].mxu1 }
 0x5c4   : > { %v9128_v43 = vpop.f32.mrb[73].mxu1 }
 0x5c5   : > { %v13324_v53 = vadd.f32 %v9128_v43, %v9127_v32  ;;  %v9130_v9 = vpop.f32.mrb[74].mxu1  ;;  %v14333_v43 = vld [vmem:[#allocation2_spill] sm:$0xff] }
 0x5c6   : > { %v9131_v5 = vpop.f32.mrb[75].mxu1 }
 0x5c7   : > { %14329 = vst [vmem:[#allocation4_spill] sm:$0xff] %v13324_v53  ;;  %v13326_v19 = vadd.f32 %v9131_v5, %v9130_v9 }
 0x5c9   : > { %14330 = vst [vmem:[#allocation65_spill] sm:$0xff] %v13326_v19 }
 0x5cb   : > { %v9133_v59 = vpop.f32.mrb[76].mxu1 }
 0x5cc   : > { %v9134_v24 = vpop.f32.mrb[77].mxu1 }
 0x5cd   : > { %v13328_v14 = vadd.f32 %v9134_v24, %v9133_v59  ;;  %v9136_v58 = vpop.f32.mrb[78].mxu1 }
 0x5ce   : > { %v9137_v12 = vpop.f32.mrb[79].mxu1 }
 0x5cf   : > { %14331 = vst [vmem:[#allocation67_spill] sm:$0xff] %v13328_v14  ;;  %v13330_v2 = vadd.f32 %v9137_v12, %v9136_v58 }
 0x5d1   : > { %14332 = vst [vmem:[#allocation42_spill] sm:$0xff] %v13330_v2 }
 0x5d3   : > { %v9295_v0 = vpop.f32.mrb[80].mxu1 }
 0x5d4   : > { %v7167_v10 = vadd.f32 %v9295_v0, %v7006_v11  ;;  %v7158_v29 = vpop.f32.mrb[81].mxu1 }
 0x5d5   : > { %v7159_v3 = vadd.f32 %v7158_v29, %v6998_v61  ;;  %v9296_v60 = vpop.f32.mrb[82].mxu1 }
 0x5d6   : > { %v7287_v35 = vmax.f32 %v7167_v10, 0.0  ;;  %v7170_v63 = vadd.f32 %v9296_v60, %v7009_v13  ;;  %v7161_v41 = vpop.f32.mrb[83].mxu1 }
 0x5d7   : > { %v7285_v21 = vmax.f32 %v7159_v3, 0.0  ;;  %v7162_v50 = vadd.f32 %v7161_v41, %v7001_v49 }
 0x5d8   : > { %v7318_v25 = vsel %vm6554_vm1, %v7287_v35, -inf  ;;  %v7288_v15 = vmax.f32 %v7170_v63, 0.0 }
 0x5d9   : > { %v7317_v26 = vsel %vm6554_vm1, %v7285_v21, -inf  ;;  %v7286_v46 = vmax.f32 %v7162_v50, 0.0 }
 0x5da   : > { %v7319_v34 = vmax.f32 %v7317_v26, %v7318_v25  ;;  %v7321_v6 = vsel %vm6554_vm1, %v7288_v15, -inf }
 0x5db   : > { %v7320_v51 = vsel %vm6554_vm1, %v7286_v46, -inf  ;;  %v9299_v33 = vpop.f32.mrb[84].mxu1 }
 0x5dc   : > { %v7381_v32 = vcombine.high %v7319_v34, %v7319_v34  ;;  %v7388_v9 = vrot.slane %v7319_v34, %v14333_v43  ;;  %v7322_v54 = vmax.f32 %v7320_v51, %v7321_v6  ;;  %v13391_v5 = vadd.f32 %v9299_v33, %v7022_v57  ;;  %v7174_v48 = vpop.f32.mrb[85].mxu1 }
 0x5dd   : > { %v13393_v59 = vadd.f32 %v7174_v48, %v7014_v45  ;;  %v13395_v24 = vpop.f32.mrb[86].mxu1 }
 0x5de   : > { %v7395_v58 = vrot.slane %v7381_v32, %v14333_v43  ;;  %v7396_v12 = vcombine.high %v7388_v9, %v7388_v9  ;;  %v7718_v11 = vsel %vm7717_vm3, %v7388_v9, -inf  ;;  %v7398_v0 = vcombine.high %v7322_v54, %v7322_v54  ;;  %v13408_v61 = vpop.f32.mrb[87].mxu1 }
 0x5df   : > { %v7719_v49 = vrot.slane %v7718_v11, 4  ;;  %v7405_v10 = vrot.slane %v7322_v54, %v14333_v43 }
 0x5e0   : > { %v7397_v7 = vcombine.high %v7395_v58, %v7395_v58  ;;  %v7725_v13 = vsel %vm7717_vm3, %v7396_v12, -inf  ;;  %v7732_v16 = vsel %vm7717_vm3, %v7395_v58, -inf  ;;  %v7412_v1 = vrot.slane %v7398_v0, %v14333_v43 }
 0x5e1   : > { %v7720_v45 = vmax.f32 %v7718_v11, %v7719_v49  ;;  %v7726_v3 = vrot.slane %v7725_v13, 4  ;;  %v7733_v60 = vrot.slane %v7732_v16, 4  ;;  %v7413_v57 = vcombine.high %v7405_v10, %v7405_v10 }
 0x5e2   : > { %v7739_v35 = vsel %vm7717_vm3, %v7397_v7, -inf  ;;  %v7414_v63 = vcombine.high %v7412_v1, %v7412_v1  ;;  %v7746_v41 = vsel %vm7717_vm3, %v7405_v10, -inf  ;;  %v7760_v21 = vsel %vm7717_vm3, %v7412_v1, -inf }
 0x5e3   : > { %v7721_v50 = vrot.slane %v7720_v45, 2  ;;  %v7727_v25 = vmax.f32 %v7725_v13, %v7726_v3  ;;  %v7734_v15 = vmax.f32 %v7732_v16, %v7733_v60  ;;  %v7740_v26 = vrot.slane %v7739_v35, 4  ;;  %v13419_v46 = vpop.f32.mrb[88].mxu1 }
 0x5e4   : > { %v7747_v34 = vrot.slane %v7746_v41, 4  ;;  %v7753_v6 = vsel %vm7717_vm3, %v7413_v57, -inf  ;;  %v7761_v51 = vrot.slane %v7760_v21, 4  ;;  %v7767_v33 = vsel %vm7717_vm3, %v7414_v63, -inf  ;;  %v13423_v32 = vpop.f32.mrb[89].mxu1 }
 0x5e5   : > { %v7722_v9 = vmax.f32 %v7720_v45, %v7721_v50  ;;  %v7728_v54 = vrot.slane %v7727_v25, 2  ;;  %v7735_v48 = vrot.slane %v7734_v15, 2  ;;  %v7741_v58 = vmax.f32 %v7739_v35, %v7740_v26  ;;  %v13425_v12 = vpop.f32.mrb[90].mxu1 }
 0x5e6   : > { %v7748_v11 = vmax.f32 %v7746_v41, %v7747_v34  ;;  %v7754_v0 = vrot.slane %v7753_v6, 4  ;;  %v7762_v49 = vmax.f32 %v7760_v21, %v7761_v51  ;;  %v7768_v10 = vrot.slane %v7767_v33, 4  ;;  %v13427_v7 = vpop.f32.mrb[91].mxu1 }
 0x5e7   : > { %v7723_v13 = vrot.slane %v7722_v9, 1  ;;  %v7729_v16 = vmax.f32 %v7727_v25, %v7728_v54  ;;  %v7736_v1 = vmax.f32 %v7734_v15, %v7735_v48  ;;  %v7742_v3 = vrot.slane %v7741_v58, 2 }
 0x5e8   : > { %v7749_v60 = vrot.slane %v7748_v11, 2  ;;  %v7755_v57 = vmax.f32 %v7753_v6, %v7754_v0  ;;  %v7763_v63 = vrot.slane %v7762_v49, 2  ;;  %v7769_v29 = vmax.f32 %v7767_v33, %v7768_v10 }
 0x5e9   : > { %v7724_v45 = vmax.f32 %v7722_v9, %v7723_v13  ;;  %v7730_v50 = vrot.slane %v7729_v16, 1  ;;  %v7737_v44 = vrot.slane %v7736_v1, 1  ;;  %v7743_v35 = vmax.f32 %v7741_v58, %v7742_v3 }
 0x5ea   : > { %v7750_v26 = vmax.f32 %v7748_v11, %v7749_v60  ;;  %v7756_v19 = vrot.slane %v7755_v57, 2  ;;  %v7764_v41 = vmax.f32 %v7762_v49, %v7763_v63  ;;  %v7770_v34 = vrot.slane %v7769_v29, 2 }
 0x5eb   : > { %v7731_v21 = vmax.f32 %v7729_v16, %v7730_v50  ;;  %v7738_v51 = vmax.f32 %v7736_v1, %v7737_v44  ;;  %v7744_v2 = vrot.slane %v7743_v35, 1  ;;  %v8897_v53 = vpack.c.bf16 %v7724_v45, %v7724_v45  ;;  %v13429_v14 = vpop.f32.mrb[92].mxu1 }
 0x5ec   : > { %v7751_v25 = vrot.slane %v7750_v26, 1  ;;  %v7757_v15 = vmax.f32 %v7755_v57, %v7756_v19  ;;  %v7765_v54 = vrot.slane %v7764_v41, 1  ;;  %v7771_v6 = vmax.f32 %v7769_v29, %v7770_v34  ;;  %v13431_v48 = vpop.f32.mrb[93].mxu1 }
 0x5ed   : > { %v7745_v33 = vmax.f32 %v7743_v35, %v7744_v2  ;;  %v8898_v9 = vpack.c.bf16 %v7731_v21, %v7731_v21  ;;  %v8899_v0 = vpack.c.bf16 %v7738_v51, %v7738_v51  ;;  %v8422_v58 = vunpack.c.l.b16 %v8897_v53  ;;  %v13433_v11 = vpop.f32.mrb[94].mxu1 }
 0x5ee   : > { %v7752_v49 = vmax.f32 %v7750_v26, %v7751_v25  ;;  %v7758_v10 = vrot.slane %v7757_v15, 1  ;;  %v7766_v13 = vmax.f32 %v7764_v41, %v7765_v54  ;;  %v7772_v44 = vrot.slane %v7771_v6, 1  ;;  %v13435_v16 = vpop.f32.mrb[95].mxu1 }
 0x5ef   : > { %v8900_v1 = vpack.c.bf16 %v7745_v33, %v7745_v33  ;;  %v8423_v3 = vunpack.c.l.b16 %v8898_v9  ;;  %v8424_v60 = vunpack.c.l.b16 %v8899_v0  ;;  %v14334_v19 = vmax.f32 %v13391_v5, 0.0 }
 0x5f0   : > { %v7759_v57 = vmax.f32 %v7757_v15, %v7758_v10  ;;  %v7773_v2 = vmax.f32 %v7771_v6, %v7772_v44  ;;  %v8901_v63 = vpack.c.bf16 %v7752_v49, %v7752_v49  ;;  %v8903_v45 = vpack.c.bf16 %v7766_v13, %v7766_v13 }
 0x5f1   : > { %v7324_v29 = vsel %vm6554_vm1, %v14334_v19, -inf  ;;  %v8425_v53 = vunpack.c.l.b16 %v8900_v1  ;;  %v8486_v50 = vsel %vm5743_vm6, %v8423_v3, %v8422_v58  ;;  %v14335_v35 = vmax.f32 %v13393_v59, 0.0 }
 0x5f2   : > { %v7186_v41 = vadd.f32 %v13395_v24, %v13345_v47  ;;  %v8487_v5 = vsel %vm5731_vm5, %v8424_v60, %v8486_v50  ;;  %v8902_v34 = vpack.c.bf16 %v7759_v57, %v7759_v57  ;;  %v8904_v21 = vpack.c.bf16 %v7773_v2, %v7773_v2 }
 0x5f3   : > { %v7323_v26 = vsel %vm6554_vm1, %v14335_v35, -inf  ;;  %v8426_v51 = vunpack.c.l.b16 %v8901_v63  ;;  %v8428_v25 = vunpack.c.l.b16 %v8903_v45  ;;  %v8488_v15 = vsel %vm5733_vm7, %v8425_v53, %v8487_v5  ;;  %v13448_v33 = vpop.f32.mrb[96].mxu1 }
 0x5f4   : > { %v7325_v54 = vmax.f32 %v7323_v26, %v7324_v29  ;;  %v7292_v6 = vmax.f32 %v7186_v41, 0.0  ;;  %v8427_v9 = vunpack.c.l.b16 %v8902_v34  ;;  %v8429_v59 = vunpack.c.l.b16 %v8904_v21  ;;  %v13453_v47 = vpop.f32.mrb[97].mxu1 }
 0x5f5   : > { %v8489_v0 = vsel %vm5735_vm8, %v8426_v51, %v8488_v15  ;;  %v7178_v58 = vadd.f32 %v13408_v61, %v13341_v18  ;;  %v7199_v13 = vadd.f32 %v13419_v46, %v13354_v17  ;;  %v13460_v44 = vpop.f32.mrb[98].mxu1  ;;  %v7191_v60 = vadd.f32 %v13423_v32, %v13348_v62 }
 0x5f6   : > { %v7415_v24 = vcombine.high %v7325_v54, %v7325_v54  ;;  %v7422_v49 = vrot.slane %v7325_v54, %v14333_v43  ;;  %v7327_v10 = vsel %vm6554_vm1, %v7292_v6, -inf  ;;  %v8490_v1 = vsel %vm5737_vm9, %v8427_v9, %v8489_v0  ;;  %v13467_v61 = vpop.f32.mrb[99].mxu1 }
 0x5f7   : > { %v7290_v3 = vmax.f32 %v7178_v58, 0.0  ;;  %v7202_v18 = vadd.f32 %v13425_v12, %v13357_v39  ;;  %v8491_v19 = vsel %vm5739_vm10, %v8428_v25, %v8490_v1  ;;  %v7295_v32 = vmax.f32 %v7199_v13, 0.0 }
 0x5f8   : > { %v7429_v29 = vrot.slane %v7415_v24, %v14333_v43  ;;  %v7430_v57 = vcombine.high %v7422_v49, %v7422_v49  ;;  %v7774_v17 = vsel %vm7717_vm3, %v7422_v49, -inf  ;;  %v8492_v62 = vsel %vm5741_vm11, %v8429_v59, %v8491_v19 }
 0x5f9   : > { %v7775_v46 = vrot.slane %v7774_v17, 4  ;;  %v7326_v39 = vsel %vm6554_vm1, %v7290_v3, -inf  ;;  %v8542_v12 = vpack.c.b16 %v8492_v62, %v8492_v62  ;;  %v7330_v5 = vsel %vm6554_vm1, %v7295_v32, -inf }
 0x5fa   : > { %v7431_v2 = vcombine.high %v7429_v29, %v7429_v29  ;;  %v7781_v63 = vsel %vm7717_vm3, %v7430_v57, -inf  ;;  %v7788_v45 = vsel %vm7717_vm3, %v7429_v29, -inf  ;;  %v7328_v26 = vmax.f32 %v7326_v39, %v7327_v10 }
 0x5fb   : > { %v7776_v53 = vmax.f32 %v7774_v17, %v7775_v46  ;;  %v7782_v50 = vrot.slane %v7781_v63, 4  ;;  %v7789_v35 = vrot.slane %v7788_v45, 4  ;;  %8559 = vst.msk [vmem:[%s13475_s17] sm:$0xf] %vm8558_vm4, %v8542_v12  ;;  %v7293_v34 = vmax.f32 %v7191_v60, 0.0  ;;  %v13485_v51 = vpop.f32.mrb[100].mxu1 }
 0x5fc   : > { %v7795_v41 = vsel %vm7717_vm3, %v7431_v2, -inf  ;;  %v7296_v21 = vmax.f32 %v7202_v18, 0.0  ;;  %v13487_v9 = vpop.f32.mrb[101].mxu1  ;;  %v7432_v59 = vcombine.high %v7328_v26, %v7328_v26  ;;  %v7439_v0 = vrot.slane %v7328_v26, %v14333_v43 }
 0x5fd   : > { %v7777_v25 = vrot.slane %v7776_v53, 2  ;;  %v7783_v15 = vmax.f32 %v7781_v63, %v7782_v50  ;;  %v7790_v54 = vmax.f32 %v7788_v45, %v7789_v35  ;;  %v7796_v6 = vrot.slane %v7795_v41, 4  ;;  %v13494_v49 = vpop.f32.mrb[102].mxu1 }
 0x5fe   : > { %v7329_v58 = vsel %vm6554_vm1, %v7293_v34, -inf  ;;  %v13492_v24 = vsel %vm6554_vm1, %v7296_v21, -inf  ;;  %v13496_v60 = vpop.f32.mrb[103].mxu1  ;;  %v7446_v18 = vrot.slane %v7432_v59, %v14333_v43  ;;  %v7447_v19 = vcombine.high %v7439_v0, %v7439_v0 }
 0x5ff   : > { %v7778_v10 = vmax.f32 %v7776_v53, %v7777_v25  ;;  %v7784_v13 = vrot.slane %v7783_v15, 2  ;;  %v7791_v1 = vrot.slane %v7790_v54, 2  ;;  %v7797_v3 = vmax.f32 %v7795_v41, %v7796_v6 }
 0x600   : > { %v7802_v29 = vsel %vm7717_vm3, %v7439_v0, -inf  ;;  %v7331_v57 = vmax.f32 %v7329_v58, %v7330_v5  ;;  %v7448_v32 = vcombine.high %v7446_v18, %v7446_v18  ;;  %v7809_v2 = vsel %vm7717_vm3, %v7447_v19, -inf }
 0x601   : > { %v7779_v17 = vrot.slane %v7778_v10, 1  ;;  %v7785_v62 = vmax.f32 %v7783_v15, %v7784_v13  ;;  %v7792_v46 = vmax.f32 %v7790_v54, %v7791_v1  ;;  %v7798_v39 = vrot.slane %v7797_v3, 2 }
 0x602   : > { %v7803_v12 = vrot.slane %v7802_v29, 4  ;;  %v7816_v63 = vsel %vm7717_vm3, %v7446_v18, -inf  ;;  %v7810_v41 = vrot.slane %v7809_v2, 4  ;;  %v7823_v21 = vsel %vm7717_vm3, %v7448_v32, -inf }
 0x603   : > { %v7780_v45 = vmax.f32 %v7778_v10, %v7779_v17  ;;  %v7786_v53 = vrot.slane %v7785_v62, 1  ;;  %v7793_v50 = vrot.slane %v7792_v46, 1  ;;  %v7799_v35 = vmax.f32 %v7797_v3, %v7798_v39  ;;  %v13503_v5 = vpop.f32.mrb[104].mxu1 }
 0x604   : > { %v7804_v26 = vmax.f32 %v7802_v29, %v7803_v12  ;;  %v7817_v34 = vrot.slane %v7816_v63, 4  ;;  %v13505_v59 = vpop.f32.mrb[105].mxu1  ;;  %v7811_v58 = vmax.f32 %v7809_v2, %v7810_v41  ;;  %v7824_v10 = vrot.slane %v7823_v21, 4 }
 0x605   : > { %v7787_v25 = vmax.f32 %v7785_v62, %v7786_v53  ;;  %v7794_v15 = vmax.f32 %v7792_v46, %v7793_v50  ;;  %v7800_v54 = vrot.slane %v7799_v35, 1  ;;  %v8905_v6 = vpack.c.bf16 %v7780_v45, %v7780_v45  ;;  %14336 = vst [vmem:[#allocation3_spill] sm:$0xff] %v13505_v59 }
 0x606   : > { %v7805_v0 = vrot.slane %v7804_v26, 2  ;;  %v7818_v13 = vmax.f32 %v7816_v63, %v7817_v34  ;;  %v7812_v17 = vrot.slane %v7811_v58, 2  ;;  %v7825_v32 = vmax.f32 %v7823_v21, %v7824_v10 }
 0x607   : > { %v7801_v1 = vmax.f32 %v7799_v35, %v7800_v54  ;;  %v8906_v18 = vpack.c.bf16 %v7787_v25, %v7787_v25  ;;  %v8907_v3 = vpack.c.bf16 %v7794_v15, %v7794_v15  ;;  %v8430_v19 = vunpack.c.l.b16 %v8905_v6 }
 0x608   : > { %v7806_v29 = vmax.f32 %v7804_v26, %v7805_v0  ;;  %v7819_v39 = vrot.slane %v7818_v13, 2  ;;  %v7449_v46 = vcombine.high %v7331_v57, %v7331_v57  ;;  %v7813_v45 = vmax.f32 %v7811_v58, %v7812_v17 }
 0x609   : > { %v8908_v12 = vpack.c.bf16 %v7801_v1, %v7801_v1  ;;  %v8431_v28 = vunpack.c.l.b16 %v8906_v18  ;;  %v8432_v62 = vunpack.c.l.b16 %v8907_v3  ;;  %v7826_v8 = vrot.slane %v7825_v32, 2 }
 0x60a   : > { %v7807_v53 = vrot.slane %v7806_v29, 1  ;;  %v7820_v50 = vmax.f32 %v7818_v13, %v7819_v39  ;;  %v7456_v63 = vrot.slane %v7331_v57, %v14333_v43  ;;  %v7463_v35 = vrot.slane %v7449_v46, %v14333_v43 }
 0x60b   : > { %v8433_v59 = vunpack.c.l.b16 %v8908_v12  ;;  %v8493_v2 = vsel %vm5743_vm6, %v8431_v28, %v8430_v19  ;;  %v7814_v34 = vrot.slane %v7813_v45, 1  ;;  %v7827_v25 = vmax.f32 %v7825_v32, %v7826_v8  ;;  %v13515_v8 = vpop.f32.mrb[106].mxu1 }
 0x60c   : > { %v8494_v26 = vsel %vm5731_vm5, %v8432_v62, %v8493_v2  ;;  %v7808_v41 = vmax.f32 %v7806_v29, %v7807_v53  ;;  %v7821_v21 = vrot.slane %v7820_v50, 1  ;;  %v7464_v54 = vcombine.high %v7456_v63, %v7456_v63  ;;  %v13518_v62 = vpop.f32.mrb[107].mxu1 }
 0x60d   : > { %v8495_v15 = vsel %vm5733_vm7, %v8433_v59, %v8494_v26  ;;  %v7465_v6 = vcombine.high %v7463_v35, %v7463_v35  ;;  %v7815_v0 = vmax.f32 %v7813_v45, %v7814_v34  ;;  %v7830_v10 = vsel %vm7717_vm3, %v7456_v63, -inf }
 0x60e   : > { %v7822_v58 = vmax.f32 %v7820_v50, %v7821_v21  ;;  %v8909_v13 = vpack.c.bf16 %v7808_v41, %v7808_v41  ;;  %v7828_v28 = vrot.slane %v7827_v25, 1  ;;  %v7831_v1 = vrot.slane %v7830_v10, 4 }
 0x60f   : > { %v7837_v57 = vsel %vm7717_vm3, %v7464_v54, -inf  ;;  %v7844_v18 = vsel %vm7717_vm3, %v7463_v35, -inf  ;;  %v8910_v3 = vpack.c.bf16 %v7815_v0, %v7815_v0  ;;  %v7851_v12 = vsel %vm7717_vm3, %v7465_v6, -inf }
 0x610   : > { %v8911_v19 = vpack.c.bf16 %v7822_v58, %v7822_v58  ;;  %v8434_v29 = vunpack.c.l.b16 %v8909_v13  ;;  %v7838_v17 = vrot.slane %v7837_v57, 4  ;;  %v7829_v59 = vmax.f32 %v7827_v25, %v7828_v28 }
 0x611   : > { %v7832_v39 = vmax.f32 %v7830_v10, %v7831_v1  ;;  %v7845_v32 = vrot.slane %v7844_v18, 4  ;;  %v8435_v46 = vunpack.c.l.b16 %v8910_v3  ;;  %v7852_v26 = vrot.slane %v7851_v12, 4 }
 0x612   : > { %v8436_v53 = vunpack.c.l.b16 %v8911_v19  ;;  %v8496_v45 = vsel %vm5735_vm8, %v8434_v29, %v8495_v15  ;;  %v7839_v50 = vmax.f32 %v7837_v57, %v7838_v17  ;;  %v8912_v2 = vpack.c.bf16 %v7829_v59, %v7829_v59 }
 0x613   : > { %v7833_v63 = vrot.slane %v7832_v39, 2  ;;  %v7846_v35 = vmax.f32 %v7844_v18, %v7845_v32  ;;  %v8497_v41 = vsel %vm5737_vm9, %v8435_v46, %v8496_v45  ;;  %v7194_v21 = vadd.f32 %v13427_v7, %v13351_v20 }
 0x614   : > { %v7840_v34 = vrot.slane %v7839_v50, 2  ;;  %v7215_v25 = vadd.f32 %v13429_v14, %v13368_v36  ;;  %v8437_v54 = vunpack.c.l.b16 %v8912_v2  ;;  %v8498_v6 = vsel %vm5739_vm10, %v8436_v53, %v8497_v41 }
 0x615   : > { %v7834_v0 = vmax.f32 %v7832_v39, %v7833_v63  ;;  %v7847_v58 = vrot.slane %v7846_v35, 2  ;;  %v7853_v13 = vmax.f32 %v7851_v12, %v7852_v26  ;;  %v7294_v10 = vmax.f32 %v7194_v21, 0.0 }
 0x616   : > { %v7841_v15 = vmax.f32 %v7839_v50, %v7840_v34  ;;  %v7299_v28 = vmax.f32 %v7215_v25, 0.0  ;;  %v8499_v1 = vsel %vm5741_vm11, %v8437_v54, %v8498_v6  ;;  %v7207_v20 = vadd.f32 %v13431_v48, %v13361_v42 }
 0x617   : > { %v7835_v57 = vrot.slane %v7834_v0, 1  ;;  %v7848_v18 = vmax.f32 %v7846_v35, %v7847_v58  ;;  %v8543_v7 = vpack.c.b16 %v8499_v1, %v8499_v1  ;;  %v7854_v14 = vrot.slane %v7853_v13, 2  ;;  %v13539_v35 = vpop.f32.mrb[108].mxu1 }
 0x618   : > { %v7842_v3 = vrot.slane %v7841_v15, 1  ;;  %v7332_v36 = vsel %vm6554_vm1, %v7294_v10, -inf  ;;  %v7336_v59 = vsel %vm6554_vm1, %v7299_v28, -inf  ;;  %v7297_v12 = vmax.f32 %v7207_v20, 0.0  ;;  %v13542_v25 = vpop.f32.mrb[109].mxu1 }
 0x619   : > { %v7836_v19 = vmax.f32 %v7834_v0, %v7835_v57  ;;  %v7849_v29 = vrot.slane %v7848_v18, 1  ;;  %v7334_v17 = vmax.f32 %v7332_v36, %v13492_v24  ;;  %8560 = vst.msk [vmem:[%s13475_s17 + $0x4] sm:$0xf] %vm8558_vm4, %v8543_v7  ;;  %v7855_v32 = vmax.f32 %v7853_v13, %v7854_v14 }
 0x61a   : > { %v7843_v39 = vmax.f32 %v7841_v15, %v7842_v3  ;;  %v7218_v46 = vadd.f32 %v13433_v11, %v13371_v22  ;;  %v7335_v63 = vsel %vm6554_vm1, %v7297_v12, -inf }
 0x61b   : > { %v7850_v42 = vmax.f32 %v7848_v18, %v7849_v29  ;;  %v8913_v48 = vpack.c.bf16 %v7836_v19, %v7836_v19  ;;  %v7466_v53 = vcombine.high %v7334_v17, %v7334_v17  ;;  %v7473_v45 = vrot.slane %v7334_v17, %v14333_v43 }
 0x61c   : > { %v7856_v50 = vrot.slane %v7855_v32, 1  ;;  %v8914_v2 = vpack.c.bf16 %v7843_v39, %v7843_v39  ;;  %v7300_v24 = vmax.f32 %v7218_v46, 0.0  ;;  %v7337_v6 = vmax.f32 %v7335_v63, %v7336_v59 }
 0x61d   : > { %v8915_v26 = vpack.c.bf16 %v7850_v42, %v7850_v42  ;;  %v8438_v41 = vunpack.c.l.b16 %v8913_v48  ;;  %v7480_v34 = vrot.slane %v7466_v53, %v14333_v43  ;;  %v7481_v21 = vcombine.high %v7473_v45, %v7473_v45 }
 0x61e   : > { %v7857_v22 = vmax.f32 %v7855_v32, %v7856_v50  ;;  %v8439_v11 = vunpack.c.l.b16 %v8914_v2  ;;  %v7858_v54 = vsel %vm7717_vm3, %v7473_v45, -inf  ;;  %v7483_v29 = vcombine.high %v7337_v6, %v7337_v6 }
 0x61f   : > { %v8440_v0 = vunpack.c.l.b16 %v8915_v26  ;;  %v7482_v58 = vcombine.high %v7480_v34, %v7480_v34  ;;  %v7859_v15 = vrot.slane %v7858_v54, 4  ;;  %v7865_v13 = vsel %vm7717_vm3, %v7481_v21, -inf  ;;  %v13557_v21 = vpop.f32.mrb[110].mxu1 }
 0x620   : > { %v8916_v10 = vpack.c.bf16 %v7857_v22, %v7857_v22  ;;  %v8500_v28 = vsel %vm5743_vm6, %v8439_v11, %v8438_v41  ;;  %v7866_v1 = vrot.slane %v7865_v13, 4  ;;  %v7872_v57 = vsel %vm7717_vm3, %v7480_v34, -inf }
 0x621   : > { %v8501_v18 = vsel %vm5731_vm5, %v8440_v0, %v8500_v28  ;;  %v7860_v20 = vmax.f32 %v7858_v54, %v7859_v15  ;;  %v7873_v7 = vrot.slane %v7872_v57, 4  ;;  %v7879_v3 = vsel %vm7717_vm3, %v7482_v58, -inf }
 0x622   : > { %v8441_v14 = vunpack.c.l.b16 %v8916_v10  ;;  %v7867_v36 = vmax.f32 %v7865_v13, %v7866_v1  ;;  %v7880_v19 = vrot.slane %v7879_v3, 4  ;;  %v7490_v39 = vrot.slane %v7337_v6, %v14333_v43  ;;  %v13561_v6 = vpop.f32.mrb[111].mxu1 }
 0x623   : > { %v7861_v17 = vrot.slane %v7860_v20, 2  ;;  %v7874_v59 = vmax.f32 %v7872_v57, %v7873_v7  ;;  %v13552_v32 = vsel %vm6554_vm1, %v7300_v24, -inf  ;;  %v7497_v48 = vrot.slane %v7483_v29, %v14333_v43 }
 0x624   : > { %v7868_v12 = vrot.slane %v7867_v36, 2  ;;  %v7881_v46 = vmax.f32 %v7879_v3, %v7880_v19  ;;  %v8502_v42 = vsel %vm5733_vm7, %v8441_v14, %v8501_v18  ;;  %v7498_v50 = vcombine.high %v7490_v39, %v7490_v39 }
 0x625   : > { %v7862_v53 = vmax.f32 %v7860_v20, %v7861_v17  ;;  %v7875_v45 = vrot.slane %v7874_v59, 2  ;;  %v7886_v2 = vsel %vm7717_vm3, %v7490_v39, -inf  ;;  %v7499_v41 = vcombine.high %v7497_v48, %v7497_v48 }
 0x626   : > { %v7869_v63 = vmax.f32 %v7867_v36, %v7868_v12  ;;  %v7882_v26 = vrot.slane %v7881_v46, 2  ;;  %v7887_v34 = vrot.slane %v7886_v2, 4  ;;  %v7893_v11 = vsel %vm7717_vm3, %v7498_v50, -inf }
 0x627   : > { %v7863_v22 = vrot.slane %v7862_v53, 1  ;;  %v7876_v24 = vmax.f32 %v7874_v59, %v7875_v45  ;;  %v7900_v54 = vsel %vm7717_vm3, %v7497_v48, -inf  ;;  %v7894_v13 = vrot.slane %v7893_v11, 4 }
 0x628   : > { %v7870_v0 = vrot.slane %v7869_v63, 1  ;;  %v7883_v58 = vmax.f32 %v7881_v46, %v7882_v26  ;;  %v7888_v15 = vmax.f32 %v7886_v2, %v7887_v34  ;;  %v7901_v1 = vrot.slane %v7900_v54, 4 }
 0x629   : > { %v7864_v10 = vmax.f32 %v7862_v53, %v7863_v22  ;;  %v7877_v28 = vrot.slane %v7876_v24, 1  ;;  %v7907_v57 = vsel %vm7717_vm3, %v7499_v41, -inf  ;;  %v7895_v3 = vmax.f32 %v7893_v11, %v7894_v13 }
 0x62a   : > { %v7871_v18 = vmax.f32 %v7869_v63, %v7870_v0  ;;  %v7884_v20 = vrot.slane %v7883_v58, 1  ;;  %v7889_v7 = vrot.slane %v7888_v15, 2  ;;  %v7902_v19 = vmax.f32 %v7900_v54, %v7901_v1 }
 0x62b   : > { %v7878_v14 = vmax.f32 %v7876_v24, %v7877_v28  ;;  %v8917_v36 = vpack.c.bf16 %v7864_v10, %v7864_v10  ;;  %v7908_v29 = vrot.slane %v7907_v57, 4  ;;  %v7896_v12 = vrot.slane %v7895_v3, 2 }
 0x62c   : > { %v7885_v17 = vmax.f32 %v7883_v58, %v7884_v20  ;;  %v8918_v59 = vpack.c.bf16 %v7871_v18, %v7871_v18  ;;  %v7890_v39 = vmax.f32 %v7888_v15, %v7889_v7  ;;  %v7903_v45 = vrot.slane %v7902_v19, 2 }
 0x62d   : > { %v8919_v46 = vpack.c.bf16 %v7878_v14, %v7878_v14  ;;  %v8442_v48 = vunpack.c.l.b16 %v8917_v36  ;;  %v7909_v53 = vmax.f32 %v7907_v57, %v7908_v29  ;;  %v7897_v41 = vmax.f32 %v7895_v3, %v7896_v12 }
 0x62e   : > { %v8920_v50 = vpack.c.bf16 %v7885_v17, %v7885_v17  ;;  %v8443_v2 = vunpack.c.l.b16 %v8918_v59  ;;  %v7891_v26 = vrot.slane %v7890_v39, 1  ;;  %v7904_v22 = vmax.f32 %v7902_v19, %v7903_v45 }
 0x62f   : > { %v8444_v63 = vunpack.c.l.b16 %v8919_v46  ;;  %v8503_v34 = vsel %vm5735_vm8, %v8442_v48, %v8502_v42  ;;  %v7910_v24 = vrot.slane %v7909_v53, 2  ;;  %v7898_v58 = vrot.slane %v7897_v41, 1 }
 0x630   : > { %v8445_v11 = vunpack.c.l.b16 %v8920_v50  ;;  %v8504_v54 = vsel %vm5737_vm9, %v8443_v2, %v8503_v34  ;;  %v7892_v0 = vmax.f32 %v7890_v39, %v7891_v26  ;;  %v7905_v13 = vrot.slane %v7904_v22, 1 }
 0x631   : > { %v8505_v15 = vsel %vm5739_vm10, %v8444_v63, %v8504_v54  ;;  %v7911_v10 = vmax.f32 %v7909_v53, %v7910_v24  ;;  %v7210_v28 = vadd.f32 %v13435_v16, %v13364_v52  ;;  %v7899_v57 = vmax.f32 %v7897_v41, %v7898_v58 }
 0x632   : > { %v8506_v1 = vsel %vm5741_vm11, %v8445_v11, %v8505_v15  ;;  %v8921_v18 = vpack.c.bf16 %v7892_v0, %v7892_v0  ;;  %v7231_v42 = vadd.f32 %v13448_v33, %v13382_v23  ;;  %v7906_v7 = vmax.f32 %v7904_v22, %v7905_v13 }
 0x633   : > { %v8544_v20 = vpack.c.b16 %v8506_v1, %v8506_v1  ;;  %v7912_v3 = vrot.slane %v7911_v10, 1  ;;  %v7298_v14 = vmax.f32 %v7210_v28, 0.0  ;;  %v8922_v36 = vpack.c.bf16 %v7899_v57, %v7899_v57 }
 0x634   : > { %v8446_v19 = vunpack.c.l.b16 %v8921_v18  ;;  %v7303_v29 = vmax.f32 %v7231_v42, 0.0  ;;  %v7223_v17 = vadd.f32 %v13453_v47, %v13375_v55  ;;  %v8923_v16 = vpack.c.bf16 %v7906_v7, %v7906_v7 }
 0x635   : > { %8561 = vst.msk [vmem:[%s13475_s17 + $0x8] sm:$0xf] %vm8558_vm4, %v8544_v20  ;;  %v7913_v52 = vmax.f32 %v7911_v10, %v7912_v3  ;;  %v7338_v59 = vsel %vm6554_vm1, %v7298_v14, -inf  ;;  %v7234_v39 = vadd.f32 %v13460_v44, %v13385_v4  ;;  %v8447_v23 = vunpack.c.l.b16 %v8922_v36 }
 0x636   : > { %v7340_v33 = vmax.f32 %v7338_v59, %v13552_v32  ;;  %v7342_v12 = vsel %vm6554_vm1, %v7303_v29, -inf  ;;  %v7301_v46 = vmax.f32 %v7223_v17, 0.0  ;;  %v8448_v45 = vunpack.c.l.b16 %v8923_v16 }
 0x637   : > { %v8924_v48 = vpack.c.bf16 %v7913_v52, %v7913_v52  ;;  %v7304_v53 = vmax.f32 %v7234_v39, 0.0  ;;  %v7226_v55 = vadd.f32 %v13467_v61, %v13378_v56  ;;  %v8507_v47 = vsel %vm5743_vm6, %v8447_v23, %v8446_v19 }
 0x638   : > { %v7500_v50 = vcombine.high %v7340_v33, %v7340_v33  ;;  %v7507_v2 = vrot.slane %v7340_v33, %v14333_v43  ;;  %v7341_v26 = vsel %vm6554_vm1, %v7301_v46, -inf  ;;  %v8508_v44 = vsel %vm5731_vm5, %v8448_v45, %v8507_v47 }
 0x639   : > { %v8449_v4 = vunpack.c.l.b16 %v8924_v48  ;;  %v7343_v32 = vmax.f32 %v7341_v26, %v7342_v12  ;;  %v7345_v41 = vsel %vm6554_vm1, %v7304_v53, -inf  ;;  %v7302_v24 = vmax.f32 %v7226_v55, 0.0 }
 0x63a   : > { %v7514_v63 = vrot.slane %v7500_v50, %v14333_v43  ;;  %v7515_v34 = vcombine.high %v7507_v2, %v7507_v2  ;;  %v7914_v22 = vsel %vm7717_vm3, %v7507_v2, -inf }
 0x63b   : > { %v7915_v56 = vrot.slane %v7914_v22, 4  ;;  %v13591_v61 = vsel %vm5733_vm7, %v8449_v4, %v8508_v44  ;;  %v7517_v11 = vcombine.high %v7343_v32, %v7343_v32  ;;  %v7524_v54 = vrot.slane %v7343_v32, %v14333_v43 }
 0x63c   : > { %v7516_v0 = vcombine.high %v7514_v63, %v7514_v63  ;;  %v7921_v58 = vsel %vm7717_vm3, %v7515_v34, -inf  ;;  %v7928_v15 = vsel %vm7717_vm3, %v7514_v63, -inf  ;;  %v7344_v13 = vsel %vm6554_vm1, %v7302_v24, -inf }
 0x63d   : > { %v7916_v10 = vmax.f32 %v7914_v22, %v7915_v56  ;;  %v7922_v28 = vrot.slane %v7921_v58, 4  ;;  %v7929_v1 = vrot.slane %v7928_v15, 4  ;;  %v7531_v57 = vrot.slane %v7517_v11, %v14333_v43 }
 0x63e   : > { %v7935_v18 = vsel %vm7717_vm3, %v7516_v0, -inf  ;;  %v7532_v42 = vcombine.high %v7524_v54, %v7524_v54  ;;  %v7942_v20 = vsel %vm7717_vm3, %v7524_v54, -inf  ;;  %v13600_v7 = vmax.f32 %v7344_v13, %v7345_v41 }
 0x63f   : > { %v7917_v3 = vrot.slane %v7916_v10, 2  ;;  %v7923_v14 = vmax.f32 %v7921_v58, %v7922_v28  ;;  %v7930_v36 = vmax.f32 %v7928_v15, %v7929_v1  ;;  %v7936_v19 = vrot.slane %v7935_v18, 4 }
 0x640   : > { %v7533_v29 = vcombine.high %v7531_v57, %v7531_v57  ;;  %v7943_v17 = vrot.slane %v7942_v20, 4  ;;  %v7949_v52 = vsel %vm7717_vm3, %v7532_v42, -inf  ;;  %v7956_v16 = vsel %vm7717_vm3, %v7531_v57, -inf }
 0x641   : > { %v7918_v59 = vmax.f32 %v7916_v10, %v7917_v3  ;;  %v7924_v39 = vrot.slane %v7923_v14, 2  ;;  %v7931_v23 = vrot.slane %v7930_v36, 2  ;;  %v7937_v33 = vmax.f32 %v7935_v18, %v7936_v19 }
 0x642   : > { %v7944_v12 = vmax.f32 %v7942_v20, %v7943_v17  ;;  %v7950_v46 = vrot.slane %v7949_v52, 4  ;;  %v7957_v48 = vrot.slane %v7956_v16, 4  ;;  %v7963_v45 = vsel %vm7717_vm3, %v7533_v29, -inf }
 0x643   : > { %v7919_v53 = vrot.slane %v7918_v59, 1  ;;  %v7925_v55 = vmax.f32 %v7923_v14, %v7924_v39  ;;  %v7932_v47 = vmax.f32 %v7930_v36, %v7931_v23  ;;  %v7938_v50 = vrot.slane %v7937_v33, 2 }
 0x644   : > { %v7945_v2 = vrot.slane %v7944_v12, 2  ;;  %v7951_v26 = vmax.f32 %v7949_v52, %v7950_v46  ;;  %v7958_v4 = vmax.f32 %v7956_v16, %v7957_v48  ;;  %v7964_v44 = vrot.slane %v7963_v45, 4 }
 0x645   : > { %v7920_v32 = vmax.f32 %v7918_v59, %v7919_v53  ;;  %v7926_v41 = vrot.slane %v7925_v55, 1  ;;  %v7933_v63 = vrot.slane %v7932_v47, 1  ;;  %v7939_v34 = vmax.f32 %v7937_v33, %v7938_v50 }
 0x646   : > { %v7946_v22 = vmax.f32 %v7944_v12, %v7945_v2  ;;  %v7952_v24 = vrot.slane %v7951_v26, 2  ;;  %v7959_v56 = vrot.slane %v7958_v4, 2  ;;  %v7965_v11 = vmax.f32 %v7963_v45, %v7964_v44 }
 0x647   : > { %v7927_v54 = vmax.f32 %v7925_v55, %v7926_v41  ;;  %v7934_v0 = vmax.f32 %v7932_v47, %v7933_v63  ;;  %v7940_v58 = vrot.slane %v7939_v34, 1  ;;  %v8925_v15 = vpack.c.bf16 %v7920_v32, %v7920_v32 }
 0x648   : > { %v7947_v13 = vrot.slane %v7946_v22, 1  ;;  %v7953_v10 = vmax.f32 %v7951_v26, %v7952_v24  ;;  %v7960_v28 = vmax.f32 %v7958_v4, %v7959_v56  ;;  %v7966_v1 = vrot.slane %v7965_v11, 2 }
 0x649   : > { %v7941_v57 = vmax.f32 %v7939_v34, %v7940_v58  ;;  %v8926_v18 = vpack.c.bf16 %v7927_v54, %v7927_v54  ;;  %v8927_v42 = vpack.c.bf16 %v7934_v0, %v7934_v0  ;;  %v8450_v20 = vunpack.c.l.b16 %v8925_v15 }
 0x64a   : > { %v7948_v3 = vmax.f32 %v7946_v22, %v7947_v13  ;;  %v7954_v14 = vrot.slane %v7953_v10, 1  ;;  %v7961_v36 = vrot.slane %v7960_v28, 1  ;;  %v7967_v19 = vmax.f32 %v7965_v11, %v7966_v1 }
 0x64b   : > { %v8928_v29 = vpack.c.bf16 %v7941_v57, %v7941_v57  ;;  %v8451_v17 = vunpack.c.l.b16 %v8926_v18  ;;  %v8452_v52 = vunpack.c.l.b16 %v8927_v42  ;;  %v8510_v16 = vsel %vm5735_vm8, %v8450_v20, %v13591_v61 }
 0x64c   : > { %v7955_v59 = vmax.f32 %v7953_v10, %v7954_v14  ;;  %v7962_v39 = vmax.f32 %v7960_v28, %v7961_v36  ;;  %v7968_v23 = vrot.slane %v7967_v19, 1  ;;  %v8929_v33 = vpack.c.bf16 %v7948_v3, %v7948_v3 }
 0x64d   : > { %v8453_v12 = vunpack.c.l.b16 %v8928_v29  ;;  %v8511_v46 = vsel %vm5737_vm9, %v8451_v17, %v8510_v16  ;;  %v7534_v48 = vcombine.high %v13600_v7, %v13600_v7  ;;  %v7541_v45 = vrot.slane %v13600_v7, %v14333_v43 }
 0x64e   : > { %v8512_v53 = vsel %vm5739_vm10, %v8452_v52, %v8511_v46  ;;  %v7969_v55 = vmax.f32 %v7967_v19, %v7968_v23  ;;  %v8930_v47 = vpack.c.bf16 %v7955_v59, %v7955_v59  ;;  %v8931_v50 = vpack.c.bf16 %v7962_v39, %v7962_v39 }
 0x64f   : > { %v8513_v61 = vsel %vm5741_vm11, %v8453_v12, %v8512_v53  ;;  %v8454_v2 = vunpack.c.l.b16 %v8929_v33  ;;  %v7548_v26 = vrot.slane %v7534_v48, %v14333_v43  ;;  %v7549_v4 = vcombine.high %v7541_v45, %v7541_v45 }
 0x650   : > { %v8545_v44 = vpack.c.b16 %v8513_v61, %v8513_v61  ;;  %v8932_v32 = vpack.c.bf16 %v7969_v55, %v7969_v55  ;;  %v8455_v41 = vunpack.c.l.b16 %v8930_v47  ;;  %v8456_v63 = vunpack.c.l.b16 %v8931_v50 }
 0x651   : > { %v7550_v34 = vcombine.high %v7548_v26, %v7548_v26  ;;  %v7970_v22 = vsel %vm7717_vm3, %v7541_v45, -inf  ;;  %v7977_v7 = vsel %vm7717_vm3, %v7549_v4, -inf  ;;  %v7984_v24 = vsel %vm7717_vm3, %v7548_v26, -inf }
 0x652   : > { %8562 = vst.msk [vmem:[%s13475_s17 + $0xc] sm:$0xf] %vm8558_vm4, %v8545_v44  ;;  %v8457_v56 = vunpack.c.l.b16 %v8932_v32  ;;  %v8514_v11 = vsel %vm5743_vm6, %v8455_v41, %v8454_v2  ;;  %v7971_v54 = vrot.slane %v7970_v22, 4  ;;  %v7978_v0 = vrot.slane %v7977_v7, 4 }
 0x653   : > { %v8515_v58 = vsel %vm5731_vm5, %v8456_v63, %v8514_v11  ;;  %v7985_v15 = vrot.slane %v7984_v24, 4  ;;  %v7991_v13 = vsel %vm7717_vm3, %v7550_v34, -inf  ;;  %v7247_v10 = vadd.f32 %v13485_v51, %v13398_v40 }
 0x654   : > { %v7972_v28 = vmax.f32 %v7970_v22, %v7971_v54  ;;  %v7979_v1 = vmax.f32 %v7977_v7, %v7978_v0  ;;  %v7992_v57 = vrot.slane %v7991_v13, 4  ;;  %v8516_v18 = vsel %vm5733_vm7, %v8457_v56, %v8515_v58 }
 0x655   : > { %v7986_v42 = vmax.f32 %v7984_v24, %v7985_v15  ;;  %v7307_v20 = vmax.f32 %v7247_v10, 0.0  ;;  %v7239_v3 = vadd.f32 %v13487_v9, %v13388_v30  ;;  %v7250_v14 = vadd.f32 %v13494_v49, %v13401_v37  ;;  %v13638_v9 = vld [vmem:[%s13760_s4] ss:$0 sm:$0xff] }
 0x656   : > { %v7973_v36 = vrot.slane %v7972_v28, 2  ;;  %v7980_v19 = vrot.slane %v7979_v1, 2  ;;  %v7993_v29 = vmax.f32 %v7991_v13, %v7992_v57  ;;  %v7242_v17 = vadd.f32 %v13496_v60, %v13404_v27 }
 0x657   : > { %v7987_v40 = vrot.slane %v7986_v42, 2  ;;  %v7348_v51 = vsel %vm6554_vm1, %v7307_v20, -inf  ;;  %v7305_v52 = vmax.f32 %v7239_v3, 0.0  ;;  %v7308_v16 = vmax.f32 %v7250_v14, 0.0 }
 0x658   : > { %v7974_v59 = vmax.f32 %v7972_v28, %v7973_v36  ;;  %v7981_v39 = vmax.f32 %v7979_v1, %v7980_v19  ;;  %v7994_v23 = vrot.slane %v7993_v29, 2  ;;  %v7306_v33 = vmax.f32 %v7242_v17, 0.0 }
 0x659   : > { %v7988_v12 = vmax.f32 %v7986_v42, %v7987_v40  ;;  %v7347_v30 = vsel %vm6554_vm1, %v7305_v52, -inf  ;;  %v7351_v37 = vsel %vm6554_vm1, %v7308_v16, -inf  ;;  %v7102_v27 = vadd.f32 %v13638_v9, %v13320_v31 }
 0x65a   : > { %v7975_v49 = vrot.slane %v7974_v59, 1  ;;  %v7982_v60 = vrot.slane %v7981_v39, 1  ;;  %v7995_v46 = vmax.f32 %v7993_v29, %v7994_v23  ;;  %v7349_v48 = vmax.f32 %v7347_v30, %v7348_v51 }
 0x65b   : > { %v7989_v45 = vrot.slane %v7988_v12, 1  ;;  %v7350_v53 = vsel %vm6554_vm1, %v7306_v33, -inf  ;;  %v13644_v55 = vadd.f32 %v13503_v5, %v7102_v27  ;;  %v13648_v47 = vadd.f32 %v13638_v9, %v13316_v38 }
 0x65c   : > { %v7976_v50 = vmax.f32 %v7974_v59, %v7975_v49  ;;  %v7983_v61 = vmax.f32 %v7981_v39, %v7982_v60  ;;  %v7996_v2 = vrot.slane %v7995_v46, 1  ;;  %v7551_v26 = vcombine.high %v7349_v48, %v7349_v48 }
 0x65d   : > { %v7990_v4 = vmax.f32 %v7988_v12, %v7989_v45  ;;  %v7558_v31 = vrot.slane %v7349_v48, %v14333_v43  ;;  %v7352_v44 = vmax.f32 %v7350_v53, %v7351_v37  ;;  %v7311_v32 = vmax.f32 %v13644_v55, 0.0 }
 0x65e   : > { %v7997_v41 = vmax.f32 %v7995_v46, %v7996_v2  ;;  %v8933_v63 = vpack.c.bf16 %v7976_v50, %v7976_v50  ;;  %v8934_v34 = vpack.c.bf16 %v7983_v61, %v7983_v61  ;;  %v7565_v5 = vrot.slane %v7551_v26, %v14333_v43 }
 0x65f   : > { %v8935_v22 = vpack.c.bf16 %v7990_v4, %v7990_v4  ;;  %v7566_v7 = vcombine.high %v7558_v31, %v7558_v31  ;;  %v7998_v38 = vsel %vm7717_vm3, %v7558_v31, -inf  ;;  %v7568_v24 = vcombine.high %v7352_v44, %v7352_v44 }
 0x660   : > { %v8936_v56 = vpack.c.bf16 %v7997_v41, %v7997_v41  ;;  %v8458_v11 = vunpack.c.l.b16 %v8933_v63  ;;  %v8459_v54 = vunpack.c.l.b16 %v8934_v34  ;;  %v7567_v0 = vcombine.high %v7565_v5, %v7565_v5 }
 0x661   : > { %v8460_v58 = vunpack.c.l.b16 %v8935_v22  ;;  %v7999_v15 = vrot.slane %v7998_v38, 4  ;;  %v8005_v13 = vsel %vm7717_vm3, %v7566_v7, -inf  ;;  %v8012_v10 = vsel %vm7717_vm3, %v7565_v5, -inf }
 0x662   : > { %v8461_v28 = vunpack.c.l.b16 %v8936_v56  ;;  %v8517_v1 = vsel %vm5735_vm8, %v8458_v11, %v8516_v18  ;;  %v8006_v57 = vrot.slane %v8005_v13, 4  ;;  %v8013_v42 = vrot.slane %v8012_v10, 4 }
 0x663   : > { %v8518_v20 = vsel %vm5737_vm9, %v8459_v54, %v8517_v1  ;;  %v8000_v3 = vmax.f32 %v7998_v38, %v7999_v15  ;;  %v8019_v14 = vsel %vm7717_vm3, %v7567_v0, -inf  ;;  %v7575_v36 = vrot.slane %v7352_v44, %v14333_v43 }
 0x664   : > { %v8519_v19 = vsel %vm5739_vm10, %v8460_v58, %v8518_v20  ;;  %v8007_v29 = vmax.f32 %v8005_v13, %v8006_v57  ;;  %v8014_v17 = vmax.f32 %v8012_v10, %v8013_v42  ;;  %v8020_v40 = vrot.slane %v8019_v14, 4 }
 0x665   : > { %v8520_v51 = vsel %vm5741_vm11, %v8461_v28, %v8519_v19  ;;  %v8001_v52 = vrot.slane %v8000_v3, 2  ;;  %v7582_v18 = vrot.slane %v7568_v24, %v14333_v43  ;;  %v7583_v16 = vcombine.high %v7575_v36, %v7575_v36 }
 0x666   : > { %v8546_v59 = vpack.c.b16 %v8520_v51, %v8520_v51  ;;  %v8008_v39 = vrot.slane %v8007_v29, 2  ;;  %v8015_v23 = vrot.slane %v8014_v17, 2  ;;  %v8021_v33 = vmax.f32 %v8019_v14, %v8020_v40 }
 0x667   : > { %v8002_v12 = vmax.f32 %v8000_v3, %v8001_v52  ;;  %v7584_v30 = vcombine.high %v7582_v18, %v7582_v18  ;;  %v8026_v37 = vsel %vm7717_vm3, %v7575_v36, -inf  ;;  %v8033_v27 = vsel %vm7717_vm3, %v7583_v16, -inf }
 0x668   : > { %8563 = vst.msk [vmem:[%s13475_s17 + $0x10] sm:$0xf] %vm8558_vm4, %v8546_v59  ;;  %v8009_v49 = vmax.f32 %v8007_v29, %v8008_v39  ;;  %v8016_v60 = vmax.f32 %v8014_v17, %v8015_v23  ;;  %v8022_v46 = vrot.slane %v8021_v33, 2  ;;  %v8027_v48 = vrot.slane %v8026_v37, 4 }
 0x669   : > { %v8003_v45 = vrot.slane %v8002_v12, 1  ;;  %v8034_v53 = vrot.slane %v8033_v27, 4  ;;  %v8040_v50 = vsel %vm7717_vm3, %v7582_v18, -inf  ;;  %v8047_v61 = vsel %vm7717_vm3, %v7584_v30, -inf  ;;  %v14337_v18 = vld [vmem:[#allocation3_spill] sm:$0xff] }
 0x66a   : > { %v8010_v2 = vrot.slane %v8009_v49, 1  ;;  %v8017_v26 = vrot.slane %v8016_v60, 1  ;;  %v8023_v4 = vmax.f32 %v8021_v33, %v8022_v46  ;;  %v8028_v31 = vmax.f32 %v8026_v37, %v8027_v48  ;;  %v14339_v46 = vld [vmem:[#allocation14_spill] sm:$0xff] }
 0x66b   : > { %v8004_v44 = vmax.f32 %v8002_v12, %v8003_v45  ;;  %v8035_v41 = vmax.f32 %v8033_v27, %v8034_v53  ;;  %v8041_v63 = vrot.slane %v8040_v50, 4  ;;  %v8048_v34 = vrot.slane %v8047_v61, 4  ;;  %v14338_v27 = vld [vmem:[#allocation66_spill] sm:$0xff] }
 0x66c   : > { %v8011_v5 = vmax.f32 %v8009_v49, %v8010_v2  ;;  %v8018_v22 = vmax.f32 %v8016_v60, %v8017_v26  ;;  %v8024_v7 = vrot.slane %v8023_v4, 1  ;;  %v8029_v38 = vrot.slane %v8028_v31, 2 }
 0x66d   : > { %v8937_v24 = vpack.c.bf16 %v8004_v44, %v8004_v44  ;;  %v8036_v56 = vrot.slane %v8035_v41, 2  ;;  %v8042_v11 = vmax.f32 %v8040_v50, %v8041_v63  ;;  %v8049_v54 = vmax.f32 %v8047_v61, %v8048_v34  ;;  %v14340_v50 = vld [vmem:[#allocation67_spill] sm:$0xff] }
 0x66e   : > { %v8025_v0 = vmax.f32 %v8023_v4, %v8024_v7  ;;  %v8938_v58 = vpack.c.bf16 %v8011_v5, %v8011_v5  ;;  %v8939_v15 = vpack.c.bf16 %v8018_v22, %v8018_v22  ;;  %v8030_v13 = vmax.f32 %v8028_v31, %v8029_v38 }
 0x66f   : > { %v8462_v10 = vunpack.c.l.b16 %v8937_v24  ;;  %v8037_v28 = vmax.f32 %v8035_v41, %v8036_v56  ;;  %v8043_v1 = vrot.slane %v8042_v11, 2  ;;  %v8050_v57 = vrot.slane %v8049_v54, 2 }
 0x670   : > { %v8940_v42 = vpack.c.bf16 %v8025_v0, %v8025_v0  ;;  %v8463_v20 = vunpack.c.l.b16 %v8938_v58  ;;  %v8464_v3 = vunpack.c.l.b16 %v8939_v15  ;;  %v8031_v14 = vrot.slane %v8030_v13, 1  ;;  %v14341_v58 = vld [vmem:[#allocation4_spill] sm:$0xff] }
 0x671   : > { %v8038_v36 = vrot.slane %v8037_v28, 1  ;;  %v8044_v19 = vmax.f32 %v8042_v11, %v8043_v1  ;;  %v8051_v29 = vmax.f32 %v8049_v54, %v8050_v57  ;;  %v7354_v17 = vsel %vm6554_vm1, %v7311_v32, -inf }
 0x672   : > { %v8465_v40 = vunpack.c.l.b16 %v8940_v42  ;;  %v8521_v51 = vsel %vm5743_vm6, %v8463_v20, %v8462_v10  ;;  %v8032_v52 = vmax.f32 %v8030_v13, %v8031_v14  ;;  %v7255_v16 = vadd.f32 %v14337_v18, %v13648_v47 }
 0x673   : > { %v8522_v59 = vsel %vm5731_vm5, %v8464_v3, %v8521_v51  ;;  %v8039_v39 = vmax.f32 %v8037_v28, %v8038_v36  ;;  %v8045_v23 = vrot.slane %v8044_v19, 1  ;;  %v8052_v33 = vrot.slane %v8051_v29, 1 }
 0x674   : > { %v8941_v12 = vpack.c.bf16 %v8032_v52, %v8032_v52  ;;  %v8523_v30 = vsel %vm5733_vm7, %v8465_v40, %v8522_v59  ;;  %v7309_v37 = vmax.f32 %v7255_v16, 0.0  ;;  %v7105_v55 = vadd.f32 %v13638_v9, %v14338_v27 }
 0x675   : > { %v8046_v32 = vmax.f32 %v8044_v19, %v8045_v23  ;;  %v8053_v49 = vmax.f32 %v8051_v29, %v8052_v33  ;;  %v8942_v60 = vpack.c.bf16 %v8039_v39, %v8039_v39  ;;  %v7097_v48 = vadd.f32 %v13638_v9, %v14339_v46 }
 0x676   : > { %v8466_v45 = vunpack.c.l.b16 %v8941_v12  ;;  %v7353_v47 = vsel %vm6554_vm1, %v7309_v37, -inf  ;;  %v7266_v53 = vadd.f32 %v13515_v8, %v7105_v55  ;;  %v7118_v61 = vadd.f32 %v13638_v9, %v14340_v50 }
 0x677   : > { %v8943_v2 = vpack.c.bf16 %v8046_v32, %v8046_v32  ;;  %v8944_v26 = vpack.c.bf16 %v8053_v49, %v8053_v49  ;;  %v8467_v4 = vunpack.c.l.b16 %v8942_v60  ;;  %v7355_v31 = vmax.f32 %v7353_v47, %v7354_v17 }
 0x678   : > { %v8524_v44 = vsel %vm5735_vm8, %v8466_v45, %v8523_v30  ;;  %v7312_v41 = vmax.f32 %v7266_v53, 0.0  ;;  %v7258_v63 = vadd.f32 %v13518_v62, %v7097_v48  ;;  %v7279_v34 = vadd.f32 %v13539_v35, %v7118_v61  ;;  %v14342_v35 = vld [vmem:[#allocation42_spill] sm:$0xff] }
 0x679   : > { %v8468_v5 = vunpack.c.l.b16 %v8943_v2  ;;  %v8469_v22 = vunpack.c.l.b16 %v8944_v26  ;;  %v8525_v7 = vsel %vm5737_vm9, %v8467_v4, %v8524_v44  ;;  %v7585_v38 = vcombine.high %v7355_v31, %v7355_v31 }
 0x67a   : > { %v7592_v8 = vrot.slane %v7355_v31, %v14333_v43  ;;  %v7357_v24 = vsel %vm6554_vm1, %v7312_v41, -inf  ;;  %v7310_v56 = vmax.f32 %v7258_v63, 0.0  ;;  %v7315_v11 = vmax.f32 %v7279_v34, 0.0 }
 0x67b   : > { %v8526_v54 = vsel %vm5739_vm10, %v8468_v5, %v8525_v7  ;;  %v7599_v0 = vrot.slane %v7585_v38, %v14333_v43  ;;  %v7110_v62 = vadd.f32 %v13638_v9, %v14341_v58  ;;  %v7121_v15 = vadd.f32 %v13638_v9, %v14342_v35 }
 0x67c   : > { %v8527_v13 = vsel %vm5741_vm11, %v8469_v22, %v8526_v54  ;;  %v7600_v10 = vcombine.high %v7592_v8, %v7592_v8  ;;  %v8054_v28 = vsel %vm7717_vm3, %v7592_v8, -inf  ;;  %v7356_v1 = vsel %vm6554_vm1, %v7310_v56, -inf }
 0x67d   : > { %v8547_v57 = vpack.c.b16 %v8527_v13, %v8527_v13  ;;  %v7601_v42 = vcombine.high %v7599_v0, %v7599_v0  ;;  %v8055_v20 = vrot.slane %v8054_v28, 4  ;;  %v8068_v3 = vsel %vm7717_vm3, %v7599_v0, -inf }
 0x67e   : > { %v8061_v14 = vsel %vm7717_vm3, %v7600_v10, -inf  ;;  %v8069_v36 = vrot.slane %v8068_v3, 4  ;;  %v7358_v19 = vmax.f32 %v7356_v1, %v7357_v24  ;;  %v7360_v29 = vsel %vm6554_vm1, %v7315_v11, -inf }
 0x67f   : > { %8564 = vst.msk [vmem:[%s13475_s17 + $0x14] sm:$0xf] %vm8558_vm4, %v8547_v57  ;;  %v8056_v17 = vmax.f32 %v8054_v28, %v8055_v20  ;;  %v8062_v40 = vrot.slane %v8061_v14, 4  ;;  %v8075_v51 = vsel %vm7717_vm3, %v7601_v42, -inf  ;;  %v7271_v52 = vadd.f32 %v13542_v25, %v7110_v62 }
 0x680   : > { %v8070_v18 = vmax.f32 %v8068_v3, %v8069_v36  ;;  %v8076_v16 = vrot.slane %v8075_v51, 4  ;;  %v7602_v59 = vcombine.high %v7358_v19, %v7358_v19  ;;  %v7609_v39 = vrot.slane %v7358_v19, %v14333_v43 }
 0x681   : > { %v8057_v23 = vrot.slane %v8056_v17, 2  ;;  %v8063_v33 = vmax.f32 %v8061_v14, %v8062_v40  ;;  %v7313_v12 = vmax.f32 %v7271_v52, 0.0  ;;  %v13709_v30 = vadd.f32 %v13557_v21, %v7121_v15 }
 0x682   : > { %v8071_v37 = vrot.slane %v8070_v18, 2  ;;  %v8077_v27 = vmax.f32 %v8075_v51, %v8076_v16  ;;  %v7616_v55 = vrot.slane %v7602_v59, %v14333_v43  ;;  %v7617_v32 = vcombine.high %v7609_v39, %v7609_v39 }
 0x683   : > { %v8058_v49 = vmax.f32 %v8056_v17, %v8057_v23  ;;  %v8064_v60 = vrot.slane %v8063_v33, 2  ;;  %v8082_v25 = vsel %vm7717_vm3, %v7609_v39, -inf  ;;  %v7359_v46 = vsel %vm6554_vm1, %v7313_v12, -inf }
 0x684   : > { %v8072_v48 = vmax.f32 %v8070_v18, %v8071_v37  ;;  %v8078_v45 = vrot.slane %v8077_v27, 2  ;;  %v7618_v47 = vcombine.high %v7616_v55, %v7616_v55  ;;  %v8083_v53 = vrot.slane %v8082_v25, 4 }
 0x685   : > { %v8059_v50 = vrot.slane %v8058_v49, 1  ;;  %v8065_v61 = vmax.f32 %v8063_v33, %v8064_v60  ;;  %v8089_v21 = vsel %vm7717_vm3, %v7617_v32, -inf  ;;  %v8096_v2 = vsel %vm7717_vm3, %v7616_v55, -inf }
 0x686   : > { %v8073_v26 = vrot.slane %v8072_v48, 1  ;;  %v8079_v4 = vmax.f32 %v8077_v27, %v8078_v45  ;;  %v8084_v31 = vmax.f32 %v8082_v25, %v8083_v53  ;;  %v8090_v44 = vrot.slane %v8089_v21, 4 }
 0x687   : > { %v8060_v41 = vmax.f32 %v8058_v49, %v8059_v50  ;;  %v8066_v63 = vrot.slane %v8065_v61, 1  ;;  %v8097_v34 = vrot.slane %v8096_v2, 4  ;;  %v8103_v5 = vsel %vm7717_vm3, %v7618_v47, -inf }
 0x688   : > { %v8074_v22 = vmax.f32 %v8072_v48, %v8073_v26  ;;  %v8080_v7 = vrot.slane %v8079_v4, 1  ;;  %v8085_v38 = vrot.slane %v8084_v31, 2  ;;  %v8091_v8 = vmax.f32 %v8089_v21, %v8090_v44 }
 0x689   : > { %v8067_v24 = vmax.f32 %v8065_v61, %v8066_v63  ;;  %v8945_v56 = vpack.c.bf16 %v8060_v41, %v8060_v41  ;;  %v8098_v11 = vmax.f32 %v8096_v2, %v8097_v34  ;;  %v8104_v54 = vrot.slane %v8103_v5, 4 }
 0x68a   : > { %v8081_v0 = vmax.f32 %v8079_v4, %v8080_v7  ;;  %v8947_v58 = vpack.c.bf16 %v8074_v22, %v8074_v22  ;;  %v8086_v62 = vmax.f32 %v8084_v31, %v8085_v38  ;;  %v8092_v35 = vrot.slane %v8091_v8, 2 }
 0x68b   : > { %v8946_v15 = vpack.c.bf16 %v8067_v24, %v8067_v24  ;;  %v8470_v13 = vunpack.c.l.b16 %v8945_v56  ;;  %v8099_v10 = vrot.slane %v8098_v11, 2  ;;  %v8105_v28 = vmax.f32 %v8103_v5, %v8104_v54  ;;  %v14343_v56 = vld [vmem:[#allocation65_spill] sm:$0xff] }
 0x68c   : > { %v8948_v1 = vpack.c.bf16 %v8081_v0, %v8081_v0  ;;  %v8472_v57 = vunpack.c.l.b16 %v8947_v58  ;;  %v8087_v42 = vrot.slane %v8086_v62, 1  ;;  %v8093_v20 = vmax.f32 %v8091_v8, %v8092_v35 }
 0x68d   : > { %v8471_v3 = vunpack.c.l.b16 %v8946_v15  ;;  %v8100_v14 = vmax.f32 %v8098_v11, %v8099_v10  ;;  %v8106_v36 = vrot.slane %v8105_v28, 2  ;;  %v7361_v19 = vmax.f32 %v7359_v46, %v7360_v29 }
 0x68e   : > { %v8473_v17 = vunpack.c.l.b16 %v8948_v1  ;;  %v8088_v40 = vmax.f32 %v8086_v62, %v8087_v42  ;;  %v8094_v51 = vrot.slane %v8093_v20, 1  ;;  %v7316_v34 = vmax.f32 %v13709_v30, 0.0 }
 0x68f   : > { %v8528_v52 = vsel %vm5743_vm6, %v8471_v3, %v8470_v13  ;;  %v8101_v18 = vrot.slane %v8100_v14, 1  ;;  %v8107_v16 = vmax.f32 %v8105_v28, %v8106_v36  ;;  %v7619_v59 = vcombine.high %v7361_v19, %v7361_v19 }
 0x690   : > { %v8529_v39 = vsel %vm5731_vm5, %v8472_v57, %v8528_v52  ;;  %v8095_v23 = vmax.f32 %v8093_v20, %v8094_v51  ;;  %v8949_v33 = vpack.c.bf16 %v8088_v40, %v8088_v40  ;;  %v7626_v12 = vrot.slane %v7361_v19, %v14333_v43 }
 0x691   : > { %v8102_v37 = vmax.f32 %v8100_v14, %v8101_v18  ;;  %v8108_v27 = vrot.slane %v8107_v16, 1  ;;  %v8530_v55 = vsel %vm5733_vm7, %v8473_v17, %v8529_v39  ;;  %v7633_v29 = vrot.slane %v7619_v59, %v14333_v43 }
 0x692   : > { %v8950_v32 = vpack.c.bf16 %v8095_v23, %v8095_v23  ;;  %v8474_v49 = vunpack.c.l.b16 %v8949_v33  ;;  %v7634_v60 = vcombine.high %v7626_v12, %v7626_v12  ;;  %v8110_v25 = vsel %vm7717_vm3, %v7626_v12, -inf }
 0x693   : > { %v8109_v46 = vmax.f32 %v8107_v16, %v8108_v27  ;;  %v8951_v48 = vpack.c.bf16 %v8102_v37, %v8102_v37  ;;  %v7635_v45 = vcombine.high %v7633_v29, %v7633_v29  ;;  %v8111_v47 = vrot.slane %v8110_v25, 4 }
 0x694   : > { %v8475_v53 = vunpack.c.l.b16 %v8950_v32  ;;  %v8531_v50 = vsel %vm5735_vm8, %v8474_v49, %v8530_v55  ;;  %v8117_v61 = vsel %vm7717_vm3, %v7634_v60, -inf  ;;  %v8124_v21 = vsel %vm7717_vm3, %v7633_v29, -inf }
 0x695   : > { %v8952_v2 = vpack.c.bf16 %v8109_v46, %v8109_v46  ;;  %v8476_v26 = vunpack.c.l.b16 %v8951_v48  ;;  %v8112_v4 = vmax.f32 %v8110_v25, %v8111_v47  ;;  %v8118_v31 = vrot.slane %v8117_v61, 4 }
 0x696   : > { %v8532_v44 = vsel %vm5737_vm9, %v8475_v53, %v8531_v50  ;;  %v8125_v41 = vrot.slane %v8124_v21, 4  ;;  %v8131_v63 = vsel %vm7717_vm3, %v7635_v45, -inf  ;;  %v7113_v11 = vadd.f32 %v13638_v9, %v14343_v56 }
 0x697   : > { %v8477_v5 = vunpack.c.l.b16 %v8952_v2  ;;  %v8533_v22 = vsel %vm5739_vm10, %v8476_v26, %v8532_v44  ;;  %v8113_v7 = vrot.slane %v8112_v4, 2  ;;  %v8119_v38 = vmax.f32 %v8117_v61, %v8118_v31 }
 0x698   : > { %v8126_v8 = vmax.f32 %v8124_v21, %v8125_v41  ;;  %v8132_v24 = vrot.slane %v8131_v63, 4  ;;  %v7274_v30 = vadd.f32 %v13561_v6, %v7113_v11  ;;  %v7363_v10 = vsel %vm6554_vm1, %v7316_v34, -inf }
 0x699   : > { %v8534_v54 = vsel %vm5741_vm11, %v8477_v5, %v8533_v22  ;;  %v8114_v0 = vmax.f32 %v8112_v4, %v8113_v7  ;;  %v8120_v58 = vrot.slane %v8119_v38, 2 }
 0x69a   : > { %v8548_v62 = vpack.c.b16 %v8534_v54, %v8534_v54  ;;  %v8127_v35 = vrot.slane %v8126_v8, 2  ;;  %v8133_v15 = vmax.f32 %v8131_v63, %v8132_v24  ;;  %v7314_v42 = vmax.f32 %v7274_v30, 0.0 }
 0x69b   : > { %v8121_v13 = vmax.f32 %v8119_v38, %v8120_v58  ;;  %v8115_v28 = vrot.slane %v8114_v0, 1 }
 0x69c   : > { %8565 = vst.msk [vmem:[%s13475_s17 + $0x18] sm:$0xf] %vm8558_vm4, %v8548_v62  ;;  %v8128_v1 = vmax.f32 %v8126_v8, %v8127_v35  ;;  %v8134_v57 = vrot.slane %v8133_v15, 2  ;;  %v7362_v14 = vsel %vm6554_vm1, %v7314_v42, -inf }
 0x69d   : > { %v8122_v20 = vrot.slane %v8121_v13, 1  ;;  %v7364_v19 = vmax.f32 %v7362_v14, %v7363_v10  ;;  %v8116_v17 = vmax.f32 %v8114_v0, %v8115_v28 }
 0x69e   : > { %v8129_v9 = vrot.slane %v8128_v1, 1  ;;  %v8135_v3 = vmax.f32 %v8133_v15, %v8134_v57 }
 0x69f   : > { %v8123_v36 = vmax.f32 %v8121_v13, %v8122_v20  ;;  %v7636_v51 = vcombine.high %v7364_v19, %v7364_v19  ;;  %v7643_v6 = vrot.slane %v7364_v19, %v14333_v43  ;;  %v8953_v23 = vpack.c.bf16 %v8116_v17, %v8116_v17 }
 0x6a0   : > { %v8136_v40 = vrot.slane %v8135_v3, 1  ;;  %v8130_v52 = vmax.f32 %v8128_v1, %v8129_v9 }
 0x6a1   : > { %v8954_v18 = vpack.c.bf16 %v8123_v36, %v8123_v36  ;;  %v7650_v16 = vrot.slane %v7636_v51, %v14333_v43  ;;  %v7651_v59 = vcombine.high %v7643_v6, %v7643_v6  ;;  %v8138_v39 = vsel %vm7717_vm3, %v7643_v6, -inf }
 0x6a2   : > { %v8139_v33 = vrot.slane %v8138_v39, 4  ;;  %v8137_v12 = vmax.f32 %v8135_v3, %v8136_v40  ;;  %v8955_v29 = vpack.c.bf16 %v8130_v52, %v8130_v52  ;;  %v8478_v53 = vunpack.c.l.b16 %v8953_v23 }
 0x6a3   : > { %v7652_v37 = vcombine.high %v7650_v16, %v7650_v16  ;;  %v8145_v27 = vsel %vm7717_vm3, %v7651_v59, -inf  ;;  %v8152_v55 = vsel %vm7717_vm3, %v7650_v16, -inf  ;;  %v8479_v60 = vunpack.c.l.b16 %v8954_v18 }
 0x6a4   : > { %v8140_v32 = vmax.f32 %v8138_v39, %v8139_v33  ;;  %v8146_v49 = vrot.slane %v8145_v27, 4  ;;  %v8153_v25 = vrot.slane %v8152_v55, 4  ;;  %v8956_v47 = vpack.c.bf16 %v8137_v12, %v8137_v12 }
 0x6a5   : > { %v8159_v46 = vsel %vm7717_vm3, %v7652_v37, -inf  ;;  %v8480_v61 = vunpack.c.l.b16 %v8955_v29  ;;  %v8535_v4 = vsel %vm5743_vm6, %v8479_v60, %v8478_v53 }
 0x6a6   : > { %v8141_v48 = vrot.slane %v8140_v32, 2  ;;  %v8147_v43 = vmax.f32 %v8145_v27, %v8146_v49  ;;  %v8160_v45 = vrot.slane %v8159_v46, 4  ;;  %v8154_v50 = vmax.f32 %v8152_v55, %v8153_v25 }
 0x6a7   : > { %v8481_v34 = vunpack.c.l.b16 %v8956_v47  ;;  %v8536_v22 = vsel %vm5731_vm5, %v8480_v61, %v8535_v4 }
 0x6a8   : > { %v8142_v21 = vmax.f32 %v8140_v32, %v8141_v48  ;;  %v8148_v2 = vrot.slane %v8147_v43, 2  ;;  %v8161_v26 = vmax.f32 %v8159_v46, %v8160_v45  ;;  %v8155_v31 = vrot.slane %v8154_v50, 2 }
 0x6a9   : > { %v8537_v58 = vsel %vm5733_vm7, %v8481_v34, %v8536_v22 }
 0x6aa   : > { %v8143_v44 = vrot.slane %v8142_v21, 1  ;;  %v8149_v41 = vmax.f32 %v8147_v43, %v8148_v2  ;;  %v8162_v63 = vrot.slane %v8161_v26, 2  ;;  %v8156_v5 = vmax.f32 %v8154_v50, %v8155_v31 }
 0x6ac   : > { %v8144_v7 = vmax.f32 %v8142_v21, %v8143_v44  ;;  %v8150_v38 = vrot.slane %v8149_v41, 1  ;;  %v8163_v8 = vmax.f32 %v8161_v26, %v8162_v63  ;;  %v8157_v24 = vrot.slane %v8156_v5, 1 }
 0x6ae   : > { %v8151_v56 = vmax.f32 %v8149_v41, %v8150_v38  ;;  %v8164_v11 = vrot.slane %v8163_v8, 1  ;;  %v8957_v54 = vpack.c.bf16 %v8144_v7, %v8144_v7  ;;  %v8158_v0 = vmax.f32 %v8156_v5, %v8157_v24 }
 0x6b0   : > { %v8165_v62 = vmax.f32 %v8163_v8, %v8164_v11  ;;  %v8958_v35 = vpack.c.bf16 %v8151_v56, %v8151_v56  ;;  %v8482_v15 = vunpack.c.l.b16 %v8957_v54  ;;  %v8959_v30 = vpack.c.bf16 %v8158_v0, %v8158_v0 }
 0x6b2   : > { %v8960_v13 = vpack.c.bf16 %v8165_v62, %v8165_v62  ;;  %v8483_v10 = vunpack.c.l.b16 %v8958_v35  ;;  %v8538_v28 = vsel %vm5735_vm8, %v8482_v15, %v8537_v58  ;;  %v8484_v1 = vunpack.c.l.b16 %v8959_v30 }
 0x6b4   : > { %v8485_v57 = vunpack.c.l.b16 %v8960_v13  ;;  %v8539_v42 = vsel %vm5737_vm9, %v8483_v10, %v8538_v28 }
 0x6b5   : > { %v8540_v20 = vsel %vm5739_vm10, %v8484_v1, %v8539_v42 }
 0x6b6   : > { %v8541_v9 = vsel %vm5741_vm11, %v8485_v57, %v8540_v20 }
 0x6b7   : > { %v8549_v3 = vpack.c.b16 %v8541_v9, %v8541_v9 }
 0x6b9   : > { %8566 = vst.msk [vmem:[%s13475_s17 + $0x1c] sm:$0xf] %vm8558_vm4, %v8549_v3 }
 0x6ba PF: > { %s15_s18 = sadd.s32 1, %s9440_s18  }
 0x6bb   : > { %p12_p4 = scmp.ge.s32.totalorder %s15_s18, 4  }
 0x6bd   :  { %14 = sbr.rel (!%p12_p4) target bundleno = 1 (0x1), region = 70 }

</bundles_post_ra>
